<compile_context>
chip_gen: v5e
topology: v5e:2x2
jax: 0.10.0
libtpu: 0.0.40
codegen_flags: <defaults>
</compile_context>

<pallas_src>
import jax
import jax.numpy as jnp
from jax.experimental import pallas as pl
from jax.experimental.pallas import tpu as pltpu

_LANE = 128


# ----------------------------------------------------------------------------
# Fused Pallas kernel: conv1+bn1+relu -> conv2+bn2+residual+relu (per batch n)
# ----------------------------------------------------------------------------
def _basic_block_kernel(xp_ref, w1_ref, b1_ref, w2_ref, b2_ref, o_ref, mid_ref):
    # xp_ref : (1, H+2, W+2, C)  bf16, reflect-padded, channel-padded input
    # w1_ref : (3, 3, C, C)      bf16, BN1 scale folded in
    # b1_ref : (1, C)            f32 folded BN1 bias
    # w2_ref : (3, 3, C, C)      bf16, BN2 scale folded in
    # b2_ref : (1, C)            f32 folded BN2 bias
    # o_ref  : (1, H, W, C)      f32 output
    # mid_ref: (H+2, W+2, C)     bf16 VMEM scratch for the padded intermediate
    _, Hp, Wp, C = xp_ref.shape
    H, W = Hp - 2, Wp - 2
    HW = H * W

    # ------- conv1 (shift-and-matmul) + folded bn1 + ReLU -------
    acc1 = jnp.zeros((HW, C), jnp.float32)
    for ky in range(3):
        for kx in range(3):
            xs = xp_ref[0, ky:ky + H, kx:kx + W, :].reshape(HW, C)
            acc1 = acc1 + jnp.dot(xs, w1_ref[ky, kx],
                                  preferred_element_type=jnp.float32)
    out1 = jnp.maximum(acc1 + b1_ref[...], 0.0)

    # ------- reflect-pad out1 into the bf16 VMEM scratch -------
    mid_ref[1:H + 1, 1:W + 1, :] = out1.reshape(H, W, C).astype(mid_ref.dtype)
    # width halo first (reflect by 1: col -1 <- col 1, col W <- col W-2)
    mid_ref[1:H + 1, 0:1, :] = mid_ref[1:H + 1, 2:3, :]
    mid_ref[1:H + 1, W + 1:W + 2, :] = mid_ref[1:H + 1, W - 1:W, :]
    # then height halo on full (already width-padded) rows -> correct corners
    mid_ref[0:1, :, :] = mid_ref[2:3, :, :]
    mid_ref[H + 1:H + 2, :, :] = mid_ref[H - 1:H, :, :]

    # ------- conv2 (shift-and-matmul) + folded bn2 + residual + ReLU -------
    acc2 = jnp.zeros((HW, C), jnp.float32)
    for ky in range(3):
        for kx in range(3):
            ms = mid_ref[ky:ky + H, kx:kx + W, :].reshape(HW, C)
            acc2 = acc2 + jnp.dot(ms, w2_ref[ky, kx],
                                  preferred_element_type=jnp.float32)
    identity = xp_ref[0, 1:H + 1, 1:W + 1, :].astype(jnp.float32).reshape(HW, C)
    y = jnp.maximum(acc2 + b2_ref[...] + identity, 0.0)
    o_ref[0, :, :, :] = y.reshape(H, W, C).astype(o_ref.dtype)


# ----------------------------------------------------------------------------
# Plain-JAX glue: BN folding, weight reshaping, channel padding
# ----------------------------------------------------------------------------
def _round_up(x, m):
    return (x + m - 1) // m * m


def _bn_fold(gamma, beta, running_mean, running_var, eps=1e-5):
    scale = gamma / jnp.sqrt(running_var + eps)
    return scale, beta - running_mean * scale


def _fold_weight(w_oihw, scale, cpad):
    """(Cout, Cin, 3, 3) -> (3, 3, Cpad, Cpad) bf16 with BN scale folded in."""
    w = jnp.transpose(w_oihw, (2, 3, 1, 0)).astype(jnp.float32)   # (3,3,Cin,Cout)
    w = w * scale[None, None, None, :]
    cin, cout = w.shape[2], w.shape[3]
    w = jnp.pad(w, ((0, 0), (0, 0), (0, cpad - cin), (0, cpad - cout)))
    return w.astype(jnp.bfloat16)


def _pad_bias(b, cpad):
    return jnp.pad(b.astype(jnp.float32), (0, cpad - b.shape[0])).reshape(1, cpad)


# ----------------------------------------------------------------------------
# BasicBlock forward (downsample=None, stride=1, groups=1, dilation=1)
# ----------------------------------------------------------------------------
@jax.jit
def basic_block_forward(x_nchw, params):
    x = jnp.transpose(x_nchw, (0, 2, 3, 1)).astype(jnp.float32)   # NHWC
    N, H, W, Cin = x.shape
    planes = params["conv1_w"].shape[0]
    assert params["conv1_w"].shape[1] == Cin
    assert params["conv2_w"].shape[:2] == (planes, planes)
    # downsample is None -> residual add needs matching shapes.
    assert Cin == planes, "TODO(synk): downsample / stride!=1 branch not implemented"

    C = _round_up(max(Cin, planes), _LANE)        # lane-dense channel count

    # reflect-pad H/W by 1, zero-pad channels to C, cast to bf16
    xp = jnp.pad(x, ((0, 0), (1, 1), (1, 1), (0, 0)), mode="reflect")
    xp = jnp.pad(xp, ((0, 0), (0, 0), (0, 0), (0, C - Cin))).astype(jnp.bfloat16)

    s1, b1 = _bn_fold(*params["bn1"])
    s2, b2 = _bn_fold(*params["bn2"])
    w1 = _fold_weight(params["conv1_w"], s1, C)
    w2 = _fold_weight(params["conv2_w"], s2, C)
    b1 = _pad_bias(b1, C)
    b2 = _pad_bias(b2, C)

    out = pl.pallas_call(
        _basic_block_kernel,
        out_shape=jax.ShapeDtypeStruct((N, H, W, C), jnp.float32),
        grid_spec=pltpu.PrefetchScalarGridSpec(
            num_scalar_prefetch=0,
            grid=(N,),
            in_specs=[
                pl.BlockSpec((1, H + 2, W + 2, C), lambda n: (n, 0, 0, 0)),
                pl.BlockSpec((3, 3, C, C), lambda n: (0, 0, 0, 0)),
                pl.BlockSpec((1, C), lambda n: (0, 0)),
                pl.BlockSpec((3, 3, C, C), lambda n: (0, 0, 0, 0)),
                pl.BlockSpec((1, C), lambda n: (0, 0)),
            ],
            out_specs=pl.BlockSpec((1, H, W, C), lambda n: (n, 0, 0, 0)),
            scratch_shapes=[pltpu.VMEM((H + 2, W + 2, C), jnp.bfloat16)],
        ),
        compiler_params=pltpu.CompilerParams(
            dimension_semantics=("parallel",),
        ),
    )(xp, w1, b1, w2, b2)

    out = out[..., :planes]                        # drop channel padding
    return jnp.transpose(out, (0, 3, 1, 2))        # back to NCHW


# ----------------------------------------------------------------------------
# Pure-JAX reference (same bf16 rounding of inputs/weights/intermediate)
# ----------------------------------------------------------------------------
def _reference_forward(x_nchw, params):
    x = jnp.transpose(x_nchw, (0, 2, 3, 1)).astype(jnp.float32)
    s1, b1 = _bn_fold(*params["bn1"])
    s2, b2 = _bn_fold(*params["bn2"])
    w1 = (jnp.transpose(params["conv1_w"], (2, 3, 1, 0)) * s1
          ).astype(jnp.bfloat16).astype(jnp.float32)
    w2 = (jnp.transpose(params["conv2_w"], (2, 3, 1, 0)) * s2
          ).astype(jnp.bfloat16).astype(jnp.float32)
    xb = x.astype(jnp.bfloat16).astype(jnp.float32)

    def conv3x3_reflect(inp, w):
        n, h, wdt, _ = inp.shape
        p = jnp.pad(inp, ((0, 0), (1, 1), (1, 1), (0, 0)), mode="reflect")
        out = jnp.zeros((n, h, wdt, w.shape[3]), jnp.float32)
        for ky in range(3):
            for kx in range(3):
                out = out + jnp.einsum(
                    "nhwc,co->nhwo", p[:, ky:ky + h, kx:kx + wdt, :], w[ky, kx],
                    preferred_element_type=jnp.float32)
        return out

    o1 = jnp.maximum(conv3x3_reflect(xb, w1) + b1, 0.0)
    o1 = o1.astype(jnp.bfloat16).astype(jnp.float32)     # kernel keeps mid in bf16
    o2 = jnp.maximum(conv3x3_reflect(o1, w2) + b2 + xb, 0.0)
    return jnp.transpose(o2, (0, 3, 1, 2))


# ----------------------------------------------------------------------------
if __name__ == "__main__":
    key = jax.random.PRNGKey(0)
    keys = jax.random.split(key, 11)

    # BasicBlock(inplanes=4, planes=4, stride=1, downsample=None)
    inplanes = planes = 4
    N, H, W = 2, 16, 16

    x = jax.random.normal(keys[0], (N, inplanes, H, W), jnp.float32)
    params = {
        "conv1_w": 0.1 * jax.random.normal(keys[1], (planes, inplanes, 3, 3), jnp.float32),
        "conv2_w": 0.1 * jax.random.normal(keys[2], (planes, planes, 3, 3), jnp.float32),
        "bn1": (
            jax.random.uniform(keys[3], (planes,), jnp.float32, 0.5, 1.5),   # gamma
            0.1 * jax.random.normal(keys[4], (planes,), jnp.float32),        # beta
            0.1 * jax.random.normal(keys[5], (planes,), jnp.float32),        # running_mean
            jax.random.uniform(keys[6], (planes,), jnp.float32, 0.5, 1.5),   # running_var
        ),
        "bn2": (
            jax.random.uniform(keys[7], (planes,), jnp.float32, 0.5, 1.5),
            0.1 * jax.random.normal(keys[8], (planes,), jnp.float32),
            0.1 * jax.random.normal(keys[9], (planes,), jnp.float32),
            jax.random.uniform(keys[10], (planes,), jnp.float32, 0.5, 1.5),
        ),
    }

    out = jax.block_until_ready(basic_block_forward(x, params))
    ref = _reference_forward(x, params)

    assert out.shape == (N, planes, H, W), out.shape
    assert jnp.allclose(out, ref, atol=1e-2, rtol=1e-2), float(
        jnp.max(jnp.abs(out - ref)))

    print("KERNEL_OK")
</pallas_src>

<mosaic_0001>
module attributes {stable_mosaic.version = 11 : i64} {
  func.func @_basic_block_kernel(%arg0: i32, %arg1: memref<1x18x18x128xbf16, #tpu.memory_space<vmem>>, %arg2: memref<3x3x128x128xbf16, #tpu.memory_space<vmem>>, %arg3: memref<1x128xf32, #tpu.memory_space<vmem>>, %arg4: memref<3x3x128x128xbf16, #tpu.memory_space<vmem>>, %arg5: memref<1x128xf32, #tpu.memory_space<vmem>>, %arg6: memref<1x16x16x128xf32, #tpu.memory_space<vmem>>, %arg7: memref<18x18x128xbf16, #tpu.memory_space<vmem>>) attributes {dimension_semantics = [#tpu.dimension_semantics<parallel>], iteration_bounds = array<i64: 2>, scalar_prefetch = 0 : i64, scratch_operands = 1 : i64, tpu.core_type = #tpu.core_type<tc>, window_params = [{transform_indices = @transform_0, window_bounds = array<i64: 1, 18, 18, 128>}, {pipeline_mode = #tpu.pipeline_mode<synchronous>, transform_indices = @transform_1, window_bounds = array<i64: 3, 3, 128, 128>}, {pipeline_mode = #tpu.pipeline_mode<synchronous>, transform_indices = @transform_2, window_bounds = array<i64: 1, 128>}, {pipeline_mode = #tpu.pipeline_mode<synchronous>, transform_indices = @transform_3, window_bounds = array<i64: 3, 3, 128, 128>}, {pipeline_mode = #tpu.pipeline_mode<synchronous>, transform_indices = @transform_4, window_bounds = array<i64: 1, 128>}, {transform_indices = @transform_5, window_bounds = array<i64: 1, 16, 16, 128>}]} {
    %cst = arith.constant 0.000000e+00 : f32
    %0 = vector.broadcast %cst : f32 to vector<256x128xf32>
    %c0 = arith.constant 0 : index
    %c0_0 = arith.constant 0 : index
    %c0_1 = arith.constant 0 : index
    %c0_2 = arith.constant 0 : index
    %1 = vector.load %arg1[%c0, %c0_0, %c0_1, %c0_2] : memref<1x18x18x128xbf16, #tpu.memory_space<vmem>>, vector<1x16x16x128xbf16>
    %2 = vector.shape_cast %1 : vector<1x16x16x128xbf16> to vector<16x16x128xbf16>
    %3 = vector.shape_cast %2 : vector<16x16x128xbf16> to vector<256x128xbf16>
    %c0_3 = arith.constant 0 : index
    %c0_4 = arith.constant 0 : index
    %c0_5 = arith.constant 0 : index
    %c0_6 = arith.constant 0 : index
    %4 = vector.load %arg2[%c0_3, %c0_4, %c0_5, %c0_6] : memref<3x3x128x128xbf16, #tpu.memory_space<vmem>>, vector<1x1x128x128xbf16>
    %5 = vector.shape_cast %4 : vector<1x1x128x128xbf16> to vector<128x128xbf16>
    %cst_7 = arith.constant dense<0.000000e+00> : vector<256x128xf32>
    %6 = tpu.matmul %3, %5, %cst_7 {dimension_numbers = #tpu.dot_dimension_numbers<[1], [0], [0], [1], [0, 0, 1, 1], [], []>} : vector<256x128xbf16>, vector<128x128xbf16>, vector<256x128xf32> -> vector<256x128xf32>
    %7 = arith.addf %0, %6 : vector<256x128xf32>
    %c0_8 = arith.constant 0 : index
    %c0_9 = arith.constant 0 : index
    %c1 = arith.constant 1 : index
    %c0_10 = arith.constant 0 : index
    %8 = vector.load %arg1[%c0_8, %c0_9, %c1, %c0_10] : memref<1x18x18x128xbf16, #tpu.memory_space<vmem>>, vector<1x16x16x128xbf16>
    %9 = vector.shape_cast %8 : vector<1x16x16x128xbf16> to vector<16x16x128xbf16>
    %10 = vector.shape_cast %9 : vector<16x16x128xbf16> to vector<256x128xbf16>
    %c0_11 = arith.constant 0 : index
    %c1_12 = arith.constant 1 : index
    %c0_13 = arith.constant 0 : index
    %c0_14 = arith.constant 0 : index
    %11 = vector.load %arg2[%c0_11, %c1_12, %c0_13, %c0_14] : memref<3x3x128x128xbf16, #tpu.memory_space<vmem>>, vector<1x1x128x128xbf16>
    %12 = vector.shape_cast %11 : vector<1x1x128x128xbf16> to vector<128x128xbf16>
    %cst_15 = arith.constant dense<0.000000e+00> : vector<256x128xf32>
    %13 = tpu.matmul %10, %12, %cst_15 {dimension_numbers = #tpu.dot_dimension_numbers<[1], [0], [0], [1], [0, 0, 1, 1], [], []>} : vector<256x128xbf16>, vector<128x128xbf16>, vector<256x128xf32> -> vector<256x128xf32>
    %14 = arith.addf %7, %13 : vector<256x128xf32>
    %c0_16 = arith.constant 0 : index
    %c0_17 = arith.constant 0 : index
    %c2 = arith.constant 2 : index
    %c0_18 = arith.constant 0 : index
    %15 = vector.load %arg1[%c0_16, %c0_17, %c2, %c0_18] : memref<1x18x18x128xbf16, #tpu.memory_space<vmem>>, vector<1x16x16x128xbf16>
    %16 = vector.shape_cast %15 : vector<1x16x16x128xbf16> to vector<16x16x128xbf16>
    %17 = vector.shape_cast %16 : vector<16x16x128xbf16> to vector<256x128xbf16>
    %c0_19 = arith.constant 0 : index
    %c2_20 = arith.constant 2 : index
    %c0_21 = arith.constant 0 : index
    %c0_22 = arith.constant 0 : index
    %18 = vector.load %arg2[%c0_19, %c2_20, %c0_21, %c0_22] : memref<3x3x128x128xbf16, #tpu.memory_space<vmem>>, vector<1x1x128x128xbf16>
    %19 = vector.shape_cast %18 : vector<1x1x128x128xbf16> to vector<128x128xbf16>
    %cst_23 = arith.constant dense<0.000000e+00> : vector<256x128xf32>
    %20 = tpu.matmul %17, %19, %cst_23 {dimension_numbers = #tpu.dot_dimension_numbers<[1], [0], [0], [1], [0, 0, 1, 1], [], []>} : vector<256x128xbf16>, vector<128x128xbf16>, vector<256x128xf32> -> vector<256x128xf32>
    %21 = arith.addf %14, %20 : vector<256x128xf32>
    %c0_24 = arith.constant 0 : index
    %c1_25 = arith.constant 1 : index
    %c0_26 = arith.constant 0 : index
    %c0_27 = arith.constant 0 : index
    %22 = vector.load %arg1[%c0_24, %c1_25, %c0_26, %c0_27] : memref<1x18x18x128xbf16, #tpu.memory_space<vmem>>, vector<1x16x16x128xbf16>
    %23 = vector.shape_cast %22 : vector<1x16x16x128xbf16> to vector<16x16x128xbf16>
    %24 = vector.shape_cast %23 : vector<16x16x128xbf16> to vector<256x128xbf16>
    %c1_28 = arith.constant 1 : index
    %c0_29 = arith.constant 0 : index
    %c0_30 = arith.constant 0 : index
    %c0_31 = arith.constant 0 : index
    %25 = vector.load %arg2[%c1_28, %c0_29, %c0_30, %c0_31] : memref<3x3x128x128xbf16, #tpu.memory_space<vmem>>, vector<1x1x128x128xbf16>
    %26 = vector.shape_cast %25 : vector<1x1x128x128xbf16> to vector<128x128xbf16>
    %cst_32 = arith.constant dense<0.000000e+00> : vector<256x128xf32>
    %27 = tpu.matmul %24, %26, %cst_32 {dimension_numbers = #tpu.dot_dimension_numbers<[1], [0], [0], [1], [0, 0, 1, 1], [], []>} : vector<256x128xbf16>, vector<128x128xbf16>, vector<256x128xf32> -> vector<256x128xf32>
    %28 = arith.addf %21, %27 : vector<256x128xf32>
    %c0_33 = arith.constant 0 : index
    %c1_34 = arith.constant 1 : index
    %c1_35 = arith.constant 1 : index
    %c0_36 = arith.constant 0 : index
    %29 = vector.load %arg1[%c0_33, %c1_34, %c1_35, %c0_36] : memref<1x18x18x128xbf16, #tpu.memory_space<vmem>>, vector<1x16x16x128xbf16>
    %30 = vector.shape_cast %29 : vector<1x16x16x128xbf16> to vector<16x16x128xbf16>
    %31 = vector.shape_cast %30 : vector<16x16x128xbf16> to vector<256x128xbf16>
    %c1_37 = arith.constant 1 : index
    %c1_38 = arith.constant 1 : index
    %c0_39 = arith.constant 0 : index
    %c0_40 = arith.constant 0 : index
    %32 = vector.load %arg2[%c1_37, %c1_38, %c0_39, %c0_40] : memref<3x3x128x128xbf16, #tpu.memory_space<vmem>>, vector<1x1x128x128xbf16>
    %33 = vector.shape_cast %32 : vector<1x1x128x128xbf16> to vector<128x128xbf16>
    %cst_41 = arith.constant dense<0.000000e+00> : vector<256x128xf32>
    %34 = tpu.matmul %31, %33, %cst_41 {dimension_numbers = #tpu.dot_dimension_numbers<[1], [0], [0], [1], [0, 0, 1, 1], [], []>} : vector<256x128xbf16>, vector<128x128xbf16>, vector<256x128xf32> -> vector<256x128xf32>
    %35 = arith.addf %28, %34 : vector<256x128xf32>
    %c0_42 = arith.constant 0 : index
    %c1_43 = arith.constant 1 : index
    %c2_44 = arith.constant 2 : index
    %c0_45 = arith.constant 0 : index
    %36 = vector.load %arg1[%c0_42, %c1_43, %c2_44, %c0_45] : memref<1x18x18x128xbf16, #tpu.memory_space<vmem>>, vector<1x16x16x128xbf16>
    %37 = vector.shape_cast %36 : vector<1x16x16x128xbf16> to vector<16x16x128xbf16>
    %38 = vector.shape_cast %37 : vector<16x16x128xbf16> to vector<256x128xbf16>
    %c1_46 = arith.constant 1 : index
    %c2_47 = arith.constant 2 : index
    %c0_48 = arith.constant 0 : index
    %c0_49 = arith.constant 0 : index
    %39 = vector.load %arg2[%c1_46, %c2_47, %c0_48, %c0_49] : memref<3x3x128x128xbf16, #tpu.memory_space<vmem>>, vector<1x1x128x128xbf16>
    %40 = vector.shape_cast %39 : vector<1x1x128x128xbf16> to vector<128x128xbf16>
    %cst_50 = arith.constant dense<0.000000e+00> : vector<256x128xf32>
    %41 = tpu.matmul %38, %40, %cst_50 {dimension_numbers = #tpu.dot_dimension_numbers<[1], [0], [0], [1], [0, 0, 1, 1], [], []>} : vector<256x128xbf16>, vector<128x128xbf16>, vector<256x128xf32> -> vector<256x128xf32>
    %42 = arith.addf %35, %41 : vector<256x128xf32>
    %c0_51 = arith.constant 0 : index
    %c2_52 = arith.constant 2 : index
    %c0_53 = arith.constant 0 : index
    %c0_54 = arith.constant 0 : index
    %43 = vector.load %arg1[%c0_51, %c2_52, %c0_53, %c0_54] : memref<1x18x18x128xbf16, #tpu.memory_space<vmem>>, vector<1x16x16x128xbf16>
    %44 = vector.shape_cast %43 : vector<1x16x16x128xbf16> to vector<16x16x128xbf16>
    %45 = vector.shape_cast %44 : vector<16x16x128xbf16> to vector<256x128xbf16>
    %c2_55 = arith.constant 2 : index
    %c0_56 = arith.constant 0 : index
    %c0_57 = arith.constant 0 : index
    %c0_58 = arith.constant 0 : index
    %46 = vector.load %arg2[%c2_55, %c0_56, %c0_57, %c0_58] : memref<3x3x128x128xbf16, #tpu.memory_space<vmem>>, vector<1x1x128x128xbf16>
    %47 = vector.shape_cast %46 : vector<1x1x128x128xbf16> to vector<128x128xbf16>
    %cst_59 = arith.constant dense<0.000000e+00> : vector<256x128xf32>
    %48 = tpu.matmul %45, %47, %cst_59 {dimension_numbers = #tpu.dot_dimension_numbers<[1], [0], [0], [1], [0, 0, 1, 1], [], []>} : vector<256x128xbf16>, vector<128x128xbf16>, vector<256x128xf32> -> vector<256x128xf32>
    %49 = arith.addf %42, %48 : vector<256x128xf32>
    %c0_60 = arith.constant 0 : index
    %c2_61 = arith.constant 2 : index
    %c1_62 = arith.constant 1 : index
    %c0_63 = arith.constant 0 : index
    %50 = vector.load %arg1[%c0_60, %c2_61, %c1_62, %c0_63] : memref<1x18x18x128xbf16, #tpu.memory_space<vmem>>, vector<1x16x16x128xbf16>
    %51 = vector.shape_cast %50 : vector<1x16x16x128xbf16> to vector<16x16x128xbf16>
    %52 = vector.shape_cast %51 : vector<16x16x128xbf16> to vector<256x128xbf16>
    %c2_64 = arith.constant 2 : index
    %c1_65 = arith.constant 1 : index
    %c0_66 = arith.constant 0 : index
    %c0_67 = arith.constant 0 : index
    %53 = vector.load %arg2[%c2_64, %c1_65, %c0_66, %c0_67] : memref<3x3x128x128xbf16, #tpu.memory_space<vmem>>, vector<1x1x128x128xbf16>
    %54 = vector.shape_cast %53 : vector<1x1x128x128xbf16> to vector<128x128xbf16>
    %cst_68 = arith.constant dense<0.000000e+00> : vector<256x128xf32>
    %55 = tpu.matmul %52, %54, %cst_68 {dimension_numbers = #tpu.dot_dimension_numbers<[1], [0], [0], [1], [0, 0, 1, 1], [], []>} : vector<256x128xbf16>, vector<128x128xbf16>, vector<256x128xf32> -> vector<256x128xf32>
    %56 = arith.addf %49, %55 : vector<256x128xf32>
    %c0_69 = arith.constant 0 : index
    %c2_70 = arith.constant 2 : index
    %c2_71 = arith.constant 2 : index
    %c0_72 = arith.constant 0 : index
    %57 = vector.load %arg1[%c0_69, %c2_70, %c2_71, %c0_72] : memref<1x18x18x128xbf16, #tpu.memory_space<vmem>>, vector<1x16x16x128xbf16>
    %58 = vector.shape_cast %57 : vector<1x16x16x128xbf16> to vector<16x16x128xbf16>
    %59 = vector.shape_cast %58 : vector<16x16x128xbf16> to vector<256x128xbf16>
    %c2_73 = arith.constant 2 : index
    %c2_74 = arith.constant 2 : index
    %c0_75 = arith.constant 0 : index
    %c0_76 = arith.constant 0 : index
    %60 = vector.load %arg2[%c2_73, %c2_74, %c0_75, %c0_76] : memref<3x3x128x128xbf16, #tpu.memory_space<vmem>>, vector<1x1x128x128xbf16>
    %61 = vector.shape_cast %60 : vector<1x1x128x128xbf16> to vector<128x128xbf16>
    %cst_77 = arith.constant dense<0.000000e+00> : vector<256x128xf32>
    %62 = tpu.matmul %59, %61, %cst_77 {dimension_numbers = #tpu.dot_dimension_numbers<[1], [0], [0], [1], [0, 0, 1, 1], [], []>} : vector<256x128xbf16>, vector<128x128xbf16>, vector<256x128xf32> -> vector<256x128xf32>
    %63 = arith.addf %56, %62 : vector<256x128xf32>
    %c0_78 = arith.constant 0 : index
    %c0_79 = arith.constant 0 : index
    %64 = vector.load %arg3[%c0_78, %c0_79] : memref<1x128xf32, #tpu.memory_space<vmem>>, vector<1x128xf32>
    %65 = vector.broadcast %64 : vector<1x128xf32> to vector<256x128xf32>
    %66 = arith.addf %63, %65 : vector<256x128xf32>
    %cst_80 = arith.constant 0.000000e+00 : f32
    %67 = vector.broadcast %cst_80 : f32 to vector<256x128xf32>
    %68 = arith.maximumf %66, %67 : vector<256x128xf32>
    %69 = vector.shape_cast %68 : vector<256x128xf32> to vector<16x16x128xf32>
    %70 = arith.truncf %69 : vector<16x16x128xf32> to vector<16x16x128xbf16>
    %c1_81 = arith.constant 1 : index
    %c1_82 = arith.constant 1 : index
    %c0_83 = arith.constant 0 : index
    %71 = vector.load %arg7[%c1_81, %c1_82, %c0_83] : memref<18x18x128xbf16, #tpu.memory_space<vmem>>, vector<16x16x128xbf16>
    tpu.vector_store %arg7[%c1_81, %c1_82, %c0_83], %70 {strides = array<i32>} : memref<18x18x128xbf16, #tpu.memory_space<vmem>>, vector<16x16x128xbf16>,
    %c1_84 = arith.constant 1 : index
    %c2_85 = arith.constant 2 : index
    %c0_86 = arith.constant 0 : index
    %72 = vector.load %arg7[%c1_84, %c2_85, %c0_86] : memref<18x18x128xbf16, #tpu.memory_space<vmem>>, vector<16x1x128xbf16>
    %c1_87 = arith.constant 1 : index
    %c0_88 = arith.constant 0 : index
    %c0_89 = arith.constant 0 : index
    %73 = vector.load %arg7[%c1_87, %c0_88, %c0_89] : memref<18x18x128xbf16, #tpu.memory_space<vmem>>, vector<16x1x128xbf16>
    tpu.vector_store %arg7[%c1_87, %c0_88, %c0_89], %72 {strides = array<i32>} : memref<18x18x128xbf16, #tpu.memory_space<vmem>>, vector<16x1x128xbf16>,
    %c1_90 = arith.constant 1 : index
    %c15 = arith.constant 15 : index
    %c0_91 = arith.constant 0 : index
    %74 = vector.load %arg7[%c1_90, %c15, %c0_91] : memref<18x18x128xbf16, #tpu.memory_space<vmem>>, vector<16x1x128xbf16>
    %c1_92 = arith.constant 1 : index
    %c17 = arith.constant 17 : index
    %c0_93 = arith.constant 0 : index
    %75 = vector.load %arg7[%c1_92, %c17, %c0_93] : memref<18x18x128xbf16, #tpu.memory_space<vmem>>, vector<16x1x128xbf16>
    tpu.vector_store %arg7[%c1_92, %c17, %c0_93], %74 {strides = array<i32>} : memref<18x18x128xbf16, #tpu.memory_space<vmem>>, vector<16x1x128xbf16>,
    %c2_94 = arith.constant 2 : index
    %c0_95 = arith.constant 0 : index
    %c0_96 = arith.constant 0 : index
    %76 = vector.load %arg7[%c2_94, %c0_95, %c0_96] : memref<18x18x128xbf16, #tpu.memory_space<vmem>>, vector<1x18x128xbf16>
    %c0_97 = arith.constant 0 : index
    %c0_98 = arith.constant 0 : index
    %c0_99 = arith.constant 0 : index
    %77 = vector.load %arg7[%c0_97, %c0_98, %c0_99] : memref<18x18x128xbf16, #tpu.memory_space<vmem>>, vector<1x18x128xbf16>
    tpu.vector_store %arg7[%c0_97, %c0_98, %c0_99], %76 {strides = array<i32>} : memref<18x18x128xbf16, #tpu.memory_space<vmem>>, vector<1x18x128xbf16>,
    %c15_100 = arith.constant 15 : index
    %c0_101 = arith.constant 0 : index
    %c0_102 = arith.constant 0 : index
    %78 = vector.load %arg7[%c15_100, %c0_101, %c0_102] : memref<18x18x128xbf16, #tpu.memory_space<vmem>>, vector<1x18x128xbf16>
    %c17_103 = arith.constant 17 : index
    %c0_104 = arith.constant 0 : index
    %c0_105 = arith.constant 0 : index
    %79 = vector.load %arg7[%c17_103, %c0_104, %c0_105] : memref<18x18x128xbf16, #tpu.memory_space<vmem>>, vector<1x18x128xbf16>
    tpu.vector_store %arg7[%c17_103, %c0_104, %c0_105], %78 {strides = array<i32>} : memref<18x18x128xbf16, #tpu.memory_space<vmem>>, vector<1x18x128xbf16>,
    %cst_106 = arith.constant 0.000000e+00 : f32
    %80 = vector.broadcast %cst_106 : f32 to vector<256x128xf32>
    %c0_107 = arith.constant 0 : index
    %c0_108 = arith.constant 0 : index
    %c0_109 = arith.constant 0 : index
    %81 = vector.load %arg7[%c0_107, %c0_108, %c0_109] : memref<18x18x128xbf16, #tpu.memory_space<vmem>>, vector<16x16x128xbf16>
    %82 = vector.shape_cast %81 : vector<16x16x128xbf16> to vector<256x128xbf16>
    %c0_110 = arith.constant 0 : index
    %c0_111 = arith.constant 0 : index
    %c0_112 = arith.constant 0 : index
    %c0_113 = arith.constant 0 : index
    %83 = vector.load %arg4[%c0_110, %c0_111, %c0_112, %c0_113] : memref<3x3x128x128xbf16, #tpu.memory_space<vmem>>, vector<1x1x128x128xbf16>
    %84 = vector.shape_cast %83 : vector<1x1x128x128xbf16> to vector<128x128xbf16>
    %cst_114 = arith.constant dense<0.000000e+00> : vector<256x128xf32>
    %85 = tpu.matmul %82, %84, %cst_114 {dimension_numbers = #tpu.dot_dimension_numbers<[1], [0], [0], [1], [0, 0, 1, 1], [], []>} : vector<256x128xbf16>, vector<128x128xbf16>, vector<256x128xf32> -> vector<256x128xf32>
    %86 = arith.addf %80, %85 : vector<256x128xf32>
    %c0_115 = arith.constant 0 : index
    %c1_116 = arith.constant 1 : index
    %c0_117 = arith.constant 0 : index
    %87 = vector.load %arg7[%c0_115, %c1_116, %c0_117] : memref<18x18x128xbf16, #tpu.memory_space<vmem>>, vector<16x16x128xbf16>
    %88 = vector.shape_cast %87 : vector<16x16x128xbf16> to vector<256x128xbf16>
    %c0_118 = arith.constant 0 : index
    %c1_119 = arith.constant 1 : index
    %c0_120 = arith.constant 0 : index
    %c0_121 = arith.constant 0 : index
    %89 = vector.load %arg4[%c0_118, %c1_119, %c0_120, %c0_121] : memref<3x3x128x128xbf16, #tpu.memory_space<vmem>>, vector<1x1x128x128xbf16>
    %90 = vector.shape_cast %89 : vector<1x1x128x128xbf16> to vector<128x128xbf16>
    %cst_122 = arith.constant dense<0.000000e+00> : vector<256x128xf32>
    %91 = tpu.matmul %88, %90, %cst_122 {dimension_numbers = #tpu.dot_dimension_numbers<[1], [0], [0], [1], [0, 0, 1, 1], [], []>} : vector<256x128xbf16>, vector<128x128xbf16>, vector<256x128xf32> -> vector<256x128xf32>
    %92 = arith.addf %86, %91 : vector<256x128xf32>
    %c0_123 = arith.constant 0 : index
    %c2_124 = arith.constant 2 : index
    %c0_125 = arith.constant 0 : index
    %93 = vector.load %arg7[%c0_123, %c2_124, %c0_125] : memref<18x18x128xbf16, #tpu.memory_space<vmem>>, vector<16x16x128xbf16>
    %94 = vector.shape_cast %93 : vector<16x16x128xbf16> to vector<256x128xbf16>
    %c0_126 = arith.constant 0 : index
    %c2_127 = arith.constant 2 : index
    %c0_128 = arith.constant 0 : index
    %c0_129 = arith.constant 0 : index
    %95 = vector.load %arg4[%c0_126, %c2_127, %c0_128, %c0_129] : memref<3x3x128x128xbf16, #tpu.memory_space<vmem>>, vector<1x1x128x128xbf16>
    %96 = vector.shape_cast %95 : vector<1x1x128x128xbf16> to vector<128x128xbf16>
    %cst_130 = arith.constant dense<0.000000e+00> : vector<256x128xf32>
    %97 = tpu.matmul %94, %96, %cst_130 {dimension_numbers = #tpu.dot_dimension_numbers<[1], [0], [0], [1], [0, 0, 1, 1], [], []>} : vector<256x128xbf16>, vector<128x128xbf16>, vector<256x128xf32> -> vector<256x128xf32>
    %98 = arith.addf %92, %97 : vector<256x128xf32>
    %c1_131 = arith.constant 1 : index
    %c0_132 = arith.constant 0 : index
    %c0_133 = arith.constant 0 : index
    %99 = vector.load %arg7[%c1_131, %c0_132, %c0_133] : memref<18x18x128xbf16, #tpu.memory_space<vmem>>, vector<16x16x128xbf16>
    %100 = vector.shape_cast %99 : vector<16x16x128xbf16> to vector<256x128xbf16>
    %c1_134 = arith.constant 1 : index
    %c0_135 = arith.constant 0 : index
    %c0_136 = arith.constant 0 : index
    %c0_137 = arith.constant 0 : index
    %101 = vector.load %arg4[%c1_134, %c0_135, %c0_136, %c0_137] : memref<3x3x128x128xbf16, #tpu.memory_space<vmem>>, vector<1x1x128x128xbf16>
    %102 = vector.shape_cast %101 : vector<1x1x128x128xbf16> to vector<128x128xbf16>
    %cst_138 = arith.constant dense<0.000000e+00> : vector<256x128xf32>
    %103 = tpu.matmul %100, %102, %cst_138 {dimension_numbers = #tpu.dot_dimension_numbers<[1], [0], [0], [1], [0, 0, 1, 1], [], []>} : vector<256x128xbf16>, vector<128x128xbf16>, vector<256x128xf32> -> vector<256x128xf32>
    %104 = arith.addf %98, %103 : vector<256x128xf32>
    %c1_139 = arith.constant 1 : index
    %c1_140 = arith.constant 1 : index
    %c0_141 = arith.constant 0 : index
    %105 = vector.load %arg7[%c1_139, %c1_140, %c0_141] : memref<18x18x128xbf16, #tpu.memory_space<vmem>>, vector<16x16x128xbf16>
    %106 = vector.shape_cast %105 : vector<16x16x128xbf16> to vector<256x128xbf16>
    %c1_142 = arith.constant 1 : index
    %c1_143 = arith.constant 1 : index
    %c0_144 = arith.constant 0 : index
    %c0_145 = arith.constant 0 : index
    %107 = vector.load %arg4[%c1_142, %c1_143, %c0_144, %c0_145] : memref<3x3x128x128xbf16, #tpu.memory_space<vmem>>, vector<1x1x128x128xbf16>
    %108 = vector.shape_cast %107 : vector<1x1x128x128xbf16> to vector<128x128xbf16>
    %cst_146 = arith.constant dense<0.000000e+00> : vector<256x128xf32>
    %109 = tpu.matmul %106, %108, %cst_146 {dimension_numbers = #tpu.dot_dimension_numbers<[1], [0], [0], [1], [0, 0, 1, 1], [], []>} : vector<256x128xbf16>, vector<128x128xbf16>, vector<256x128xf32> -> vector<256x128xf32>
    %110 = arith.addf %104, %109 : vector<256x128xf32>
    %c1_147 = arith.constant 1 : index
    %c2_148 = arith.constant 2 : index
    %c0_149 = arith.constant 0 : index
    %111 = vector.load %arg7[%c1_147, %c2_148, %c0_149] : memref<18x18x128xbf16, #tpu.memory_space<vmem>>, vector<16x16x128xbf16>
    %112 = vector.shape_cast %111 : vector<16x16x128xbf16> to vector<256x128xbf16>
    %c1_150 = arith.constant 1 : index
    %c2_151 = arith.constant 2 : index
    %c0_152 = arith.constant 0 : index
    %c0_153 = arith.constant 0 : index
    %113 = vector.load %arg4[%c1_150, %c2_151, %c0_152, %c0_153] : memref<3x3x128x128xbf16, #tpu.memory_space<vmem>>, vector<1x1x128x128xbf16>
    %114 = vector.shape_cast %113 : vector<1x1x128x128xbf16> to vector<128x128xbf16>
    %cst_154 = arith.constant dense<0.000000e+00> : vector<256x128xf32>
    %115 = tpu.matmul %112, %114, %cst_154 {dimension_numbers = #tpu.dot_dimension_numbers<[1], [0], [0], [1], [0, 0, 1, 1], [], []>} : vector<256x128xbf16>, vector<128x128xbf16>, vector<256x128xf32> -> vector<256x128xf32>
    %116 = arith.addf %110, %115 : vector<256x128xf32>
    %c2_155 = arith.constant 2 : index
    %c0_156 = arith.constant 0 : index
    %c0_157 = arith.constant 0 : index
    %117 = vector.load %arg7[%c2_155, %c0_156, %c0_157] : memref<18x18x128xbf16, #tpu.memory_space<vmem>>, vector<16x16x128xbf16>
    %118 = vector.shape_cast %117 : vector<16x16x128xbf16> to vector<256x128xbf16>
    %c2_158 = arith.constant 2 : index
    %c0_159 = arith.constant 0 : index
    %c0_160 = arith.constant 0 : index
    %c0_161 = arith.constant 0 : index
    %119 = vector.load %arg4[%c2_158, %c0_159, %c0_160, %c0_161] : memref<3x3x128x128xbf16, #tpu.memory_space<vmem>>, vector<1x1x128x128xbf16>
    %120 = vector.shape_cast %119 : vector<1x1x128x128xbf16> to vector<128x128xbf16>
    %cst_162 = arith.constant dense<0.000000e+00> : vector<256x128xf32>
    %121 = tpu.matmul %118, %120, %cst_162 {dimension_numbers = #tpu.dot_dimension_numbers<[1], [0], [0], [1], [0, 0, 1, 1], [], []>} : vector<256x128xbf16>, vector<128x128xbf16>, vector<256x128xf32> -> vector<256x128xf32>
    %122 = arith.addf %116, %121 : vector<256x128xf32>
    %c2_163 = arith.constant 2 : index
    %c1_164 = arith.constant 1 : index
    %c0_165 = arith.constant 0 : index
    %123 = vector.load %arg7[%c2_163, %c1_164, %c0_165] : memref<18x18x128xbf16, #tpu.memory_space<vmem>>, vector<16x16x128xbf16>
    %124 = vector.shape_cast %123 : vector<16x16x128xbf16> to vector<256x128xbf16>
    %c2_166 = arith.constant 2 : index
    %c1_167 = arith.constant 1 : index
    %c0_168 = arith.constant 0 : index
    %c0_169 = arith.constant 0 : index
    %125 = vector.load %arg4[%c2_166, %c1_167, %c0_168, %c0_169] : memref<3x3x128x128xbf16, #tpu.memory_space<vmem>>, vector<1x1x128x128xbf16>
    %126 = vector.shape_cast %125 : vector<1x1x128x128xbf16> to vector<128x128xbf16>
    %cst_170 = arith.constant dense<0.000000e+00> : vector<256x128xf32>
    %127 = tpu.matmul %124, %126, %cst_170 {dimension_numbers = #tpu.dot_dimension_numbers<[1], [0], [0], [1], [0, 0, 1, 1], [], []>} : vector<256x128xbf16>, vector<128x128xbf16>, vector<256x128xf32> -> vector<256x128xf32>
    %128 = arith.addf %122, %127 : vector<256x128xf32>
    %c2_171 = arith.constant 2 : index
    %c2_172 = arith.constant 2 : index
    %c0_173 = arith.constant 0 : index
    %129 = vector.load %arg7[%c2_171, %c2_172, %c0_173] : memref<18x18x128xbf16, #tpu.memory_space<vmem>>, vector<16x16x128xbf16>
    %130 = vector.shape_cast %129 : vector<16x16x128xbf16> to vector<256x128xbf16>
    %c2_174 = arith.constant 2 : index
    %c2_175 = arith.constant 2 : index
    %c0_176 = arith.constant 0 : index
    %c0_177 = arith.constant 0 : index
    %131 = vector.load %arg4[%c2_174, %c2_175, %c0_176, %c0_177] : memref<3x3x128x128xbf16, #tpu.memory_space<vmem>>, vector<1x1x128x128xbf16>
    %132 = vector.shape_cast %131 : vector<1x1x128x128xbf16> to vector<128x128xbf16>
    %cst_178 = arith.constant dense<0.000000e+00> : vector<256x128xf32>
    %133 = tpu.matmul %130, %132, %cst_178 {dimension_numbers = #tpu.dot_dimension_numbers<[1], [0], [0], [1], [0, 0, 1, 1], [], []>} : vector<256x128xbf16>, vector<128x128xbf16>, vector<256x128xf32> -> vector<256x128xf32>
    %134 = arith.addf %128, %133 : vector<256x128xf32>
    %c0_179 = arith.constant 0 : index
    %c1_180 = arith.constant 1 : index
    %c1_181 = arith.constant 1 : index
    %c0_182 = arith.constant 0 : index
    %135 = vector.load %arg1[%c0_179, %c1_180, %c1_181, %c0_182] : memref<1x18x18x128xbf16, #tpu.memory_space<vmem>>, vector<1x16x16x128xbf16>
    %136 = vector.shape_cast %135 : vector<1x16x16x128xbf16> to vector<16x16x128xbf16>
    %137 = arith.extf %136 : vector<16x16x128xbf16> to vector<16x16x128xf32>
    %138 = vector.shape_cast %137 : vector<16x16x128xf32> to vector<256x128xf32>
    %c0_183 = arith.constant 0 : index
    %c0_184 = arith.constant 0 : index
    %139 = vector.load %arg5[%c0_183, %c0_184] : memref<1x128xf32, #tpu.memory_space<vmem>>, vector<1x128xf32>
    %140 = vector.broadcast %139 : vector<1x128xf32> to vector<256x128xf32>
    %141 = arith.addf %134, %140 : vector<256x128xf32>
    %142 = arith.addf %141, %138 : vector<256x128xf32>
    %cst_185 = arith.constant 0.000000e+00 : f32
    %143 = vector.broadcast %cst_185 : f32 to vector<256x128xf32>
    %144 = arith.maximumf %142, %143 : vector<256x128xf32>
    %145 = vector.shape_cast %144 : vector<256x128xf32> to vector<16x16x128xf32>
    %c0_186 = arith.constant 0 : index
    %c0_187 = arith.constant 0 : index
    %c0_188 = arith.constant 0 : index
    %c0_189 = arith.constant 0 : index
    %146 = vector.load %arg6[%c0_186, %c0_187, %c0_188, %c0_189] : memref<1x16x16x128xf32, #tpu.memory_space<vmem>>, vector<1x16x16x128xf32>
    %147 = vector.shape_cast %146 : vector<1x16x16x128xf32> to vector<16x16x128xf32>
    %148 = vector.shape_cast %145 : vector<16x16x128xf32> to vector<1x16x16x128xf32>
    tpu.vector_store %arg6[%c0_186, %c0_187, %c0_188, %c0_189], %148 {strides = array<i32>} : memref<1x16x16x128xf32, #tpu.memory_space<vmem>>, vector<1x16x16x128xf32>,
    return
  }
  func.func @transform_0(%arg0: i32) -> (i32, i32, i32, i32) {
    %c0_i32 = arith.constant 0 : i32
    %c0_i32_0 = arith.constant 0 : i32
    %c0_i32_1 = arith.constant 0 : i32
    %c0_i32_2 = arith.constant 0 : i32
    return %arg0, %c0_i32, %c0_i32_0, %c0_i32_1 : i32, i32, i32, i32
  }
  func.func @transform_1(%arg0: i32) -> (i32, i32, i32, i32) {
    %c0_i32 = arith.constant 0 : i32
    %c0_i32_0 = arith.constant 0 : i32
    %c0_i32_1 = arith.constant 0 : i32
    %c0_i32_2 = arith.constant 0 : i32
    %c0_i32_3 = arith.constant 0 : i32
    return %c0_i32, %c0_i32_0, %c0_i32_1, %c0_i32_2 : i32, i32, i32, i32
  }
  func.func @transform_2(%arg0: i32) -> (i32, i32) {
    %c0_i32 = arith.constant 0 : i32
    %c0_i32_0 = arith.constant 0 : i32
    %c0_i32_1 = arith.constant 0 : i32
    return %c0_i32, %c0_i32_0 : i32, i32
  }
  func.func @transform_3(%arg0: i32) -> (i32, i32, i32, i32) {
    %c0_i32 = arith.constant 0 : i32
    %c0_i32_0 = arith.constant 0 : i32
    %c0_i32_1 = arith.constant 0 : i32
    %c0_i32_2 = arith.constant 0 : i32
    %c0_i32_3 = arith.constant 0 : i32
    return %c0_i32, %c0_i32_0, %c0_i32_1, %c0_i32_2 : i32, i32, i32, i32
  }
  func.func @transform_4(%arg0: i32) -> (i32, i32) {
    %c0_i32 = arith.constant 0 : i32
    %c0_i32_0 = arith.constant 0 : i32
    %c0_i32_1 = arith.constant 0 : i32
    return %c0_i32, %c0_i32_0 : i32, i32
  }
  func.func @transform_5(%arg0: i32) -> (i32, i32, i32, i32) {
    %c0_i32 = arith.constant 0 : i32
    %c0_i32_0 = arith.constant 0 : i32
    %c0_i32_1 = arith.constant 0 : i32
    %c0_i32_2 = arith.constant 0 : i32
    return %arg0, %c0_i32, %c0_i32_0, %c0_i32_1 : i32, i32, i32, i32
  }
}

</mosaic_0001>

<bundles_post_ra>
// kernel: basic_block_forward.1
= control target key start
LH: loop header
LB: loop body
LE: loop exit
PB: predicated region body
PF: predicated region fallthrough
CT: control target
= control target key end

     0   :  { %s11786_s18 = smov 0   ;;  %s15302_s0 = inlined_call_operand.vmem [shape: bf16[2,18,18,128], index: 0, kind: input, shape index: {}]   ;;  %s15303_s1 = inlined_call_operand.vmem [shape: bf16[3,3,128,128], index: 1, kind: input, shape index: {}]   ;;  %s15304_s2 = inlined_call_operand.vmem [shape: f32[1,128], index: 2, kind: input, shape index: {}]   ;;  %s15305_s3 = inlined_call_operand.vmem [shape: bf16[3,3,128,128], index: 3, kind: input, shape index: {}]   ;;  %s15306_s4 = inlined_call_operand.vmem [shape: f32[1,128], index: 4, kind: input, shape index: {}]   ;;  %s15307_s5 = inlined_call_operand.vmem [shape: f32[2,16,16,128], index: 5, kind: output, shape index: {}]  }
   0x1 LB: > { %s9796_s19 = sadd.s32 4294967295, %s11754_s18   ;;  %p9800_p0 = scmp.ge.s32.totalorder %s11754_s18, 1  ;;  %s11754_s18 = sphi %s11786_s18, %s15_s18  }
   0x2   : > { %p187_p1 = scmp.lt.s32.totalorder %s11754_s18, 3 }
   0x4   : > { %p188_p2 = pnand %p9800_p0, %p187_p1 }
   0x6   : > { %191 = sbr.rel (%p188_p2) target bundleno = 1545 (0x609), region = 40 }
   0xb   : > { %v11422_v0 = vld [vmem:[%s15303_s1 + $0x78] sm:$0xff]  ;;  %p215_p3 = scmp.lt.s32.totalorder %s9796_s19, 1  ;;  %v11421_v2 = vld [vmem:[%s15303_s1 + $0x70] sm:$0xff]  ;;  %v11420_v4 = vld [vmem:[%s15303_s1 + $0x68] sm:$0xff]  ;;  %vm289_vm0 = vsmask.f32 3328 }
   0xc   : > { %v11414_v1 = vld [vmem:[%s15303_s1 + $0x38] sm:$0xff]  ;;  %805 = vmatpush.bf16.msra.mxu0 %v11422_v0  ;;  %11671 = vmatpush.bf16.msra.mxu2 %v11422_v0  ;;  %v11413_v3 = vld [vmem:[%s15303_s1 + $0x30] sm:$0xff]  ;;  %v11412_v5 = vld [vmem:[%s15303_s1 + $0x28] sm:$0xff]  ;;  %vm290_vm1 = vsmask.f32 7440  ;;  %vm1175_vm3 = vcmask 1042432  }
   0xd   : > { %s15446_s19 = smov (!%p215_p3, %s9796_s19), 1  ;;  %11679 = vmatpush.bf16.msra.mxu3 %v11414_v1  ;;  %1038 = vmatpush.bf16.msra.mxu1 %v11414_v1  ;;  %v11419_v16 = vld [vmem:[%s15303_s1 + $0x60] sm:$0xff]  ;;  %v11418_v32 = vld [vmem:[%s15303_s1 + $0x58] sm:$0xff]  ;;  %vm11839_vm2 = vmor %vm289_vm0, %vm290_vm1  ;;  %vm1176_vm4 = vcmask 1046532   ;;  %vm4810_vm6 = vcmask 1043456   ;;  %vm4817_vm10 = vcmask 1040384  }
   0xe   : > { %s11687_s28 = smul.u32 216, %s15446_s19  ;;  %v11411_v21 = vld [vmem:[%s15303_s1 + $0x20] sm:$0xff]  ;;  %v11410_v35 = vld [vmem:[%s15303_s1 + $0x18] sm:$0xff]  ;;  %v11417_v45 = vld [vmem:[%s15303_s1 + $0x50] sm:$0xff]  ;;  %vm4811_vm7 = vsmask.f32 7938 }
   0xf   : > { %v11409_v49 = vld [vmem:[%s15303_s1 + $0x10] sm:$0xff]  ;;  %v11416_v59 = vld [vmem:[%s15303_s1 + $0x48] sm:$0xff]  ;;  %vm12141_vm5 = vmor %vm1175_vm3, %vm1176_vm4  ;;  %vm4486_vm9 = vsmask.f32 256  ;;  %vm4487_vm11 = vsmask.f32 4368 }
  0x10   : > { %806 = vmatpush.bf16.msra.mxu0 %v11421_v2  ;;  %11672 = vmatpush.bf16.msra.mxu2 %v11421_v2  ;;  %s11815_s8 = scalar_lea.vmem %s15302_s0, %s11687_s28  ;;  %v11408_v0 = vld [vmem:[%s15303_s1 + $0x8] sm:$0xff]  ;;  %vm12957_vm8 = vmand %vm4810_vm6, %vm4811_vm7  ;;  %vm9496_vm15 = vcmask 1046528   ;;  %s11390_s9 = sshll.u32 %s15446_s19, 8 }
  0x11   : > { %11680 = vmatpush.bf16.msra.mxu3 %v11413_v3  ;;  %1039 = vmatpush.bf16.msra.mxu1 %v11413_v3  ;;  %v225_v6 = vld [vmem:[%s11815_s8] sm:$0xf]  ;;  %v226_v7 = vld [vmem:[%s11815_s8 + $0x4] sm:$0xf]  ;;  %v273_v13 = vld [vmem:[%s11815_s8 + $0x8] sm:$0x1]  ;;  %s15023_s12 = scalar_lea.vmem %s15307_s5, %s11390_s9 }
  0x12   : > { %v293_v8 = vshrl.u32 %v225_v6, 16  ;;  %v296_v9 = vshll.u32 %v225_v6, 16  ;;  %v302_v10 = vshll.u32 %v226_v7, 16  ;;  %v306_v11 = vshrl.u32 %v226_v7, 16  ;;  %v241_v12 = vld [vmem:[%s11815_s8 + $0x60] sm:$0xf]  ;;  %vm12984_vm12 = vmand %vm4817_vm10, %vm4486_vm9 }
  0x13   : > { %v242_v14 = vld [vmem:[%s11815_s8 + $0x64] sm:$0xf]  ;;  %v485_v15 = vshrl.u32 %v241_v12, 16  ;;  %v281_v22 = vld [vmem:[%s11815_s8 + $0x68] sm:$0x1]  ;;  %v488_v24 = vshll.u32 %v241_v12, 16  ;;  %vm12998_vm13 = vmor %vm4486_vm9, %vm4487_vm11 }
  0x14   : > { %807 = vmatpush.bf16.msra.mxu0 %v11420_v4  ;;  %11673 = vmatpush.bf16.msra.mxu2 %v11420_v4  ;;  %v295_v17 = vrot.slane %v293_v8, 4  ;;  %v298_v18 = vrot.slane %v296_v9, 5  ;;  %v304_v19 = vrot.slane %v302_v10, 5  ;;  %v308_v20 = vrot.slane %v306_v11, 4  ;;  %v227_v43 = vld [vmem:[%s11815_s8 + $0xc] sm:$0xf]  ;;  %vm13062_vm14 = vmand %vm4817_vm10, %vm4811_vm7 }
  0x15   : > { %11681 = vmatpush.bf16.msra.mxu3 %v11412_v5  ;;  %1040 = vmatpush.bf16.msra.mxu1 %v11412_v5  ;;  %v487_v23 = vrot.slane %v485_v15, 4  ;;  %v494_v25 = vshll.u32 %v242_v14, 16  ;;  %v312_v27 = vshll.u32 %v273_v13, 16  ;;  %v498_v28 = vshrl.u32 %v242_v14, 16  ;;  %v228_v44 = vld [vmem:[%s11815_s8 + $0x10] sm:$0xf] }
  0x16   : > { %v299_v26 = vor.u32 %v298_v18, %v295_v17  ;;  %v309_v29 = vor.u32 %v308_v20, %v304_v19  ;;  %v490_v30 = vrot.slane %v488_v24, 5  ;;  %v504_v34 = vshll.u32 %v281_v22, 16  ;;  %v243_v48 = vld [vmem:[%s11815_s8 + $0x6c] sm:$0xf]  ;;  %v244_v50 = vld [vmem:[%s11815_s8 + $0x70] sm:$0xf] }
  0x17   : > { %v496_v31 = vrot.slane %v494_v25, 5  ;;  %v500_v33 = vrot.slane %v498_v28, 4  ;;  %v314_v38 = vrot.slane %v312_v27, 5  ;;  %v317_v52 = vshrl.u32 %v227_v43, 16  ;;  %v11415_v5 = vld [vmem:[%s15303_s1 + $0x40] sm:$0xff]  ;;  %v11430_v17 = vld [vmem:[%s15303_s1 + $0xb8] sm:$0xff] }
  0x18   : > { %808 = vmatpush.bf16.msra.mxu0 %v11419_v16  ;;  %11674 = vmatpush.bf16.msra.mxu2 %v11419_v16  ;;  %v491_v36 = vor.u32 %v490_v30, %v487_v23  ;;  %v300_v37 = vrot.slane %v299_v26, 4  ;;  %v310_v41 = vrot.slane %v309_v29, 4  ;;  %v506_v47 = vrot.slane %v504_v34, 5  ;;  %v11873_v10 = vld [vmem:[%s11815_s8 + $0x14] sm:$0x1]  ;;  %v11407_v15 = vld [vmem:[%s15303_s1] sm:$0xff] }
  0x19   : > { %11682 = vmatpush.bf16.msra.mxu3 %v11411_v21  ;;  %1041 = vmatpush.bf16.msra.mxu1 %v11411_v21  ;;  %v501_v39 = vor.u32 %v500_v33, %v496_v31  ;;  %v320_v53 = vshll.u32 %v227_v43, 16  ;;  %v326_v54 = vshll.u32 %v228_v44, 16  ;;  %v330_v57 = vshrl.u32 %v228_v44, 16  ;;  %v282_v16 = vld [vmem:[%s11815_s8 + $0x74] sm:$0x1]  ;;  %v11454_v18 = vld [vmem:[%s15303_s1 + $0xf8] sm:$0xff] }
  0x1a   : > { %v492_v42 = vrot.slane %v491_v36, 4  ;;  %v305_v51 = vsel %vm11839_vm2, %v300_v37, %v304_v19  ;;  %v315_v55 = vsel %vm11839_vm2, %v310_v41, %v314_v38  ;;  %v509_v58 = vshrl.u32 %v243_v48, 16  ;;  %v11399_v24 = vld [vmem:[%s11815_s8 + $0x60] sm:$0xff]  ;;  %v11462_v29 = vld [vmem:[%s15303_s1 + $0x138] sm:$0xff]  ;;  %v11429_v30 = vld [vmem:[%s15303_s1 + $0xb0] sm:$0xff] }
  0x1b   : > { %v502_v46 = vrot.slane %v501_v39, 4  ;;  %v512_v61 = vshll.u32 %v243_v48, 16  ;;  %v518_v62 = vshll.u32 %v244_v50, 16  ;;  %v522_v63 = vshrl.u32 %v244_v50, 16  ;;  %v11391_v25 = vld [vmem:[%s11815_s8] sm:$0xff]  ;;  %v11461_v43 = vld [vmem:[%s15303_s1 + $0x130] sm:$0xff] }
  0x1c   : > { %809 = vmatpush.bf16.msra.mxu0 %v11418_v32  ;;  %11675 = vmatpush.bf16.msra.mxu2 %v11418_v32  ;;  %v497_v56 = vsel %vm11839_vm2, %v492_v42, %v496_v31  ;;  %v693_v1 = vunpack.c.l.b16 %v305_v51  ;;  %v694_v2 = vunpack.c.l.b16 %v315_v55  ;;  %v319_v3 = vrot.slane %v317_v52, 4  ;;  %v11453_v31 = vld [vmem:[%s15303_s1 + $0xf0] sm:$0xff]  ;;  %v229_v32 = vld [vmem:[%s11815_s8 + $0x18] sm:$0xf]  ;;  %v11903_v33 = vld [vmem:[%s11815_s8 + $0x1c] sm:$0xf] }
  0x1d   : > { %11683 = vmatpush.bf16.msra.mxu3 %v11410_v35  ;;  %1042 = vmatpush.bf16.msra.mxu1 %v11410_v35  ;;  %v507_v60 = vsel %vm11839_vm2, %v502_v46, %v506_v47  ;;  %v322_v4 = vrot.slane %v320_v53, 5  ;;  %v709_v6 = vunpack.c.l.b16 %v497_v56  ;;  %v11870_v8 = vrot.slane %v326_v54, 5  ;;  %v245_v37 = vld [vmem:[%s11815_s8 + $0x78] sm:$0xf]  ;;  %v246_v42 = vld [vmem:[%s11815_s8 + $0x7c] sm:$0xf] }
  0x1e   : > { %v710_v7 = vunpack.c.l.b16 %v507_v60  ;;  %v332_v9 = vrot.slane %v330_v57, 4  ;;  %v511_v11 = vrot.slane %v509_v58, 4  ;;  %v514_v12 = vrot.slane %v512_v61, 5  ;;  %v11428_v50 = vld [vmem:[%s15303_s1 + $0xa8] sm:$0xff] }
  0x1f   : > { %v11875_v13 = vrot.slane %v518_v62, 5  ;;  %v524_v14 = vrot.slane %v522_v63, 4  ;;  %v323_v19 = vor.u32 %v322_v4, %v319_v3  ;;  %v725_v20 = vpack.c.b16 %v694_v2, %v693_v1  ;;  %v11452_v51 = vld [vmem:[%s15303_s1 + $0xe8] sm:$0xff]  ;;  %v11932_v1 = vld [vmem:[%s11815_s8 + $0x20] sm:$0x1] }
  0x20   : > { %810 = vmatpush.bf16.msra.mxu0 %v11417_v45  ;;  %11676 = vmatpush.bf16.msra.mxu2 %v11417_v45  ;;  %v733_v21 = vpack.c.b16 %v710_v7, %v709_v6  ;;  %v333_v22 = vor.u32 %v332_v9, %v11870_v8  ;;  %v336_v23 = vshll.u32 %v11873_v10, 16  ;;  %v515_v26 = vor.u32 %v514_v12, %v511_v11  ;;  %v11460_v62 = vld [vmem:[%s15303_s1 + $0x128] sm:$0xff] }
  0x21   : > { %11684 = vmatpush.bf16.msra.mxu3 %v11409_v49  ;;  %1043 = vmatpush.bf16.msra.mxu1 %v11409_v49  ;;  %v525_v27 = vor.u32 %v524_v14, %v11875_v13  ;;  %v528_v28 = vshll.u32 %v282_v16, 16  ;;  %v324_v34 = vrot.slane %v323_v19, 4  ;;  %v341_v44 = vshrl.u32 %v229_v32, 16  ;;  %v11392_v19 = vld [vmem:[%s11815_s8 + $0xc] sm:$0xff] }
  0x22   : > { %v334_v35 = vrot.slane %v333_v22, 4  ;;  %v338_v36 = vrot.slane %v336_v23, 5  ;;  %v516_v38 = vrot.slane %v515_v26, 4  ;;  %v344_v45 = vshll.u32 %v229_v32, 16 }
  0x23   : > { %v526_v39 = vrot.slane %v525_v27, 4  ;;  %v530_v41 = vrot.slane %v528_v28, 5  ;;  %v350_v46 = vshll.u32 %v11903_v33, 16  ;;  %v354_v47 = vshrl.u32 %v11903_v33, 16  ;;  %v11940_v27 = vld [vmem:[%s11815_s8 + $0x28] sm:$0xf] }
  0x24   : > { %811 = vmatpush.bf16.msra.mxu0 %v11416_v59  ;;  %11677 = vmatpush.bf16.msra.mxu2 %v11416_v59  ;;  %v533_v48 = vshrl.u32 %v245_v37, 16  ;;  %v536_v49 = vshll.u32 %v245_v37, 16  ;;  %v329_v52 = vsel %vm11839_vm2, %v324_v34, %v11870_v8  ;;  %v339_v53 = vsel %vm11839_vm2, %v334_v35, %v338_v36  ;;  %v283_v8 = vld [vmem:[%s11815_s8 + $0x80] sm:$0x1]  ;;  %v247_v28 = vld [vmem:[%s11815_s8 + $0x84] sm:$0xf] }
  0x25   : > { %11685 = vmatpush.bf16.msra.mxu3 %v11408_v0  ;;  %1044 = vmatpush.bf16.msra.mxu1 %v11408_v0  ;;  %v542_v54 = vshll.u32 %v246_v42, 16  ;;  %v546_v55 = vshrl.u32 %v246_v42, 16  ;;  %v521_v56 = vsel %vm11839_vm2, %v516_v38, %v11875_v13  ;;  %v531_v57 = vsel %vm11839_vm2, %v526_v39, %v530_v41  ;;  %v11459_v37 = vld [vmem:[%s15303_s1 + $0x120] sm:$0xff] }
  0x26   : > { %v343_v58 = vrot.slane %v341_v44, 4  ;;  %v346_v59 = vrot.slane %v344_v45, 5  ;;  %v352_v60 = vrot.slane %v350_v46, 5  ;;  %v356_v61 = vrot.slane %v354_v47, 4 }
  0x27   : > { %v695_v63 = vunpack.c.l.b16 %v329_v52  ;;  %v696_v0 = vunpack.c.l.b16 %v339_v53  ;;  %v535_v2 = vrot.slane %v533_v48, 4  ;;  %v538_v3 = vrot.slane %v536_v49, 5 }
  0x28   : > { %812 = vmatpush.bf16.msra.mxu0 %v11415_v5  ;;  %11678 = vmatpush.bf16.msra.mxu2 %v11415_v5  ;;  %v711_v4 = vunpack.c.l.b16 %v521_v56  ;;  %v712_v5 = vunpack.c.l.b16 %v531_v57  ;;  %v544_v6 = vrot.slane %v542_v54, 5  ;;  %v548_v7 = vrot.slane %v546_v55, 4  ;;  %v11964_v55 = vld [vmem:[%s11815_s8 + $0x2c] sm:$0x1] }
  0x29   : > { %11686 = vmatpush.bf16.msra.mxu3 %v11407_v15  ;;  %1045 = vmatpush.bf16.msra.mxu1 %v11407_v15  ;;  %v347_v9 = vor.u32 %v346_v59, %v343_v58  ;;  %v357_v11 = vor.u32 %v356_v61, %v352_v60  ;;  %v360_v12 = vshll.u32 %v11932_v1, 16  ;;  %v539_v13 = vor.u32 %v538_v3, %v535_v2 }
  0x2a   : > { %v726_v14 = vpack.c.b16 %v696_v0, %v695_v63  ;;  %v734_v15 = vpack.c.b16 %v712_v5, %v711_v4  ;;  %v549_v16 = vor.u32 %v548_v7, %v544_v6  ;;  %v374_v39 = vshll.u32 %v11940_v27, 16  ;;  %v11393_v7 = vld [vmem:[%s11815_s8 + $0x18] sm:$0xff] }
  0x2b   : > { %813 = vmatmul.bf16.vlgmr.msra.gmra.mxu0 %v725_v20  ;;  %853 = vmatmul.bf16.vlgmr.msra.gmra.mxu2 %v733_v21  ;;  %v348_v20 = vrot.slane %v347_v9, 4  ;;  %v358_v21 = vrot.slane %v357_v11, 4  ;;  %v362_v22 = vrot.slane %v360_v12, 5  ;;  %v540_v23 = vrot.slane %v539_v13, 4  ;;  %v234_v9 = vld [vmem:[%s11815_s8 + $0x34] sm:$0xf] }
  0x2c   : > { %1419 = vmatpush.bf16.msrb.mxu2 %v11430_v17  ;;  %1086 = vmatmul.bf16.vlgmr.msra.gmra.mxu3 %v11399_v24  ;;  %v552_v17 = vshll.u32 %v283_v8, 16  ;;  %v231_v24 = vld [vmem:[%s11815_s8 + $0x24] sm:$0xf]  ;;  %v378_v41 = vshrl.u32 %v11940_v27, 16  ;;  %v557_v42 = vshrl.u32 %v247_v28, 16  ;;  %v560_v44 = vshll.u32 %v247_v28, 16 }
  0x2d   : > { %1734 = vmatpush.bf16.msrb.mxu3 %v11454_v18  ;;  %1046 = vmatmul.bf16.vlgmr.msra.gmra.mxu1 %v11391_v25  ;;  %v11400_v18 = vld [vmem:[%s11815_s8 + $0x6c] sm:$0xff]  ;;  %v550_v25 = vrot.slane %v549_v16, 4  ;;  %v353_v32 = vsel %vm11839_vm2, %v348_v20, %v352_v60  ;;  %v363_v34 = vsel %vm11839_vm2, %v358_v21, %v362_v22  ;;  %v365_v35 = vshrl.u32 %v231_v24, 16 }
  0x2e   : > { %2416 = vmatpush.bf16.msrb.mxu0 %v11462_v29  ;;  %v554_v26 = vrot.slane %v552_v17, 5  ;;  %v248_v29 = vld [vmem:[%s11815_s8 + $0x88] sm:$0xf]  ;;  %v368_v36 = vshll.u32 %v231_v24, 16  ;;  %v545_v38 = vsel %vm11839_vm2, %v540_v23, %v544_v6  ;;  %v697_v47 = vunpack.c.l.b16 %v353_v32  ;;  %v284_v60 = vld [vmem:[%s11815_s8 + $0x8c] sm:$0x1] }
  0x2f   : > { %v566_v45 = vshll.u32 %v248_v29, 16  ;;  %v570_v46 = vshrl.u32 %v248_v29, 16  ;;  %v698_v48 = vunpack.c.l.b16 %v363_v34  ;;  %v713_v49 = vunpack.c.l.b16 %v545_v38  ;;  %v11401_v6 = vld [vmem:[%s11815_s8 + $0x78] sm:$0xff]  ;;  %v233_v8 = vld [vmem:[%s11815_s8 + $0x30] sm:$0xf] }
  0x30   : > { %1420 = vmatpush.bf16.msrb.mxu2 %v11429_v30  ;;  %v11427_v30 = vld [vmem:[%s15303_s1 + $0xa0] sm:$0xff]  ;;  %v370_v52 = vrot.slane %v368_v36, 5  ;;  %v376_v53 = vrot.slane %v374_v39, 5  ;;  %v380_v54 = vrot.slane %v378_v41, 4  ;;  %v559_v56 = vrot.slane %v557_v42, 4  ;;  %v11426_v23 = vld [vmem:[%s15303_s1 + $0x98] sm:$0xff] }
  0x31   : > { %1735 = vmatpush.bf16.msrb.mxu3 %v11453_v31  ;;  %v11451_v31 = vld [vmem:[%s15303_s1 + $0xe0] sm:$0xff]  ;;  %v562_v57 = vrot.slane %v560_v44, 5  ;;  %v568_v58 = vrot.slane %v566_v45, 5  ;;  %v572_v59 = vrot.slane %v570_v46, 4  ;;  %v727_v61 = vpack.c.b16 %v698_v48, %v697_v47  ;;  %v249_v13 = vld [vmem:[%s11815_s8 + $0x90] sm:$0xf] }
  0x32   : > { %2417 = vmatpush.bf16.msrb.mxu0 %v11461_v43  ;;  %v555_v43 = vsel %vm11839_vm2, %v550_v25, %v554_v26  ;;  %v381_v63 = vor.u32 %v380_v54, %v376_v53  ;;  %v384_v0 = vshll.u32 %v11964_v55, 16  ;;  %v576_v5 = vshll.u32 %v284_v60, 16  ;;  %v11450_v24 = vld [vmem:[%s15303_s1 + $0xd8] sm:$0xff]  ;;  %v11402_v60 = vld [vmem:[%s11815_s8 + $0x84] sm:$0xff] }
  0x33   : > { %v563_v3 = vor.u32 %v562_v57, %v559_v56  ;;  %v573_v4 = vor.u32 %v572_v59, %v568_v58  ;;  %v392_v20 = vshll.u32 %v233_v8, 16  ;;  %v398_v21 = vshll.u32 %v234_v9, 16  ;;  %v11992_v41 = vld [vmem:[%s11815_s8 + $0x38] sm:$0x1] }
  0x34   : > { %1421 = vmatpush.bf16.msrb.mxu2 %v11428_v50  ;;  %v367_v50 = vrot.slane %v365_v35, 4  ;;  %v386_v12 = vrot.slane %v384_v0, 5  ;;  %v402_v22 = vshrl.u32 %v234_v9, 16  ;;  %v581_v25 = vshrl.u32 %v249_v13, 16  ;;  %v285_v46 = vld [vmem:[%s11815_s8 + $0x98] sm:$0x1] }
  0x35   : > { %1736 = vmatpush.bf16.msrb.mxu3 %v11452_v51  ;;  %v714_v51 = vunpack.c.l.b16 %v555_v43  ;;  %v564_v16 = vrot.slane %v563_v3, 4  ;;  %v574_v17 = vrot.slane %v573_v4, 4  ;;  %v584_v26 = vshll.u32 %v249_v13, 16  ;;  %v11425_v9 = vld [vmem:[%s15303_s1 + $0x90] sm:$0xff] }
  0x36   : > { %2418 = vmatpush.bf16.msrb.mxu0 %v11460_v62  ;;  %v371_v62 = vor.u32 %v370_v52, %v367_v50  ;;  %v400_v38 = vrot.slane %v398_v21, 5  ;;  %v404_v39 = vrot.slane %v402_v22, 4  ;;  %v583_v42 = vrot.slane %v581_v25, 4 }
  0x37   : > { %v735_v2 = vpack.c.b16 %v714_v51, %v713_v49  ;;  %v569_v34 = vsel %vm11839_vm2, %v564_v16, %v568_v58  ;;  %v586_v43 = vrot.slane %v584_v26, 5  ;;  %v408_v52 = vshll.u32 %v11992_v41, 16  ;;  %v11457_v16 = vld [vmem:[%s15303_s1 + $0x110] sm:$0xff] }
  0x38   : > { %1422 = vmatpush.bf16.msrb.mxu2 %v11427_v30  ;;  %v372_v11 = vrot.slane %v371_v62, 4  ;;  %v11458_v30 = vld [vmem:[%s15303_s1 + $0x118] sm:$0xff]  ;;  %v715_v49 = vunpack.c.l.b16 %v569_v34  ;;  %v600_v57 = vshll.u32 %v285_v46, 16 }
  0x39   : > { %1737 = vmatpush.bf16.msrb.mxu3 %v11451_v31  ;;  %v587_v54 = vor.u32 %v586_v43, %v583_v42  ;;  %v286_v42 = vld [vmem:[%s11815_s8 + $0xa4] sm:$0x1] }
  0x3a   : > { %2419 = vmatpush.bf16.msrb.mxu0 %v11459_v37  ;;  %v377_v31 = vsel %vm11839_vm2, %v372_v11, %v376_v53  ;;  %v394_v37 = vrot.slane %v392_v20, 5  ;;  %v405_v53 = vor.u32 %v404_v39, %v400_v38  ;;  %v602_v4 = vrot.slane %v600_v57, 5  ;;  %v11449_v11 = vld [vmem:[%s15303_s1 + $0xd0] sm:$0xff] }
  0x3b   : > { %818 = vmatmul.bf16.gmra.mxu0 %v726_v14  ;;  %858 = vmatmul.bf16.gmra.mxu2 %v734_v15  ;;  %v250_v14 = vld [vmem:[%s11815_s8 + $0x94] sm:$0xf]  ;;  %v382_v15 = vrot.slane %v381_v63, 4  ;;  %v699_v47 = vunpack.c.l.b16 %v377_v31  ;;  %v410_v63 = vrot.slane %v408_v52, 5 }
  0x3c   : > { %1091 = vmatmul.bf16.gmra.mxu3 %v11400_v18  ;;  %v578_v18 = vrot.slane %v576_v5, 5  ;;  %v590_v28 = vshll.u32 %v250_v14, 16  ;;  %v594_v29 = vshrl.u32 %v250_v14, 16  ;;  %1423 = vmatpush.bf16.msrb.mxu2 %v11426_v23  ;;  %v406_v0 = vrot.slane %v405_v53, 4  ;;  %v235_v5 = vld [vmem:[%s11815_s8 + $0x3c] sm:$0xf] }
  0x3d   : > { %1051 = vmatmul.bf16.gmra.mxu1 %v11392_v19  ;;  %v389_v19 = vshrl.u32 %v233_v8, 16  ;;  %1738 = vmatpush.bf16.msrb.mxu3 %v11450_v24  ;;  %v387_v32 = vsel %vm11839_vm2, %v382_v15, %v386_v12  ;;  %v252_v8 = vld [vmem:[%s11815_s8 + $0xa0] sm:$0xf]  ;;  %v11395_v52 = vld [vmem:[%s11815_s8 + $0x30] sm:$0xff]  ;;  %v237_v53 = vld [vmem:[%s11815_s8 + $0x48] sm:$0xf] }
  0x3e   : > { %v579_v35 = vsel %vm11839_vm2, %v574_v17, %v578_v18  ;;  %2420 = vmatpush.bf16.msrb.mxu0 %v11458_v30  ;;  %v592_v44 = vrot.slane %v590_v28, 5  ;;  %v596_v45 = vrot.slane %v594_v29, 4  ;;  %v700_v48 = vunpack.c.l.b16 %v387_v32 }
  0x3f   : > { %v391_v36 = vrot.slane %v389_v19, 4  ;;  %v716_v50 = vunpack.c.l.b16 %v579_v35  ;;  %v411_v13 = vsel %vm11839_vm2, %v406_v0, %v410_v63  ;;  %v413_v17 = vshrl.u32 %v235_v5, 16  ;;  %v12024_v35 = vld [vmem:[%s11815_s8 + $0x44] sm:$0x1] }
  0x40   : > { %v597_v56 = vor.u32 %v596_v45, %v592_v44  ;;  %v728_v58 = vpack.c.b16 %v700_v48, %v699_v47  ;;  %v416_v18 = vshll.u32 %v235_v5, 16  ;;  %1424 = vmatpush.bf16.msrb.mxu2 %v11425_v9  ;;  %v614_v23 = vshll.u32 %v252_v8, 16  ;;  %v11424_v5 = vld [vmem:[%s15303_s1 + $0x88] sm:$0xff] }
  0x41   : > { %v395_v51 = vor.u32 %v394_v37, %v391_v36  ;;  %v736_v59 = vpack.c.b16 %v716_v50, %v715_v49  ;;  %1739 = vmatpush.bf16.msrb.mxu3 %v11449_v11  ;;  %v618_v24 = vshrl.u32 %v252_v8, 16  ;;  %v702_v26 = vunpack.c.l.b16 %v411_v13  ;;  %v11456_v13 = vld [vmem:[%s15303_s1 + $0x108] sm:$0xff] }
  0x42   : > { %v598_v3 = vrot.slane %v597_v56, 4  ;;  %2421 = vmatpush.bf16.msrb.mxu0 %v11457_v16  ;;  %v415_v30 = vrot.slane %v413_v17, 4  ;;  %v418_v31 = vrot.slane %v416_v18, 5  ;;  %v432_v46 = vshll.u32 %v12024_v35, 16 }
  0x43   : > { %v396_v62 = vrot.slane %v395_v51, 4  ;;  %v620_v39 = vrot.slane %v618_v24, 4  ;;  %v624_v50 = vshll.u32 %v286_v42, 16  ;;  %v11403_v51 = vld [vmem:[%s11815_s8 + $0x90] sm:$0xff]  ;;  %v437_v0 = vshrl.u32 %v237_v53, 16 }
  0x44   : > { %v603_v15 = vsel %vm11839_vm2, %v598_v3, %v602_v4  ;;  %v419_v45 = vor.u32 %v418_v31, %v415_v30  ;;  %v434_v57 = vrot.slane %v432_v46, 5  ;;  %1425 = vmatpush.bf16.msrb.mxu2 %v11424_v5  ;;  %v11404_v46 = vld [vmem:[%s11815_s8 + $0x9c] sm:$0xff] }
  0x45   : > { %v401_v12 = vsel %vm11839_vm2, %v396_v62, %v400_v38  ;;  %v718_v29 = vunpack.c.l.b16 %v603_v15  ;;  %v616_v38 = vrot.slane %v614_v23, 5  ;;  %v626_v63 = vrot.slane %v624_v50, 5  ;;  %v12055_v23 = vld [vmem:[%s11815_s8 + $0x50] sm:$0x1] }
  0x46   : > { %v701_v25 = vunpack.c.l.b16 %v401_v12  ;;  %v420_v56 = vrot.slane %v419_v45, 4  ;;  %2422 = vmatpush.bf16.msrb.mxu0 %v11456_v13 }
  0x47   : > { %v621_v49 = vor.u32 %v620_v39, %v616_v38 }
  0x48   : > { %v729_v43 = vpack.c.b16 %v702_v26, %v701_v25 }
  0x49   : > { %v622_v62 = vrot.slane %v621_v49, 4 }
  0x4b   : > { %823 = vmatmul.bf16.gmra.mxu0 %v727_v61  ;;  %863 = vmatmul.bf16.gmra.mxu2 %v735_v2  ;;  %v11394_v61 = vld [vmem:[%s11815_s8 + $0x24] sm:$0xff]  ;;  %v588_v2 = vrot.slane %v587_v54, 4  ;;  %v238_v54 = vld [vmem:[%s11815_s8 + $0x4c] sm:$0xf]  ;;  %v627_v18 = vsel %vm11839_vm2, %v622_v62, %v626_v63 }
  0x4c   : > { %1096 = vmatmul.bf16.gmra.mxu3 %v11401_v6  ;;  %v12000_v6 = vld [vmem:[%s11815_s8 + $0x40] sm:$0xf]  ;;  %v446_v3 = vshll.u32 %v238_v54, 16  ;;  %v450_v4 = vshrl.u32 %v238_v54, 16  ;;  %v239_v54 = vld [vmem:[%s11815_s8 + $0x54] sm:$0xf] }
  0x4d   : > { %1056 = vmatmul.bf16.gmra.mxu1 %v11393_v7  ;;  %v251_v7 = vld [vmem:[%s11815_s8 + $0x9c] sm:$0xf]  ;;  %v593_v14 = vsel %vm11839_vm2, %v588_v2, %v592_v44  ;;  %v422_v19 = vshll.u32 %v12000_v6, 16  ;;  %v426_v20 = vshrl.u32 %v12000_v6, 16  ;;  %v440_v2 = vshll.u32 %v237_v53, 16 }
  0x4e   : > { %v605_v21 = vshrl.u32 %v251_v7, 16  ;;  %v608_v22 = vshll.u32 %v251_v7, 16  ;;  %v717_v28 = vunpack.c.l.b16 %v593_v14  ;;  %v11448_v7 = vld [vmem:[%s15303_s1 + $0xc8] sm:$0xff]  ;;  %v11470_v14 = vld [vmem:[%s15303_s1 + $0x178] sm:$0xff]  ;;  %v461_v5 = vshrl.u32 %v239_v54, 16 }
  0x4f   : > { %v424_v32 = vrot.slane %v422_v19, 5  ;;  %v428_v34 = vrot.slane %v426_v20, 4  ;;  %1740 = vmatpush.bf16.msrb.mxu3 %v11448_v7  ;;  %2842 = vmatpush.bf16.msrb.mxu1 %v11470_v14  ;;  %v439_v19 = vrot.slane %v437_v0, 4  ;;  %v442_v20 = vrot.slane %v440_v2, 5 }
  0x50   : > { %v607_v36 = vrot.slane %v605_v21, 4  ;;  %v610_v37 = vrot.slane %v608_v22, 5  ;;  %v737_v44 = vpack.c.b16 %v718_v29, %v717_v28  ;;  %v448_v21 = vrot.slane %v446_v3, 5  ;;  %v287_v29 = vld [vmem:[%s11815_s8 + $0xb0] sm:$0x1]  ;;  %v11468_v3 = vld [vmem:[%s15303_s1 + $0x168] sm:$0xff] }
  0x51   : > { %v429_v47 = vor.u32 %v428_v34, %v424_v32  ;;  %v425_v15 = vsel %vm11839_vm2, %v420_v56, %v424_v32  ;;  %v452_v22 = vrot.slane %v450_v4, 4  ;;  %v720_v34 = vunpack.c.l.b16 %v627_v18  ;;  %v240_v56 = vld [vmem:[%s11815_s8 + $0x58] sm:$0xf]  ;;  %v11455_v4 = vld [vmem:[%s15303_s1 + $0x100] sm:$0xff] }
  0x52   : > { %v611_v48 = vor.u32 %v610_v37, %v607_v36  ;;  %v703_v30 = vunpack.c.l.b16 %v425_v15  ;;  %v443_v36 = vor.u32 %v442_v20, %v439_v19  ;;  %v456_v37 = vshll.u32 %v12055_v23, 16  ;;  %2423 = vmatpush.bf16.msrb.mxu0 %v11455_v4  ;;  %v11467_v19 = vld [vmem:[%s15303_s1 + $0x160] sm:$0xff] }
  0x53   : > { %v464_v7 = vshll.u32 %v239_v54, 16  ;;  %v463_v20 = vrot.slane %v461_v5, 4  ;;  %v11494_v54 = vld [vmem:[%s15303_s1 + $0x1b8] sm:$0xff]  ;;  %v11463_v5 = vld [vmem:[%s15303_s1 + $0x140] sm:$0xff] }
  0x54   : > { %v458_v49 = vrot.slane %v456_v37, 5 }
  0x5b   : > { %828 = vmatmul.bf16.gmra.mxu0 %v728_v58  ;;  %868 = vmatmul.bf16.gmra.mxu2 %v736_v59  ;;  %v253_v58 = vld [vmem:[%s11815_s8 + $0xa8] sm:$0xf]  ;;  %v254_v59 = vld [vmem:[%s11815_s8 + $0xac] sm:$0xf] }
  0x5c   : > { %1101 = vmatmul.bf16.gmra.mxu3 %v11402_v60  ;;  %v430_v60 = vrot.slane %v429_v47, 4  ;;  %v629_v8 = vshrl.u32 %v253_v58, 16  ;;  %v632_v9 = vshll.u32 %v253_v58, 16  ;;  %v638_v11 = vshll.u32 %v254_v59, 16  ;;  %v11396_v47 = vld [vmem:[%s11815_s8 + $0x3c] sm:$0xff]  ;;  %v11469_v58 = vld [vmem:[%s15303_s1 + $0x170] sm:$0xff] }
  0x5d   : > { %1061 = vmatmul.bf16.gmra.mxu1 %v11394_v61  ;;  %v612_v61 = vrot.slane %v611_v48, 4  ;;  %v642_v12 = vshrl.u32 %v254_v59, 16  ;;  %v444_v48 = vrot.slane %v443_v36, 4  ;;  %v256_v59 = vld [vmem:[%s11815_s8 + $0xb8] sm:$0xf] }
  0x5e   : > { %v435_v16 = vsel %vm11839_vm2, %v430_v60, %v434_v57  ;;  %v631_v24 = vrot.slane %v629_v8, 4  ;;  %v634_v25 = vrot.slane %v632_v9, 5  ;;  %v640_v26 = vrot.slane %v638_v11, 5  ;;  %v255_v57 = vld [vmem:[%s11815_s8 + $0xb4] sm:$0xf]  ;;  %v11423_v60 = vld [vmem:[%s15303_s1 + $0x80] sm:$0xff]  ;;  %2843 = vmatpush.bf16.msrb.mxu1 %v11469_v58 }
  0x5f   : > { %v617_v17 = vsel %vm11839_vm2, %v612_v61, %v616_v38  ;;  %v644_v28 = vrot.slane %v642_v12, 4  ;;  %v704_v31 = vunpack.c.l.b16 %v435_v16  ;;  %v453_v38 = vor.u32 %v452_v22, %v448_v21  ;;  %v11447_v61 = vld [vmem:[%s15303_s1 + $0xc0] sm:$0xff]  ;;  %1426 = vmatpush.bf16.msrb.mxu2 %v11423_v60  ;;  %v12112_v58 = vld [vmem:[%s11815_s8 + $0x10] sm:$0xf] }
  0x60   : > { %v719_v32 = vunpack.c.l.b16 %v617_v17  ;;  %v635_v39 = vor.u32 %v634_v25, %v631_v24  ;;  %v449_v62 = vsel %vm11839_vm2, %v444_v48, %v448_v21  ;;  %v470_v8 = vshll.u32 %v240_v56, 16  ;;  %1741 = vmatpush.bf16.msrb.mxu3 %v11447_v61  ;;  %v12092_v25 = vld [vmem:[%s11815_s8 + $0x5c] sm:$0x1] }
  0x61   : > { %v645_v42 = vor.u32 %v644_v28, %v640_v26  ;;  %v454_v50 = vrot.slane %v453_v38, 4  ;;  %v474_v9 = vshrl.u32 %v240_v56, 16  ;;  %v653_v11 = vshrl.u32 %v255_v57, 16  ;;  %v11502_v56 = vld [vmem:[%s15303_s1 + $0x1f8] sm:$0xff] }
  0x62   : > { %v738_v45 = vpack.c.b16 %v720_v34, %v719_v32  ;;  %v656_v12 = vshll.u32 %v255_v57, 16  ;;  %v662_v13 = vshll.u32 %v256_v59, 16  ;;  %v666_v14 = vshrl.u32 %v256_v59, 16  ;;  %2844 = vmatpush.bf16.msrb.mxu1 %v11468_v3  ;;  %v10156_v57 = vld [vmem:[%s11815_s8 + $0xc] sm:$0xf] }
  0x63   : > { %v459_v63 = vsel %vm11839_vm2, %v454_v50, %v458_v49  ;;  %v705_v15 = vunpack.c.l.b16 %v449_v62  ;;  %v466_v21 = vrot.slane %v464_v7, 5  ;;  %v472_v22 = vrot.slane %v470_v8, 5  ;;  %3157 = vmatpush.bf16.msra.mxu2 %v11494_v54  ;;  %v11510_v7 = vld [vmem:[%s15303_s1 + $0x238] sm:$0xff] }
  0x64   : > { %v706_v16 = vunpack.c.l.b16 %v459_v63  ;;  %v476_v24 = vrot.slane %v474_v9, 4  ;;  %v658_v28 = vrot.slane %v656_v12, 5  ;;  %v480_v37 = vshll.u32 %v12092_v25, 16  ;;  %3839 = vmatpush.bf16.msra.mxu3 %v11502_v56  ;;  %v11464_v63 = vld [vmem:[%s15303_s1 + $0x148] sm:$0xff]  ;;  %4265 = vmatpush.bf16.msra.mxu0 %v11510_v7 }
  0x65   : > { %v467_v36 = vor.u32 %v466_v21, %v463_v20  ;;  %v1913_v3 = vshll.u32 %v12112_v58, 16  ;;  %v1917_v4 = vshrl.u32 %v12112_v58, 16  ;;  %v11698_v20 = vld [vmem:[%s11815_s8 + $0x4] sm:$0xf] }
  0x66   : > { %2845 = vmatpush.bf16.msrb.mxu1 %v11467_v19  ;;  %v731_v32 = vpack.c.b16 %v706_v16, %v705_v15  ;;  %v477_v38 = vor.u32 %v476_v24, %v472_v22  ;;  %v482_v48 = vrot.slane %v480_v37, 5  ;;  %v1180_v21 = vrot.slane %v11698_v20, 5  ;;  %v11398_v24 = vld [vmem:[%s11815_s8 + $0x54] sm:$0xff]  ;;  %v11699_v37 = vld [vmem:[%s11815_s8 + $0x8] sm:$0x1] }
  0x67   : > { %v1915_v15 = vrot.slane %v1913_v3, 5  ;;  %v1919_v16 = vrot.slane %v1917_v4, 4 }
  0x68   : > { %v478_v49 = vrot.slane %v477_v38, 4  ;;  %v1183_v38 = vrot.slane %v11699_v37, 5  ;;  %v10162_v37 = vld [vmem:[%s11815_s8 + $0x24] sm:$0xf] }
  0x6a   : > { %v483_v60 = vsel %vm11839_vm2, %v478_v49, %v482_v48  ;;  %v12147_v49 = vld [vmem:[%s11815_s8 + $0x1c] sm:$0xf] }
  0x6b   : > { %833 = vmatmul.bf16.gmra.mxu0 %v729_v43  ;;  %873 = vmatmul.bf16.gmra.mxu2 %v737_v44  ;;  %v648_v43 = vshll.u32 %v287_v29, 16  ;;  %v730_v44 = vpack.c.b16 %v704_v31, %v703_v30  ;;  %v664_v29 = vrot.slane %v662_v13, 5  ;;  %v668_v30 = vrot.slane %v666_v14, 4  ;;  %v288_v31 = vld [vmem:[%s11815_s8 + $0xbc] sm:$0x1] }
  0x6c   : > { %1106 = vmatmul.bf16.gmra.mxu3 %v11403_v51  ;;  %v636_v51 = vrot.slane %v635_v39, 4  ;;  %v708_v9 = vunpack.c.l.b16 %v483_v60 }
  0x6d   : > { %1066 = vmatmul.bf16.gmra.mxu1 %v11395_v52  ;;  %v646_v52 = vrot.slane %v645_v42, 4  ;;  %v650_v53 = vrot.slane %v648_v43, 5  ;;  %v669_v42 = vor.u32 %v668_v30, %v664_v29  ;;  %v672_v43 = vshll.u32 %v288_v31, 16 }
  0x6e   : > { %v641_v0 = vsel %vm11839_vm2, %v636_v51, %v640_v26  ;;  %v655_v26 = vrot.slane %v653_v11, 4  ;;  %v2603_v31 = vrot.slane %v12112_v58, 5  ;;  %v1941_v58 = vshrl.u32 %v12147_v49, 16 }
  0x6f   : > { %v651_v2 = vsel %vm11839_vm2, %v646_v52, %v650_v53  ;;  %v721_v17 = vunpack.c.l.b16 %v641_v0  ;;  %v670_v51 = vrot.slane %v669_v42, 4  ;;  %v674_v52 = vrot.slane %v672_v43, 5  ;;  %v11465_v53 = vld [vmem:[%s15303_s1 + $0x150] sm:$0xff] }
  0x70   : > { %v722_v18 = vunpack.c.l.b16 %v651_v2  ;;  %v659_v39 = vor.u32 %v658_v28, %v655_v26  ;;  %v1904_v0 = vshrl.u32 %v10156_v57, 16  ;;  %v1907_v2 = vshll.u32 %v10156_v57, 16  ;;  %v1127_v26 = vld [vmem:[%s11815_s8] sm:$0xe] }
  0x71   : > { %v675_v62 = vsel %vm11839_vm2, %v670_v51, %v674_v52  ;;  %v1937_v57 = vshll.u32 %v12147_v49, 16 }
  0x72   : > { %v739_v34 = vpack.c.b16 %v722_v18, %v721_v17  ;;  %v660_v50 = vrot.slane %v659_v39, 4  ;;  %v724_v12 = vunpack.c.l.b16 %v675_v62  ;;  %v1906_v13 = vrot.slane %v1904_v0, 4  ;;  %v10158_v17 = vld [vmem:[%s11815_s8 + $0x14] sm:$0x1] }
  0x73   : > { %v1909_v14 = vrot.slane %v1907_v2, 5  ;;  %v1923_v30 = vshll.u32 %v10158_v17, 16  ;;  %v2606_v48 = vrot.slane %v10158_v17, 5  ;;  %v1939_v7 = vrot.slane %v1937_v57, 5 }
  0x74   : > { %v665_v61 = vsel %vm11839_vm2, %v660_v50, %v664_v29  ;;  %v1920_v29 = vor.u32 %v1919_v16, %v1915_v15 }
  0x75   : > { %v723_v11 = vunpack.c.l.b16 %v665_v61  ;;  %v1910_v28 = vor.u32 %v1909_v14, %v1906_v13  ;;  %v1128_v13 = vld [vmem:[%s11815_s8 + $0xc] sm:$0xe]  ;;  %v11700_v14 = vld [vmem:[%s11815_s8 + $0x10] sm:$0xf] }
  0x76   : > { %v1921_v43 = vrot.slane %v1920_v29, 4  ;;  %v10253_v29 = vld [vmem:[%s11815_s8 + $0x18] sm:$0xe] }
  0x77   : > { %v740_v19 = vpack.c.b16 %v724_v12, %v723_v11  ;;  %v1911_v42 = vrot.slane %v1910_v28, 4  ;;  %v9949_v28 = vrot.slane %v1128_v13, 9  ;;  %v10164_v13 = vld [vmem:[%s11815_s8 + $0x2c] sm:$0x1] }
  0x79   : > { %v1916_v54 = vsel %vm11839_vm2, %v1911_v42, %v1915_v15  ;;  %v1187_v15 = vrot.slane %v11700_v14, 5  ;;  %v11501_v42 = vld [vmem:[%s15303_s1 + $0x1f0] sm:$0xff] }
  0x7a   : > { %3840 = vmatpush.bf16.msra.mxu3 %v11501_v42 }
  0x7b   : > { %838 = vmatmul.bf16.gmra.mxu0 %v730_v44  ;;  %878 = vmatmul.bf16.gmra.mxu2 %v738_v45  ;;  %v11466_v44 = vld [vmem:[%s15303_s1 + $0x158] sm:$0xff]  ;;  %v11405_v45 = vld [vmem:[%s11815_s8 + $0xa8] sm:$0xff] }
  0x7c   : > { %1111 = vmatmul.bf16.gmra.mxu3 %v11404_v46  ;;  %v11397_v46 = vld [vmem:[%s11815_s8 + $0x48] sm:$0xff]  ;;  %2846 = vmatpush.bf16.msrb.mxu1 %v11466_v44  ;;  %v1925_v44 = vrot.slane %v1923_v30, 5  ;;  %v1189_v30 = vrot.slane %v1187_v15, 4 }
  0x7d   : > { %1071 = vmatmul.bf16.gmra.mxu1 %v11396_v47  ;;  %v468_v47 = vrot.slane %v467_v36, 4  ;;  %v1182_v36 = vrot.slane %v1180_v21, 4 }
  0x7e   : > { %v1926_v56 = vsel %vm11839_vm2, %v1921_v43, %v1925_v44  ;;  %v10269_v43 = vrot.slane %v10253_v29, 9 }
  0x7f   : > { %v473_v59 = vsel %vm11839_vm2, %v468_v47, %v472_v22  ;;  %v11406_v22 = vld [vmem:[%s11815_s8 + $0xb4] sm:$0xff]  ;;  %v2605_v47 = vrot.slane %v2603_v31, 4  ;;  %v1184_v51 = vsel %vm12141_vm5, %v1182_v36, %v1183_v38  ;;  %v2305_v0 = vunpack.c.l.b16 %v1926_v56 }
  0x80   : > { %2847 = vmatpush.bf16.msrb.mxu1 %v11465_v53  ;;  %v707_v8 = vunpack.c.l.b16 %v473_v59  ;;  %v1308_v62 = vunpack.c.l.b16 %v1184_v51  ;;  %v11493_v38 = vld [vmem:[%s15303_s1 + $0x1b0] sm:$0xff]  ;;  %v1952_v51 = vshrl.u32 %v10162_v37, 16 }
  0x81   : > { %v2607_v60 = vsel %vm12141_vm5, %v2605_v47, %v2606_v48  ;;  %v1188_v47 = vsel %vm12141_vm5, %v9949_v28, %v1187_v15  ;;  %3158 = vmatpush.bf16.msra.mxu2 %v11493_v38  ;;  %v1197_v38 = vrot.slane %v11932_v1, 5 }
  0x82   : > { %v732_v18 = vpack.c.b16 %v708_v9, %v707_v8  ;;  %v1943_v8 = vrot.slane %v1941_v58, 4  ;;  %v10161_v9 = vld [vmem:[%s11815_s8 + $0x20] sm:$0x1] }
  0x84   : > { %2848 = vmatpush.bf16.msrb.mxu1 %v11464_v63  ;;  %v2304_v63 = vunpack.c.l.b16 %v1916_v54  ;;  %v1944_v20 = vor.u32 %v1943_v8, %v1939_v7 }
  0x86   : > { %v2336_v12 = vpack.c.b16 %v2305_v0, %v2304_v63  ;;  %v1309_v63 = vunpack.c.l.b16 %v1188_v47 }
  0x88   : > { %2849 = vmatpush.bf16.msrb.mxu1 %v11463_v5  ;;  %v2731_v5 = vunpack.c.l.b16 %v2607_v60 }
  0x8b   : > { %843 = vmatmul.bf16.gmra.mxu0 %v731_v32  ;;  %883 = vmatmul.bf16.gmra.mxu2 %v739_v34  ;;  %v10252_v32 = vld [vmem:[%s11815_s8 + $0xc] sm:$0xe]  ;;  %v9948_v34 = vrot.slane %v1127_v26, 9 }
  0x8c   : > { %1116 = vmatmul.bf16.gmra.mxu3 %v11405_v45  ;;  %v10159_v45 = vld [vmem:[%s11815_s8 + $0x18] sm:$0xf] }
  0x8d   : > { %1076 = vmatmul.bf16.gmra.mxu1 %v11397_v46  ;;  %v10268_v46 = vrot.slane %v10252_v32, 9  ;;  %v1181_v50 = vsel %vm12141_vm5, %v9948_v34, %v1180_v21  ;;  %v1928_v52 = vshrl.u32 %v10159_v45, 16  ;;  %v1931_v53 = vshll.u32 %v10159_v45, 16 }
  0x8e   : > { %v1307_v61 = vunpack.c.l.b16 %v1181_v50  ;;  %v1947_v21 = vshll.u32 %v10161_v9, 16  ;;  %v1945_v34 = vrot.slane %v1944_v20, 4  ;;  %v2613_v45 = vrot.slane %v10161_v9, 5 }
  0x8f   : > { %v2604_v59 = vsel %vm12141_vm5, %v10268_v46, %v2603_v31  ;;  %v1930_v2 = vrot.slane %v1928_v52, 4  ;;  %v1933_v3 = vrot.slane %v1931_v53, 5  ;;  %v1190_v31 = vrot.slane %v11873_v10, 5  ;;  %v12180_v46 = vld [vmem:[%s11815_s8 + $0x28] sm:$0xf] }
  0x90   : > { %v2730_v4 = vunpack.c.l.b16 %v2604_v59  ;;  %v1339_v11 = vpack.c.b16 %v1308_v62, %v1307_v61  ;;  %v1949_v36 = vrot.slane %v1947_v21, 5  ;;  %v1955_v52 = vshll.u32 %v10162_v37, 16  ;;  %v10254_v37 = vld [vmem:[%s11815_s8 + $0x24] sm:$0xe] }
  0x91   : > { %v1934_v16 = vor.u32 %v1933_v3, %v1930_v2  ;;  %v1961_v57 = vshll.u32 %v12180_v46, 16  ;;  %v1965_v58 = vshrl.u32 %v12180_v46, 16  ;;  %v11509_v2 = vld [vmem:[%s15303_s1 + $0x230] sm:$0xff] }
  0x92   : > { %v1950_v56 = vsel %vm11839_vm2, %v1945_v34, %v1949_v36  ;;  %4266 = vmatpush.bf16.msra.mxu0 %v11509_v2 }
  0x93   : > { %v1935_v32 = vrot.slane %v1934_v16, 4 }
  0x95   : > { %v1940_v50 = vsel %vm11839_vm2, %v1935_v32, %v1939_v7  ;;  %v1957_v7 = vrot.slane %v1955_v52, 5  ;;  %v2617_v32 = vrot.slane %v12180_v46, 5  ;;  %v12216_v46 = vld [vmem:[%s11815_s8 + $0x34] sm:$0xf] }
  0x96   : > { %v2306_v3 = vunpack.c.l.b16 %v1940_v50 }
  0x97   : > { %v2619_v47 = vrot.slane %v2617_v32, 4 }
  0x9b   : > { %848 = vmatmul.bf16.gmra.mxu0 %v732_v18  ;;  %888 = vmatmul.bf16.gmra.mxu2 %v740_v19  ;;  %v11431_v18 = vld [vmem:[%s11815_s8 + $0xc] sm:$0xff]  ;;  %v2762_v19 = vpack.c.b16 %v2731_v5, %v2730_v4  ;;  %v2307_v4 = vunpack.c.l.b16 %v1950_v56  ;;  %v1954_v5 = vrot.slane %v1952_v51, 4 }
  0x9c   : > { %1121 = vmatmul.bf16.gmra.mxu3 %v11406_v22 }
  0x9d   : > { %1081 = vmatmul.bf16.gmra.mxu1 %v11398_v24  ;;  %v2610_v24 = vrot.slane %v12147_v49, 5  ;;  %v1191_v49 = vsel %vm12141_vm5, %v1189_v30, %v1190_v31  ;;  %v1958_v20 = vor.u32 %v1957_v7, %v1954_v5  ;;  %v1971_v30 = vshll.u32 %v10164_v13, 16 }
  0x9e   : > { %v1310_v0 = vunpack.c.l.b16 %v1191_v49 }
  0x9f   : > { %v2612_v44 = vrot.slane %v2610_v24, 4  ;;  %v2611_v60 = vsel %vm12141_vm5, %v10269_v43, %v2610_v24  ;;  %v11432_v24 = vld [vmem:[%s11815_s8 + $0x18] sm:$0xff]  ;;  %v1959_v42 = vrot.slane %v1958_v20, 4 }
  0xa0   : > { %v2732_v8 = vunpack.c.l.b16 %v2611_v60  ;;  %v1340_v16 = vpack.c.b16 %v1310_v0, %v1309_v63  ;;  %v1985_v60 = vshll.u32 %v12216_v46, 16 }
  0xa1   : > { %v2614_v61 = vsel %vm12141_vm5, %v2612_v44, %v2613_v45  ;;  %v1973_v44 = vrot.slane %v1971_v30, 5  ;;  %v10165_v45 = vld [vmem:[%s11815_s8 + $0x30] sm:$0xf] }
  0xa2   : > { %v2733_v9 = vunpack.c.l.b16 %v2614_v61  ;;  %v1979_v56 = vshll.u32 %v10165_v45, 16  ;;  %v1989_v61 = vshrl.u32 %v12216_v46, 16 }
  0xa4   : > { %v2763_v28 = vpack.c.b16 %v2733_v9, %v2732_v8 }
  0xa8   : > { %v814_v17 = vpop.f32.mrf.mxu0 }
  0xaa   : > { %v1047_v22 = vpop.f32.mrf.mxu1 }
  0xab   : > { %v12168_v26 = vadd.f32 %v1047_v22, %v814_v17  ;;  %1427 = vmatmul.bf16.vlgmr.msrb.gmra.mxu2 %v1339_v11  ;;  %2424 = vmatmul.bf16.vlgmr.msrb.gmra.mxu0 %v2336_v12  ;;  %v1963_v11 = vrot.slane %v1961_v57, 5  ;;  %v1967_v12 = vrot.slane %v1965_v58, 4  ;;  %v2337_v17 = vpack.c.b16 %v2307_v4, %v2306_v3 }
  0xac   : > { %1742 = vmatmul.bf16.vlgmr.msrb.gmra.mxu3 %v11431_v18  ;;  %v1129_v18 = vld [vmem:[%s11815_s8 + $0x18] sm:$0xe] }
  0xad   : > { %2850 = vmatmul.bf16.vlgmr.msrb.gmra.mxu1 %v2762_v19  ;;  %v1194_v19 = vrot.slane %v11903_v33, 5  ;;  %v1968_v29 = vor.u32 %v1967_v12, %v1963_v11  ;;  %v9950_v36 = vrot.slane %v1129_v18, 9  ;;  %v1964_v1 = vsel %vm11839_vm2, %v1959_v42, %v1963_v11 }
  0xae   : > { %v854_v10 = vpop.f32.mrf.mxu2  ;;  %v2308_v7 = vunpack.c.l.b16 %v1964_v1  ;;  %v1981_v11 = vrot.slane %v1979_v56, 5 }
  0xaf   : > { %v1087_v48 = vpop.f32.mrf.mxu3  ;;  %v1196_v33 = vrot.slane %v1194_v19, 4  ;;  %v1969_v43 = vrot.slane %v1968_v29, 4  ;;  %v1195_v50 = vsel %vm12141_vm5, %v9950_v36, %v1194_v19 }
  0xb0   : > { %v12188_v53 = vadd.f32 %v1087_v48, %v854_v10  ;;  %v816_v54 = vpop.f32.mrf.mxu0  ;;  %v10270_v10 = vrot.slane %v10254_v37, 9  ;;  %v2620_v48 = vrot.slane %v10164_v13, 5  ;;  %v1311_v4 = vunpack.c.l.b16 %v1195_v50  ;;  %v11500_v50 = vld [vmem:[%s15303_s1 + $0x1e8] sm:$0xff] }
  0xb1   : > { %v1198_v52 = vsel %vm12141_vm5, %v1196_v33, %v1197_v38  ;;  %v2624_v38 = vrot.slane %v12216_v46, 5  ;;  %v11492_v46 = vld [vmem:[%s15303_s1 + $0x1a8] sm:$0xff]  ;;  %3841 = vmatpush.bf16.msra.mxu3 %v11500_v50 }
  0xb2   : > { %v1049_v59 = vpop.f32.mrf.mxu1  ;;  %v2618_v0 = vsel %vm12141_vm5, %v10270_v10, %v2617_v32  ;;  %v2621_v2 = vsel %vm12141_vm5, %v2619_v47, %v2620_v48  ;;  %v1312_v5 = vunpack.c.l.b16 %v1198_v52  ;;  %3159 = vmatpush.bf16.msra.mxu2 %v11492_v46 }
  0xb3   : > { %v12198_v62 = vadd.f32 %v1049_v59, %v816_v54  ;;  %v1976_v54 = vshrl.u32 %v10165_v45, 16  ;;  %v1974_v59 = vsel %vm11839_vm2, %v1969_v43, %v1973_v44  ;;  %v2734_v12 = vunpack.c.l.b16 %v2618_v0  ;;  %v10255_v44 = vld [vmem:[%s11815_s8 + $0x30] sm:$0xe] }
  0xb4   : > { %v2309_v8 = vunpack.c.l.b16 %v1974_v59  ;;  %v2735_v13 = vunpack.c.l.b16 %v2621_v2  ;;  %v1341_v19 = vpack.c.b16 %v1312_v5, %v1311_v4  ;;  %v1204_v45 = vrot.slane %v11964_v55, 5 }
  0xb5   : > { %v1978_v9 = vrot.slane %v1976_v54, 4  ;;  %v2626_v52 = vrot.slane %v2624_v38, 4  ;;  %v12255_v54 = vld [vmem:[%s11815_s8 + $0x40] sm:$0xf] }
  0xb6   : > { %v856_v14 = vpop.f32.mrf.mxu2  ;;  %v2338_v20 = vpack.c.b16 %v2309_v8, %v2308_v7  ;;  %v2764_v32 = vpack.c.b16 %v2735_v13, %v2734_v12  ;;  %v2009_v5 = vshll.u32 %v12255_v54, 16  ;;  %v2013_v7 = vshrl.u32 %v12255_v54, 16 }
  0xb7   : > { %v1089_v15 = vpop.f32.mrf.mxu3  ;;  %v2631_v50 = vrot.slane %v12255_v54, 5  ;;  %v12291_v54 = vld [vmem:[%s11815_s8 + $0x4c] sm:$0xf] }
  0xb8   : > { %v12206_v21 = vadd.f32 %v1089_v15, %v856_v14  ;;  %v819_v22 = vpop.f32.mrf.mxu0  ;;  %v1987_v14 = vrot.slane %v1985_v60, 5  ;;  %v1991_v15 = vrot.slane %v1989_v61, 4 }
  0xba   : > { %v1052_v31 = vpop.f32.mrf.mxu1  ;;  %v1992_v36 = vor.u32 %v1991_v15, %v1987_v14  ;;  %v11508_v15 = vld [vmem:[%s15303_s1 + $0x228] sm:$0xff] }
  0xbb   : > { %v12210_v34 = vadd.f32 %v1052_v31, %v819_v22  ;;  %1432 = vmatmul.bf16.gmra.mxu2 %v1340_v16  ;;  %2429 = vmatmul.bf16.gmra.mxu0 %v2337_v17  ;;  %v10167_v16 = vld [vmem:[%s11815_s8 + $0x38] sm:$0x1]  ;;  %v1130_v22 = vld [vmem:[%s11815_s8 + $0x24] sm:$0xe] }
  0xbc   : > { %1747 = vmatmul.bf16.gmra.mxu3 %v11432_v24  ;;  %v1201_v24 = vrot.slane %v11940_v27, 5  ;;  %v11433_v31 = vld [vmem:[%s11815_s8 + $0x24] sm:$0xff]  ;;  %v1995_v37 = vshll.u32 %v10167_v16, 16  ;;  %v9951_v43 = vrot.slane %v1130_v22, 9  ;;  %v1993_v47 = vrot.slane %v1992_v36, 4  ;;  %4267 = vmatpush.bf16.msra.mxu0 %v11508_v15 }
  0xbd   : > { %2855 = vmatmul.bf16.gmra.mxu1 %v2763_v28  ;;  %v1982_v28 = vor.u32 %v1981_v11, %v1978_v9  ;;  %v2627_v1 = vrot.slane %v10167_v16, 5 }
  0xbe   : > { %v859_v49 = vpop.f32.mrf.mxu2  ;;  %v1203_v27 = vrot.slane %v1201_v24, 4  ;;  %v1997_v48 = vrot.slane %v1995_v37, 5  ;;  %v1202_v56 = vsel %vm12141_vm5, %v9951_v43, %v1201_v24  ;;  %v2011_v24 = vrot.slane %v2009_v5, 5 }
  0xbf   : > { %v1092_v51 = vpop.f32.mrf.mxu3  ;;  %v1983_v10 = vrot.slane %v1982_v28, 4  ;;  %v2628_v11 = vsel %vm12141_vm5, %v2626_v52, %v2627_v1  ;;  %v1313_v13 = vunpack.c.l.b16 %v1202_v56  ;;  %v2015_v28 = vrot.slane %v2013_v7, 4  ;;  %v10256_v1 = vld [vmem:[%s11815_s8 + $0x3c] sm:$0xe] }
  0xc0   : > { %v12224_v57 = vadd.f32 %v1092_v51, %v859_v49  ;;  %v821_v58 = vpop.f32.mrf.mxu0  ;;  %v10168_v49 = vld [vmem:[%s11815_s8 + $0x3c] sm:$0xf]  ;;  %v10271_v51 = vrot.slane %v10255_v44, 9  ;;  %v1205_v59 = vsel %vm12141_vm5, %v1203_v27, %v1204_v45  ;;  %v1998_v4 = vsel %vm11839_vm2, %v1993_v47, %v1997_v48 }
  0xc1   : > { %v1988_v60 = vsel %vm11839_vm2, %v1983_v10, %v1987_v14  ;;  %v2000_v61 = vshrl.u32 %v10168_v49, 16  ;;  %v1314_v14 = vunpack.c.l.b16 %v1205_v59  ;;  %v2737_v22 = vunpack.c.l.b16 %v2628_v11  ;;  %v11434_v10 = vld [vmem:[%s11815_s8 + $0x30] sm:$0xff] }
  0xc2   : > { %v1054_v63 = vpop.f32.mrf.mxu1  ;;  %v2625_v9 = vsel %vm12141_vm5, %v10271_v51, %v2624_v38  ;;  %v2310_v16 = vunpack.c.l.b16 %v1988_v60  ;;  %v11701_v38 = vld [vmem:[%s11815_s8 + $0x34] sm:$0xf]  ;;  %v2016_v48 = vor.u32 %v2015_v28, %v2011_v24  ;;  %v1211_v56 = vrot.slane %v11992_v41, 5 }
  0xc3   : > { %v12234_v3 = vadd.f32 %v1054_v63, %v821_v58  ;;  %v2003_v63 = vshll.u32 %v10168_v49, 16  ;;  %v1342_v36 = vpack.c.b16 %v1314_v14, %v1313_v13  ;;  %v1208_v43 = vrot.slane %v11701_v38, 5 }
  0xc4   : > { %v2017_v59 = vrot.slane %v2016_v48, 4 }
  0xc6   : > { %v861_v17 = vpop.f32.mrf.mxu2 }
  0xc7   : > { %v1094_v18 = vpop.f32.mrf.mxu3 }
  0xc8   : > { %v12239_v29 = vadd.f32 %v1094_v18, %v861_v17  ;;  %v824_v30 = vpop.f32.mrf.mxu0  ;;  %v2311_v17 = vunpack.c.l.b16 %v1998_v4  ;;  %v2002_v18 = vrot.slane %v2000_v61, 4  ;;  %v10171_v61 = vld [vmem:[%s11815_s8 + $0x48] sm:$0xf] }
  0xc9   : > { %v2024_v11 = vshrl.u32 %v10171_v61, 16  ;;  %v2027_v13 = vshll.u32 %v10171_v61, 16 }
  0xca   : > { %v1057_v33 = vpop.f32.mrf.mxu1  ;;  %v2339_v37 = vpack.c.b16 %v2311_v17, %v2310_v16  ;;  %v2033_v17 = vshll.u32 %v12291_v54, 16 }
  0xcb   : > { %v12243_v42 = vadd.f32 %v1057_v33, %v824_v30  ;;  %1437 = vmatmul.bf16.gmra.mxu2 %v1341_v19  ;;  %2434 = vmatmul.bf16.gmra.mxu0 %v2338_v20  ;;  %v2005_v19 = vrot.slane %v2003_v63, 5  ;;  %v2736_v20 = vunpack.c.l.b16 %v2625_v9  ;;  %v10170_v30 = vld [vmem:[%s11815_s8 + $0x44] sm:$0x1]  ;;  %v1131_v33 = vld [vmem:[%s11815_s8 + $0x30] sm:$0xe]  ;;  %v10272_v63 = vrot.slane %v10256_v1, 9 }
  0xcc   : > { %1752 = vmatmul.bf16.gmra.mxu3 %v11433_v31  ;;  %v2019_v49 = vshll.u32 %v10170_v30, 16  ;;  %v9952_v52 = vrot.slane %v1131_v33, 9  ;;  %v2634_v4 = vrot.slane %v10170_v30, 5 }
  0xcd   : > { %2860 = vmatmul.bf16.gmra.mxu1 %v2764_v32  ;;  %v2006_v44 = vor.u32 %v2005_v19, %v2002_v18  ;;  %v2765_v47 = vpack.c.b16 %v2737_v22, %v2736_v20  ;;  %v2037_v18 = vshrl.u32 %v12291_v54, 16  ;;  %v2632_v20 = vsel %vm12141_vm5, %v10272_v63, %v2631_v50 }
  0xce   : > { %v864_v55 = vpop.f32.mrf.mxu2  ;;  %v2021_v60 = vrot.slane %v2019_v49, 5  ;;  %v1209_v7 = vsel %vm12141_vm5, %v9952_v52, %v1208_v43  ;;  %v2738_v33 = vunpack.c.l.b16 %v2632_v20  ;;  %v2638_v63 = vrot.slane %v12291_v54, 5  ;;  %v11491_v54 = vld [vmem:[%s15303_s1 + $0x1a0] sm:$0xff] }
  0xcf   : > { %v1097_v58 = vpop.f32.mrf.mxu3  ;;  %v1315_v28 = vunpack.c.l.b16 %v1209_v7  ;;  %v1218_v7 = vrot.slane %v12024_v35, 5  ;;  %3160 = vmatpush.bf16.msra.mxu2 %v11491_v54 }
  0xd0   : > { %v12263_v0 = vadd.f32 %v1097_v58, %v864_v55  ;;  %v826_v2 = vpop.f32.mrf.mxu0  ;;  %v1210_v55 = vrot.slane %v1208_v43, 4  ;;  %v2007_v58 = vrot.slane %v2006_v44, 4  ;;  %v2022_v16 = vsel %vm11839_vm2, %v2017_v59, %v2021_v60 }
  0xd1   : > { %v2035_v43 = vrot.slane %v2033_v17, 5  ;;  %v2039_v44 = vrot.slane %v2037_v18, 4  ;;  %v12330_v18 = vld [vmem:[%s11815_s8 + $0x58] sm:$0xf] }
  0xd2   : > { %v1059_v8 = vpop.f32.mrf.mxu1  ;;  %v1212_v9 = vsel %vm12141_vm5, %v1210_v55, %v1211_v56  ;;  %v2012_v41 = vsel %vm11839_vm2, %v2007_v58, %v2011_v24  ;;  %v11435_v56 = vld [vmem:[%s11815_s8 + $0x3c] sm:$0xff] }
  0xd3   : > { %v12273_v12 = vadd.f32 %v1059_v8, %v826_v2  ;;  %v2633_v2 = vrot.slane %v2631_v50, 4  ;;  %v1316_v30 = vunpack.c.l.b16 %v1212_v9  ;;  %v1215_v50 = vrot.slane %v12000_v6, 5 }
  0xd4   : > { %v2040_v59 = vor.u32 %v2039_v44, %v2035_v43 }
  0xd5   : > { %v2635_v22 = vsel %vm12141_vm5, %v2633_v2, %v2634_v4  ;;  %v1343_v48 = vpack.c.b16 %v1316_v30, %v1315_v28  ;;  %v1217_v6 = vrot.slane %v1215_v50, 4 }
  0xd6   : > { %v866_v31 = vpop.f32.mrf.mxu2  ;;  %v2739_v38 = vunpack.c.l.b16 %v2635_v22  ;;  %v2041_v9 = vrot.slane %v2040_v59, 4 }
  0xd7   : > { %v1099_v32 = vpop.f32.mrf.mxu3  ;;  %v1219_v22 = vsel %vm12141_vm5, %v1217_v6, %v1218_v7  ;;  %v1133_v7 = vld [vmem:[%s11815_s8 + $0x48] sm:$0xe] }
  0xd8   : > { %v12281_v27 = vadd.f32 %v1099_v32, %v866_v31  ;;  %v829_v45 = vpop.f32.mrf.mxu0  ;;  %v2312_v31 = vunpack.c.l.b16 %v2012_v41  ;;  %v2313_v32 = vunpack.c.l.b16 %v2022_v16  ;;  %v2766_v58 = vpack.c.b16 %v2739_v38, %v2738_v33 }
  0xd9   : > { %v2640_v16 = vrot.slane %v2638_v63, 4  ;;  %v2057_v33 = vshll.u32 %v12330_v18, 16  ;;  %v2061_v38 = vshrl.u32 %v12330_v18, 16 }
  0xda   : > { %v1062_v46 = vpop.f32.mrf.mxu1  ;;  %v2340_v49 = vpack.c.b16 %v2313_v32, %v2312_v31 }
  0xdb   : > { %v12285_v51 = vadd.f32 %v1062_v46, %v829_v45  ;;  %1442 = vmatmul.bf16.gmra.mxu2 %v1342_v36  ;;  %2439 = vmatmul.bf16.gmra.mxu0 %v2339_v37  ;;  %v2026_v36 = vrot.slane %v2024_v11, 4  ;;  %v2029_v37 = vrot.slane %v2027_v13, 5  ;;  %v10173_v45 = vld [vmem:[%s11815_s8 + $0x50] sm:$0x1]  ;;  %v1132_v46 = vld [vmem:[%s11815_s8 + $0x3c] sm:$0xe] }
  0xdc   : > { %1757 = vmatmul.bf16.gmra.mxu3 %v11434_v10  ;;  %v2043_v60 = vshll.u32 %v10173_v45, 16  ;;  %v9953_v4 = vrot.slane %v1132_v46, 9  ;;  %v10174_v11 = vld [vmem:[%s11815_s8 + $0x54] sm:$0xf]  ;;  %v11499_v13 = vld [vmem:[%s15303_s1 + $0x1e0] sm:$0xff]  ;;  %v2641_v17 = vrot.slane %v10173_v45, 5 }
  0xdd   : > { %2865 = vmatmul.bf16.gmra.mxu1 %v2765_v47  ;;  %v2030_v52 = vor.u32 %v2029_v37, %v2026_v36  ;;  %3842 = vmatpush.bf16.msra.mxu3 %v11499_v13  ;;  %v2048_v30 = vshrl.u32 %v10174_v11, 16  ;;  %v2051_v31 = vshll.u32 %v10174_v11, 16  ;;  %v2059_v59 = vrot.slane %v2057_v33, 5  ;;  %v11436_v13 = vld [vmem:[%s11815_s8 + $0x48] sm:$0xff] }
  0xde   : > { %v869_v5 = vpop.f32.mrf.mxu2  ;;  %v2045_v41 = vrot.slane %v2043_v60, 5  ;;  %v2063_v60 = vrot.slane %v2061_v38, 4  ;;  %v10177_v38 = vld [vmem:[%s11815_s8 + $0x60] sm:$0xf] }
  0xdf   : > { %v1102_v8 = vpop.f32.mrf.mxu3 }
  0xe0   : > { %v12299_v14 = vadd.f32 %v1102_v8, %v869_v5  ;;  %v831_v15 = vpop.f32.mrf.mxu0  ;;  %v10257_v5 = vld [vmem:[%s11815_s8 + $0x48] sm:$0xe]  ;;  %v2031_v8 = vrot.slane %v2030_v52, 4  ;;  %v2046_v37 = vsel %vm11839_vm2, %v2041_v9, %v2045_v41  ;;  %v2050_v52 = vrot.slane %v2048_v30, 4 }
  0xe2   : > { %v1064_v19 = vpop.f32.mrf.mxu1  ;;  %v2036_v28 = vsel %vm11839_vm2, %v2031_v8, %v2035_v43  ;;  %v2642_v43 = vsel %vm12141_vm5, %v2640_v16, %v2641_v17  ;;  %v11702_v8 = vld [vmem:[%s11815_s8 + $0x4c] sm:$0xf]  ;;  %v2064_v16 = vor.u32 %v2063_v60, %v2059_v59 }
  0xe3   : > { %v12309_v24 = vadd.f32 %v1064_v19, %v831_v15  ;;  %v10273_v15 = vrot.slane %v10257_v5, 9  ;;  %v1216_v19 = vsel %vm12141_vm5, %v9953_v4, %v1215_v50  ;;  %v2314_v46 = vunpack.c.l.b16 %v2036_v28  ;;  %v10258_v28 = vld [vmem:[%s11815_s8 + $0x54] sm:$0xe] }
  0xe4   : > { %v2315_v50 = vunpack.c.l.b16 %v2046_v37  ;;  %v1222_v9 = vrot.slane %v11702_v8, 5  ;;  %v2065_v37 = vrot.slane %v2064_v16, 4 }
  0xe5   : > { %v2639_v45 = vsel %vm12141_vm5, %v10273_v15, %v2638_v63 }
  0xe6   : > { %v871_v10 = vpop.f32.mrf.mxu2  ;;  %v2341_v6 = vpack.c.b16 %v2315_v50, %v2314_v46  ;;  %v1224_v30 = vrot.slane %v1222_v9, 4  ;;  %v2072_v50 = vshrl.u32 %v10177_v38, 16 }
  0xe7   : > { %v1104_v47 = vpop.f32.mrf.mxu3 }
  0xe8   : > { %v12314_v1 = vadd.f32 %v1104_v47, %v871_v10  ;;  %v834_v55 = vpop.f32.mrf.mxu0  ;;  %v1317_v47 = vunpack.c.l.b16 %v1216_v19  ;;  %v2645_v19 = vrot.slane %v12330_v18, 5  ;;  %v12366_v18 = vld [vmem:[%s11815_s8 + $0x64] sm:$0xf] }
  0xe9   : > { %v2081_v60 = vshll.u32 %v12366_v18, 16 }
  0xea   : > { %v1067_v61 = vpop.f32.mrf.mxu1 }
  0xeb   : > { %v12318_v2 = vadd.f32 %v1067_v61, %v834_v55  ;;  %1447 = vmatmul.bf16.gmra.mxu2 %v1343_v48  ;;  %2444 = vmatmul.bf16.gmra.mxu0 %v2340_v49  ;;  %v1318_v48 = vunpack.c.l.b16 %v1219_v22  ;;  %v11507_v49 = vld [vmem:[%s15303_s1 + $0x220] sm:$0xff]  ;;  %v2053_v55 = vrot.slane %v2051_v31, 5  ;;  %v10176_v61 = vld [vmem:[%s11815_s8 + $0x5c] sm:$0x1]  ;;  %v9954_v22 = vrot.slane %v1133_v7, 9 }
  0xec   : > { %1762 = vmatmul.bf16.gmra.mxu3 %v11435_v56  ;;  %v2740_v56 = vunpack.c.l.b16 %v2639_v45  ;;  %4268 = vmatpush.bf16.msra.mxu0 %v11507_v49  ;;  %v2067_v17 = vshll.u32 %v10176_v61, 16  ;;  %v1225_v31 = vrot.slane %v12055_v23, 5  ;;  %v2647_v45 = vrot.slane %v2645_v19, 4 }
  0xed   : > { %2870 = vmatmul.bf16.gmra.mxu1 %v2766_v58  ;;  %v2741_v58 = vunpack.c.l.b16 %v2642_v43  ;;  %v1344_v5 = vpack.c.b16 %v1318_v48, %v1317_v47  ;;  %v2054_v41 = vor.u32 %v2053_v55, %v2050_v52  ;;  %v2648_v43 = vrot.slane %v10176_v61, 5 }
  0xee   : > { %v874_v35 = vpop.f32.mrf.mxu2  ;;  %v2069_v33 = vrot.slane %v2067_v17, 5  ;;  %v1223_v48 = vsel %vm12141_vm5, %v9954_v22, %v1222_v9  ;;  %v1226_v46 = vsel %vm12141_vm5, %v1224_v30, %v1225_v31  ;;  %v2075_v52 = vshll.u32 %v10177_v38, 16  ;;  %v1134_v31 = vld [vmem:[%s11815_s8 + $0x54] sm:$0xe] }
  0xef   : > { %v1107_v20 = vpop.f32.mrf.mxu3  ;;  %v2767_v15 = vpack.c.b16 %v2741_v58, %v2740_v56  ;;  %v2085_v61 = vshrl.u32 %v12366_v18, 16  ;;  %v1320_v7 = vunpack.c.l.b16 %v1226_v46  ;;  %v2083_v16 = vrot.slane %v2081_v60, 5 }
  0xf0   : > { %v12338_v32 = vadd.f32 %v1107_v20, %v874_v35  ;;  %v836_v36 = vpop.f32.mrf.mxu0  ;;  %v2070_v58 = vsel %vm11839_vm2, %v2065_v37, %v2069_v33  ;;  %v2652_v46 = vrot.slane %v12366_v18, 5  ;;  %v11490_v18 = vld [vmem:[%s15303_s1 + $0x198] sm:$0xff] }
  0xf1   : > { %v2317_v9 = vunpack.c.l.b16 %v2070_v58  ;;  %v2087_v17 = vrot.slane %v2085_v61, 4  ;;  %v1232_v58 = vrot.slane %v12092_v25, 5  ;;  %3161 = vmatpush.bf16.msra.mxu2 %v11490_v18 }
  0xf2   : > { %v1069_v44 = vpop.f32.mrf.mxu1 }
  0xf3   : > { %v12348_v10 = vadd.f32 %v1069_v44, %v836_v36  ;;  %v2055_v36 = vrot.slane %v2054_v41, 4  ;;  %v10274_v44 = vrot.slane %v10258_v28, 9  ;;  %v2074_v41 = vrot.slane %v2072_v50, 4 }
  0xf4   : > { %v9955_v50 = vrot.slane %v1134_v31, 9 }
  0xf5   : > { %v2060_v23 = vsel %vm11839_vm2, %v2055_v36, %v2059_v59  ;;  %v2649_v59 = vsel %vm12141_vm5, %v2647_v45, %v2648_v43  ;;  %v11703_v36 = vld [vmem:[%s11815_s8 + $0x58] sm:$0xf] }
  0xf6   : > { %v876_v63 = vpop.f32.mrf.mxu2  ;;  %v2316_v8 = vunpack.c.l.b16 %v2060_v23  ;;  %v1229_v37 = vrot.slane %v11703_v36, 5  ;;  %v11437_v45 = vld [vmem:[%s11815_s8 + $0x54] sm:$0xff] }
  0xf7   : > { %v1109_v4 = vpop.f32.mrf.mxu3 }
  0xf8   : > { %v12356_v11 = vadd.f32 %v1109_v4, %v876_v63  ;;  %v839_v54 = vpop.f32.mrf.mxu0  ;;  %v2646_v4 = vsel %vm12141_vm5, %v10274_v44, %v2645_v19  ;;  %v2342_v30 = vpack.c.b16 %v2317_v9, %v2316_v8  ;;  %v12405_v9 = vld [vmem:[%s11815_s8 + $0x70] sm:$0xf] }
  0xf9   : > { %v2109_v31 = vshrl.u32 %v12405_v9, 16 }
  0xfa   : > { %v1072_v35 = vpop.f32.mrf.mxu1 }
  0xfb   : > { %v12360_v20 = vadd.f32 %v1072_v35, %v839_v54  ;;  %1452 = vmatmul.bf16.gmra.mxu2 %v1344_v5  ;;  %2449 = vmatmul.bf16.gmra.mxu0 %v2341_v6  ;;  %v1319_v6 = vunpack.c.l.b16 %v1223_v48  ;;  %v2077_v54 = vrot.slane %v2075_v52, 5  ;;  %v10179_v35 = vld [vmem:[%s11815_s8 + $0x68] sm:$0x1]  ;;  %v10259_v52 = vld [vmem:[%s11815_s8 + $0x60] sm:$0xe] }
  0xfc   : > { %1767 = vmatmul.bf16.gmra.mxu3 %v11436_v13  ;;  %v2742_v13 = vunpack.c.l.b16 %v2646_v4  ;;  %v2091_v48 = vshll.u32 %v10179_v35, 16  ;;  %v10180_v4 = vld [vmem:[%s11815_s8 + $0x6c] sm:$0xf]  ;;  %v2655_v8 = vrot.slane %v10179_v35, 5 }
  0xfd   : > { %2875 = vmatmul.bf16.gmra.mxu1 %v2767_v15  ;;  %v2743_v15 = vunpack.c.l.b16 %v2649_v59  ;;  %v1345_v28 = vpack.c.b16 %v1320_v7, %v1319_v6  ;;  %v2078_v33 = vor.u32 %v2077_v54, %v2074_v41  ;;  %v11498_v59 = vld [vmem:[%s15303_s1 + $0x1d8] sm:$0xff]  ;;  %v10275_v6 = vrot.slane %v10259_v52, 9 }
  0xfe   : > { %v879_v47 = vpop.f32.mrf.mxu2  ;;  %v2654_v7 = vrot.slane %v2652_v46, 4  ;;  %v1230_v41 = vsel %vm12141_vm5, %v9955_v50, %v1229_v37  ;;  %3843 = vmatpush.bf16.msra.mxu3 %v11498_v59  ;;  %v1135_v59 = vld [vmem:[%s11815_s8 + $0x60] sm:$0xe] }
  0xff   : > { %v1112_v49 = vpop.f32.mrf.mxu3  ;;  %v2768_v43 = vpack.c.b16 %v2743_v15, %v2742_v13  ;;  %v2079_v60 = vrot.slane %v2078_v33, 4 }
 0x100   : > { %v12374_v55 = vadd.f32 %v1112_v49, %v879_v47  ;;  %v841_v56 = vpop.f32.mrf.mxu0  ;;  %v2088_v47 = vor.u32 %v2087_v17, %v2083_v16  ;;  %v2096_v17 = vshrl.u32 %v10180_v4, 16 }
 0x101   : > { %v2084_v15 = vsel %vm11839_vm2, %v2079_v60, %v2083_v16  ;;  %v2656_v16 = vsel %vm12141_vm5, %v2654_v7, %v2655_v8  ;;  %v10182_v60 = vld [vmem:[%s11815_s8 + $0x74] sm:$0x1] }
 0x102   : > { %v1074_v63 = vpop.f32.mrf.mxu1  ;;  %v2089_v61 = vrot.slane %v2088_v47, 4  ;;  %v2745_v52 = vunpack.c.l.b16 %v2656_v16 }
 0x103   : > { %v12384_v5 = vadd.f32 %v1074_v63, %v841_v56  ;;  %v1231_v56 = vrot.slane %v1229_v37, 4  ;;  %v2093_v63 = vrot.slane %v2091_v48, 5  ;;  %v2653_v37 = vsel %vm12141_vm5, %v10275_v6, %v2652_v46  ;;  %v11506_v46 = vld [vmem:[%s15303_s1 + $0x218] sm:$0xff]  ;;  %v11704_v6 = vld [vmem:[%s11815_s8 + $0x64] sm:$0xf] }
 0x104   : > { %v2098_v48 = vrot.slane %v2096_v17, 4  ;;  %v2744_v50 = vunpack.c.l.b16 %v2653_v37  ;;  %v1236_v7 = vrot.slane %v11704_v6, 5  ;;  %4269 = vmatpush.bf16.msra.mxu0 %v11506_v46  ;;  %v2115_v17 = vshll.u32 %v10182_v60, 16  ;;  %v11705_v37 = vld [vmem:[%s11815_s8 + $0x68] sm:$0x1] }
 0x105   : > { %v1233_v13 = vsel %vm12141_vm5, %v1231_v56, %v1232_v58  ;;  %v2111_v58 = vrot.slane %v2109_v31, 4  ;;  %v10260_v31 = vld [vmem:[%s11815_s8 + $0x6c] sm:$0xe]  ;;  %v1239_v16 = vrot.slane %v11705_v37, 5 }
 0x106   : > { %v881_v19 = vpop.f32.mrf.mxu2 }
 0x107   : > { %v1114_v22 = vpop.f32.mrf.mxu3 }
 0x108   : > { %v12389_v38 = vadd.f32 %v1114_v22, %v881_v19  ;;  %v844_v44 = vpop.f32.mrf.mxu0  ;;  %v2099_v19 = vshll.u32 %v10180_v4, 16 }
 0x10a   : > { %v1077_v49 = vpop.f32.mrf.mxu1 }
 0x10b   : > { %v12393_v23 = vadd.f32 %v1077_v49, %v844_v44  ;;  %1457 = vmatmul.bf16.gmra.mxu2 %v1345_v28  ;;  %2454 = vmatmul.bf16.gmra.mxu0 %v2342_v30  ;;  %v2094_v28 = vsel %vm11839_vm2, %v2089_v61, %v2093_v63  ;;  %v2105_v30 = vshll.u32 %v12405_v9, 16  ;;  %v1321_v44 = vunpack.c.l.b16 %v1230_v41 }
 0x10c   : > { %1772 = vmatmul.bf16.gmra.mxu3 %v11437_v45  ;;  %v1322_v45 = vunpack.c.l.b16 %v1233_v13  ;;  %v2319_v47 = vunpack.c.l.b16 %v2094_v28  ;;  %v2101_v49 = vrot.slane %v2099_v19, 5  ;;  %v2769_v13 = vpack.c.b16 %v2745_v52, %v2744_v50 }
 0x10d   : > { %2880 = vmatmul.bf16.gmra.mxu1 %v2768_v43  ;;  %v2318_v43 = vunpack.c.l.b16 %v2084_v15  ;;  %v2107_v56 = vrot.slane %v2105_v30, 5  ;;  %v9956_v30 = vrot.slane %v1135_v59, 9  ;;  %v2662_v50 = vrot.slane %v10182_v60, 5 }
 0x10e   : > { %v884_v25 = vpop.f32.mrf.mxu2  ;;  %v1346_v4 = vpack.c.b16 %v1322_v45, %v1321_v44  ;;  %v2102_v8 = vor.u32 %v2101_v49, %v2098_v48  ;;  %v10276_v48 = vrot.slane %v10260_v31, 9 }
 0x10f   : > { %v1117_v54 = vpop.f32.mrf.mxu3  ;;  %v2343_v18 = vpack.c.b16 %v2319_v47, %v2318_v43  ;;  %v2112_v15 = vor.u32 %v2111_v58, %v2107_v56  ;;  %v2117_v43 = vrot.slane %v2115_v17, 5  ;;  %v10183_v47 = vld [vmem:[%s11815_s8 + $0x78] sm:$0xf]  ;;  %v1237_v58 = vsel %vm12141_vm5, %v9956_v30, %v1236_v7 }
 0x110   : > { %v12413_v22 = vadd.f32 %v1117_v54, %v884_v25  ;;  %v846_v35 = vpop.f32.mrf.mxu0  ;;  %v11438_v54 = vld [vmem:[%s11815_s8 + $0x60] sm:$0xff]  ;;  %v2103_v44 = vrot.slane %v2102_v8, 4 }
 0x111   : > { %v2113_v45 = vrot.slane %v2112_v15, 4  ;;  %v1323_v15 = vunpack.c.l.b16 %v1237_v58  ;;  %v1136_v58 = vld [vmem:[%s11815_s8 + $0x6c] sm:$0xe] }
 0x112   : > { %v1079_v36 = vpop.f32.mrf.mxu1 }
 0x113   : > { %v12423_v33 = vadd.f32 %v1079_v36, %v846_v35  ;;  %v2659_v35 = vrot.slane %v12405_v9, 5  ;;  %v1238_v36 = vrot.slane %v1236_v7, 4  ;;  %v12441_v9 = vld [vmem:[%s11815_s8 + $0x7c] sm:$0xf]  ;;  %v2118_v60 = vsel %vm11839_vm2, %v2113_v45, %v2117_v43  ;;  %v10185_v43 = vld [vmem:[%s11815_s8 + $0x80] sm:$0x1] }
 0x114   : > { %v2129_v8 = vshll.u32 %v12441_v9, 16  ;;  %v2133_v7 = vshrl.u32 %v12441_v9, 16  ;;  %v2321_v30 = vunpack.c.l.b16 %v2118_v60  ;;  %v2139_v60 = vshll.u32 %v10185_v43, 16 }
 0x115   : > { %v2661_v49 = vrot.slane %v2659_v35, 4 }
 0x116   : > { %v886_v61 = vpop.f32.mrf.mxu2  ;;  %v2135_v45 = vrot.slane %v2133_v7, 4  ;;  %v2666_v7 = vrot.slane %v12441_v9, 5 }
 0x117   : > { %v1119_v63 = vpop.f32.mrf.mxu3 }
 0x118   : > { %v12431_v25 = vadd.f32 %v1119_v63, %v886_v61  ;;  %v849_v41 = vpop.f32.mrf.mxu0  ;;  %v1240_v61 = vsel %vm12141_vm5, %v1238_v36, %v1239_v16  ;;  %v2108_v63 = vsel %vm11839_vm2, %v2103_v44, %v2107_v56  ;;  %v2663_v56 = vsel %vm12141_vm5, %v2661_v49, %v2662_v50 }
 0x119   : > { %v1324_v17 = vunpack.c.l.b16 %v1240_v61  ;;  %v2747_v16 = vunpack.c.l.b16 %v2663_v56  ;;  %v2131_v44 = vrot.slane %v2129_v8, 5  ;;  %v11707_v56 = vld [vmem:[%s11815_s8 + $0x74] sm:$0x1]  ;;  %v2668_v9 = vrot.slane %v2666_v7, 4 }
 0x11a   : > { %v1082_v19 = vpop.f32.mrf.mxu1 }
 0x11b   : > { %v12435_v28 = vadd.f32 %v1082_v19, %v849_v41  ;;  %1462 = vmatmul.bf16.gmra.mxu2 %v1346_v4  ;;  %2459 = vmatmul.bf16.gmra.mxu0 %v2343_v18  ;;  %v2120_v4 = vshrl.u32 %v10183_v47, 16  ;;  %v2123_v18 = vshll.u32 %v10183_v47, 16  ;;  %v2320_v19 = vunpack.c.l.b16 %v2108_v63 }
 0x11c   : > { %1777 = vmatmul.bf16.gmra.mxu3 %v11438_v54  ;;  %v2660_v54 = vsel %vm12141_vm5, %v10276_v48, %v2659_v35  ;;  %v11706_v35 = vld [vmem:[%s11815_s8 + $0x70] sm:$0xf]  ;;  %v1347_v50 = vpack.c.b16 %v1324_v17, %v1323_v15  ;;  %v1246_v15 = vrot.slane %v11707_v56, 5  ;;  %v10261_v17 = vld [vmem:[%s11815_s8 + $0x78] sm:$0xe] }
 0x11d   : > { %2885 = vmatmul.bf16.gmra.mxu1 %v2769_v13  ;;  %v2122_v31 = vrot.slane %v2120_v4, 4  ;;  %v2125_v36 = vrot.slane %v2123_v18, 5  ;;  %v2746_v37 = vunpack.c.l.b16 %v2660_v54  ;;  %v1243_v48 = vrot.slane %v11706_v35, 5  ;;  %v11439_v4 = vld [vmem:[%s11815_s8 + $0x6c] sm:$0xff] }
 0x11e   : > { %v889_v52 = vpop.f32.mrf.mxu2  ;;  %v11497_v35 = vld [vmem:[%s15303_s1 + $0x1d0] sm:$0xff] }
 0x11f   : > { %v1122_v46 = vpop.f32.mrf.mxu3  ;;  %v2770_v18 = vpack.c.b16 %v2747_v16, %v2746_v37  ;;  %v1245_v54 = vrot.slane %v1243_v48, 4  ;;  %v11489_v37 = vld [vmem:[%s15303_s1 + $0x190] sm:$0xff]  ;;  %v10277_v16 = vrot.slane %v10261_v17, 9  ;;  %3844 = vmatpush.bf16.msra.mxu3 %v11497_v35 }
 0x120   : > { %v12449_v59 = vadd.f32 %v1122_v46, %v889_v52  ;;  %v851_v6 = vpop.f32.mrf.mxu0  ;;  %v2344_v52 = vpack.c.b16 %v2321_v30, %v2320_v19  ;;  %v2126_v46 = vor.u32 %v2125_v36, %v2122_v31  ;;  %v2141_v31 = vrot.slane %v2139_v60, 5  ;;  %v10186_v36 = vld [vmem:[%s11815_s8 + $0x84] sm:$0xf]  ;;  %3162 = vmatpush.bf16.msra.mxu2 %v11489_v37 }
 0x122   : > { %v1084_v41 = vpop.f32.mrf.mxu1  ;;  %v2127_v19 = vrot.slane %v2126_v46, 4 }
 0x123   : > { %v12459_v13 = vadd.f32 %v1084_v41, %v851_v6  ;;  %v2136_v6 = vor.u32 %v2135_v45, %v2131_v44  ;;  %v9957_v41 = vrot.slane %v1136_v58, 9  ;;  %v2669_v45 = vrot.slane %v10185_v43, 5 }
 0x124   : > { %v2132_v43 = vsel %vm11839_vm2, %v2127_v19, %v2131_v44 }
 0x125   : > { %v2137_v30 = vrot.slane %v2136_v6, 4  ;;  %v2670_v44 = vsel %vm12141_vm5, %v2668_v9, %v2669_v45  ;;  %v2322_v19 = vunpack.c.l.b16 %v2132_v43  ;;  %v11708_v45 = vld [vmem:[%s11815_s8 + $0x7c] sm:$0xf] }
 0x126   : > { %v891_v47 = vpop.f32.mrf.mxu2 }
 0x127   : > { %v1124_v49 = vpop.f32.mrf.mxu3  ;;  %v2142_v60 = vsel %vm11839_vm2, %v2137_v30, %v2141_v31 }
 0x128   : > { %v12464_v61 = vadd.f32 %v1124_v49, %v891_v47  ;;  %v2425_v63 = vpop.f32.mrf.mxu0  ;;  %v12475_v47 = vld [vmem:[%s11815_s8 + $0x88] sm:$0xf]  ;;  %v2323_v37 = vunpack.c.l.b16 %v2142_v60 }
 0x129   : > { %v2153_v56 = vshll.u32 %v12475_v47, 16 }
 0x12a   : > { %15314 = vst [vmem:[#allocation3_spill] sm:$0xff] %v12464_v61  ;;  %v2851_v8 = vpop.f32.mrf.mxu1 }
 0x12b   : > { %1467 = vmatmul.bf16.gmra.mxu2 %v1347_v50  ;;  %2464 = vmatmul.bf16.gmra.mxu0 %v2344_v52  ;;  %v1244_v50 = vsel %vm12141_vm5, %v9957_v41, %v1243_v48  ;;  %v1247_v52 = vsel %vm12141_vm5, %v1245_v54, %v1246_v15  ;;  %v2157_v48 = vshrl.u32 %v12475_v47, 16 }
 0x12c   : > { %1782 = vmatmul.bf16.gmra.mxu3 %v11439_v4  ;;  %v2144_v4 = vshrl.u32 %v10186_v36, 16  ;;  %v1325_v15 = vunpack.c.l.b16 %v1244_v50  ;;  %v1326_v17 = vunpack.c.l.b16 %v1247_v52  ;;  %v1250_v50 = vrot.slane %v11708_v45, 5 }
 0x12d   : > { %2890 = vmatmul.bf16.gmra.mxu1 %v2770_v18  ;;  %v2147_v18 = vshll.u32 %v10186_v36, 16  ;;  %v2673_v45 = vrot.slane %v12475_v47, 5 }
 0x12e   : > { %v1428_v49 = vpop.f32.mrf.mxu2  ;;  %v2146_v30 = vrot.slane %v2144_v4, 4  ;;  %v1348_v43 = vpack.c.b16 %v1326_v17, %v1325_v15  ;;  %v2345_v4 = vpack.c.b16 %v2323_v37, %v2322_v19  ;;  %v10262_v17 = vld [vmem:[%s11815_s8 + $0x84] sm:$0xe] }
 0x12f   : > { %v1508_v58 = vadd.f32 %v1428_v49, %v12168_v26  ;;  %v1743_v46 = vpop.f32.mrf.mxu3  ;;  %v2667_v26 = vsel %vm12141_vm5, %v10277_v16, %v2666_v7  ;;  %v2149_v31 = vrot.slane %v2147_v18, 5  ;;  %v2749_v49 = vunpack.c.l.b16 %v2670_v44  ;;  %v10188_v7 = vld [vmem:[%s11815_s8 + $0x8c] sm:$0x1]  ;;  %v11505_v16 = vld [vmem:[%s15303_s1 + $0x210] sm:$0xff]  ;;  %v1137_v18 = vld [vmem:[%s11815_s8 + $0x78] sm:$0xe] }
 0x130   : > { %v2427_v6 = vpop.f32.mrf.mxu0  ;;  %v2748_v35 = vunpack.c.l.b16 %v2667_v26  ;;  %4270 = vmatpush.bf16.msra.mxu0 %v11505_v16  ;;  %v2163_v26 = vshll.u32 %v10188_v7, 16  ;;  %v2675_v16 = vrot.slane %v2673_v45, 4  ;;  %v2676_v47 = vrot.slane %v10188_v7, 5 }
 0x131   : > { %v1823_v41 = vadd.f32 %v1743_v46, %v1508_v58  ;;  %v2155_v58 = vrot.slane %v2153_v56, 5  ;;  %v2159_v46 = vrot.slane %v2157_v48, 4  ;;  %v2150_v60 = vor.u32 %v2149_v31, %v2146_v30  ;;  %v11440_v56 = vld [vmem:[%s11815_s8 + $0x78] sm:$0xff] }
 0x132   : > { %v2853_v54 = vpop.f32.mrf.mxu1  ;;  %v2771_v48 = vpack.c.b16 %v2749_v49, %v2748_v35  ;;  %v2165_v31 = vrot.slane %v2163_v26, 5  ;;  %v10189_v35 = vld [vmem:[%s11815_s8 + $0x90] sm:$0xf] }
 0x133   : > { %v2505_v36 = vadd.f32 %v2425_v63, %v1823_v41  ;;  %v2160_v41 = vor.u32 %v2159_v46, %v2155_v58  ;;  %v2151_v37 = vrot.slane %v2150_v60, 4  ;;  %v10278_v46 = vrot.slane %v10262_v17, 9 }
 0x135   : > { %v12495_v61 = vadd.f32 %v2851_v8, %v2505_v36  ;;  %v2161_v30 = vrot.slane %v2160_v41, 4  ;;  %v2156_v60 = vsel %vm11839_vm2, %v2151_v37, %v2155_v58 }
 0x136   : > { %v1430_v9 = vpop.f32.mrf.mxu2 }
 0x137   : > { %15315 = vst [vmem:[#allocation4_spill] sm:$0xff] %v12495_v61  ;;  %v1509_v63 = vadd.f32 %v1430_v9, %v12198_v62  ;;  %v1745_v52 = vpop.f32.mrf.mxu3  ;;  %v9958_v61 = vrot.slane %v1137_v18, 9  ;;  %v1252_v62 = vrot.slane %v1250_v50, 4  ;;  %v11709_v9 = vld [vmem:[%s11815_s8 + $0x80] sm:$0x1]  ;;  %v2166_v7 = vsel %vm11839_vm2, %v2161_v30, %v2165_v31 }
 0x138   : > { %v2430_v8 = vpop.f32.mrf.mxu0  ;;  %v1253_v15 = vrot.slane %v11709_v9, 5  ;;  %v2325_v17 = vunpack.c.l.b16 %v2166_v7  ;;  %v11441_v7 = vld [vmem:[%s11815_s8 + $0x84] sm:$0xff] }
 0x139   : > { %v1824_v44 = vadd.f32 %v1745_v52, %v1509_v63  ;;  %v12512_v63 = vld [vmem:[%s11815_s8 + $0x94] sm:$0xf]  ;;  %v1251_v18 = vsel %vm12141_vm5, %v9958_v61, %v1250_v50  ;;  %v2674_v50 = vsel %vm12141_vm5, %v10278_v46, %v2673_v45  ;;  %v10191_v45 = vld [vmem:[%s11815_s8 + $0x98] sm:$0x1] }
 0x13a   : > { %v2856_v36 = vpop.f32.mrf.mxu1  ;;  %v2177_v41 = vshll.u32 %v12512_v63, 16  ;;  %v2181_v26 = vshrl.u32 %v12512_v63, 16  ;;  %v1327_v58 = vunpack.c.l.b16 %v1251_v18  ;;  %v2750_v30 = vunpack.c.l.b16 %v2674_v50 }
 0x13b   : > { %1472 = vmatmul.bf16.gmra.mxu2 %v1348_v43  ;;  %2469 = vmatmul.bf16.gmra.mxu0 %v2345_v4  ;;  %v2506_v19 = vadd.f32 %v2427_v6, %v1824_v44  ;;  %v1254_v6 = vsel %vm12141_vm5, %v1252_v62, %v1253_v15  ;;  %v2324_v62 = vunpack.c.l.b16 %v2156_v60  ;;  %v1138_v60 = vld [vmem:[%s11815_s8 + $0x84] sm:$0xe]  ;;  %v2680_v50 = vrot.slane %v12512_v63, 5  ;;  %v11488_v63 = vld [vmem:[%s15303_s1 + $0x188] sm:$0xff] }
 0x13c   : > { %1787 = vmatmul.bf16.gmra.mxu3 %v11440_v56  ;;  %v2171_v56 = vshll.u32 %v10189_v35, 16  ;;  %v1328_v44 = vunpack.c.l.b16 %v1254_v6  ;;  %3163 = vmatpush.bf16.msra.mxu2 %v11488_v63 }
 0x13d   : > { %2895 = vmatmul.bf16.gmra.mxu1 %v2771_v48  ;;  %v12509_v49 = vadd.f32 %v2853_v54, %v2506_v19  ;;  %v2168_v54 = vshrl.u32 %v10189_v35, 16  ;;  %v2179_v35 = vrot.slane %v2177_v41, 5 }
 0x13e   : > { %v1433_v52 = vpop.f32.mrf.mxu2  ;;  %v2173_v37 = vrot.slane %v2171_v56, 5 }
 0x13f   : > { %v1510_v43 = vadd.f32 %v1433_v52, %v12210_v34  ;;  %v1748_v4 = vpop.f32.mrf.mxu3  ;;  %v2677_v34 = vsel %vm12141_vm5, %v2675_v16, %v2676_v47  ;;  %v2170_v19 = vrot.slane %v2168_v54, 4  ;;  %v2183_v52 = vrot.slane %v2181_v26, 4  ;;  %v11710_v16 = vld [vmem:[%s11815_s8 + $0x88] sm:$0xf] }
 0x140   : > { %v2432_v48 = vpop.f32.mrf.mxu0  ;;  %v2751_v31 = vunpack.c.l.b16 %v2677_v34  ;;  %v1257_v47 = vrot.slane %v11710_v16, 5  ;;  %v2187_v26 = vshll.u32 %v10191_v45, 16  ;;  %v9959_v34 = vrot.slane %v1138_v60, 9  ;;  %v11711_v16 = vld [vmem:[%s11815_s8 + $0x8c] sm:$0x1] }
 0x141   : > { %v1825_v61 = vadd.f32 %v1748_v4, %v1510_v43  ;;  %v2346_v4 = vpack.c.b16 %v2325_v17, %v2324_v62  ;;  %v2174_v54 = vor.u32 %v2173_v37, %v2170_v19  ;;  %v2184_v41 = vor.u32 %v2183_v52, %v2179_v35  ;;  %v10192_v37 = vld [vmem:[%s11815_s8 + $0x9c] sm:$0xf] }
 0x142   : > { %v2858_v9 = vpop.f32.mrf.mxu1  ;;  %v2189_v19 = vrot.slane %v2187_v26, 5  ;;  %v2682_v52 = vrot.slane %v2680_v50, 4 }
 0x143   : > { %v2507_v15 = vadd.f32 %v2430_v8, %v1825_v61  ;;  %v1349_v8 = vpack.c.b16 %v1328_v44, %v1327_v58  ;;  %v2772_v61 = vpack.c.b16 %v2751_v31, %v2750_v30  ;;  %v2175_v44 = vrot.slane %v2174_v54, 4 }
 0x144   : > { %v2185_v17 = vrot.slane %v2184_v41, 4  ;;  %v2192_v54 = vshrl.u32 %v10192_v37, 16 }
 0x145   : > { %v12529_v43 = vadd.f32 %v2856_v36, %v2507_v15  ;;  %v1259_v15 = vrot.slane %v1257_v47, 4 }
 0x146   : > { %v1435_v46 = vpop.f32.mrf.mxu2  ;;  %v2190_v41 = vsel %vm11839_vm2, %v2185_v17, %v2189_v19 }
 0x147   : > { %15316 = vst [vmem:[#allocation5_spill] sm:$0xff] %v12529_v43  ;;  %v1511_v18 = vadd.f32 %v1435_v46, %v12234_v3  ;;  %v1750_v6 = vpop.f32.mrf.mxu3  ;;  %v1260_v43 = vrot.slane %v11711_v16, 5  ;;  %v10263_v3 = vld [vmem:[%s11815_s8 + $0x90] sm:$0xe]  ;;  %v2683_v46 = vrot.slane %v10191_v45, 5  ;;  %v2180_v45 = vsel %vm11839_vm2, %v2175_v44, %v2179_v35 }
 0x148   : > { %v2435_v56 = vpop.f32.mrf.mxu0  ;;  %v10279_v31 = vrot.slane %v10263_v3, 9  ;;  %v2327_v3 = vunpack.c.l.b16 %v2190_v41 }
 0x149   : > { %v1826_v36 = vadd.f32 %v1750_v6, %v1511_v18  ;;  %v12546_v18 = vld [vmem:[%s11815_s8 + $0xa0] sm:$0xf] }
 0x14a   : > { %v2861_v62 = vpop.f32.mrf.mxu1  ;;  %v2201_v26 = vshll.u32 %v12546_v18, 16 }
 0x14b   : > { %1477 = vmatmul.bf16.gmra.mxu2 %v1349_v8  ;;  %2474 = vmatmul.bf16.gmra.mxu0 %v2346_v4  ;;  %v2508_v58 = vadd.f32 %v2432_v48, %v1826_v36  ;;  %v11496_v48 = vld [vmem:[%s15303_s1 + $0x1c8] sm:$0xff]  ;;  %v1258_v8 = vsel %vm12141_vm5, %v9959_v34, %v1257_v47  ;;  %v1261_v4 = vsel %vm12141_vm5, %v1259_v15, %v1260_v43  ;;  %v2205_v47 = vshrl.u32 %v12546_v18, 16 }
 0x14c   : > { %1792 = vmatmul.bf16.gmra.mxu3 %v11441_v7  ;;  %v2195_v7 = vshll.u32 %v10192_v37, 16  ;;  %v2684_v36 = vsel %vm12141_vm5, %v2682_v52, %v2683_v46  ;;  %v1329_v35 = vunpack.c.l.b16 %v1258_v8  ;;  %v1330_v34 = vunpack.c.l.b16 %v1261_v4 }
 0x14d   : > { %2900 = vmatmul.bf16.gmra.mxu1 %v2772_v61  ;;  %v12543_v30 = vadd.f32 %v2858_v9, %v2508_v58  ;;  %3845 = vmatpush.bf16.msra.mxu3 %v11496_v48  ;;  %v2326_v15 = vunpack.c.l.b16 %v2180_v45  ;;  %v2194_v58 = vrot.slane %v2192_v54, 4  ;;  %v2753_v19 = vunpack.c.l.b16 %v2684_v36  ;;  %v1139_v45 = vld [vmem:[%s11815_s8 + $0x90] sm:$0xe] }
 0x14e   : > { %v1438_v6 = vpop.f32.mrf.mxu2  ;;  %v2197_v44 = vrot.slane %v2195_v7, 5  ;;  %v2203_v37 = vrot.slane %v2201_v26, 5  ;;  %v2207_v63 = vrot.slane %v2205_v47, 4  ;;  %v11442_v7 = vld [vmem:[%s11815_s8 + $0x90] sm:$0xff]  ;;  %v9960_v36 = vrot.slane %v1139_v45, 9 }
 0x14f   : > { %v1512_v9 = vadd.f32 %v1438_v6, %v12243_v42  ;;  %v1753_v60 = vpop.f32.mrf.mxu3  ;;  %v2681_v42 = vsel %vm12141_vm5, %v10279_v31, %v2680_v50  ;;  %v10194_v50 = vld [vmem:[%s11815_s8 + $0xa4] sm:$0x1]  ;;  %v11504_v31 = vld [vmem:[%s15303_s1 + $0x208] sm:$0xff]  ;;  %v11712_v6 = vld [vmem:[%s11815_s8 + $0x94] sm:$0xf] }
 0x150   : > { %v2437_v61 = vpop.f32.mrf.mxu0  ;;  %v2752_v17 = vunpack.c.l.b16 %v2681_v42  ;;  %v2198_v54 = vor.u32 %v2197_v44, %v2194_v58  ;;  %4271 = vmatpush.bf16.msra.mxu0 %v11504_v31  ;;  %v2208_v26 = vor.u32 %v2207_v63, %v2203_v37  ;;  %v2211_v47 = vshll.u32 %v10194_v50, 16  ;;  %v10195_v44 = vld [vmem:[%s11815_s8 + $0xa8] sm:$0xf]  ;;  %v12583_v31 = vld [vmem:[%s11815_s8 + $0xac] sm:$0xf] }
 0x151   : > { %v1827_v43 = vadd.f32 %v1753_v60, %v1512_v9  ;;  %v1350_v9 = vpack.c.b16 %v1330_v34, %v1329_v35  ;;  %v2347_v60 = vpack.c.b16 %v2327_v3, %v2326_v15  ;;  %v2687_v42 = vrot.slane %v12546_v18, 5  ;;  %v10264_v35 = vld [vmem:[%s11815_s8 + $0x9c] sm:$0xe] }
 0x152   : > { %v2863_v46 = vpop.f32.mrf.mxu1  ;;  %v2773_v41 = vpack.c.b16 %v2753_v19, %v2752_v17  ;;  %v2199_v15 = vrot.slane %v2198_v54, 4  ;;  %v2209_v3 = vrot.slane %v2208_v26, 4  ;;  %v2213_v58 = vrot.slane %v2211_v47, 5 }
 0x153   : > { %v2509_v16 = vadd.f32 %v2435_v56, %v1827_v43  ;;  %v1264_v56 = vrot.slane %v11712_v6, 5  ;;  %v10280_v19 = vrot.slane %v10264_v35, 9  ;;  %v2689_v63 = vrot.slane %v2687_v42, 4 }
 0x154   : > { %v2690_v18 = vrot.slane %v10194_v50, 5  ;;  %v2219_v45 = vshll.u32 %v10195_v44, 16  ;;  %v2214_v50 = vsel %vm11839_vm2, %v2209_v3, %v2213_v58 }
 0x155   : > { %v12566_v48 = vadd.f32 %v2861_v62, %v2509_v16  ;;  %v1266_v16 = vrot.slane %v1264_v56, 4  ;;  %v2688_v47 = vsel %vm12141_vm5, %v10280_v19, %v2687_v42  ;;  %v10197_v19 = vld [vmem:[%s11815_s8 + $0xb0] sm:$0x1] }
 0x156   : > { %v1440_v52 = vpop.f32.mrf.mxu2 }
 0x157   : > { %v1513_v8 = vadd.f32 %v1440_v52, %v12273_v12  ;;  %v1755_v4 = vpop.f32.mrf.mxu3  ;;  %v11713_v12 = vld [vmem:[%s11815_s8 + $0x98] sm:$0x1] }
 0x158   : > { %v2440_v62 = vpop.f32.mrf.mxu0  ;;  %v1267_v52 = vrot.slane %v11713_v12, 5 }
 0x159   : > { %v1828_v43 = vadd.f32 %v1755_v4, %v1513_v8  ;;  %v1265_v8 = vsel %vm12141_vm5, %v9960_v36, %v1264_v56  ;;  %v2229_v56 = vshrl.u32 %v12583_v31, 16 }
 0x15b   : > { %1482 = vmatmul.bf16.gmra.mxu2 %v1350_v9  ;;  %2479 = vmatmul.bf16.gmra.mxu0 %v2347_v60  ;;  %v2510_v34 = vadd.f32 %v2437_v61, %v1828_v43  ;;  %v1268_v61 = vsel %vm12141_vm5, %v1266_v16, %v1267_v52  ;;  %v2204_v60 = vsel %vm11839_vm2, %v2199_v15, %v2203_v37  ;;  %v11542_v37 = vld [vmem:[%s15305_s3 + $0x78] sm:$0xff]  ;;  %v1331_v43 = vunpack.c.l.b16 %v1265_v8 }
 0x15c   : > { %1797 = vmatmul.bf16.gmra.mxu3 %v11442_v7  ;;  %v2866_v7 = vpop.f32.mrf.mxu1  ;;  %v1332_v36 = vunpack.c.l.b16 %v1268_v61  ;;  %v2328_v16 = vunpack.c.l.b16 %v2204_v60  ;;  %v2329_v52 = vunpack.c.l.b16 %v2214_v50  ;;  %5776 = vmatpush.bf16.msra.mxu1 %v11542_v37  ;;  %v2754_v15 = vunpack.c.l.b16 %v2688_v47 }
 0x15d   : > { %2905 = vmatmul.bf16.gmra.mxu1 %v2773_v41  ;;  %v12580_v17 = vadd.f32 %v2863_v46, %v2510_v34  ;;  %v2216_v46 = vshrl.u32 %v10195_v44, 16  ;;  %v2225_v41 = vshll.u32 %v12583_v31, 16  ;;  %v2221_v34 = vrot.slane %v2219_v45, 5  ;;  %v11443_v45 = vld [vmem:[%s11815_s8 + $0x9c] sm:$0xff] }
 0x15e   : > { %v1443_v6 = vpop.f32.mrf.mxu2  ;;  %v2231_v58 = vrot.slane %v2229_v56, 4  ;;  %v1351_v61 = vpack.c.b16 %v1332_v36, %v1331_v43  ;;  %v2235_v56 = vshll.u32 %v10197_v19, 16  ;;  %v10265_v43 = vld [vmem:[%s11815_s8 + $0xa8] sm:$0xe] }
 0x15f   : > { %v1514_v4 = vadd.f32 %v1443_v6, %v12285_v51  ;;  %v1758_v9 = vpop.f32.mrf.mxu3  ;;  %v2691_v51 = vsel %vm12141_vm5, %v2689_v63, %v2690_v18  ;;  %v2218_v35 = vrot.slane %v2216_v46, 4  ;;  %v2227_v3 = vrot.slane %v2225_v41, 5  ;;  %v11714_v18 = vld [vmem:[%s11815_s8 + $0xa0] sm:$0xf] }
 0x160   : > { %v2442_v54 = vpop.f32.mrf.mxu0  ;;  %v2755_v42 = vunpack.c.l.b16 %v2691_v51  ;;  %v1271_v6 = vrot.slane %v11714_v18, 5  ;;  %v12620_v18 = vld [vmem:[%s11815_s8 + $0xb8] sm:$0xf] }
 0x161   : > { %v1829_v26 = vadd.f32 %v1758_v9, %v1514_v4  ;;  %v2348_v4 = vpack.c.b16 %v2329_v52, %v2328_v16  ;;  %v1140_v9 = vld [vmem:[%s11815_s8 + $0x9c] sm:$0xe]  ;;  %v2222_v60 = vor.u32 %v2221_v34, %v2218_v35  ;;  %v2232_v41 = vor.u32 %v2231_v58, %v2227_v3  ;;  %v10198_v34 = vld [vmem:[%s11815_s8 + $0xb4] sm:$0xf] }
 0x162   : > { %v2774_v50 = vpack.c.b16 %v2755_v42, %v2754_v15  ;;  %v9961_v51 = vrot.slane %v1140_v9, 9  ;;  %v1273_v37 = vrot.slane %v1271_v6, 4  ;;  %v2237_v35 = vrot.slane %v2235_v56, 5 }
 0x163   : > { %v2511_v12 = vadd.f32 %v2440_v62, %v1829_v26  ;;  %v2694_v26 = vrot.slane %v12583_v31, 5  ;;  %v2223_v16 = vrot.slane %v2222_v60, 4  ;;  %v2233_v52 = vrot.slane %v2232_v41, 4  ;;  %v11487_v31 = vld [vmem:[%s15303_s1 + $0x180] sm:$0xff] }
 0x164   : > { %v2868_v47 = vpop.f32.mrf.mxu1  ;;  %v10281_v42 = vrot.slane %v10265_v43, 9  ;;  %3164 = vmatpush.bf16.msra.mxu2 %v11487_v31  ;;  %v2240_v60 = vshrl.u32 %v10198_v34, 16  ;;  %v2249_v56 = vshll.u32 %v12620_v18, 16  ;;  %v10200_v31 = vld [vmem:[%s11815_s8 + $0xbc] sm:$0x1] }
 0x165   : > { %v12603_v44 = vadd.f32 %v2866_v7, %v2511_v12  ;;  %v2696_v58 = vrot.slane %v2694_v26, 4  ;;  %v2238_v41 = vsel %vm11839_vm2, %v2233_v52, %v2237_v35 }
 0x166   : > { %v1445_v63 = vpop.f32.mrf.mxu2  ;;  %v2242_v43 = vrot.slane %v2240_v60, 4  ;;  %v2251_v35 = vrot.slane %v2249_v56, 5 }
 0x167   : > { %v1515_v8 = vadd.f32 %v1445_v63, %v12309_v24  ;;  %v1760_v62 = vpop.f32.mrf.mxu3  ;;  %v11715_v24 = vld [vmem:[%s11815_s8 + $0xa4] sm:$0x1]  ;;  %v2697_v63 = vrot.slane %v10197_v19, 5  ;;  %v2228_v19 = vsel %vm11839_vm2, %v2223_v16, %v2227_v3 }
 0x168   : > { %v2445_v46 = vpop.f32.mrf.mxu0  ;;  %v1274_v12 = vrot.slane %v11715_v24, 5 }
 0x169   : > { %v1830_v7 = vadd.f32 %v1760_v62, %v1515_v8  ;;  %v1272_v62 = vsel %vm12141_vm5, %v9961_v51, %v1271_v6  ;;  %v2253_v6 = vshrl.u32 %v12620_v18, 16  ;;  %v2698_v3 = vsel %vm12141_vm5, %v2696_v58, %v2697_v63  ;;  %v11716_v58 = vld [vmem:[%s11815_s8 + $0xac] sm:$0xf] }
 0x16a   : > { %v2757_v52 = vunpack.c.l.b16 %v2698_v3  ;;  %v1278_v63 = vrot.slane %v11716_v58, 5 }
 0x16b   : > { %1487 = vmatmul.bf16.gmra.mxu2 %v1351_v61  ;;  %2484 = vmatmul.bf16.gmra.mxu0 %v2348_v4  ;;  %v2512_v36 = vadd.f32 %v2442_v54, %v1830_v7  ;;  %v11495_v54 = vld [vmem:[%s15303_s1 + $0x1c0] sm:$0xff]  ;;  %v1275_v61 = vsel %vm12141_vm5, %v1273_v37, %v1274_v12  ;;  %v2330_v37 = vunpack.c.l.b16 %v2228_v19  ;;  %v2331_v12 = vunpack.c.l.b16 %v2238_v41  ;;  %v11444_v19 = vld [vmem:[%s11815_s8 + $0xa8] sm:$0xff] }
 0x16c   : > { %1802 = vmatmul.bf16.gmra.mxu3 %v11443_v45  ;;  %v2243_v45 = vshll.u32 %v10198_v34, 16  ;;  %v1334_v51 = vunpack.c.l.b16 %v1275_v61  ;;  %v2255_v34 = vrot.slane %v2253_v6, 4  ;;  %v1141_v61 = vld [vmem:[%s11815_s8 + $0xa8] sm:$0xe]  ;;  %v2259_v41 = vshll.u32 %v10200_v31, 16 }
 0x16d   : > { %2910 = vmatmul.bf16.gmra.mxu1 %v2774_v50  ;;  %v12617_v15 = vadd.f32 %v2868_v47, %v2512_v36  ;;  %3846 = vmatpush.bf16.msra.mxu3 %v11495_v54  ;;  %v1333_v47 = vunpack.c.l.b16 %v1272_v62  ;;  %v2349_v62 = vpack.c.b16 %v2331_v12, %v2330_v37  ;;  %v2701_v6 = vrot.slane %v12620_v18, 5  ;;  %v12657_v18 = vld [vmem:[%s11815_s8 + $0xc4] sm:$0xf] }
 0x16e   : > { %v1448_v8 = vpop.f32.mrf.mxu2  ;;  %v2245_v36 = vrot.slane %v2243_v45, 5  ;;  %v2256_v45 = vor.u32 %v2255_v34, %v2251_v35  ;;  %v2704_v34 = vrot.slane %v10200_v31, 5 }
 0x16f   : > { %v1516_v4 = vadd.f32 %v1448_v8, %v12318_v2  ;;  %v1763_v9 = vpop.f32.mrf.mxu3  ;;  %v2695_v2 = vsel %vm12141_vm5, %v10281_v42, %v2694_v26  ;;  %v11503_v26 = vld [vmem:[%s15303_s1 + $0x200] sm:$0xff]  ;;  %v1352_v8 = vpack.c.b16 %v1334_v51, %v1333_v47  ;;  %v10266_v47 = vld [vmem:[%s11815_s8 + $0xb4] sm:$0xe] }
 0x170   : > { %v2447_v50 = vpop.f32.mrf.mxu0  ;;  %v2756_v16 = vunpack.c.l.b16 %v2695_v2  ;;  %4272 = vmatpush.bf16.msra.mxu0 %v11503_v26  ;;  %v1280_v2 = vrot.slane %v1278_v63, 4  ;;  %v2257_v12 = vrot.slane %v2256_v45, 4 }
 0x171   : > { %v1831_v7 = vadd.f32 %v1763_v9, %v1516_v4  ;;  %v2246_v4 = vor.u32 %v2245_v36, %v2242_v43  ;;  %v2261_v43 = vrot.slane %v2259_v41, 5  ;;  %v10201_v36 = vld [vmem:[%s11815_s8 + $0xc0] sm:$0xf] }
 0x172   : > { %v2775_v60 = vpack.c.b16 %v2757_v52, %v2756_v16  ;;  %v10282_v16 = vrot.slane %v10266_v47, 9  ;;  %v2703_v52 = vrot.slane %v2701_v6, 4 }
 0x173   : > { %v12640_v24 = vadd.f32 %v2445_v46, %v1831_v7  ;;  %v9962_v7 = vrot.slane %v1141_v61, 9  ;;  %v2247_v37 = vrot.slane %v2246_v4, 4  ;;  %v2262_v31 = vsel %vm11839_vm2, %v2257_v12, %v2261_v43  ;;  %v10203_v43 = vld [vmem:[%s11815_s8 + $0xc8] sm:$0x1] }
 0x174   : > { %v2273_v4 = vshll.u32 %v12657_v18, 16 }
 0x176   : > { %v1450_v42 = vpop.f32.mrf.mxu2 }
 0x177   : > { %v1517_v46 = vadd.f32 %v1450_v42, %v12348_v10  ;;  %v1765_v54 = vpop.f32.mrf.mxu3  ;;  %v11717_v10 = vld [vmem:[%s11815_s8 + $0xb0] sm:$0x1]  ;;  %v1279_v42 = vsel %vm12141_vm5, %v9962_v7, %v1278_v63 }
 0x178   : > { %v2450_v9 = vpop.f32.mrf.mxu0  ;;  %v1281_v3 = vrot.slane %v11717_v10, 5  ;;  %v1335_v45 = vunpack.c.l.b16 %v1279_v42 }
 0x179   : > { %v1832_v56 = vadd.f32 %v1765_v54, %v1517_v46  ;;  %v2252_v54 = vsel %vm11839_vm2, %v2247_v37, %v2251_v35  ;;  %v11541_v35 = vld [vmem:[%s15305_s3 + $0x70] sm:$0xff]  ;;  %v2275_v37 = vrot.slane %v2273_v4, 5 }
 0x17a   : > { %v1282_v58 = vsel %vm12141_vm5, %v1280_v2, %v1281_v3  ;;  %v2333_v2 = vunpack.c.l.b16 %v2262_v31  ;;  %5777 = vmatpush.bf16.msra.mxu1 %v11541_v35  ;;  %v2283_v31 = vshll.u32 %v10203_v43, 16  ;;  %v10267_v35 = vld [vmem:[%s11815_s8 + $0xc0] sm:$0xe] }
 0x17b   : > { %1492 = vmatmul.bf16.gmra.mxu2 %v1352_v8  ;;  %2489 = vmatmul.bf16.gmra.mxu0 %v2349_v62  ;;  %v12653_v51 = vadd.f32 %v2447_v50, %v1832_v56  ;;  %v2264_v8 = vshrl.u32 %v10201_v36, 16  ;;  %v2267_v62 = vshll.u32 %v10201_v36, 16  ;;  %v1336_v41 = vunpack.c.l.b16 %v1282_v58  ;;  %v1142_v58 = vld [vmem:[%s11815_s8 + $0xb4] sm:$0xe] }
 0x17c   : > { %1807 = vmatmul.bf16.gmra.mxu3 %v11444_v19  ;;  %v2277_v19 = vshrl.u32 %v12657_v18, 16  ;;  %v2332_v56 = vunpack.c.l.b16 %v2252_v54  ;;  %v11445_v54 = vld [vmem:[%s11815_s8 + $0xb4] sm:$0xff] }
 0x17d   : > { %2915 = vmatmul.bf16.gmra.mxu1 %v2775_v60  ;;  %v2702_v60 = vsel %vm12141_vm5, %v10282_v16, %v2701_v6  ;;  %v2266_v10 = vrot.slane %v2264_v8, 4  ;;  %v2269_v3 = vrot.slane %v2267_v62, 5  ;;  %v11718_v16 = vld [vmem:[%s11815_s8 + $0xb8] sm:$0xf] }
 0x17e   : > { %v1453_v26 = vpop.f32.mrf.mxu2  ;;  %v2758_v6 = vunpack.c.l.b16 %v2702_v60  ;;  %v2279_v12 = vrot.slane %v2277_v19, 4  ;;  %v2350_v42 = vpack.c.b16 %v2333_v2, %v2332_v56  ;;  %v2708_v19 = vrot.slane %v12657_v18, 5  ;;  %v10477_v18 = vld [vmem:[%s11815_s8 + $0x1c] sm:$0xf] }
 0x17f   : > { %v1518_v50 = vadd.f32 %v1453_v26, %v12360_v20  ;;  %v1768_v46 = vpop.f32.mrf.mxu3  ;;  %v2705_v20 = vsel %vm12141_vm5, %v2703_v52, %v2704_v34  ;;  %v1285_v52 = vrot.slane %v11718_v16, 5  ;;  %v2285_v2 = vrot.slane %v2283_v31, 5 }
 0x180   : > { %v2452_v61 = vpop.f32.mrf.mxu0  ;;  %v2759_v47 = vunpack.c.l.b16 %v2705_v20  ;;  %v2280_v62 = vor.u32 %v2279_v12, %v2275_v37  ;;  %v11719_v20 = vld [vmem:[%s11815_s8 + $0xbc] sm:$0x1] }
 0x181   : > { %v1833_v63 = vadd.f32 %v1768_v46, %v1518_v50  ;;  %v2270_v50 = vor.u32 %v2269_v3, %v2266_v10  ;;  %v1287_v60 = vrot.slane %v1285_v52, 4  ;;  %v10476_v10 = vld [vmem:[%s11815_s8 + $0x18] sm:$0xf]  ;;  %v10283_v3 = vrot.slane %v10267_v35, 9 }
 0x182   : > { %v2776_v8 = vpack.c.b16 %v2759_v47, %v2758_v6  ;;  %v2281_v56 = vrot.slane %v2280_v62, 4  ;;  %v2710_v6 = vrot.slane %v2708_v19, 4  ;;  %v2711_v47 = vrot.slane %v10203_v43, 5 }
 0x183   : > { %v12677_v7 = vadd.f32 %v2450_v9, %v1833_v63  ;;  %v1353_v9 = vpack.c.b16 %v1336_v41, %v1335_v45  ;;  %v9963_v63 = vrot.slane %v1142_v58, 9  ;;  %v2271_v41 = vrot.slane %v2270_v50, 4 }
 0x184   : > { %v2286_v43 = vsel %vm11839_vm2, %v2281_v56, %v2285_v2  ;;  %v3336_v50 = vshll.u32 %v10477_v18, 16 }
 0x186   : > { %v1455_v36 = vpop.f32.mrf.mxu2  ;;  %v3338_v56 = vrot.slane %v3336_v50, 5 }
 0x187   : > { %v1519_v34 = vadd.f32 %v1455_v36, %v12384_v5  ;;  %v1770_v26 = vpop.f32.mrf.mxu3  ;;  %v1288_v5 = vrot.slane %v11719_v20, 5  ;;  %v1286_v36 = vsel %vm12141_vm5, %v9963_v63, %v1285_v52  ;;  %v2709_v52 = vsel %vm12141_vm5, %v10283_v3, %v2708_v19 }
 0x188   : > { %v2455_v46 = vpop.f32.mrf.mxu0  ;;  %v1337_v62 = vunpack.c.l.b16 %v1286_v36  ;;  %v2335_v63 = vunpack.c.l.b16 %v2286_v43 }
 0x189   : > { %v1834_v4 = vadd.f32 %v1770_v26, %v1519_v34  ;;  %v1289_v16 = vsel %vm12141_vm5, %v1287_v60, %v1288_v5  ;;  %v2276_v26 = vsel %vm11839_vm2, %v2271_v41, %v2275_v37  ;;  %v2760_v5 = vunpack.c.l.b16 %v2709_v52  ;;  %v10478_v41 = vld [vmem:[%s11815_s8 + $0x20] sm:$0x1] }
 0x18a   : > { %v1338_v31 = vunpack.c.l.b16 %v1289_v16 }
 0x18b   : > { %1497 = vmatmul.bf16.gmra.mxu2 %v1353_v9  ;;  %2494 = vmatmul.bf16.gmra.mxu0 %v2350_v42  ;;  %v12687_v45 = vadd.f32 %v2452_v61, %v1834_v4  ;;  %v3327_v9 = vshrl.u32 %v10476_v10, 16  ;;  %v3330_v42 = vshll.u32 %v10476_v10, 16  ;;  %v2334_v4 = vunpack.c.l.b16 %v2276_v26  ;;  %v10572_v26 = vld [vmem:[%s11815_s8 + $0x18] sm:$0xe] }
 0x18c   : > { %1812 = vmatmul.bf16.gmra.mxu3 %v11445_v54  ;;  %v3340_v54 = vshrl.u32 %v10477_v18, 16 }
 0x18d   : > { %2920 = vmatmul.bf16.gmra.mxu1 %v2776_v8  ;;  %v3329_v60 = vrot.slane %v3327_v9, 4  ;;  %v3332_v20 = vrot.slane %v3330_v42, 5  ;;  %v4026_v9 = vrot.slane %v10477_v18, 5 }
 0x18e   : > { %v1458_v12 = vpop.f32.mrf.mxu2  ;;  %v3342_v2 = vrot.slane %v3340_v54, 4 }
 0x18f   : > { %v1520_v61 = vadd.f32 %v1458_v12, %v12393_v23  ;;  %v1773_v34 = vpop.f32.mrf.mxu3  ;;  %v2712_v23 = vsel %vm12141_vm5, %v2710_v6, %v2711_v47  ;;  %v1354_v6 = vpack.c.b16 %v1338_v31, %v1337_v62  ;;  %v2351_v47 = vpack.c.b16 %v2335_v63, %v2334_v4  ;;  %v10479_v62 = vld [vmem:[%s11815_s8 + $0x24] sm:$0xf]  ;;  %v10480_v4 = vld [vmem:[%s11815_s8 + $0x28] sm:$0xf] }
 0x190   : > { %v2457_v58 = vpop.f32.mrf.mxu0  ;;  %v2761_v35 = vunpack.c.l.b16 %v2712_v23  ;;  %v3346_v12 = vshll.u32 %v10478_v41, 16  ;;  %v4028_v52 = vrot.slane %v4026_v9, 4  ;;  %v4029_v23 = vrot.slane %v10478_v41, 5 }
 0x191   : > { %v1835_v8 = vadd.f32 %v1773_v34, %v1520_v61  ;;  %v3333_v61 = vor.u32 %v3332_v20, %v3329_v60  ;;  %v3343_v34 = vor.u32 %v3342_v2, %v3338_v56  ;;  %v3351_v41 = vshrl.u32 %v10479_v62, 16 }
 0x192   : > { %v2777_v16 = vpack.c.b16 %v2761_v35, %v2760_v5  ;;  %v3348_v50 = vrot.slane %v3346_v12, 5  ;;  %v4030_v35 = vsel %vm12141_vm5, %v4028_v52, %v4029_v23  ;;  %v10573_v23 = vld [vmem:[%s11815_s8 + $0x24] sm:$0xe] }
 0x193   : > { %v12704_v37 = vadd.f32 %v2455_v46, %v1835_v8  ;;  %v11446_v46 = vld [vmem:[%s11815_s8 + $0xc0] sm:$0xff]  ;;  %v3334_v54 = vrot.slane %v3333_v61, 4  ;;  %v3344_v8 = vrot.slane %v3343_v34, 4 }
 0x195   : > { %v3349_v5 = vsel %vm11839_vm2, %v3344_v8, %v3348_v50 }
 0x196   : > { %v1460_v10 = vpop.f32.mrf.mxu2 }
 0x197   : > { %v1521_v19 = vadd.f32 %v1460_v10, %v12423_v33  ;;  %v1775_v3 = vpop.f32.mrf.mxu3  ;;  %v10588_v33 = vrot.slane %v10572_v26, 9  ;;  %v3354_v10 = vshll.u32 %v10479_v62, 16  ;;  %v4033_v62 = vrot.slane %v10480_v4, 5 }
 0x198   : > { %v2460_v36 = vpop.f32.mrf.mxu0 }
 0x199   : > { %v1836_v42 = vadd.f32 %v1775_v3, %v1521_v19  ;;  %v4027_v18 = vsel %vm12141_vm5, %v10588_v33, %v4026_v9  ;;  %v3360_v19 = vshll.u32 %v10480_v4, 16  ;;  %v11540_v3 = vld [vmem:[%s15305_s3 + $0x68] sm:$0xff]  ;;  %v3356_v61 = vrot.slane %v3354_v10, 5 }
 0x19a   : > { %5778 = vmatpush.bf16.msra.mxu1 %v11540_v3 }
 0x19b   : > { %1502 = vmatmul.bf16.gmra.mxu2 %v1354_v6  ;;  %2499 = vmatmul.bf16.gmra.mxu0 %v2351_v47  ;;  %v12710_v43 = vadd.f32 %v2457_v58, %v1836_v42  ;;  %v3339_v58 = vsel %vm11839_vm2, %v3334_v54, %v3338_v56  ;;  %v4153_v56 = vunpack.c.l.b16 %v4027_v18  ;;  %v4154_v47 = vunpack.c.l.b16 %v4030_v35  ;;  %v10481_v42 = vld [vmem:[%s11815_s8 + $0x2c] sm:$0x1]  ;;  %v11471_v54 = vld [vmem:[%s11815_s8 + $0x18] sm:$0xff] }
 0x19c   : > { %1817 = vmatmul.bf16.gmra.mxu3 %v11446_v46  ;;  %v3727_v12 = vunpack.c.l.b16 %v3339_v58  ;;  %v3728_v46 = vunpack.c.l.b16 %v3349_v5  ;;  %v3362_v34 = vrot.slane %v3360_v19, 5  ;;  %v3370_v18 = vshll.u32 %v10481_v42, 16 }
 0x19d   : > { %2925 = vmatmul.bf16.gmra.mxu1 %v2777_v16  ;;  %v3353_v16 = vrot.slane %v3351_v41, 4  ;;  %v4185_v8 = vpack.c.b16 %v4154_v47, %v4153_v56  ;;  %v10589_v5 = vrot.slane %v10573_v23, 9  ;;  %v4036_v35 = vrot.slane %v10481_v42, 5  ;;  %v10482_v41 = vld [vmem:[%s11815_s8 + $0x30] sm:$0xf] }
 0x19e   : > { %v1463_v31 = vpop.f32.mrf.mxu2  ;;  %v3759_v52 = vpack.c.b16 %v3728_v46, %v3727_v12  ;;  %v3372_v19 = vrot.slane %v3370_v18, 5  ;;  %v3375_v12 = vshrl.u32 %v10482_v41, 16 }
 0x19f   : > { %v1522_v63 = vadd.f32 %v1463_v31, %v12435_v28  ;;  %v1778_v60 = vpop.f32.mrf.mxu3  ;;  %v3364_v28 = vshrl.u32 %v10480_v4, 16  ;;  %v4034_v47 = vsel %vm12141_vm5, %v10589_v5, %v4033_v62 }
 0x1a0   : > { %v2462_v20 = vpop.f32.mrf.mxu0 }
 0x1a1   : > { %v1837_v2 = vadd.f32 %v1778_v60, %v1522_v63  ;;  %v3366_v26 = vrot.slane %v3364_v28, 4  ;;  %v3357_v63 = vor.u32 %v3356_v61, %v3353_v16  ;;  %v10483_v28 = vld [vmem:[%s11815_s8 + $0x34] sm:$0xf] }
 0x1a2   : > { %v3384_v61 = vshll.u32 %v10483_v28, 16 }
 0x1a3   : > { %v12726_v6 = vadd.f32 %v2460_v36, %v1837_v2  ;;  %v3367_v60 = vor.u32 %v3366_v26, %v3362_v34  ;;  %v3358_v2 = vrot.slane %v3357_v63, 4  ;;  %v3388_v26 = vshrl.u32 %v10483_v28, 16 }
 0x1a4   : > { %v3386_v63 = vrot.slane %v3384_v61, 5 }
 0x1a5   : > { %v3368_v10 = vrot.slane %v3367_v60, 4  ;;  %v3363_v42 = vsel %vm11839_vm2, %v3358_v2, %v3362_v34  ;;  %v3390_v60 = vrot.slane %v3388_v26, 4  ;;  %v11472_v34 = vld [vmem:[%s11815_s8 + $0x24] sm:$0xff] }
 0x1a6   : > { %v1465_v9 = vpop.f32.mrf.mxu2  ;;  %v3729_v23 = vunpack.c.l.b16 %v3363_v42 }
 0x1a7   : > { %v1523_v50 = vadd.f32 %v1465_v9, %v12459_v13  ;;  %v1780_v33 = vpop.f32.mrf.mxu3  ;;  %v4035_v13 = vrot.slane %v4033_v62, 4 }
 0x1a8   : > { %v2465_v36 = vpop.f32.mrf.mxu0 }
 0x1a9   : > { %v1838_v31 = vadd.f32 %v1780_v33, %v1523_v50  ;;  %v4037_v16 = vsel %vm12141_vm5, %v4035_v13, %v4036_v35  ;;  %v4155_v50 = vunpack.c.l.b16 %v4034_v47 }
 0x1ab   : > { %3165 = vmatmul.bf16.vlgmr.msra.gmra.mxu2 %v11471_v54  ;;  %4273 = vmatmul.bf16.vlgmr.msra.gmra.mxu0 %v4185_v8  ;;  %v12732_v58 = vadd.f32 %v2462_v20, %v1838_v31  ;;  %v3378_v20 = vshll.u32 %v10482_v41, 16  ;;  %v4156_v54 = vunpack.c.l.b16 %v4037_v16  ;;  %v3377_v8 = vrot.slane %v3375_v12, 4  ;;  %v10484_v31 = vld [vmem:[%s11815_s8 + $0x38] sm:$0x1] }
 0x1ac   : > { %3847 = vmatmul.bf16.vlgmr.msra.gmra.mxu3 %v3759_v52  ;;  %v3394_v2 = vshll.u32 %v10484_v31, 16  ;;  %v4043_v26 = vrot.slane %v10484_v31, 5 }
 0x1ad   : > { %v3380_v52 = vrot.slane %v3378_v20, 5  ;;  %v4186_v35 = vpack.c.b16 %v4156_v54, %v4155_v50 }
 0x1ae   : > { %v1468_v3 = vpop.f32.mrf.mxu2  ;;  %v3396_v20 = vrot.slane %v3394_v2, 5 }
 0x1af   : > { %v1524_v4 = vadd.f32 %v1468_v3, %v12188_v53  ;;  %v1783_v56 = vpop.f32.mrf.mxu3  ;;  %v3373_v53 = vsel %vm11839_vm2, %v3368_v10, %v3372_v19  ;;  %v3381_v41 = vor.u32 %v3380_v52, %v3377_v8  ;;  %v3391_v19 = vor.u32 %v3390_v60, %v3386_v63 }
 0x1b0   : > { %v2467_v46 = vpop.f32.mrf.mxu0  ;;  %v3730_v62 = vunpack.c.l.b16 %v3373_v53  ;;  %v4040_v3 = vrot.slane %v10483_v28, 5  ;;  %v10486_v53 = vld [vmem:[%s11815_s8 + $0x40] sm:$0xf] }
 0x1b1   : > { %v1839_v9 = vadd.f32 %v1783_v56, %v1524_v4  ;;  %v10574_v56 = vld [vmem:[%s11815_s8 + $0x30] sm:$0xe]  ;;  %v3382_v12 = vrot.slane %v3381_v41, 4 }
 0x1b2   : > { %v10590_v16 = vrot.slane %v10574_v56, 9  ;;  %v4042_v61 = vrot.slane %v4040_v3, 4  ;;  %v10487_v56 = vld [vmem:[%s11815_s8 + $0x44] sm:$0x1] }
 0x1b3   : > { %v12745_v33 = vadd.f32 %v2465_v36, %v1839_v9  ;;  %v3760_v36 = vpack.c.b16 %v3730_v62, %v3729_v23  ;;  %v10485_v9 = vld [vmem:[%s11815_s8 + $0x3c] sm:$0xf]  ;;  %v3387_v28 = vsel %vm11839_vm2, %v3382_v12, %v3386_v63  ;;  %v11539_v63 = vld [vmem:[%s15305_s3 + $0x60] sm:$0xff] }
 0x1b4   : > { %v4041_v52 = vsel %vm12141_vm5, %v10590_v16, %v4040_v3  ;;  %v4044_v23 = vsel %vm12141_vm5, %v4042_v61, %v4043_v26  ;;  %v3399_v62 = vshrl.u32 %v10485_v9, 16  ;;  %v3402_v60 = vshll.u32 %v10485_v9, 16  ;;  %5779 = vmatpush.bf16.msra.mxu1 %v11539_v63  ;;  %v10575_v26 = vld [vmem:[%s11815_s8 + $0x3c] sm:$0xe] }
 0x1b5   : > { %15317 = vst [vmem:[#allocation6_spill] sm:$0xff] %v12745_v33  ;;  %v4047_v9 = vrot.slane %v10486_v53, 5 }
 0x1b6   : > { %v1470_v18 = vpop.f32.mrf.mxu2  ;;  %v3401_v2 = vrot.slane %v3399_v62, 4  ;;  %v10488_v62 = vld [vmem:[%s11815_s8 + $0x48] sm:$0xf] }
 0x1b7   : > { %v1525_v5 = vadd.f32 %v1470_v18, %v12206_v21  ;;  %v1785_v13 = vpop.f32.mrf.mxu3  ;;  %v3392_v21 = vrot.slane %v3391_v19, 4  ;;  %v3408_v18 = vshll.u32 %v10486_v53, 16 }
 0x1b8   : > { %v2470_v10 = vpop.f32.mrf.mxu0 }
 0x1b9   : > { %v1840_v4 = vadd.f32 %v1785_v13, %v1525_v5  ;;  %v4157_v13 = vunpack.c.l.b16 %v4041_v52  ;;  %v3410_v19 = vrot.slane %v3408_v18, 5  ;;  %v10591_v52 = vrot.slane %v10575_v26, 9 }
 0x1bb   : > { %3170 = vmatmul.bf16.gmra.mxu2 %v11472_v34  ;;  %4278 = vmatmul.bf16.gmra.mxu0 %v4186_v35  ;;  %v12751_v47 = vadd.f32 %v2467_v46, %v1840_v4  ;;  %v3397_v46 = vsel %vm11839_vm2, %v3392_v21, %v3396_v20  ;;  %v4158_v34 = vunpack.c.l.b16 %v4044_v23  ;;  %v3731_v35 = vunpack.c.l.b16 %v3387_v28  ;;  %v11473_v21 = vld [vmem:[%s11815_s8 + $0x30] sm:$0xff] }
 0x1bc   : > { %3852 = vmatmul.bf16.gmra.mxu3 %v3760_v36  ;;  %v3732_v41 = vunpack.c.l.b16 %v3397_v46  ;;  %v3404_v36 = vrot.slane %v3402_v60, 5  ;;  %v3418_v28 = vshll.u32 %v10487_v56, 16  ;;  %v4050_v23 = vrot.slane %v10487_v56, 5 }
 0x1bd   : > { %15318 = vst [vmem:[#allocation7_spill] sm:$0xff] %v12751_v47  ;;  %v4187_v16 = vpack.c.b16 %v4158_v34, %v4157_v13  ;;  %v4048_v34 = vsel %vm12141_vm5, %v10591_v52, %v4047_v9 }
 0x1be   : > { %v1473_v42 = vpop.f32.mrf.mxu2  ;;  %v3761_v61 = vpack.c.b16 %v3732_v41, %v3731_v35  ;;  %v3420_v18 = vrot.slane %v3418_v28, 5  ;;  %v3423_v35 = vshrl.u32 %v10488_v62, 16 }
 0x1bf   : > { %v1526_v50 = vadd.f32 %v1473_v42, %v12224_v57  ;;  %v1788_v54 = vpop.f32.mrf.mxu3  ;;  %v3412_v57 = vshrl.u32 %v10486_v53, 16 }
 0x1c0   : > { %v2472_v8 = vpop.f32.mrf.mxu0 }
 0x1c1   : > { %v1841_v31 = vadd.f32 %v1788_v54, %v1526_v50  ;;  %v3414_v3 = vrot.slane %v3412_v57, 4  ;;  %v3405_v50 = vor.u32 %v3404_v36, %v3401_v2  ;;  %v10489_v57 = vld [vmem:[%s11815_s8 + $0x4c] sm:$0xf] }
 0x1c2   : > { %v3432_v36 = vshll.u32 %v10489_v57, 16 }
 0x1c3   : > { %v12767_v5 = vadd.f32 %v2470_v10, %v1841_v31  ;;  %v3415_v54 = vor.u32 %v3414_v3, %v3410_v19  ;;  %v3406_v31 = vrot.slane %v3405_v50, 4  ;;  %v3436_v3 = vshrl.u32 %v10489_v57, 16 }
 0x1c4   : > { %v3434_v50 = vrot.slane %v3432_v36, 5 }
 0x1c5   : > { %15319 = vst [vmem:[#allocation8_spill] sm:$0xff] %v12767_v5  ;;  %v3416_v60 = vrot.slane %v3415_v54, 4  ;;  %v3411_v56 = vsel %vm11839_vm2, %v3406_v31, %v3410_v19  ;;  %v3438_v54 = vrot.slane %v3436_v3, 4  ;;  %v11474_v19 = vld [vmem:[%s11815_s8 + $0x3c] sm:$0xff] }
 0x1c6   : > { %v1475_v4 = vpop.f32.mrf.mxu2  ;;  %v3733_v26 = vunpack.c.l.b16 %v3411_v56 }
 0x1c7   : > { %v1527_v12 = vadd.f32 %v1475_v4, %v12239_v29  ;;  %v1790_v20 = vpop.f32.mrf.mxu3  ;;  %v4049_v29 = vrot.slane %v4047_v9, 4 }
 0x1c8   : > { %v2475_v10 = vpop.f32.mrf.mxu0 }
 0x1c9   : > { %v1842_v42 = vadd.f32 %v1790_v20, %v1527_v12  ;;  %v4051_v2 = vsel %vm12141_vm5, %v4049_v29, %v4050_v23  ;;  %v4159_v12 = vunpack.c.l.b16 %v4048_v34 }
 0x1cb   : > { %3175 = vmatmul.bf16.gmra.mxu2 %v11473_v21  ;;  %4283 = vmatmul.bf16.gmra.mxu0 %v4187_v16  ;;  %v12773_v46 = vadd.f32 %v2472_v8, %v1842_v42  ;;  %v3426_v8 = vshll.u32 %v10488_v62, 16  ;;  %v4160_v21 = vunpack.c.l.b16 %v4051_v2  ;;  %v3425_v16 = vrot.slane %v3423_v35, 4  ;;  %v10490_v42 = vld [vmem:[%s11815_s8 + $0x50] sm:$0x1] }
 0x1cc   : > { %3857 = vmatmul.bf16.gmra.mxu3 %v3761_v61  ;;  %v3442_v31 = vshll.u32 %v10490_v42, 16  ;;  %v4057_v3 = vrot.slane %v10490_v42, 5 }
 0x1cd   : > { %15320 = vst [vmem:[#allocation9_spill] sm:$0xff] %v12773_v46  ;;  %v3428_v61 = vrot.slane %v3426_v8, 5  ;;  %v4188_v23 = vpack.c.b16 %v4160_v21, %v4159_v12 }
 0x1ce   : > { %v1478_v63 = vpop.f32.mrf.mxu2  ;;  %v3444_v8 = vrot.slane %v3442_v31, 5 }
 0x1cf   : > { %v1528_v53 = vadd.f32 %v1478_v63, %v12263_v0  ;;  %v1793_v13 = vpop.f32.mrf.mxu3  ;;  %v3421_v0 = vsel %vm11839_vm2, %v3416_v60, %v3420_v18  ;;  %v3429_v62 = vor.u32 %v3428_v61, %v3425_v16  ;;  %v3439_v18 = vor.u32 %v3438_v54, %v3434_v50 }
 0x1d0   : > { %v2477_v41 = vpop.f32.mrf.mxu0  ;;  %v3734_v9 = vunpack.c.l.b16 %v3421_v0  ;;  %v4054_v63 = vrot.slane %v10489_v57, 5  ;;  %v10492_v0 = vld [vmem:[%s11815_s8 + $0x58] sm:$0xf] }
 0x1d1   : > { %v1843_v4 = vadd.f32 %v1793_v13, %v1528_v53  ;;  %v10576_v13 = vld [vmem:[%s11815_s8 + $0x48] sm:$0xe]  ;;  %v3430_v35 = vrot.slane %v3429_v62, 4 }
 0x1d2   : > { %v10592_v2 = vrot.slane %v10576_v13, 9  ;;  %v4056_v36 = vrot.slane %v4054_v63, 4  ;;  %v10493_v13 = vld [vmem:[%s11815_s8 + $0x5c] sm:$0x1] }
 0x1d3   : > { %v12786_v20 = vadd.f32 %v2475_v10, %v1843_v4  ;;  %v3762_v10 = vpack.c.b16 %v3734_v9, %v3733_v26  ;;  %v10491_v4 = vld [vmem:[%s11815_s8 + $0x54] sm:$0xf]  ;;  %v3435_v57 = vsel %vm11839_vm2, %v3430_v35, %v3434_v50  ;;  %v11538_v50 = vld [vmem:[%s15305_s3 + $0x58] sm:$0xff] }
 0x1d4   : > { %v4055_v61 = vsel %vm12141_vm5, %v10592_v2, %v4054_v63  ;;  %v4058_v26 = vsel %vm12141_vm5, %v4056_v36, %v4057_v3  ;;  %v3447_v9 = vshrl.u32 %v10491_v4, 16  ;;  %v3450_v54 = vshll.u32 %v10491_v4, 16  ;;  %5780 = vmatpush.bf16.msra.mxu1 %v11538_v50  ;;  %v10577_v3 = vld [vmem:[%s11815_s8 + $0x54] sm:$0xe] }
 0x1d5   : > { %15321 = vst [vmem:[#allocation10_spill] sm:$0xff] %v12786_v20  ;;  %v4061_v4 = vrot.slane %v10492_v0, 5 }
 0x1d6   : > { %v1480_v28 = vpop.f32.mrf.mxu2  ;;  %v3449_v31 = vrot.slane %v3447_v9, 4  ;;  %v10494_v9 = vld [vmem:[%s11815_s8 + $0x60] sm:$0xf] }
 0x1d7   : > { %v1529_v52 = vadd.f32 %v1480_v28, %v12281_v27  ;;  %v1795_v29 = vpop.f32.mrf.mxu3  ;;  %v3440_v27 = vrot.slane %v3439_v18, 4  ;;  %v3456_v28 = vshll.u32 %v10492_v0, 16 }
 0x1d8   : > { %v2480_v60 = vpop.f32.mrf.mxu0 }
 0x1d9   : > { %v1844_v53 = vadd.f32 %v1795_v29, %v1529_v52  ;;  %v4161_v29 = vunpack.c.l.b16 %v4055_v61  ;;  %v3458_v18 = vrot.slane %v3456_v28, 5  ;;  %v10593_v61 = vrot.slane %v10577_v3, 9 }
 0x1db   : > { %3180 = vmatmul.bf16.gmra.mxu2 %v11474_v19  ;;  %4288 = vmatmul.bf16.gmra.mxu0 %v4188_v23  ;;  %v12792_v34 = vadd.f32 %v2477_v41, %v1844_v53  ;;  %v3445_v41 = vsel %vm11839_vm2, %v3440_v27, %v3444_v8  ;;  %v4162_v19 = vunpack.c.l.b16 %v4058_v26  ;;  %v3735_v23 = vunpack.c.l.b16 %v3435_v57  ;;  %v11475_v27 = vld [vmem:[%s11815_s8 + $0x48] sm:$0xff] }
 0x1dc   : > { %3862 = vmatmul.bf16.gmra.mxu3 %v3762_v10  ;;  %v3736_v62 = vunpack.c.l.b16 %v3445_v41  ;;  %v3452_v10 = vrot.slane %v3450_v54, 5  ;;  %v3466_v57 = vshll.u32 %v10493_v13, 16  ;;  %v4064_v26 = vrot.slane %v10493_v13, 5 }
 0x1dd   : > { %15322 = vst [vmem:[#allocation11_spill] sm:$0xff] %v12792_v34  ;;  %v4189_v2 = vpack.c.b16 %v4162_v19, %v4161_v29  ;;  %v4062_v19 = vsel %vm12141_vm5, %v10593_v61, %v4061_v4 }
 0x1de   : > { %v1483_v56 = vpop.f32.mrf.mxu2  ;;  %v3763_v36 = vpack.c.b16 %v3736_v62, %v3735_v23  ;;  %v3468_v28 = vrot.slane %v3466_v57, 5  ;;  %v3471_v23 = vshrl.u32 %v10494_v9, 16 }
 0x1df   : > { %v1530_v12 = vadd.f32 %v1483_v56, %v12299_v14  ;;  %v1798_v21 = vpop.f32.mrf.mxu3  ;;  %v3460_v14 = vshrl.u32 %v10492_v0, 16 }
 0x1e0   : > { %v2482_v16 = vpop.f32.mrf.mxu0 }
 0x1e1   : > { %v1845_v42 = vadd.f32 %v1798_v21, %v1530_v12  ;;  %v3462_v63 = vrot.slane %v3460_v14, 4  ;;  %v3453_v12 = vor.u32 %v3452_v10, %v3449_v31  ;;  %v10495_v14 = vld [vmem:[%s11815_s8 + $0x64] sm:$0xf] }
 0x1e2   : > { %v3480_v10 = vshll.u32 %v10495_v14, 16 }
 0x1e3   : > { %v12808_v52 = vadd.f32 %v2480_v60, %v1845_v42  ;;  %v3463_v21 = vor.u32 %v3462_v63, %v3458_v18  ;;  %v3454_v42 = vrot.slane %v3453_v12, 4  ;;  %v3484_v63 = vshrl.u32 %v10495_v14, 16 }
 0x1e4   : > { %v3482_v12 = vrot.slane %v3480_v10, 5 }
 0x1e5   : > { %15323 = vst [vmem:[#allocation12_spill] sm:$0xff] %v12808_v52  ;;  %v3464_v54 = vrot.slane %v3463_v21, 4  ;;  %v3459_v13 = vsel %vm11839_vm2, %v3454_v42, %v3458_v18  ;;  %v3486_v21 = vrot.slane %v3484_v63, 4  ;;  %v11476_v18 = vld [vmem:[%s11815_s8 + $0x54] sm:$0xff] }
 0x1e6   : > { %v1485_v53 = vpop.f32.mrf.mxu2  ;;  %v3737_v3 = vunpack.c.l.b16 %v3459_v13 }
 0x1e7   : > { %v1531_v35 = vadd.f32 %v1485_v53, %v12314_v1  ;;  %v1800_v8 = vpop.f32.mrf.mxu3  ;;  %v4063_v1 = vrot.slane %v4061_v4, 4 }
 0x1e8   : > { %v2485_v60 = vpop.f32.mrf.mxu0 }
 0x1e9   : > { %v1846_v56 = vadd.f32 %v1800_v8, %v1531_v35  ;;  %v4065_v31 = vsel %vm12141_vm5, %v4063_v1, %v4064_v26  ;;  %v4163_v35 = vunpack.c.l.b16 %v4062_v19 }
 0x1eb   : > { %3185 = vmatmul.bf16.gmra.mxu2 %v11475_v27  ;;  %4293 = vmatmul.bf16.gmra.mxu0 %v4189_v2  ;;  %v12814_v41 = vadd.f32 %v2482_v16, %v1846_v56  ;;  %v3474_v16 = vshll.u32 %v10494_v9, 16  ;;  %v4164_v27 = vunpack.c.l.b16 %v4065_v31  ;;  %v3473_v2 = vrot.slane %v3471_v23, 4  ;;  %v10496_v56 = vld [vmem:[%s11815_s8 + $0x68] sm:$0x1] }
 0x1ec   : > { %3867 = vmatmul.bf16.gmra.mxu3 %v3763_v36  ;;  %v3490_v42 = vshll.u32 %v10496_v56, 16  ;;  %v4071_v63 = vrot.slane %v10496_v56, 5 }
 0x1ed   : > { %15324 = vst [vmem:[#allocation13_spill] sm:$0xff] %v12814_v41  ;;  %v3476_v36 = vrot.slane %v3474_v16, 5  ;;  %v4190_v26 = vpack.c.b16 %v4164_v27, %v4163_v35  ;;  %v13023_v41 = vld [vmem:[%s11815_s8 + $0xb0] sm:$0x1] }
 0x1ee   : > { %v1488_v50 = vpop.f32.mrf.mxu2  ;;  %v3492_v16 = vrot.slane %v3490_v42, 5 }
 0x1ef   : > { %v1532_v0 = vadd.f32 %v1488_v50, %v12338_v32  ;;  %v1803_v29 = vpop.f32.mrf.mxu3  ;;  %v3469_v32 = vsel %vm11839_vm2, %v3464_v54, %v3468_v28  ;;  %v3477_v9 = vor.u32 %v3476_v36, %v3473_v2  ;;  %v3487_v28 = vor.u32 %v3486_v21, %v3482_v12 }
 0x1f0   : > { %v2487_v62 = vpop.f32.mrf.mxu0  ;;  %v3738_v4 = vunpack.c.l.b16 %v3469_v32  ;;  %v4068_v50 = vrot.slane %v10495_v14, 5  ;;  %v10498_v32 = vld [vmem:[%s11815_s8 + $0x70] sm:$0xf] }
 0x1f1   : > { %v1847_v53 = vadd.f32 %v1803_v29, %v1532_v0  ;;  %v10578_v29 = vld [vmem:[%s11815_s8 + $0x60] sm:$0xe]  ;;  %v3478_v23 = vrot.slane %v3477_v9, 4 }
 0x1f2   : > { %v10594_v31 = vrot.slane %v10578_v29, 9  ;;  %v4070_v10 = vrot.slane %v4068_v50, 4  ;;  %v10499_v29 = vld [vmem:[%s11815_s8 + $0x74] sm:$0x1] }
 0x1f3   : > { %v12827_v8 = vadd.f32 %v2485_v60, %v1847_v53  ;;  %v3764_v60 = vpack.c.b16 %v3738_v4, %v3737_v3  ;;  %v10497_v53 = vld [vmem:[%s11815_s8 + $0x6c] sm:$0xf]  ;;  %v3483_v14 = vsel %vm11839_vm2, %v3478_v23, %v3482_v12  ;;  %v11537_v12 = vld [vmem:[%s15305_s3 + $0x50] sm:$0xff] }
 0x1f4   : > { %v4069_v36 = vsel %vm12141_vm5, %v10594_v31, %v4068_v50  ;;  %v4072_v3 = vsel %vm12141_vm5, %v4070_v10, %v4071_v63  ;;  %v3495_v4 = vshrl.u32 %v10497_v53, 16  ;;  %v3498_v21 = vshll.u32 %v10497_v53, 16  ;;  %5781 = vmatpush.bf16.msra.mxu1 %v11537_v12  ;;  %v10579_v63 = vld [vmem:[%s11815_s8 + $0x6c] sm:$0xe] }
 0x1f5   : > { %15325 = vst [vmem:[#allocation14_spill] sm:$0xff] %v12827_v8  ;;  %v4075_v53 = vrot.slane %v10498_v32, 5 }
 0x1f6   : > { %v1490_v57 = vpop.f32.mrf.mxu2  ;;  %v3497_v42 = vrot.slane %v3495_v4, 4  ;;  %v10500_v4 = vld [vmem:[%s11815_s8 + $0x78] sm:$0xf] }
 0x1f7   : > { %v1533_v61 = vadd.f32 %v1490_v57, %v12356_v11  ;;  %v1805_v1 = vpop.f32.mrf.mxu3  ;;  %v3488_v11 = vrot.slane %v3487_v28, 4  ;;  %v3504_v57 = vshll.u32 %v10498_v32, 16 }
 0x1f8   : > { %v2490_v54 = vpop.f32.mrf.mxu0 }
 0x1f9   : > { %v1848_v0 = vadd.f32 %v1805_v1, %v1533_v61  ;;  %v4165_v1 = vunpack.c.l.b16 %v4069_v36  ;;  %v3506_v28 = vrot.slane %v3504_v57, 5  ;;  %v10595_v36 = vrot.slane %v10579_v63, 9 }
 0x1fb   : > { %3190 = vmatmul.bf16.gmra.mxu2 %v11476_v18  ;;  %4298 = vmatmul.bf16.gmra.mxu0 %v4190_v26  ;;  %v12833_v19 = vadd.f32 %v2487_v62, %v1848_v0  ;;  %v3493_v62 = vsel %vm11839_vm2, %v3488_v11, %v3492_v16  ;;  %v4166_v18 = vunpack.c.l.b16 %v4072_v3  ;;  %v3739_v26 = vunpack.c.l.b16 %v3483_v14  ;;  %v11477_v11 = vld [vmem:[%s11815_s8 + $0x60] sm:$0xff] }
 0x1fc   : > { %3872 = vmatmul.bf16.gmra.mxu3 %v3764_v60  ;;  %v3740_v9 = vunpack.c.l.b16 %v3493_v62  ;;  %v3500_v60 = vrot.slane %v3498_v21, 5  ;;  %v3514_v14 = vshll.u32 %v10499_v29, 16  ;;  %v4078_v3 = vrot.slane %v10499_v29, 5 }
 0x1fd   : > { %15326 = vst [vmem:[#allocation15_spill] sm:$0xff] %v12833_v19  ;;  %v4191_v31 = vpack.c.b16 %v4166_v18, %v4165_v1  ;;  %v4076_v18 = vsel %vm12141_vm5, %v10595_v36, %v4075_v53  ;;  %v12979_v19 = vld [vmem:[%s11815_s8 + $0xac] sm:$0xf] }
 0x1fe   : > { %v1493_v13 = vpop.f32.mrf.mxu2  ;;  %v3765_v10 = vpack.c.b16 %v3740_v9, %v3739_v26  ;;  %v3516_v57 = vrot.slane %v3514_v14, 5  ;;  %v3519_v26 = vshrl.u32 %v10500_v4, 16  ;;  %v3522_v9 = vshll.u32 %v10500_v4, 16 }
 0x1ff   : > { %v1534_v35 = vadd.f32 %v1493_v13, %v12374_v55  ;;  %v1808_v27 = vpop.f32.mrf.mxu3  ;;  %v3508_v55 = vshrl.u32 %v10498_v32, 16 }
 0x200   : > { %v2492_v2 = vpop.f32.mrf.mxu0  ;;  %v3524_v63 = vrot.slane %v3522_v9, 5 }
 0x201   : > { %v1849_v56 = vadd.f32 %v1808_v27, %v1534_v35  ;;  %v3510_v50 = vrot.slane %v3508_v55, 4  ;;  %v3501_v35 = vor.u32 %v3500_v60, %v3497_v42  ;;  %v10501_v55 = vld [vmem:[%s11815_s8 + $0x7c] sm:$0xf] }
 0x202   : > { %v3528_v60 = vshll.u32 %v10501_v55, 16 }
 0x203   : > { %v12849_v61 = vadd.f32 %v2490_v54, %v1849_v56  ;;  %v3511_v27 = vor.u32 %v3510_v50, %v3506_v28  ;;  %v3502_v56 = vrot.slane %v3501_v35, 4  ;;  %v3532_v50 = vshrl.u32 %v10501_v55, 16  ;;  %v10502_v35 = vld [vmem:[%s11815_s8 + $0x80] sm:$0x1] }
 0x205   : > { %15327 = vst [vmem:[#allocation16_spill] sm:$0xff] %v12849_v61  ;;  %v3512_v21 = vrot.slane %v3511_v27, 4  ;;  %v3530_v27 = vrot.slane %v3528_v60, 5  ;;  %v3534_v14 = vrot.slane %v3532_v50, 4 }
 0x206   : > { %v1495_v0 = vpop.f32.mrf.mxu2 }
 0x207   : > { %v1535_v23 = vadd.f32 %v1495_v0, %v12389_v38  ;;  %v1810_v16 = vpop.f32.mrf.mxu3  ;;  %v4077_v38 = vrot.slane %v4075_v53, 4  ;;  %v12864_v0 = vpop.f32.mrf.mxu1 }
 0x208   : > { %v2495_v54 = vpop.f32.mrf.mxu0 }
 0x209   : > { %v1850_v13 = vadd.f32 %v1810_v16, %v1535_v23  ;;  %v4079_v42 = vsel %vm12141_vm5, %v4077_v38, %v4078_v3  ;;  %v3517_v23 = vsel %vm11839_vm2, %v3512_v21, %v3516_v57  ;;  %v4167_v16 = vunpack.c.l.b16 %v4076_v18  ;;  %v10580_v18 = vld [vmem:[%s11815_s8 + $0x78] sm:$0xe] }
 0x20a   : > { %v3538_v21 = vshll.u32 %v10502_v35, 16  ;;  %v10596_v50 = vrot.slane %v10580_v18, 9 }
 0x20b   : > { %3195 = vmatmul.bf16.gmra.mxu2 %v11477_v11  ;;  %4303 = vmatmul.bf16.gmra.mxu0 %v4191_v31  ;;  %v12855_v62 = vadd.f32 %v2492_v2, %v1850_v13  ;;  %v4168_v31 = vunpack.c.l.b16 %v4079_v42  ;;  %v3742_v13 = vunpack.c.l.b16 %v3517_v23  ;;  %v10503_v23 = vld [vmem:[%s11815_s8 + $0x84] sm:$0xf] }
 0x20c   : > { %3877 = vmatmul.bf16.gmra.mxu3 %v3765_v10  ;;  %v3521_v10 = vrot.slane %v3519_v26, 4  ;;  %v3540_v42 = vrot.slane %v3538_v21, 5 }
 0x20d   : > { %15328 = vst [vmem:[#allocation17_spill] sm:$0xff] %v12855_v62  ;;  %v4192_v4 = vpack.c.b16 %v4168_v31, %v4167_v16  ;;  %v10504_v31 = vld [vmem:[%s11815_s8 + $0x88] sm:$0xf] }
 0x20e   : > { %v1498_v12 = vpop.f32.mrf.mxu2 }
 0x20f   : > { %v1536_v32 = vadd.f32 %v1498_v12, %v12413_v22  ;;  %v1813_v1 = vpop.f32.mrf.mxu3  ;;  %v3507_v22 = vsel %vm11839_vm2, %v3502_v56, %v3506_v28  ;;  %v11478_v28 = vld [vmem:[%s11815_s8 + $0x6c] sm:$0xff]  ;;  %v3525_v56 = vor.u32 %v3524_v63, %v3521_v10  ;;  %v3535_v12 = vor.u32 %v3534_v14, %v3530_v27  ;;  %v12876_v26 = vpop.f32.mrf.mxu1 }
 0x210   : > { %v2497_v2 = vpop.f32.mrf.mxu0  ;;  %v3741_v53 = vunpack.c.l.b16 %v3507_v22  ;;  %v4085_v22 = vrot.slane %v10502_v35, 5  ;;  %v3543_v35 = vshrl.u32 %v10503_v23, 16 }
 0x211   : > { %v1851_v29 = vadd.f32 %v1813_v1, %v1536_v32  ;;  %v4082_v32 = vrot.slane %v10501_v55, 5  ;;  %v3536_v60 = vrot.slane %v3535_v12, 4 }
 0x212   : > { %v3545_v12 = vrot.slane %v3543_v35, 4 }
 0x213   : > { %v12870_v11 = vadd.f32 %v2495_v54, %v1851_v29  ;;  %v3766_v54 = vpack.c.b16 %v3742_v13, %v3741_v53  ;;  %v4084_v29 = vrot.slane %v4082_v32, 4  ;;  %v4083_v13 = vsel %vm12141_vm5, %v10596_v50, %v4082_v32 }
 0x214   : > { %v4089_v50 = vrot.slane %v10504_v31, 5 }
 0x215   : > { %15329 = vst [vmem:[#allocation18_spill] sm:$0xff] %v12870_v11  ;;  %v4086_v14 = vsel %vm12141_vm5, %v4084_v29, %v4085_v22  ;;  %v15332_v29 = vld [vmem:[#allocation3_spill] sm:$0xff] }
 0x216   : > { %v1500_v36 = vpop.f32.mrf.mxu2 }
 0x217   : > { %v1537_v38 = vadd.f32 %v1500_v36, %v12431_v25  ;;  %v1815_v3 = vpop.f32.mrf.mxu3  ;;  %v3526_v25 = vrot.slane %v3525_v56, 4 }
 0x218   : > { %v2500_v57 = vpop.f32.mrf.mxu0 }
 0x219   : > { %v1852_v1 = vadd.f32 %v1815_v3, %v1537_v38  ;;  %v3531_v63 = vsel %vm11839_vm2, %v3526_v25, %v3530_v27  ;;  %v3546_v38 = vshll.u32 %v10503_v23, 16  ;;  %v3556_v3 = vshrl.u32 %v10504_v31, 16  ;;  %v10506_v25 = vld [vmem:[%s11815_s8 + $0x90] sm:$0xf]  ;;  %v11479_v23 = vld [vmem:[%s11815_s8 + $0x78] sm:$0xff] }
 0x21a   : > { %v4169_v27 = vunpack.c.l.b16 %v4083_v13  ;;  %v3743_v56 = vunpack.c.l.b16 %v3531_v63  ;;  %v3567_v13 = vshrl.u32 %v10506_v25, 16 }
 0x21b   : > { %3200 = vmatmul.bf16.gmra.mxu2 %v11478_v28  ;;  %4308 = vmatmul.bf16.gmra.mxu0 %v4192_v4  ;;  %v12878_v9 = vadd.f32 %v2497_v2, %v1852_v1  ;;  %v3541_v2 = vsel %vm11839_vm2, %v3536_v60, %v3540_v42  ;;  %v4170_v4 = vunpack.c.l.b16 %v4086_v14  ;;  %v3548_v32 = vrot.slane %v3546_v38, 5  ;;  %v10505_v60 = vld [vmem:[%s11815_s8 + $0x8c] sm:$0x1] }
 0x21c   : > { %3882 = vmatmul.bf16.gmra.mxu3 %v3766_v54  ;;  %v3744_v21 = vunpack.c.l.b16 %v3541_v2  ;;  %v12893_v54 = vpop.f32.mrf.mxu1  ;;  %v3558_v18 = vrot.slane %v3556_v3, 4  ;;  %v12901_v2 = vld [vmem:[%s11815_s8 + $0x94] sm:$0xf]  ;;  %v3570_v14 = vshll.u32 %v10506_v25, 16 }
 0x21d   : > { %15330 = vst [vmem:[#allocation19_spill] sm:$0xff] %v12878_v9 }
 0x21e   : > { %v1503_v16 = vpop.f32.mrf.mxu2  ;;  %v3767_v63 = vpack.c.b16 %v3744_v21, %v3743_v56  ;;  %v3569_v56 = vrot.slane %v3567_v13, 4  ;;  %v3572_v21 = vrot.slane %v3570_v14, 5 }
 0x21f   : > { %v1538_v55 = vadd.f32 %v1503_v16, %v12449_v59  ;;  %v1818_v10 = vpop.f32.mrf.mxu3  ;;  %v3552_v59 = vshll.u32 %v10504_v31, 16  ;;  %v4193_v16 = vpack.c.b16 %v4170_v4, %v4169_v27  ;;  %v3576_v27 = vshll.u32 %v12901_v2, 16 }
 0x220   : > { %v2502_v53 = vpop.f32.mrf.mxu0  ;;  %v3580_v4 = vshrl.u32 %v12901_v2, 16  ;;  %v3573_v14 = vor.u32 %v3572_v21, %v3569_v56 }
 0x221   : > { %v1853_v36 = vadd.f32 %v1818_v10, %v1538_v55  ;;  %v3554_v1 = vrot.slane %v3552_v59, 5  ;;  %v10581_v55 = vld [vmem:[%s11815_s8 + $0x84] sm:$0xe]  ;;  %v3562_v59 = vshll.u32 %v10505_v60, 16 }
 0x222   : > { %v10597_v3 = vrot.slane %v10581_v55, 9  ;;  %v3578_v55 = vrot.slane %v3576_v27, 5 }
 0x223   : > { %v12891_v28 = vadd.f32 %v2500_v57, %v1853_v36  ;;  %v3549_v36 = vor.u32 %v3548_v32, %v3545_v12  ;;  %v3559_v38 = vor.u32 %v3558_v18, %v3554_v1  ;;  %v3564_v12 = vrot.slane %v3562_v59, 5 }
 0x224   : > { %v4090_v18 = vsel %vm12141_vm5, %v10597_v3, %v4089_v50 }
 0x225   : > { %15331 = vst [vmem:[#allocation20_spill] sm:$0xff] %v12891_v28  ;;  %v4091_v28 = vrot.slane %v4089_v50, 4  ;;  %v3550_v25 = vrot.slane %v3549_v36, 4  ;;  %v12918_v50 = vld [vmem:[%s15304_s2] ss:$0 sm:$0xff] }
 0x226   : > { %v1505_v42 = vpop.f32.mrf.mxu2 }
 0x227   : > { %v1539_v57 = vadd.f32 %v1505_v42, %v15332_v29  ;;  %v1820_v22 = vpop.f32.mrf.mxu3  ;;  %v4092_v42 = vrot.slane %v10505_v60, 5  ;;  %v3560_v29 = vrot.slane %v3559_v38, 4  ;;  %v3555_v36 = vsel %vm11839_vm2, %v3550_v25, %v3554_v1 }
 0x228   : > { %v4274_v10 = vpop.f32.mrf.mxu0  ;;  %v3745_v56 = vunpack.c.l.b16 %v3555_v36 }
 0x229   : > { %v1854_v35 = vadd.f32 %v1820_v22, %v1539_v57  ;;  %v12909_v57 = vpop.f32.mrf.mxu1  ;;  %v3565_v38 = vsel %vm11839_vm2, %v3560_v29, %v3564_v12 }
 0x22a   : > { %v3746_v21 = vunpack.c.l.b16 %v3565_v38  ;;  %v11480_v38 = vld [vmem:[%s11815_s8 + $0x84] sm:$0xff] }
 0x22b   : > { %3205 = vmatmul.bf16.gmra.mxu2 %v11479_v23  ;;  %4313 = vmatmul.bf16.gmra.mxu0 %v4193_v16  ;;  %v12903_v31 = vadd.f32 %v2502_v53, %v1854_v35  ;;  %v15334_v53 = vld [vmem:[#allocation4_spill] sm:$0xff]  ;;  %v4093_v23 = vsel %vm12141_vm5, %v4091_v28, %v4092_v42  ;;  %v10508_v16 = vld [vmem:[%s11815_s8 + $0x98] sm:$0x1]  ;;  %v4171_v28 = vunpack.c.l.b16 %v4090_v18  ;;  %v10509_v42 = vld [vmem:[%s11815_s8 + $0x9c] sm:$0xf] }
 0x22c   : > { %3887 = vmatmul.bf16.gmra.mxu3 %v3767_v63  ;;  %v3582_v63 = vrot.slane %v3580_v4, 4  ;;  %v4172_v59 = vunpack.c.l.b16 %v4093_v23  ;;  %v3586_v3 = vshll.u32 %v10508_v16, 16  ;;  %v3591_v25 = vshrl.u32 %v10509_v42, 16 }
 0x22d   : > { %15333 = vst [vmem:[#allocation3_spill] sm:$0xff] %v12903_v31  ;;  %v3594_v31 = vshll.u32 %v10509_v42, 16  ;;  %v4099_v62 = vrot.slane %v10508_v16, 5 }
 0x22e   : > { %v3166_v32 = vpop.f32.mrf.mxu2  ;;  %v3583_v4 = vor.u32 %v3582_v63, %v3578_v55  ;;  %v4194_v12 = vpack.c.b16 %v4172_v59, %v4171_v28  ;;  %v3588_v18 = vrot.slane %v3586_v3, 5  ;;  %v3593_v61 = vrot.slane %v3591_v25, 4 }
 0x22f   : > { %v3246_v22 = vadd.f32 %v3166_v32, %v15334_v53  ;;  %v3848_v60 = vpop.f32.mrf.mxu3  ;;  %v12926_v32 = vld [vmem:[%s11815_s8 + $0xa0] sm:$0xf]  ;;  %v3574_v53 = vrot.slane %v3573_v14, 4 }
 0x230   : > { %v4276_v13 = vpop.f32.mrf.mxu0  ;;  %v3600_v23 = vshll.u32 %v12926_v32, 16  ;;  %v3584_v14 = vrot.slane %v3583_v4, 4 }
 0x231   : > { %v3928_v35 = vadd.f32 %v3848_v60, %v3246_v22  ;;  %v10582_v22 = vld [vmem:[%s11815_s8 + $0x90] sm:$0xe]  ;;  %v4096_v60 = vrot.slane %v12901_v2, 5  ;;  %v3768_v2 = vpack.c.b16 %v3746_v21, %v3745_v56  ;;  %v12937_v28 = vpop.f32.mrf.mxu1  ;;  %v12946_v56 = vld [vmem:[%s11815_s8 + $0xa4] sm:$0x1] }
 0x232   : > { %v10598_v9 = vrot.slane %v10582_v22, 9 }
 0x233   : > { %v4354_v27 = vadd.f32 %v4274_v10, %v3928_v35  ;;  %v3604_v10 = vshrl.u32 %v12926_v32, 16  ;;  %v4098_v42 = vrot.slane %v4096_v60, 4 }
 0x234   : > { %v4097_v16 = vsel %vm12141_vm5, %v10598_v9, %v4096_v60  ;;  %v4813_v9 = vld [vmem:[#allocation2 + $0xc] sm:$0xf] }
 0x235   : > { %v4390_v1 = vadd.f32 %v12918_v50, %v4354_v27  ;;  %v3579_v27 = vsel %vm11839_vm2, %v3574_v53, %v3578_v55  ;;  %v3606_v4 = vrot.slane %v3604_v10, 4  ;;  %v3589_v55 = vsel %vm11839_vm2, %v3584_v14, %v3588_v18 }
 0x236   : > { %v3168_v29 = vpop.f32.mrf.mxu2  ;;  %v12948_v21 = vunpack.c.l.b16 %v3579_v27  ;;  %v4173_v10 = vunpack.c.l.b16 %v4097_v16 }
 0x237   : > { %v4422_v63 = vmax.f32 %v4390_v1, 0.0  ;;  %v3247_v35 = vadd.f32 %v3168_v29, %v12509_v49  ;;  %v3850_v36 = vpop.f32.mrf.mxu3  ;;  %v3596_v1 = vrot.slane %v3594_v31, 5  ;;  %v12939_v49 = vrot.slane %v3600_v23, 5 }
 0x238   : > { %v4279_v11 = vpop.f32.mrf.mxu0  ;;  %v4100_v31 = vsel %vm12141_vm5, %v4098_v42, %v4099_v62  ;;  %v12961_v23 = vunpack.c.l.b16 %v3589_v55  ;;  %v10583_v42 = vld [vmem:[%s11815_s8 + $0x9c] sm:$0xe] }
 0x239   : > { %v4454_v59 = vpack.c.bf16 %v4422_v63, %v4422_v63  ;;  %v3929_v3 = vadd.f32 %v3850_v36, %v3247_v35  ;;  %v3607_v62 = vor.u32 %v3606_v4, %v12939_v49  ;;  %v3610_v63 = vshll.u32 %v12946_v56, 16  ;;  %v15337_v36 = vld [vmem:[#allocation5_spill] sm:$0xff] }
 0x23a   : > { %v3769_v55 = vpack.c.b16 %v12961_v23, %v12948_v21 }
 0x23b   : > { %v4490_v22 = vshrl.u32 %v4454_v59, 16  ;;  %v4355_v29 = vadd.f32 %v4276_v13, %v3929_v3  ;;  %3210 = vmatmul.bf16.gmra.mxu2 %v11480_v38  ;;  %4318 = vmatmul.bf16.gmra.mxu0 %v4194_v12  ;;  %v4493_v25 = vshll.u32 %v4454_v59, 16  ;;  %v3597_v12 = vor.u32 %v3596_v1, %v3593_v61 }
 0x23c   : > { %3892 = vmatmul.bf16.gmra.mxu3 %v3768_v2  ;;  %v4174_v2 = vunpack.c.l.b16 %v4100_v31  ;;  %v4103_v59 = vrot.slane %v12926_v32, 5  ;;  %v3608_v16 = vrot.slane %v3607_v62, 4  ;;  %v3612_v31 = vrot.slane %v3610_v63, 5 }
 0x23d   : > { %v12952_v53 = vrot.slane %v4490_v22, 7  ;;  %v4391_v13 = vadd.f32 %v12918_v50, %v4355_v29  ;;  %v3598_v22 = vrot.slane %v3597_v12, 4  ;;  %v10512_v29 = vld [vmem:[%s11815_s8 + $0xa8] sm:$0xf] }
 0x23e   : > { %v3171_v60 = vpop.f32.mrf.mxu2  ;;  %v4195_v32 = vpack.c.b16 %v4174_v2, %v4173_v10  ;;  %v3615_v12 = vshrl.u32 %v10512_v29, 16 }
 0x23f   : > { %v4495_v35 = vor.u32 %v4493_v25, %v12952_v53  ;;  %v4423_v61 = vmax.f32 %v4391_v13, 0.0  ;;  %v3248_v38 = vadd.f32 %v3171_v60, %v15337_v36  ;;  %v3853_v14 = vpop.f32.mrf.mxu3  ;;  %v12976_v25 = vpop.f32.mrf.mxu1  ;;  %v10599_v36 = vrot.slane %v10583_v42, 9 }
 0x240   : > { %v12967_v27 = vpop.f32.mrf.mxu0  ;;  %v4496_v10 = vrot.slane %v12952_v53, 4  ;;  %v3613_v42 = vsel %vm11839_vm2, %v3608_v16, %v3612_v31  ;;  %v3617_v31 = vrot.slane %v3615_v12, 4 }
 0x241   : > { %v4814_v3 = vsel %vm12957_vm8, %v4495_v35, %v4813_v9  ;;  %v4455_v1 = vpack.c.bf16 %v4423_v61, %v4423_v61  ;;  %v3930_v4 = vadd.f32 %v3853_v14, %v3248_v38  ;;  %v4105_v9 = vrot.slane %v4103_v59, 4  ;;  %v4819_v14 = vld [vmem:[#allocation2 + $0x14] sm:$0x1] }
 0x242   : > { %4815 = vst [vmem:[#allocation2 + $0xc] sm:$0xf] %v4814_v3  ;;  %v4106_v35 = vrot.slane %v12946_v56, 5  ;;  %v3618_v61 = vshll.u32 %v10512_v29, 16  ;;  %v3603_v56 = vsel %vm11839_vm2, %v3598_v22, %v12939_v49  ;;  %v3624_v3 = vshll.u32 %v12979_v19, 16 }
 0x243   : > { %v4498_v13 = vshrl.u32 %v4455_v1, 16  ;;  %v4356_v60 = vadd.f32 %v4279_v11, %v3930_v4  ;;  %v4501_v23 = vshll.u32 %v4455_v1, 16  ;;  %v11536_v11 = vld [vmem:[%s15305_s3 + $0x48] sm:$0xff]  ;;  %v3628_v1 = vshrl.u32 %v12979_v19, 16 }
 0x244   : > { %5782 = vmatpush.bf16.msra.mxu1 %v11536_v11  ;;  %v13012_v8 = vsel %vm12141_vm5, %v10599_v36, %v4103_v59  ;;  %v13016_v16 = vsel %vm12141_vm5, %v4105_v9, %v4106_v35  ;;  %v13025_v59 = vunpack.c.l.b16 %v3603_v56  ;;  %v13027_v36 = vunpack.c.l.b16 %v3613_v42  ;;  %v13032_v35 = vld [vmem:[%s11815_s8 + $0xa8] sm:$0xe]  ;;  %v4822_v56 = vld [vmem:[#allocation2 + $0x18] sm:$0xf] }
 0x245   : > { %v4500_v21 = vrot.slane %v4498_v13, 7  ;;  %v4392_v62 = vadd.f32 %v12918_v50, %v4356_v60  ;;  %v11481_v13 = vld [vmem:[%s11815_s8 + $0x90] sm:$0xff]  ;;  %v13029_v9 = vrot.slane %v3624_v3, 5  ;;  %v4175_v42 = vunpack.c.l.b16 %v13012_v8 }
 0x246   : > { %v3173_v2 = vpop.f32.mrf.mxu2  ;;  %v4176_v3 = vunpack.c.l.b16 %v13016_v16  ;;  %v4110_v8 = vrot.slane %v12979_v19, 5  ;;  %v13051_v16 = vld [vmem:[%s11815_s8 + $0xb8] sm:$0xf] }
 0x247   : > { %v4503_v4 = vor.u32 %v4501_v23, %v4500_v21  ;;  %v4505_v29 = vrot.slane %v4500_v21, 4  ;;  %v4424_v49 = vmax.f32 %v4392_v62, 0.0  ;;  %v3249_v53 = vadd.f32 %v3173_v2, %v12543_v30  ;;  %v3855_v22 = vpop.f32.mrf.mxu3 }
 0x248   : > { %v13008_v60 = vpop.f32.mrf.mxu0  ;;  %v3620_v21 = vrot.slane %v3618_v61, 5 }
 0x249   : > { %v4927_v23 = vld [vmem:[#allocation2 + $0xc] sm:$0x2]  ;;  %v4504_v62 = vsel %vm12998_vm13, %v4496_v10, %v4503_v4  ;;  %v4820_v30 = vsel %vm12984_vm12, %v4505_v29, %v4819_v14  ;;  %v4456_v11 = vpack.c.bf16 %v4424_v49, %v4424_v49  ;;  %v3931_v2 = vadd.f32 %v3855_v22, %v3249_v53  ;;  %v5007_v12 = vld [vmem:[#allocation2 + $0xc] sm:$0x1]  ;;  %v13039_v29 = vpop.f32.mrf.mxu1 }
 0x24a   : > { %v10652_v52 = vrot.slane %v4927_v23, 9  ;;  %4816 = vst [vmem:[#allocation2 + $0x10] sm:$0xf] %v4504_v62  ;;  %v3630_v14 = vrot.slane %v3628_v1, 4  ;;  %v3634_v1 = vshll.u32 %v13023_v41, 16  ;;  %v3621_v22 = vor.u32 %v3620_v21, %v3617_v31 }
 0x24b   : > { %4821 = vst [vmem:[#allocation2 + $0x14] sm:$0x1] %v4820_v30  ;;  %v4507_v61 = vshrl.u32 %v4456_v11, 16  ;;  %v4357_v10 = vadd.f32 %v12967_v27, %v3931_v2  ;;  %3215 = vmatmul.bf16.gmra.mxu2 %v11481_v13  ;;  %4323 = vmatmul.bf16.gmra.mxu0 %v4195_v32  ;;  %v4510_v27 = vshll.u32 %v4456_v11, 16  ;;  %v10515_v13 = vld [vmem:[%s11815_s8 + $0xb4] sm:$0xf] }
 0x24c   : > { %v5008_v4 = vsel %vm12984_vm12, %v10652_v52, %v5007_v12  ;;  %3897 = vmatmul.bf16.gmra.mxu3 %v3769_v55  ;;  %v10600_v55 = vrot.slane %v13032_v35, 9  ;;  %v3631_v2 = vor.u32 %v3630_v14, %v13029_v9  ;;  %v3648_v31 = vshll.u32 %v13051_v16, 16 }
 0x24d   : > { %5009 = vst [vmem:[#allocation2 + $0xc] sm:$0x1] %v5008_v4  ;;  %v13041_v49 = vrot.slane %v4507_v61, 7  ;;  %v4393_v32 = vadd.f32 %v12918_v50, %v4357_v10  ;;  %v3639_v61 = vshrl.u32 %v10515_v13, 16  ;;  %v3642_v10 = vshll.u32 %v10515_v13, 16 }
 0x24e   : > { %v3176_v53 = vpop.f32.mrf.mxu2  ;;  %v3652_v21 = vshrl.u32 %v13051_v16, 16  ;;  %v3636_v13 = vrot.slane %v3634_v1, 5  ;;  %v4112_v52 = vrot.slane %v4110_v8, 4  ;;  %v3632_v5 = vrot.slane %v3631_v2, 4  ;;  %v4826_v2 = vld [vmem:[#allocation2 + $0x20] sm:$0x1] }
 0x24f   : > { %v4512_v23 = vor.u32 %v4510_v27, %v13041_v49  ;;  %v4425_v62 = vmax.f32 %v4393_v32, 0.0  ;;  %v3250_v30 = vadd.f32 %v3176_v53, %v12566_v48  ;;  %v3858_v11 = vpop.f32.mrf.mxu3  ;;  %v4113_v27 = vrot.slane %v13023_v41, 5 }
 0x250   : > { %v13056_v12 = vpop.f32.mrf.mxu0  ;;  %v3622_v53 = vrot.slane %v3621_v22, 4  ;;  %v3641_v47 = vrot.slane %v3639_v61, 4  ;;  %v4196_v22 = vpack.c.b16 %v4176_v3, %v4175_v42 }
 0x251   : > { %v5055_v35 = vld [vmem:[#allocation2 + $0x10] sm:$0x8]  ;;  %v4823_v48 = vsel %vm12957_vm8, %v4512_v23, %v4822_v56  ;;  %v4457_v4 = vpack.c.bf16 %v4425_v62, %v4425_v62  ;;  %v3932_v14 = vadd.f32 %v3858_v11, %v3250_v30  ;;  %v3644_v56 = vrot.slane %v3642_v10, 5  ;;  %v13076_v11 = vld [vmem:[%s11815_s8 + $0xbc] sm:$0x1] }
 0x252   : > { %v10668_v32 = vrot.slane %v5055_v35, 11  ;;  %4824 = vst [vmem:[#allocation2 + $0x18] sm:$0xf] %v4823_v48  ;;  %v5136_v34 = vld [vmem:[#allocation2 + $0x14] sm:$0x1]  ;;  %v13072_v23 = vrot.slane %v3648_v31, 5  ;;  %v4111_v10 = vsel %vm12141_vm5, %v10600_v55, %v4110_v8 }
 0x253   : > { %v4515_v20 = vshrl.u32 %v4457_v4, 16  ;;  %v4358_v46 = vadd.f32 %v13008_v60, %v3932_v14  ;;  %v3654_v62 = vrot.slane %v3652_v21, 4  ;;  %v4518_v30 = vshll.u32 %v4457_v4, 16  ;;  %v11482_v21 = vld [vmem:[%s11815_s8 + $0x9c] sm:$0xff] }
 0x254   : > { %v5137_v33 = vsel %vm13062_vm14, %v10668_v32, %v5136_v34  ;;  %v4513_v60 = vrot.slane %v13041_v49, 4  ;;  %v3627_v34 = vsel %vm11839_vm2, %v3622_v53, %v13029_v9  ;;  %v3637_v9 = vsel %vm11839_vm2, %v3632_v5, %v3636_v13  ;;  %v11535_v5 = vld [vmem:[%s15305_s3 + $0x40] sm:$0xff]  ;;  %v10585_v13 = vld [vmem:[%s11815_s8 + $0xb4] sm:$0xe] }
 0x255   : > { %5138 = vst [vmem:[#allocation2 + $0x14] sm:$0x1] %v5137_v33  ;;  %v4517_v41 = vrot.slane %v4515_v20, 7  ;;  %v4394_v1 = vadd.f32 %v12918_v50, %v4358_v46  ;;  %v4114_v33 = vsel %vm12141_vm5, %v4112_v52, %v4113_v27  ;;  %v13086_v20 = vpop.f32.mrf.mxu1  ;;  %v3645_v48 = vor.u32 %v3644_v56, %v3641_v47  ;;  %5783 = vmatpush.bf16.msra.mxu1 %v11535_v5 }
 0x256   : > { %v3178_v61 = vpop.f32.mrf.mxu2  ;;  %v3655_v55 = vor.u32 %v3654_v62, %v13072_v23  ;;  %v3658_v52 = vshll.u32 %v13076_v11, 16  ;;  %v13103_v47 = vunpack.c.l.b16 %v3627_v34  ;;  %v4177_v53 = vunpack.c.l.b16 %v4111_v10 }
 0x257   : > { %v4520_v46 = vor.u32 %v4518_v30, %v4517_v41  ;;  %v4522_v42 = vrot.slane %v4517_v41, 4  ;;  %v4426_v3 = vmax.f32 %v4394_v1, 0.0  ;;  %v3251_v31 = vadd.f32 %v3178_v61, %v12580_v17  ;;  %v3860_v49 = vpop.f32.mrf.mxu3 }
 0x258   : > { %v13090_v35 = vpop.f32.mrf.mxu0  ;;  %v13107_v30 = vunpack.c.l.b16 %v3637_v9  ;;  %v4117_v1 = vrot.slane %v13051_v16, 5  ;;  %v4178_v61 = vunpack.c.l.b16 %v4114_v33  ;;  %v3646_v34 = vrot.slane %v3645_v48, 4  ;;  %v5201_v48 = vld [vmem:[#allocation2 + $0xc] sm:$0xf] }
 0x259   : > { %v4928_v8 = vld [vmem:[#allocation2 + $0x18] sm:$0x2]  ;;  %v4521_v4 = vsel %vm12998_vm13, %v4513_v60, %v4520_v46  ;;  %v4827_v17 = vsel %vm12984_vm12, %v4522_v42, %v4826_v2  ;;  %v4458_v14 = vpack.c.bf16 %v4426_v3, %v4426_v3  ;;  %v3933_v27 = vadd.f32 %v3860_v49, %v3251_v31  ;;  %v5010_v56 = vld [vmem:[#allocation2 + $0x18] sm:$0x1]  ;;  %v4829_v3 = vld [vmem:[#allocation2 + $0x24] sm:$0xf] }
 0x25a   : > { %v10653_v32 = vrot.slane %v4928_v8, 9  ;;  %4825 = vst [vmem:[#allocation2 + $0x1c] sm:$0xf] %v4521_v4  ;;  %v15344_v2 = vpack.c.b16 %v13027_v36, %v13025_v59  ;;  %v3660_v10 = vrot.slane %v3658_v52, 5  ;;  %v3656_v42 = vrot.slane %v3655_v55, 4 }
 0x25b   : > { %4828 = vst [vmem:[#allocation2 + $0x20] sm:$0x1] %v4827_v17  ;;  %v4524_v62 = vshrl.u32 %v4458_v14, 16  ;;  %v4359_v41 = vadd.f32 %v13056_v12, %v3933_v27  ;;  %3220 = vmatmul.bf16.gmra.mxu2 %v11482_v21  ;;  %4328 = vmatmul.bf16.gmra.mxu0 %v4196_v22  ;;  %v4527_v12 = vshll.u32 %v4458_v14, 16  ;;  %v10601_v31 = vrot.slane %v10585_v13, 9 }
 0x25c   : > { %v5011_v60 = vsel %vm12984_vm12, %v10653_v32, %v5010_v56  ;;  %3902 = vmatmul.bf16.gmra.mxu3 %v15344_v2  ;;  %v4120_v49 = vrot.slane %v13076_v11, 5  ;;  %v4119_v9 = vrot.slane %v4117_v1, 4  ;;  %v3771_v8 = vpack.c.b16 %v13107_v30, %v13103_v47  ;;  %v13136_v13 = vld [vmem:[#allocation2 + $0x10] sm:$0xf] }
 0x25d   : > { %5012 = vst [vmem:[#allocation2 + $0x18] sm:$0x1] %v5011_v60  ;;  %v13115_v46 = vrot.slane %v4524_v62, 7  ;;  %v4395_v22 = vadd.f32 %v12918_v50, %v4359_v41  ;;  %v13125_v4 = vpack.c.b16 %v4178_v61, %v4177_v53  ;;  %v3651_v55 = vsel %vm11839_vm2, %v3646_v34, %v13072_v23  ;;  %v13130_v11 = vpop.f32.mrf.mxu1 }
 0x25e   : > { %v3181_v16 = vpop.f32.mrf.mxu2  ;;  %v3661_v5 = vsel %vm11839_vm2, %v3656_v42, %v3660_v10  ;;  %v13140_v56 = vsel %vm12141_vm5, %v10601_v31, %v4117_v1  ;;  %v5288_v23 = vshrl.u32 %v5201_v48, 16  ;;  %v5291_v62 = vshll.u32 %v5201_v48, 16 }
 0x25f   : > { %v4529_v21 = vor.u32 %v4527_v12, %v13115_v46  ;;  %v4427_v59 = vmax.f32 %v4395_v22, 0.0  ;;  %v3252_v36 = vadd.f32 %v3181_v16, %v12603_v44  ;;  %v3863_v33 = vpop.f32.mrf.mxu3  ;;  %v13143_v61 = vunpack.c.l.b16 %v3651_v55  ;;  %v4833_v22 = vld [vmem:[#allocation2 + $0x2c] sm:$0x1] }
 0x260   : > { %v13121_v52 = vpop.f32.mrf.mxu0  ;;  %v4121_v34 = vsel %vm12141_vm5, %v4119_v9, %v4120_v49  ;;  %v13149_v1 = vunpack.c.l.b16 %v3661_v5  ;;  %v5297_v42 = vshll.u32 %v13136_v13, 16  ;;  %v4179_v49 = vunpack.c.l.b16 %v13140_v56 }
 0x261   : > { %v5056_v17 = vld [vmem:[#allocation2 + $0x1c] sm:$0x8]  ;;  %v4830_v44 = vsel %vm12957_vm8, %v4529_v21, %v4829_v3  ;;  %v4459_v27 = vpack.c.bf16 %v4427_v59, %v4427_v59  ;;  %v3934_v32 = vadd.f32 %v3863_v33, %v3252_v36  ;;  %v5301_v3 = vshrl.u32 %v13136_v13, 16  ;;  %v13156_v21 = vld [vmem:[%s11815_s8 + $0xc0] sm:$0xf] }
 0x262   : > { %v5186_v14 = vld [vmem:[#allocation2 + $0x1c] sm:$0xf]  ;;  %v10669_v53 = vrot.slane %v5056_v17, 11  ;;  %v5139_v41 = vld [vmem:[#allocation2 + $0x20] sm:$0x1]  ;;  %v4530_v59 = vrot.slane %v13115_v46, 4  ;;  %v4180_v33 = vunpack.c.l.b16 %v4121_v34 }
 0x263   : > { %5189 = vst [vmem:[#allocation2 + $0x4] sm:$0xf] %v5186_v14  ;;  %v4532_v60 = vshrl.u32 %v4459_v27, 16  ;;  %v4360_v2 = vadd.f32 %v13090_v35, %v3934_v32  ;;  %v4535_v35 = vshll.u32 %v4459_v27, 16  ;;  %v13159_v9 = vrot.slane %v5288_v23, 4  ;;  %v11483_v32 = vld [vmem:[%s11815_s8 + $0xa8] sm:$0xff] }
 0x264   : > { %4831 = vst [vmem:[#allocation2 + $0x24] sm:$0xf] %v4830_v44  ;;  %v5185_v10 = vld [vmem:[#allocation2 + $0x18] sm:$0xf]  ;;  %v5140_v12 = vsel %vm13062_vm14, %v10669_v53, %v5139_v41  ;;  %v13161_v48 = vrot.slane %v5291_v62, 5  ;;  %v3663_v56 = vshrl.u32 %v13156_v21, 16 }
 0x265   : > { %5188 = vst [vmem:[#allocation2] sm:$0xf] %v5185_v10  ;;  %v4534_v16 = vrot.slane %v4532_v60, 7  ;;  %v4396_v31 = vadd.f32 %v12918_v50, %v4360_v2  ;;  %v13168_v53 = vld [vmem:[%s11815_s8 + $0xc4] sm:$0xf]  ;;  %v3666_v46 = vshll.u32 %v13156_v21, 16  ;;  %v2939_v10 = vadd.f32 %v12864_v0, %v12640_v24 }
 0x266   : > { %5141 = vst [vmem:[#allocation2 + $0x20] sm:$0x1] %v5140_v12  ;;  %v3183_v36 = vpop.f32.mrf.mxu2  ;;  %v13172_v41 = vrot.slane %v5297_v42, 5  ;;  %v13174_v23 = vrot.slane %v5301_v3, 4  ;;  %v13186_v12 = vadd.f32 %v12876_v26, %v12653_v51  ;;  %v13190_v42 = vadd.f32 %v12893_v54, %v12677_v7  ;;  %v11534_v51 = vld [vmem:[%s15305_s3 + $0x38] sm:$0xff] }
 0x267   : > { %v4537_v55 = vor.u32 %v4535_v35, %v4534_v16  ;;  %v4539_v17 = vrot.slane %v4534_v16, 4  ;;  %v4428_v14 = vmax.f32 %v4396_v31, 0.0  ;;  %v3253_v44 = vadd.f32 %v3183_v36, %v12617_v15  ;;  %v3865_v27 = vpop.f32.mrf.mxu3  ;;  %v13196_v35 = vpop.f32.mrf.mxu1  ;;  %v4836_v26 = vld [vmem:[#allocation2 + $0x30] sm:$0xf]  ;;  %v11550_v54 = vld [vmem:[%s15305_s3 + $0xb8] sm:$0xff]  ;;  %6009 = vmatpush.bf16.msrb.mxu2 %v11534_v51 }
 0x268   : > { %v13165_v5 = vpop.f32.mrf.mxu0  ;;  %v13194_v3 = vadd.f32 %v12909_v57, %v12687_v45  ;;  %15345 = vst [vmem:[#allocation4_spill] sm:$0xff] %v13196_v35  ;;  %v3672_v7 = vshll.u32 %v13168_v53, 16  ;;  %6387 = vmatpush.bf16.msrb.mxu3 %v11550_v54 }
 0x269   : > { %v4538_v62 = vsel %vm12998_vm13, %v4530_v59, %v4537_v55  ;;  %v4834_v15 = vsel %vm12984_vm12, %v4539_v17, %v4833_v22  ;;  %v4460_v60 = vpack.c.bf16 %v4428_v14, %v4428_v14  ;;  %v3935_v2 = vadd.f32 %v3865_v27, %v3253_v44  ;;  %v13224_v17 = vld [vmem:[%s11815_s8 + $0xc8] sm:$0x1] }
 0x26a   : > { %v13180_v34 = vld [vmem:[#allocation2 + $0x4] sm:$0xf]  ;;  %4832 = vst [vmem:[#allocation2 + $0x28] sm:$0xf] %v4538_v62  ;;  %v3676_v59 = vshrl.u32 %v13168_v53, 16  ;;  %v13228_v27 = vrot.slane %v3663_v56, 4 }
 0x26b   : > { %v4929_v22 = vld [vmem:[#allocation2 + $0x24] sm:$0x2]  ;;  %v5013_v16 = vld [vmem:[#allocation2 + $0x24] sm:$0x1]  ;;  %4835 = vst [vmem:[#allocation2 + $0x2c] sm:$0x1] %v4834_v15  ;;  %v4361_v0 = vadd.f32 %v13121_v52, %v3935_v2  ;;  %3225 = vmatmul.bf16.gmra.mxu2 %v11483_v32  ;;  %4333 = vmatmul.bf16.gmra.mxu0 %v13125_v4  ;;  %v13212_v52 = vpack.c.b16 %v4180_v33, %v4179_v49 }
 0x26c   : > { %v10654_v31 = vrot.slane %v4929_v22, 9  ;;  %v4541_v24 = vshrl.u32 %v4460_v60, 16  ;;  %v4544_v45 = vshll.u32 %v4460_v60, 16  ;;  %3907 = vmatmul.bf16.gmra.mxu3 %v3771_v8  ;;  %v11574_v4 = vld [vmem:[%s15305_s3 + $0xf8] sm:$0xff]  ;;  %v5199_v21 = vld [vmem:[#allocation2] sm:$0xf] }
 0x26d   : > { %v4397_v8 = vadd.f32 %v12918_v50, %v4361_v0  ;;  %v5187_v36 = vld [vmem:[#allocation2 + $0x20] sm:$0x1]  ;;  %v5264_v55 = vshrl.u32 %v5199_v21, 16  ;;  %6701 = vmatpush.bf16.msrb.mxu0 %v11574_v4  ;;  %v5267_v33 = vshll.u32 %v5199_v21, 16  ;;  %v5273_v14 = vshll.u32 %v13180_v34, 16 }
 0x26e   : > { %v5014_v47 = vsel %vm12984_vm12, %v10654_v31, %v5013_v16  ;;  %v13220_v30 = vrot.slane %v4541_v24, 7  ;;  %v3186_v49 = vpop.f32.mrf.mxu2  ;;  %v5277_v44 = vshrl.u32 %v13180_v34, 16  ;;  %5190 = vst [vmem:[#allocation2 + $0x8] sm:$0x1] %v5187_v36  ;;  %v3668_v2 = vrot.slane %v3666_v46, 5 }
 0x26f   : > { %5015 = vst [vmem:[#allocation2 + $0x24] sm:$0x1] %v5014_v47  ;;  %v4429_v62 = vmax.f32 %v4397_v8, 0.0  ;;  %v3254_v15 = vadd.f32 %v3186_v49, %v2939_v10  ;;  %v3868_v60 = vpop.f32.mrf.mxu3  ;;  %v5266_v16 = vrot.slane %v5264_v55, 4  ;;  %v5269_v31 = vrot.slane %v5267_v33, 5 }
 0x270   : > { %v4546_v32 = vor.u32 %v4544_v45, %v13220_v30  ;;  %v13231_v22 = vpop.f32.mrf.mxu0  ;;  %v13233_v24 = vrot.slane %v3672_v7, 5  ;;  %v3682_v0 = vshll.u32 %v13224_v17, 16  ;;  %v3678_v45 = vrot.slane %v3676_v59, 4  ;;  %v13238_v10 = vld [vmem:[#allocation2 + $0x14] sm:$0x1] }
 0x271   : > { %v5057_v51 = vld [vmem:[#allocation2 + $0x28] sm:$0x8]  ;;  %v4461_v54 = vpack.c.bf16 %v4429_v62, %v4429_v62  ;;  %v3936_v4 = vadd.f32 %v3868_v60, %v3254_v15  ;;  %v5270_v46 = vor.u32 %v5269_v31, %v5266_v16  ;;  %v13240_v47 = vrot.slane %v5273_v14, 5  ;;  %v10586_v14 = vld [vmem:[%s11815_s8 + $0xc0] sm:$0xe]  ;;  %v13254_v62 = vpop.f32.mrf.mxu1 }
 0x272   : > { %v4837_v56 = vsel %vm12957_vm8, %v4546_v32, %v4836_v26  ;;  %v10670_v21 = vrot.slane %v5057_v51, 11  ;;  %v5279_v8 = vrot.slane %v5277_v44, 4  ;;  %v5142_v7 = vld [vmem:[#allocation2 + $0x2c] sm:$0x1]  ;;  %v3669_v33 = vor.u32 %v3668_v2, %v13228_v27  ;;  %15346 = vst [vmem:[#allocation5_spill] sm:$0xff] %v13254_v62 }
 0x273   : > { %4838 = vst [vmem:[#allocation2 + $0x30] sm:$0xf] %v4837_v56  ;;  %v4549_v36 = vshrl.u32 %v4461_v54, 16  ;;  %v4362_v55 = vadd.f32 %v13165_v5, %v3936_v4  ;;  %v13250_v32 = vrot.slane %v3682_v0, 5  ;;  %v4552_v15 = vshll.u32 %v4461_v54, 16 }
 0x274   : > { %v5143_v59 = vsel %vm13062_vm14, %v10670_v21, %v5142_v7  ;;  %v4124_v16 = vrot.slane %v13168_v53, 5  ;;  %v4547_v31 = vrot.slane %v13220_v30, 4  ;;  %v4840_v51 = vld [vmem:[#allocation2 + $0x38] sm:$0x1]  ;;  %v5271_v2 = vrot.slane %v5270_v46, 4 }
 0x275   : > { %5144 = vst [vmem:[#allocation2 + $0x2c] sm:$0x1] %v5143_v59  ;;  %v4551_v5 = vrot.slane %v4549_v36, 7  ;;  %v4398_v60 = vadd.f32 %v12918_v50, %v4362_v55  ;;  %v13259_v27 = vld [vmem:[#allocation2 + $0x8] sm:$0x1]  ;;  %v5280_v0 = vor.u32 %v5279_v8, %v13240_v47  ;;  %v3679_v4 = vor.u32 %v3678_v45, %v13233_v24  ;;  %v11484_v55 = vld [vmem:[%s11815_s8 + $0xb4] sm:$0xff] }
 0x276   : > { %v3188_v56 = vpop.f32.mrf.mxu2  ;;  %v5283_v53 = vshll.u32 %v13259_v27, 16  ;;  %v10602_v30 = vrot.slane %v10586_v14, 9  ;;  %v4126_v26 = vrot.slane %v4124_v16, 4  ;;  %v4127_v44 = vrot.slane %v13224_v17, 5 }
 0x277   : > { %v4554_v21 = vor.u32 %v4552_v15, %v4551_v5  ;;  %v4556_v7 = vrot.slane %v4551_v5, 4  ;;  %v4430_v36 = vmax.f32 %v4398_v60, 0.0  ;;  %v3255_v54 = vadd.f32 %v3188_v56, %v13186_v12  ;;  %v3870_v59 = vpop.f32.mrf.mxu3  ;;  %v5203_v12 = vld [vmem:[#allocation2 + $0x18] sm:$0xf] }
 0x278   : > { %v13265_v49 = vpop.f32.mrf.mxu0  ;;  %v5281_v56 = vrot.slane %v5280_v0, 4  ;;  %v5285_v57 = vrot.slane %v5283_v53, 5  ;;  %v3670_v62 = vrot.slane %v3669_v33, 4  ;;  %v15347_v0 = vpack.c.b16 %v13149_v1, %v13143_v61  ;;  %v11582_v61 = vld [vmem:[%s15305_s3 + $0x138] sm:$0xff] }
 0x279   : > { %v4555_v8 = vsel %vm12998_vm13, %v4547_v31, %v4554_v21  ;;  %v4841_v45 = vsel %vm12984_vm12, %v4556_v7, %v4840_v51  ;;  %v4462_v5 = vpack.c.bf16 %v4430_v36, %v4430_v36  ;;  %v3937_v15 = vadd.f32 %v3870_v59, %v3255_v54  ;;  %v4843_v1 = vld [vmem:[#allocation2 + $0x3c] sm:$0xf]  ;;  %7383 = vmatpush.bf16.msrb.mxu1 %v11582_v61 }
 0x27a   : > { %v4930_v46 = vld [vmem:[#allocation2 + $0x30] sm:$0x2]  ;;  %4839 = vst [vmem:[#allocation2 + $0x34] sm:$0xf] %v4555_v8  ;;  %v5016_v35 = vld [vmem:[#allocation2 + $0x30] sm:$0x1]  ;;  %v5276_v31 = vsel %vm11839_vm2, %v5271_v2, %v13240_v47  ;;  %v5286_v33 = vsel %vm11839_vm2, %v5281_v56, %v5285_v57 }
 0x27b   : > { %v10655_v60 = vrot.slane %v4930_v46, 9  ;;  %4842 = vst [vmem:[#allocation2 + $0x38] sm:$0x1] %v4841_v45  ;;  %v4558_v14 = vshrl.u32 %v4462_v5, 16  ;;  %v4363_v17 = vadd.f32 %v13231_v22, %v3937_v15  ;;  %3230 = vmatmul.bf16.gmra.mxu2 %v11484_v55  ;;  %4338 = vmatmul.bf16.gmra.mxu0 %v13212_v52  ;;  %v3680_v51 = vrot.slane %v3679_v4, 4 }
 0x27c   : > { %3912 = vmatmul.bf16.gmra.mxu3 %v15347_v0  ;;  %v4125_v22 = vsel %vm12141_vm5, %v10602_v30, %v4124_v16  ;;  %v4128_v52 = vsel %vm12141_vm5, %v4126_v26, %v4127_v44  ;;  %v4561_v47 = vshll.u32 %v4462_v5, 16  ;;  %v5664_v57 = vunpack.c.l.b16 %v5276_v31  ;;  %v13298_v44 = vpop.f32.mrf.mxu1  ;;  %v13305_v46 = vld [vmem:[#allocation2 + $0x1c] sm:$0xf] }
 0x27d   : > { %v5017_v21 = vsel %vm12984_vm12, %v10655_v60, %v5016_v35  ;;  %v13289_v7 = vrot.slane %v4558_v14, 7  ;;  %v4399_v2 = vadd.f32 %v12918_v50, %v4363_v17  ;;  %v5665_v35 = vunpack.c.l.b16 %v5286_v33 }
 0x27e   : > { %5018 = vst [vmem:[#allocation2 + $0x30] sm:$0x1] %v5017_v21  ;;  %v3191_v4 = vpop.f32.mrf.mxu2  ;;  %v3675_v16 = vsel %vm11839_vm2, %v3670_v62, %v13233_v24  ;;  %v5312_v36 = vshrl.u32 %v5203_v12, 16  ;;  %v5315_v26 = vshll.u32 %v5203_v12, 16  ;;  %v3685_v30 = vsel %vm11839_vm2, %v3680_v51, %v13250_v32 }
 0x27f   : > { %v4563_v54 = vor.u32 %v4561_v47, %v13289_v7  ;;  %v4431_v59 = vmax.f32 %v4399_v2, 0.0  ;;  %v3256_v55 = vadd.f32 %v3191_v4, %v13190_v42  ;;  %v3873_v53 = vpop.f32.mrf.mxu3  ;;  %v5696_v8 = vpack.c.b16 %v5665_v35, %v5664_v57 }
 0x280   : > { %v4301_v45 = vpop.f32.mrf.mxu0  ;;  %v4181_v24 = vunpack.c.l.b16 %v4125_v22  ;;  %v4182_v62 = vunpack.c.l.b16 %v4128_v52  ;;  %v15348_v5 = vshll.u32 %v13238_v10, 16  ;;  %v5314_v14 = vrot.slane %v5312_v36, 4 }
 0x281   : > { %v5058_v12 = vld [vmem:[#allocation2 + $0x34] sm:$0x8]  ;;  %v4844_v60 = vsel %vm12957_vm8, %v4563_v54, %v4843_v1  ;;  %v4463_v42 = vpack.c.bf16 %v4431_v59, %v4431_v59  ;;  %v3938_v56 = vadd.f32 %v3873_v53, %v3256_v55  ;;  %5784 = vmatmul.bf16.vlgmr.msra.gmra.mxu1 %v5696_v8  ;;  %v5317_v32 = vrot.slane %v5315_v26, 5  ;;  %v4847_v26 = vld [vmem:[#allocation2 + $0x44] sm:$0x1] }
 0x282   : > { %v5309_v15 = vrot.slane %v15348_v5, 5  ;;  %v10671_v17 = vrot.slane %v5058_v12, 11  ;;  %4845 = vst [vmem:[#allocation2 + $0x3c] sm:$0xf] %v4844_v60  ;;  %v5321_v31 = vshll.u32 %v13305_v46, 16  ;;  %v5325_v51 = vshrl.u32 %v13305_v46, 16 }
 0x283   : > { %v5145_v21 = vld [vmem:[#allocation2 + $0x38] sm:$0x1]  ;;  %v4566_v0 = vshrl.u32 %v4463_v42, 16  ;;  %v4364_v33 = vadd.f32 %v13265_v49, %v3938_v56  ;;  %v3755_v22 = vunpack.c.l.b16 %v3675_v16  ;;  %v15349_v52 = vor.u32 %v13174_v23, %v13172_v41  ;;  %v13330_v5 = vld [vmem:[#allocation2 + $0x20] sm:$0x1] }
 0x284   : > { %v5146_v2 = vsel %vm13062_vm14, %v10671_v17, %v5145_v21  ;;  %v3756_v35 = vunpack.c.l.b16 %v3685_v30  ;;  %v4199_v61 = vpack.c.b16 %v4182_v62, %v4181_v24  ;;  %v15350_v1 = vor.u32 %v13161_v48, %v13159_v9  ;;  %v11485_v62 = vld [vmem:[%s11815_s8 + $0xc0] sm:$0xff]  ;;  %v13339_v60 = vpop.f32.mrf.mxu1 }
 0x285   : > { %v5305_v47 = vrot.slane %v15349_v52, 4  ;;  %5147 = vst [vmem:[#allocation2 + $0x38] sm:$0x1] %v5146_v2  ;;  %v4568_v57 = vrot.slane %v4566_v0, 7  ;;  %v4569_v36 = vshll.u32 %v4463_v42, 16  ;;  %v4400_v49 = vadd.f32 %v12918_v50, %v4364_v33 }
 0x286   : > { %v5295_v4 = vrot.slane %v15350_v1, 4  ;;  %v4564_v23 = vrot.slane %v13289_v7, 4  ;;  %v3193_v54 = vpop.f32.mrf.mxu2  ;;  %v5318_v59 = vor.u32 %v5317_v32, %v5314_v14  ;;  %v13326_v55 = vrot.slane %v5321_v31, 5  ;;  %v13345_v32 = vld [vmem:[#allocation2 + $0x24] sm:$0xf] }
 0x287   : > { %v5310_v16 = vsel %vm11839_vm2, %v5305_v47, %v5309_v15  ;;  %v5327_v53 = vrot.slane %v5325_v51, 4  ;;  %v4571_v30 = vor.u32 %v4569_v36, %v4568_v57  ;;  %v4573_v9 = vrot.slane %v4568_v57, 4  ;;  %v3875_v24 = vpop.f32.mrf.mxu3  ;;  %v4850_v57 = vld [vmem:[#allocation2 + $0x48] sm:$0xf] }
 0x288   : > { %v4432_v48 = vmax.f32 %v4400_v49, 0.0  ;;  %v3257_v8 = vadd.f32 %v3193_v54, %v13194_v3  ;;  %v13332_v50 = vpop.f32.mrf.mxu0  ;;  %v3773_v15 = vpack.c.b16 %v3756_v35, %v3755_v22  ;;  %v5300_v7 = vsel %vm11839_vm2, %v5295_v4, %v13172_v41  ;;  %v13357_v4 = vld [vmem:[#allocation2 + $0x28] sm:$0xf] }
 0x289   : > { %v13337_v12 = vunpack.c.l.b16 %v5310_v16  ;;  %v4931_v42 = vld [vmem:[#allocation2 + $0x3c] sm:$0x2]  ;;  %v4572_v56 = vsel %vm12998_vm13, %v4564_v23, %v4571_v30  ;;  %v4848_v3 = vsel %vm12984_vm12, %v4573_v9, %v4847_v26  ;;  %v5319_v51 = vrot.slane %v5318_v59, 4  ;;  %v5019_v0 = vld [vmem:[#allocation2 + $0x3c] sm:$0x1]  ;;  %v11532_v49 = vld [vmem:[%s15305_s3 + $0x28] sm:$0xff] }
 0x28a   : > { %v4464_v14 = vpack.c.bf16 %v4432_v48, %v4432_v48  ;;  %v3939_v17 = vadd.f32 %v3875_v24, %v3257_v8  ;;  %v10656_v31 = vrot.slane %v4931_v42, 9  ;;  %4846 = vst [vmem:[#allocation2 + $0x40] sm:$0xf] %v4572_v56  ;;  %v5328_v41 = vor.u32 %v5327_v53, %v13326_v55  ;;  %v11548_v48 = vld [vmem:[%s15305_s3 + $0xa8] sm:$0xff] }
 0x28b   : > { %v5331_v21 = vshll.u32 %v13330_v5, 16  ;;  %4849 = vst [vmem:[#allocation2 + $0x44] sm:$0x1] %v4848_v3  ;;  %3235 = vmatmul.bf16.gmra.mxu2 %v11485_v62  ;;  %4343 = vmatmul.bf16.gmra.mxu0 %v4199_v61  ;;  %v5666_v52 = vunpack.c.l.b16 %v5300_v7  ;;  %v2943_v47 = vadd.f32 %v12937_v28, %v12704_v37  ;;  %v13353_v2 = vadd.f32 %v12976_v25, %v12710_v43  ;;  %v13368_v37 = vld [vmem:[%s15304_s2] ss:$0 sm:$0xff]  ;;  %v11533_v25 = vld [vmem:[%s15305_s3 + $0x30] sm:$0xff] }
 0x28c   : > { %v4575_v33 = vshrl.u32 %v4464_v14, 16  ;;  %v4365_v22 = vadd.f32 %v4301_v45, %v3939_v17  ;;  %v5020_v35 = vsel %vm12984_vm12, %v10656_v31, %v5019_v0  ;;  %v4578_v1 = vshll.u32 %v4464_v14, 16  ;;  %3917 = vmatmul.bf16.gmra.mxu3 %v3773_v15  ;;  %6010 = vmatpush.bf16.msrb.mxu2 %v11533_v25  ;;  %v10521_v8 = vld [vmem:[%s11815_s8 + $0xcc] sm:$0xf]  ;;  %v10522_v7 = vld [vmem:[%s11815_s8 + $0xd0] sm:$0xf] }
 0x28d   : > { %v13361_v45 = vadd.f32 %v13039_v29, %v12726_v6  ;;  %5021 = vst [vmem:[#allocation2 + $0x3c] sm:$0x1] %v5020_v35  ;;  %v5697_v28 = vpack.c.b16 %v13337_v12, %v5666_v52  ;;  %v11549_v6 = vld [vmem:[%s15305_s3 + $0xb0] sm:$0xff]  ;;  %v5324_v16 = vsel %vm11839_vm2, %v5319_v51, %v13326_v55  ;;  %v5329_v23 = vrot.slane %v5328_v41, 4  ;;  %v11572_v55 = vld [vmem:[%s15305_s3 + $0xe8] sm:$0xff] }
 0x28e   : > { %v13363_v61 = vrot.slane %v4575_v33, 7  ;;  %v4401_v43 = vadd.f32 %v13368_v37, %v4365_v22  ;;  %v11573_v29 = vld [vmem:[%s15305_s3 + $0xf0] sm:$0xff]  ;;  %v3196_v36 = vpop.f32.mrf.mxu2  ;;  %v5333_v26 = vrot.slane %v5331_v21, 5  ;;  %v5336_v54 = vshrl.u32 %v13345_v32, 16  ;;  %6388 = vmatpush.bf16.msrb.mxu3 %v11549_v6  ;;  %v10587_v6 = vld [vmem:[%s11815_s8 + $0xcc] sm:$0xe] }
 0x28f   : > { %v3258_v30 = vadd.f32 %v3196_v36, %v2943_v47  ;;  %v3878_v9 = vpop.f32.mrf.mxu3  ;;  %v5339_v24 = vshll.u32 %v13345_v32, 16  ;;  %6702 = vmatpush.bf16.msrb.mxu0 %v11573_v29  ;;  %v3687_v12 = vshrl.u32 %v10521_v8, 16  ;;  %v3690_v42 = vshll.u32 %v10521_v8, 16  ;;  %v13405_v51 = vld [vmem:[%s11815_s8 + $0xd4] sm:$0x1]  ;;  %v13411_v47 = vpop.f32.mrf.mxu1 }
 0x290   : > { %v4580_v59 = vor.u32 %v4578_v1, %v13363_v61  ;;  %v4433_v53 = vmax.f32 %v4401_v43, 0.0  ;;  %v4581_v62 = vrot.slane %v13363_v61, 4  ;;  %v13398_v15 = vpop.f32.mrf.mxu0  ;;  %v5345_v56 = vshll.u32 %v13357_v4, 16  ;;  %6011 = vmatpush.bf16.msrb.mxu2 %v11532_v49  ;;  %v11547_v49 = vld [vmem:[%s15305_s3 + $0xa0] sm:$0xff] }
 0x291   : > { %v5059_v3 = vld [vmem:[#allocation2 + $0x40] sm:$0x8]  ;;  %v3940_v31 = vadd.f32 %v3878_v9, %v3258_v30  ;;  %v3696_v41 = vshll.u32 %v10522_v7, 16  ;;  %5789 = vmatmul.bf16.gmra.mxu1 %v5697_v28  ;;  %v3689_v33 = vrot.slane %v3687_v12, 4  ;;  %v5334_v22 = vsel %vm11839_vm2, %v5329_v23, %v5333_v26  ;;  %v4854_v30 = vld [vmem:[#allocation2 + $0x50] sm:$0x1] }
 0x292   : > { %v4851_v14 = vsel %vm12957_vm8, %v4580_v59, %v4850_v57  ;;  %v4465_v17 = vpack.c.bf16 %v4433_v53, %v4433_v53  ;;  %v10672_v21 = vrot.slane %v5059_v3, 11  ;;  %v5148_v0 = vld [vmem:[#allocation2 + $0x44] sm:$0x1]  ;;  %v13409_v52 = vunpack.c.l.b16 %v5324_v16  ;;  %6389 = vmatpush.bf16.msrb.mxu3 %v11548_v48 }
 0x293   : > { %4852 = vst [vmem:[#allocation2 + $0x48] sm:$0xf] %v4851_v14  ;;  %v4366_v43 = vadd.f32 %v13332_v50, %v3940_v31  ;;  %v3692_v25 = vrot.slane %v3690_v42, 5  ;;  %6703 = vmatpush.bf16.msrb.mxu0 %v11572_v55  ;;  %v3698_v28 = vrot.slane %v3696_v41, 5  ;;  %v3700_v57 = vshrl.u32 %v10522_v7, 16  ;;  %v11531_v50 = vld [vmem:[%s15305_s3 + $0x20] sm:$0xff] }
 0x294   : > { %v4583_v35 = vshrl.u32 %v4465_v17, 16  ;;  %v4586_v1 = vshll.u32 %v4465_v17, 16  ;;  %v5149_v29 = vsel %vm13062_vm14, %v10672_v21, %v5148_v0  ;;  %v3706_v36 = vshll.u32 %v13405_v51, 16  ;;  %v11571_v26 = vld [vmem:[%s15305_s3 + $0xe0] sm:$0xff]  ;;  %6012 = vmatpush.bf16.msrb.mxu2 %v11531_v50  ;;  %v11486_v41 = vld [vmem:[%s11815_s8 + $0xcc] sm:$0xff]  ;;  %v11546_v21 = vld [vmem:[%s15305_s3 + $0x98] sm:$0xff] }
 0x295   : > { %5150 = vst [vmem:[#allocation2 + $0x44] sm:$0x1] %v5149_v29  ;;  %v4402_v23 = vadd.f32 %v13368_v37, %v4366_v43  ;;  %v3693_v59 = vor.u32 %v3692_v25, %v3689_v33  ;;  %v13428_v53 = vunpack.c.l.b16 %v5334_v22  ;;  %v3702_v48 = vrot.slane %v3700_v57, 4 }
 0x296   : > { %v4585_v16 = vrot.slane %v4583_v35, 7  ;;  %v3198_v9 = vpop.f32.mrf.mxu2  ;;  %v3708_v55 = vrot.slane %v3706_v36, 5  ;;  %v10603_v8 = vrot.slane %v10587_v6, 9  ;;  %v4131_v12 = vrot.slane %v10522_v7, 5  ;;  %6390 = vmatpush.bf16.msrb.mxu3 %v11547_v49 }
 0x297   : > { %v4434_v14 = vmax.f32 %v4402_v23, 0.0  ;;  %v3259_v17 = vadd.f32 %v3198_v9, %v13353_v2  ;;  %v3880_v31 = vpop.f32.mrf.mxu3  ;;  %6704 = vmatpush.bf16.msrb.mxu0 %v11571_v26  ;;  %v3694_v33 = vrot.slane %v3693_v59, 4  ;;  %v3703_v22 = vor.u32 %v3702_v48, %v3698_v28  ;;  %v11530_v2 = vld [vmem:[%s15305_s3 + $0x18] sm:$0xff] }
 0x298   : > { %v4588_v42 = vor.u32 %v4586_v1, %v4585_v16  ;;  %v4590_v3 = vrot.slane %v4585_v16, 4  ;;  %v13435_v0 = vpop.f32.mrf.mxu0  ;;  %v4132_v7 = vsel %vm12141_vm5, %v10603_v8, %v4131_v12  ;;  %v4133_v35 = vrot.slane %v4131_v12, 4  ;;  %v11570_v1 = vld [vmem:[%s15305_s3 + $0xd8] sm:$0xff]  ;;  %6013 = vmatpush.bf16.msrb.mxu2 %v11530_v2  ;;  %v13463_v8 = vpop.f32.mrf.mxu1  ;;  %v4857_v12 = vld [vmem:[#allocation2 + $0x54] sm:$0xf] }
 0x299   : > { %v4466_v29 = vpack.c.bf16 %v4434_v14, %v4434_v14  ;;  %v3941_v57 = vadd.f32 %v3880_v31, %v3259_v17  ;;  %v3699_v16 = vsel %vm11839_vm2, %v3694_v33, %v3698_v28  ;;  %v3704_v23 = vrot.slane %v3703_v22, 4  ;;  %v11581_v31 = vld [vmem:[%s15305_s3 + $0x130] sm:$0xff] }
 0x29a   : > { %v4932_v43 = vld [vmem:[#allocation2 + $0x48] sm:$0x2]  ;;  %v4589_v25 = vsel %vm12998_vm13, %v4581_v62, %v4588_v42  ;;  %v4855_v6 = vsel %vm12984_vm12, %v4590_v3, %v4854_v30  ;;  %v4134_v50 = vrot.slane %v13405_v51, 5  ;;  %v5022_v49 = vld [vmem:[#allocation2 + $0x48] sm:$0x1]  ;;  %v3757_v62 = vunpack.c.l.b16 %v3699_v16  ;;  %6391 = vmatpush.bf16.msrb.mxu3 %v11546_v21  ;;  %v11545_v2 = vld [vmem:[%s15305_s3 + $0x90] sm:$0xff]  ;;  %7384 = vmatpush.bf16.msrb.mxu1 %v11581_v31 }
 0x29b   : > { %v10657_v36 = vrot.slane %v4932_v43, 9  ;;  %4853 = vst [vmem:[#allocation2 + $0x4c] sm:$0xf] %v4589_v25  ;;  %v4592_v26 = vshrl.u32 %v4466_v29, 16  ;;  %v4595_v61 = vshll.u32 %v4466_v29, 16  ;;  %v4367_v59 = vadd.f32 %v13398_v15, %v3941_v57  ;;  %3240 = vmatmul.bf16.gmra.mxu2 %v11486_v41  ;;  %6705 = vmatpush.bf16.msrb.mxu0 %v11570_v1  ;;  %v11529_v41 = vld [vmem:[%s15305_s3 + $0x10] sm:$0xff] }
 0x29c   : > { %4856 = vst [vmem:[#allocation2 + $0x50] sm:$0x1] %v4855_v6  ;;  %v3709_v9 = vsel %vm11839_vm2, %v3704_v23, %v3708_v55  ;;  %v4135_v28 = vsel %vm12141_vm5, %v4133_v35, %v4134_v50  ;;  %v4183_v48 = vunpack.c.l.b16 %v4132_v7  ;;  %v13461_v51 = vld [vmem:[#allocation2 + $0x2c] sm:$0x1]  ;;  %v5698_v55 = vpack.c.b16 %v13428_v53, %v13409_v52  ;;  %v11569_v1 = vld [vmem:[%s15305_s3 + $0xd0] sm:$0xff]  ;;  %6014 = vmatpush.bf16.msrb.mxu2 %v11529_v41 }
 0x29d   : > { %v5023_v30 = vsel %vm12984_vm12, %v10657_v36, %v5022_v49  ;;  %v13465_v15 = vrot.slane %v4592_v26, 7  ;;  %v4403_v42 = vadd.f32 %v13368_v37, %v4367_v59  ;;  %v3758_v3 = vunpack.c.l.b16 %v3709_v9  ;;  %v11528_v25 = vld [vmem:[%s15305_s3 + $0x8] sm:$0xff]  ;;  %v13498_v6 = vld [vmem:[#allocation2] sm:$0xe]  ;;  %v4861_v31 = vld [vmem:[#allocation2 + $0x5c] sm:$0x1] }
 0x29e   : > { %5024 = vst [vmem:[#allocation2 + $0x48] sm:$0x1] %v5023_v30  ;;  %v4184_v14 = vunpack.c.l.b16 %v4135_v28  ;;  %v3201_v17 = vpop.f32.mrf.mxu2  ;;  %v5338_v21 = vrot.slane %v5336_v54, 4  ;;  %v5341_v33 = vrot.slane %v5339_v24, 5  ;;  %v5349_v22 = vshrl.u32 %v13357_v4, 16  ;;  %6392 = vmatpush.bf16.msrb.mxu3 %v11545_v2 }
 0x29f   : > { %v4597_v7 = vor.u32 %v4595_v61, %v13465_v15  ;;  %v4435_v35 = vmax.f32 %v4403_v42, 0.0  ;;  %v3774_v52 = vpack.c.b16 %v3758_v3, %v3757_v62  ;;  %v3883_v53 = vpop.f32.mrf.mxu3  ;;  %v13490_v54 = vrot.slane %v5345_v56, 5  ;;  %6706 = vmatpush.bf16.msrb.mxu0 %v11569_v1  ;;  %v11544_v62 = vld [vmem:[%s15305_s3 + $0x88] sm:$0xff] }
 0x2a0   : > { %v4200_v32 = vpack.c.b16 %v4184_v14, %v4183_v48  ;;  %v3260_v24 = vadd.f32 %v3201_v17, %v13361_v45  ;;  %v13493_v43 = vpop.f32.mrf.mxu0  ;;  %v5351_v29 = vrot.slane %v5349_v22, 4  ;;  %v5355_v57 = vshll.u32 %v13461_v51, 16  ;;  %v11568_v45 = vld [vmem:[%s15305_s3 + $0xc8] sm:$0xff]  ;;  %6015 = vmatpush.bf16.msrb.mxu2 %v11528_v25  ;;  %v11527_v17 = vld [vmem:[%s15305_s3] sm:$0xff] }
 0x2a1   : > { %v4858_v56 = vsel %vm12957_vm8, %v4597_v7, %v4857_v12  ;;  %v4467_v16 = vpack.c.bf16 %v4435_v35, %v4435_v35  ;;  %3922 = vmatmul.bf16.gmra.mxu3 %v3774_v52  ;;  %5794 = vmatmul.bf16.gmra.mxu1 %v5698_v55  ;;  %v6148_v49 = vrot.slane %v13180_v34, 5  ;;  %v5342_v26 = vor.u32 %v5341_v33, %v5338_v21  ;;  %v11567_v55 = vld [vmem:[%s15305_s3 + $0xc0] sm:$0xff] }
 0x2a2   : > { %v5060_v36 = vld [vmem:[#allocation2 + $0x4c] sm:$0x8]  ;;  %4859 = vst [vmem:[#allocation2 + $0x54] sm:$0xf] %v4858_v56  ;;  %4348 = vmatmul.bf16.gmra.mxu0 %v4200_v32  ;;  %v3942_v50 = vadd.f32 %v3883_v53, %v3260_v24  ;;  %v10828_v30 = vrot.slane %v13498_v6, 9  ;;  %v5352_v9 = vor.u32 %v5351_v29, %v13490_v54  ;;  %v6151_v34 = vrot.slane %v13259_v27, 5  ;;  %6393 = vmatpush.bf16.msrb.mxu3 %v11544_v62 }
 0x2a3   : > { %v10673_v23 = vrot.slane %v5060_v36, 11  ;;  %v5151_v61 = vld [vmem:[#allocation2 + $0x50] sm:$0x1]  ;;  %v4600_v59 = vshrl.u32 %v4467_v16, 16  ;;  %v5357_v12 = vrot.slane %v5355_v57, 5  ;;  %v2946_v42 = vadd.f32 %v13086_v20, %v12732_v58  ;;  %6707 = vmatpush.bf16.msrb.mxu0 %v11568_v45  ;;  %v13526_v20 = vpop.f32.mrf.mxu1  ;;  %v11543_v52 = vld [vmem:[%s15305_s3 + $0x80] sm:$0xff] }
 0x2a4   : > { %v4368_v48 = vadd.f32 %v13435_v0, %v3942_v50  ;;  %v4603_v14 = vshll.u32 %v4467_v16, 16  ;;  %v4598_v0 = vrot.slane %v13465_v15, 4  ;;  %v6150_v21 = vrot.slane %v6148_v49, 4  ;;  %6016 = vmatpush.bf16.msrb.mxu2 %v11527_v17  ;;  %v11511_v29 = vld [vmem:[#allocation2] sm:$0xff] }
 0x2a5   : > { %v5152_v28 = vsel %vm13062_vm14, %v10673_v23, %v5151_v61  ;;  %v4602_v3 = vrot.slane %v4600_v59, 7  ;;  %v5343_v58 = vrot.slane %v5342_v26, 4  ;;  %v5353_v53 = vrot.slane %v5352_v9, 4  ;;  %v15351_v9 = vld [vmem:[#allocation6_spill] sm:$0xff] }
 0x2a6   : > { %5153 = vst [vmem:[#allocation2 + $0x50] sm:$0x1] %v5152_v28  ;;  %v4404_v27 = vadd.f32 %v13368_v37, %v4368_v48  ;;  %v3203_v41 = vpop.f32.mrf.mxu2  ;;  %v6152_v1 = vsel %vm12141_vm5, %v6150_v21, %v6151_v34  ;;  %v6149_v16 = vsel %vm12141_vm5, %v10828_v30, %v6148_v49  ;;  %6394 = vmatpush.bf16.msrb.mxu3 %v11543_v52 }
 0x2a7   : > { %v4605_v33 = vor.u32 %v4603_v14, %v4602_v3  ;;  %v4607_v22 = vrot.slane %v4602_v3, 4  ;;  %v3261_v7 = vadd.f32 %v3203_v41, %v2946_v42  ;;  %v3885_v35 = vpop.f32.mrf.mxu3  ;;  %6708 = vmatpush.bf16.msrb.mxu0 %v11567_v55  ;;  %v5358_v57 = vsel %vm11839_vm2, %v5353_v53, %v5357_v12  ;;  %v4864_v42 = vld [vmem:[#allocation2 + $0x60] sm:$0xf] }
 0x2a8   : > { %v4436_v2 = vmax.f32 %v4404_v27, 0.0  ;;  %v4314_v15 = vpop.f32.mrf.mxu0  ;;  %v6276_v50 = vunpack.c.l.b16 %v6152_v1  ;;  %v5348_v26 = vsel %vm11839_vm2, %v5343_v58, %v13490_v54  ;;  %v5671_v62 = vunpack.c.l.b16 %v5358_v57 }
 0x2a9   : > { %v4933_v32 = vld [vmem:[#allocation2 + $0x54] sm:$0x2]  ;;  %v4606_v24 = vsel %vm12998_vm13, %v4598_v0, %v4605_v33  ;;  %v4862_v25 = vsel %vm12984_vm12, %v4607_v22, %v4861_v31  ;;  %v3943_v6 = vadd.f32 %v3885_v35, %v3261_v7  ;;  %v5025_v45 = vld [vmem:[#allocation2 + $0x54] sm:$0x1]  ;;  %v2947_v28 = vadd.f32 %v13130_v11, %v15351_v9  ;;  %v11551_v0 = vld [vmem:[#allocation2 + $0xc] sm:$0xff] }
 0x2aa   : > { %v10658_v36 = vrot.slane %v4933_v32, 9  ;;  %4860 = vst [vmem:[#allocation2 + $0x58] sm:$0xf] %v4606_v24  ;;  %v4468_v56 = vpack.c.bf16 %v4436_v2, %v4436_v2  ;;  %v6275_v30 = vunpack.c.l.b16 %v6149_v16  ;;  %v5670_v12 = vunpack.c.l.b16 %v5348_v26  ;;  %v6099_v7 = vld [vmem:[#allocation2 + $0xc] sm:$0xe]  ;;  %v15352_v24 = vld [vmem:[#allocation7_spill] sm:$0xff] }
 0x2ab   : > { %4863 = vst [vmem:[#allocation2 + $0x5c] sm:$0x1] %v4862_v25  ;;  %v4369_v23 = vadd.f32 %v13493_v43, %v3943_v6  ;;  %6017 = vmatmul.bf16.vlgmr.msrb.gmra.mxu2 %v11511_v29  ;;  %v13550_v41 = vpop.f32.mrf.mxu1  ;;  %v6155_v35 = vrot.slane %v13136_v13, 5  ;;  %v6158_v32 = vrot.slane %v13238_v10, 5  ;;  %v15353_v25 = vld [vmem:[#allocation4_spill] sm:$0xff] }
 0x2ac   : > { %v5026_v61 = vsel %vm12984_vm12, %v10658_v36, %v5025_v45  ;;  %v4609_v59 = vshrl.u32 %v4468_v56, 16  ;;  %v4612_v48 = vshll.u32 %v4468_v56, 16  ;;  %v6307_v14 = vpack.c.b16 %v6276_v50, %v6275_v30  ;;  %v4868_v16 = vld [vmem:[#allocation2 + $0x68] sm:$0x1] }
 0x2ad   : > { %5027 = vst [vmem:[#allocation2 + $0x54] sm:$0x1] %v5026_v61  ;;  %v4405_v49 = vadd.f32 %v13368_v37, %v4369_v23  ;;  %v5699_v31 = vpack.c.b16 %v5671_v62, %v5670_v12  ;;  %v2948_v6 = vadd.f32 %v15353_v25, %v15352_v24  ;;  %v10829_v45 = vrot.slane %v6099_v7, 9  ;;  %v15354_v12 = vld [vmem:[#allocation8_spill] sm:$0xff] }
 0x2ae   : > { %v4611_v43 = vrot.slane %v4609_v59, 7  ;;  %v3206_v34 = vpop.f32.mrf.mxu2  ;;  %v6157_v23 = vrot.slane %v6155_v35, 4 }
 0x2af   : > { %v4437_v3 = vmax.f32 %v4405_v49, 0.0  ;;  %v3262_v54 = vadd.f32 %v3206_v34, %v2947_v28  ;;  %v3888_v17 = vpop.f32.mrf.mxu3  ;;  %v6156_v10 = vsel %vm12141_vm5, %v10829_v45, %v6155_v35  ;;  %v13571_v34 = vld [vmem:[#allocation2 + $0x34] sm:$0xf] }
 0x2b0   : > { %v4614_v55 = vor.u32 %v4612_v48, %v4611_v43  ;;  %v4316_v27 = vpop.f32.mrf.mxu0  ;;  %v4615_v56 = vrot.slane %v4611_v43, 4  ;;  %v6159_v9 = vsel %vm12141_vm5, %v6157_v23, %v6158_v32  ;;  %v11512_v48 = vld [vmem:[#allocation2 + $0xc] sm:$0xff]  ;;  %v5369_v7 = vshll.u32 %v13571_v34, 16  ;;  %v11552_v23 = vld [vmem:[#allocation2 + $0x18] sm:$0xff] }
 0x2b1   : > { %v5061_v11 = vld [vmem:[#allocation2 + $0x58] sm:$0x8]  ;;  %v4469_v21 = vpack.c.bf16 %v4437_v3, %v4437_v3  ;;  %6395 = vmatmul.bf16.vlgmr.msrb.gmra.mxu3 %v6307_v14  ;;  %v3944_v58 = vadd.f32 %v3888_v17, %v3262_v54  ;;  %5799 = vmatmul.bf16.gmra.mxu1 %v5699_v31  ;;  %v5373_v35 = vshrl.u32 %v13571_v34, 16  ;;  %v11580_v32 = vld [vmem:[%s15305_s3 + $0x128] sm:$0xff] }
 0x2b2   : > { %v10674_v33 = vrot.slane %v5061_v11, 11  ;;  %v4865_v22 = vsel %vm12957_vm8, %v4614_v55, %v4864_v42  ;;  %6709 = vmatmul.bf16.vlgmr.msrb.gmra.mxu0 %v11551_v0  ;;  %v5154_v52 = vld [vmem:[#allocation2 + $0x5c] sm:$0x1]  ;;  %v15355_v42 = vld [vmem:[#allocation5_spill] sm:$0xff]  ;;  %v6278_v11 = vunpack.c.l.b16 %v6159_v9  ;;  %7385 = vmatpush.bf16.msrb.mxu1 %v11580_v32 }
 0x2b3   : > { %4866 = vst [vmem:[#allocation2 + $0x60] sm:$0xf] %v4865_v22  ;;  %v4617_v53 = vshrl.u32 %v4469_v21, 16  ;;  %v4370_v2 = vadd.f32 %v4314_v15, %v3944_v58  ;;  %v4620_v57 = vshll.u32 %v4469_v21, 16  ;;  %v2949_v3 = vadd.f32 %v15355_v42, %v15354_v12  ;;  %v13575_v54 = vpop.f32.mrf.mxu1  ;;  %v4871_v58 = vld [vmem:[#allocation2 + $0x6c] sm:$0xf] }
 0x2b4   : > { %v5155_v1 = vsel %vm13062_vm14, %v10674_v33, %v5154_v52  ;;  %v6277_v33 = vunpack.c.l.b16 %v6156_v10  ;;  %v5207_v22 = vld [vmem:[#allocation2 + $0x30] sm:$0xf]  ;;  %v6162_v12 = vrot.slane %v13305_v46, 5  ;;  %v15356_v42 = vld [vmem:[#allocation9_spill] sm:$0xff] }
 0x2b5   : > { %5156 = vst [vmem:[#allocation2 + $0x5c] sm:$0x1] %v5155_v1  ;;  %v4619_v29 = vrot.slane %v4617_v53, 7  ;;  %v4406_v36 = vadd.f32 %v13368_v37, %v4370_v2  ;;  %v13584_v1 = vld [vmem:[#allocation2 + $0x38] sm:$0x1]  ;;  %v5363_v25 = vshll.u32 %v5207_v22, 16 }
 0x2b6   : > { %v3208_v13 = vpop.f32.mrf.mxu2  ;;  %v6164_v32 = vrot.slane %v6162_v12, 4 }
 0x2b7   : > { %v4622_v50 = vor.u32 %v4620_v57, %v4619_v29  ;;  %v4624_v15 = vrot.slane %v4619_v29, 4  ;;  %v4438_v26 = vmax.f32 %v4406_v36, 0.0  ;;  %v3263_v61 = vadd.f32 %v3208_v13, %v2948_v6  ;;  %v3890_v59 = vpop.f32.mrf.mxu3 }
 0x2b8   : > { %v13561_v62 = vpop.f32.mrf.mxu0  ;;  %v5371_v6 = vrot.slane %v5369_v7, 5  ;;  %v5375_v29 = vrot.slane %v5373_v35, 4  ;;  %v5379_v57 = vshll.u32 %v13584_v1, 16  ;;  %v4875_v35 = vld [vmem:[#allocation2 + $0x74] sm:$0x1] }
 0x2b9   : > { %v4623_v28 = vsel %vm12998_vm13, %v4615_v56, %v4622_v50  ;;  %v4869_v49 = vsel %vm12984_vm12, %v4624_v15, %v4868_v16  ;;  %v4470_v30 = vpack.c.bf16 %v4438_v26, %v4438_v26  ;;  %v3945_v43 = vadd.f32 %v3890_v59, %v3263_v61 }
 0x2ba   : > { %v4934_v14 = vld [vmem:[#allocation2 + $0x60] sm:$0x2]  ;;  %4867 = vst [vmem:[#allocation2 + $0x64] sm:$0xf] %v4623_v28  ;;  %v5028_v55 = vld [vmem:[#allocation2 + $0x60] sm:$0x1]  ;;  %v6308_v16 = vpack.c.b16 %v6278_v11, %v6277_v33  ;;  %v5376_v26 = vor.u32 %v5375_v29, %v5371_v6 }
 0x2bb   : > { %v10659_v17 = vrot.slane %v4934_v14, 9  ;;  %4870 = vst [vmem:[#allocation2 + $0x68] sm:$0x1] %v4869_v49  ;;  %v4626_v0 = vshrl.u32 %v4470_v30, 16  ;;  %v4371_v31 = vadd.f32 %v4316_v27, %v3945_v43  ;;  %6022 = vmatmul.bf16.gmra.mxu2 %v11512_v48  ;;  %v4629_v21 = vshll.u32 %v4470_v30, 16  ;;  %v13604_v33 = vpop.f32.mrf.mxu1 }
 0x2bc   : > { %v5360_v27 = vshrl.u32 %v5207_v22, 16  ;;  %v5365_v15 = vrot.slane %v5363_v25, 5  ;;  %v5381_v61 = vrot.slane %v5379_v57, 5  ;;  %v5377_v48 = vrot.slane %v5376_v26, 4  ;;  %v13620_v26 = vld [vmem:[#allocation2 + $0x40] sm:$0xf] }
 0x2bd   : > { %v5029_v52 = vsel %vm12984_vm12, %v10659_v17, %v5028_v55  ;;  %v13581_v53 = vrot.slane %v4626_v0, 7  ;;  %v4407_v2 = vadd.f32 %v13368_v37, %v4371_v31  ;;  %v6100_v0 = vld [vmem:[#allocation2 + $0x18] sm:$0xe] }
 0x2be   : > { %5030 = vst [vmem:[#allocation2 + $0x60] sm:$0x1] %v5029_v52  ;;  %v3211_v24 = vpop.f32.mrf.mxu2  ;;  %v5362_v50 = vrot.slane %v5360_v27, 4  ;;  %v10830_v27 = vrot.slane %v6100_v0, 9 }
 0x2bf   : > { %v4631_v36 = vor.u32 %v4629_v21, %v13581_v53  ;;  %v4439_v56 = vmax.f32 %v4407_v2, 0.0  ;;  %v3264_v13 = vadd.f32 %v3211_v24, %v2949_v3  ;;  %v3893_v45 = vpop.f32.mrf.mxu3  ;;  %v2950_v3 = vadd.f32 %v13298_v44, %v15356_v42 }
 0x2c0   : > { %v13591_v59 = vpop.f32.mrf.mxu0  ;;  %v5366_v43 = vor.u32 %v5365_v15, %v5362_v50  ;;  %v5382_v21 = vsel %vm11839_vm2, %v5377_v48, %v5381_v61  ;;  %v11513_v15 = vld [vmem:[#allocation2 + $0x18] sm:$0xff] }
 0x2c1   : > { %v5062_v10 = vld [vmem:[#allocation2 + $0x64] sm:$0x8]  ;;  %v4872_v9 = vsel %vm12957_vm8, %v4631_v36, %v4871_v58  ;;  %v4471_v28 = vpack.c.bf16 %v4439_v56, %v4439_v56  ;;  %6400 = vmatmul.bf16.gmra.mxu3 %v6308_v16  ;;  %v3946_v49 = vadd.f32 %v3893_v45, %v3264_v13  ;;  %v6165_v58 = vrot.slane %v13330_v5, 5 }
 0x2c2   : > { %v10675_v30 = vrot.slane %v5062_v10, 11  ;;  %4873 = vst [vmem:[#allocation2 + $0x6c] sm:$0xf] %v4872_v9  ;;  %6714 = vmatmul.bf16.gmra.mxu0 %v11552_v23  ;;  %v5157_v14 = vld [vmem:[#allocation2 + $0x68] sm:$0x1]  ;;  %v5367_v11 = vrot.slane %v5366_v43, 4  ;;  %v5673_v7 = vunpack.c.l.b16 %v5382_v21  ;;  %v6163_v16 = vsel %vm12141_vm5, %v10830_v27, %v6162_v12 }
 0x2c3   : > { %v4634_v17 = vshrl.u32 %v4471_v28, 16  ;;  %v4372_v55 = vadd.f32 %v13561_v62, %v3946_v49  ;;  %v4637_v22 = vshll.u32 %v4471_v28, 16  ;;  %v4632_v62 = vrot.slane %v13581_v53, 4  ;;  %v13631_v21 = vld [vmem:[#allocation2 + $0x44] sm:$0x1] }
 0x2c4   : > { %v5158_v31 = vsel %vm13062_vm14, %v10675_v30, %v5157_v14  ;;  %v5372_v52 = vsel %vm11839_vm2, %v5367_v11, %v5371_v6  ;;  %v6166_v53 = vsel %vm12141_vm5, %v6164_v32, %v6165_v58  ;;  %v5393_v9 = vshll.u32 %v13620_v26, 16 }
 0x2c5   : > { %5159 = vst [vmem:[#allocation2 + $0x68] sm:$0x1] %v5158_v31  ;;  %v4636_v46 = vrot.slane %v4634_v17, 7  ;;  %v4408_v44 = vadd.f32 %v13368_v37, %v4372_v55  ;;  %v5672_v29 = vunpack.c.l.b16 %v5372_v52  ;;  %v5397_v28 = vshrl.u32 %v13620_v26, 16  ;;  %v15357_v55 = vld [vmem:[#allocation10_spill] sm:$0xff] }
 0x2c6   : > { %v3213_v2 = vpop.f32.mrf.mxu2  ;;  %v6280_v48 = vunpack.c.l.b16 %v6166_v53  ;;  %v5395_v14 = vrot.slane %v5393_v9, 5  ;;  %v2951_v0 = vadd.f32 %v13339_v60, %v15357_v55  ;;  %v6279_v11 = vunpack.c.l.b16 %v6163_v16 }
 0x2c7   : > { %v4639_v24 = vor.u32 %v4637_v22, %v4636_v46  ;;  %v4641_v25 = vrot.slane %v4636_v46, 4  ;;  %v4440_v5 = vmax.f32 %v4408_v44, 0.0  ;;  %v3895_v57 = vpop.f32.mrf.mxu3  ;;  %v3265_v36 = vadd.f32 %v3213_v2, %v2950_v3  ;;  %v5209_v3 = vld [vmem:[#allocation2 + $0x3c] sm:$0xf]  ;;  %v4878_v46 = vld [vmem:[#allocation2 + $0x78] sm:$0xf] }
 0x2c8   : > { %v13610_v56 = vpop.f32.mrf.mxu0  ;;  %v5700_v50 = vpack.c.b16 %v5673_v7, %v5672_v29  ;;  %v5399_v17 = vrot.slane %v5397_v28, 4  ;;  %v5384_v58 = vshrl.u32 %v5209_v3, 16  ;;  %v5387_v7 = vshll.u32 %v5209_v3, 16 }
 0x2c9   : > { %v4935_v13 = vld [vmem:[#allocation2 + $0x6c] sm:$0x2]  ;;  %v4640_v6 = vsel %vm12998_vm13, %v4632_v62, %v4639_v24  ;;  %v4876_v45 = vsel %vm12984_vm12, %v4641_v25, %v4875_v35  ;;  %v4472_v23 = vpack.c.bf16 %v4440_v5, %v4440_v5  ;;  %v3947_v10 = vadd.f32 %v3895_v57, %v3265_v36  ;;  %v5031_v49 = vld [vmem:[#allocation2 + $0x6c] sm:$0x1]  ;;  %v13635_v35 = vpop.f32.mrf.mxu1  ;;  %v11553_v25 = vld [vmem:[#allocation2 + $0x24] sm:$0xff] }
 0x2ca   : > { %v10660_v61 = vrot.slane %v4935_v13, 9  ;;  %4874 = vst [vmem:[#allocation2 + $0x70] sm:$0xf] %v4640_v6  ;;  %5804 = vmatmul.bf16.gmra.mxu1 %v5700_v50  ;;  %v5400_v62 = vor.u32 %v5399_v17, %v5395_v14  ;;  %v6309_v60 = vpack.c.b16 %v6280_v48, %v6279_v11  ;;  %v5386_v32 = vrot.slane %v5384_v58, 4  ;;  %v4882_v11 = vld [vmem:[#allocation2 + $0x80] sm:$0x1] }
 0x2cb   : > { %4877 = vst [vmem:[#allocation2 + $0x74] sm:$0x1] %v4876_v45  ;;  %v4643_v30 = vshrl.u32 %v4472_v23, 16  ;;  %v4646_v43 = vshll.u32 %v4472_v23, 16  ;;  %6027 = vmatmul.bf16.gmra.mxu2 %v11513_v15  ;;  %v4373_v42 = vadd.f32 %v13591_v59, %v3947_v10  ;;  %v5403_v59 = vshll.u32 %v13631_v21, 16 }
 0x2cc   : > { %v5032_v12 = vsel %vm12984_vm12, %v10660_v61, %v5031_v49  ;;  %v5389_v5 = vrot.slane %v5387_v7, 5  ;;  %v5401_v29 = vrot.slane %v5400_v62, 4  ;;  %v6169_v6 = vrot.slane %v13357_v4, 5  ;;  %v15358_v4 = vld [vmem:[#allocation11_spill] sm:$0xff] }
 0x2cd   : > { %5033 = vst [vmem:[#allocation2 + $0x6c] sm:$0x1] %v5032_v12  ;;  %v13629_v31 = vrot.slane %v4643_v30, 7  ;;  %v4409_v22 = vadd.f32 %v13368_v37, %v4373_v42  ;;  %v5405_v57 = vrot.slane %v5403_v59, 5  ;;  %v6101_v30 = vld [vmem:[#allocation2 + $0x24] sm:$0xe]  ;;  %v2952_v48 = vadd.f32 %v13411_v47, %v15358_v4 }
 0x2ce   : > { %v3216_v44 = vpop.f32.mrf.mxu2  ;;  %v5390_v50 = vor.u32 %v5389_v5, %v5386_v32  ;;  %v13661_v5 = vld [vmem:[#allocation2 + $0x4c] sm:$0xf] }
 0x2cf   : > { %v4648_v52 = vor.u32 %v4646_v43, %v13629_v31  ;;  %v3266_v2 = vadd.f32 %v3216_v44, %v2951_v0  ;;  %v3898_v27 = vpop.f32.mrf.mxu3  ;;  %v4441_v24 = vmax.f32 %v4409_v22, 0.0  ;;  %v5406_v15 = vsel %vm11839_vm2, %v5401_v29, %v5405_v57 }
 0x2d0   : > { %v4326_v36 = vpop.f32.mrf.mxu0  ;;  %v5391_v49 = vrot.slane %v5390_v50, 4  ;;  %v6172_v43 = vrot.slane %v13461_v51, 5  ;;  %v5675_v42 = vunpack.c.l.b16 %v5406_v15  ;;  %v6171_v0 = vrot.slane %v6169_v6, 4  ;;  %v15359_v50 = vld [vmem:[#allocation12_spill] sm:$0xff] }
 0x2d1   : > { %v5063_v16 = vld [vmem:[#allocation2 + $0x70] sm:$0x8]  ;;  %v4879_v53 = vsel %vm12957_vm8, %v4648_v52, %v4878_v46  ;;  %6405 = vmatmul.bf16.gmra.mxu3 %v6309_v60  ;;  %v3948_v13 = vadd.f32 %v3898_v27, %v3266_v2  ;;  %v4473_v23 = vpack.c.bf16 %v4441_v24, %v4441_v24  ;;  %v10831_v51 = vrot.slane %v6101_v30, 9  ;;  %v13657_v60 = vpop.f32.mrf.mxu1  ;;  %v11514_v24 = vld [vmem:[#allocation2 + $0x24] sm:$0xff] }
 0x2d2   : > { %v10676_v45 = vrot.slane %v5063_v16, 11  ;;  %4880 = vst [vmem:[#allocation2 + $0x78] sm:$0xf] %v4879_v53  ;;  %6719 = vmatmul.bf16.gmra.mxu0 %v11553_v25  ;;  %v5160_v61 = vld [vmem:[#allocation2 + $0x74] sm:$0x1]  ;;  %v4649_v7 = vrot.slane %v13629_v31, 4  ;;  %v6173_v52 = vsel %vm12141_vm5, %v6171_v0, %v6172_v43  ;;  %v2953_v15 = vadd.f32 %v13463_v8, %v15359_v50 }
 0x2d3   : > { %v4374_v10 = vadd.f32 %v13610_v56, %v3948_v13  ;;  %v4651_v28 = vshrl.u32 %v4473_v23, 16  ;;  %v4654_v17 = vshll.u32 %v4473_v23, 16  ;;  %v5396_v56 = vsel %vm11839_vm2, %v5391_v49, %v5395_v14  ;;  %v13676_v43 = vld [vmem:[#allocation2 + $0x50] sm:$0x1] }
 0x2d4   : > { %v5161_v9 = vsel %vm13062_vm14, %v10676_v45, %v5160_v61  ;;  %v5674_v46 = vunpack.c.l.b16 %v5396_v56  ;;  %v6170_v25 = vsel %vm12141_vm5, %v10831_v51, %v6169_v6  ;;  %v5417_v16 = vshll.u32 %v13661_v5, 16 }
 0x2d5   : > { %5162 = vst [vmem:[#allocation2 + $0x74] sm:$0x1] %v5161_v9  ;;  %v4410_v12 = vadd.f32 %v13368_v37, %v4374_v10  ;;  %v4653_v3 = vrot.slane %v4651_v28, 7  ;;  %v6282_v23 = vunpack.c.l.b16 %v6173_v52  ;;  %v5421_v6 = vshrl.u32 %v13661_v5, 16  ;;  %v5211_v9 = vld [vmem:[#allocation2 + $0x48] sm:$0xf] }
 0x2d6   : > { %v3218_v55 = vpop.f32.mrf.mxu2  ;;  %v5701_v27 = vpack.c.b16 %v5675_v42, %v5674_v46  ;;  %v5419_v28 = vrot.slane %v5417_v16, 5  ;;  %v5408_v4 = vshrl.u32 %v5211_v9, 16  ;;  %v5411_v42 = vshll.u32 %v5211_v9, 16  ;;  %v11554_v46 = vld [vmem:[#allocation2 + $0x30] sm:$0xff]  ;;  %v15360_v9 = vld [vmem:[#allocation13_spill] sm:$0xff] }
 0x2d7   : > { %v4442_v58 = vmax.f32 %v4410_v12, 0.0  ;;  %v3267_v22 = vadd.f32 %v3218_v55, %v2952_v48  ;;  %v3900_v44 = vpop.f32.mrf.mxu3  ;;  %v4656_v47 = vor.u32 %v4654_v17, %v4653_v3  ;;  %v4658_v62 = vrot.slane %v4653_v3, 4  ;;  %v4885_v48 = vld [vmem:[#allocation2 + $0x84] sm:$0xf] }
 0x2d8   : > { %v13653_v59 = vpop.f32.mrf.mxu0  ;;  %v5423_v8 = vrot.slane %v5421_v6, 4  ;;  %v5427_v3 = vshll.u32 %v13676_v43, 16  ;;  %v11579_v17 = vld [vmem:[%s15305_s3 + $0x120] sm:$0xff]  ;;  %v6179_v50 = vrot.slane %v13584_v1, 5 }
 0x2d9   : > { %v4936_v14 = vld [vmem:[#allocation2 + $0x78] sm:$0x2]  ;;  %v4474_v2 = vpack.c.bf16 %v4442_v58, %v4442_v58  ;;  %v3949_v32 = vadd.f32 %v3900_v44, %v3267_v22  ;;  %v4657_v29 = vsel %vm12998_vm13, %v4649_v7, %v4656_v47  ;;  %v4883_v57 = vsel %vm12984_vm12, %v4658_v62, %v4882_v11  ;;  %v5034_v53 = vld [vmem:[#allocation2 + $0x78] sm:$0x1]  ;;  %7386 = vmatpush.bf16.msrb.mxu1 %v11579_v17  ;;  %v6102_v62 = vld [vmem:[#allocation2 + $0x30] sm:$0xe] }
 0x2da   : > { %v10661_v31 = vrot.slane %v4936_v14, 9  ;;  %4881 = vst [vmem:[#allocation2 + $0x7c] sm:$0xf] %v4657_v29  ;;  %5809 = vmatmul.bf16.gmra.mxu1 %v5701_v27  ;;  %v5410_v22 = vrot.slane %v5408_v4, 4  ;;  %v5413_v44 = vrot.slane %v5411_v42, 5  ;;  %v5424_v51 = vor.u32 %v5423_v8, %v5419_v28 }
 0x2db   : > { %v4660_v13 = vshrl.u32 %v4474_v2, 16  ;;  %v4375_v45 = vadd.f32 %v4326_v36, %v3949_v32  ;;  %6032 = vmatmul.bf16.gmra.mxu2 %v11514_v24  ;;  %4884 = vst [vmem:[#allocation2 + $0x80] sm:$0x1] %v4883_v57  ;;  %v4663_v10 = vshll.u32 %v4474_v2, 16  ;;  %v6281_v36 = vunpack.c.l.b16 %v6170_v25  ;;  %v6108_v38 = vld [vmem:[#allocation2 + $0x78] sm:$0xe] }
 0x2dc   : > { %v5035_v61 = vsel %vm12984_vm12, %v10661_v31, %v5034_v53  ;;  %v5429_v7 = vrot.slane %v5427_v3, 5  ;;  %v5414_v32 = vor.u32 %v5413_v44, %v5410_v22  ;;  %v5425_v24 = vrot.slane %v5424_v51, 4  ;;  %v13688_v31 = vpop.f32.mrf.mxu1  ;;  %v13712_v22 = vld [vmem:[#allocation2 + $0x58] sm:$0xf] }
 0x2dd   : > { %5036 = vst [vmem:[#allocation2 + $0x78] sm:$0x1] %v5035_v61  ;;  %v13673_v49 = vrot.slane %v4660_v13, 7  ;;  %v4411_v30 = vadd.f32 %v13368_v37, %v4375_v45  ;;  %v6310_v0 = vpack.c.b16 %v6282_v23, %v6281_v36  ;;  %v6176_v25 = vrot.slane %v13571_v34, 5  ;;  %v4889_v36 = vld [vmem:[#allocation2 + $0x8c] sm:$0x1] }
 0x2de   : > { %v3221_v12 = vpop.f32.mrf.mxu2  ;;  %v10832_v53 = vrot.slane %v6102_v62, 9  ;;  %v5415_v23 = vrot.slane %v5414_v32, 4  ;;  %v5430_v6 = vsel %vm11839_vm2, %v5425_v24, %v5429_v7  ;;  %v5441_v7 = vshll.u32 %v13712_v22, 16 }
 0x2df   : > { %v4665_v56 = vor.u32 %v4663_v10, %v13673_v49  ;;  %v4443_v55 = vmax.f32 %v4411_v30, 0.0  ;;  %v3268_v11 = vadd.f32 %v3221_v12, %v2953_v15  ;;  %v3903_v58 = vpop.f32.mrf.mxu3  ;;  %v5677_v10 = vunpack.c.l.b16 %v5430_v6  ;;  %v13725_v6 = vld [vmem:[#allocation2 + $0x5c] sm:$0x1] }
 0x2e0   : > { %v13683_v47 = vpop.f32.mrf.mxu0  ;;  %v2954_v30 = vadd.f32 %v13526_v20, %v15360_v9  ;;  %v5420_v4 = vsel %vm11839_vm2, %v5415_v23, %v5419_v28  ;;  %v6178_v12 = vrot.slane %v6176_v25, 4  ;;  %v6177_v20 = vsel %vm12141_vm5, %v10832_v53, %v6176_v25  ;;  %v5213_v25 = vld [vmem:[#allocation2 + $0x54] sm:$0xf] }
 0x2e1   : > { %v4886_v52 = vsel %vm12957_vm8, %v4665_v56, %v4885_v48  ;;  %v4475_v14 = vpack.c.bf16 %v4443_v55, %v4443_v55  ;;  %6410 = vmatmul.bf16.gmra.mxu3 %v6310_v0  ;;  %v3950_v2 = vadd.f32 %v3903_v58, %v3268_v11  ;;  %v5064_v27 = vld [vmem:[#allocation2 + $0x7c] sm:$0x8]  ;;  %v5676_v3 = vunpack.c.l.b16 %v5420_v4 }
 0x2e2   : > { %4887 = vst [vmem:[#allocation2 + $0x84] sm:$0xf] %v4886_v52  ;;  %6724 = vmatmul.bf16.gmra.mxu0 %v11554_v46  ;;  %v10677_v29 = vrot.slane %v5064_v27, 11  ;;  %v5163_v13 = vld [vmem:[#allocation2 + $0x80] sm:$0x1]  ;;  %v11515_v46 = vld [vmem:[#allocation2 + $0x30] sm:$0xff]  ;;  %v6283_v23 = vunpack.c.l.b16 %v6177_v20 }
 0x2e3   : > { %v4668_v57 = vshrl.u32 %v4475_v14, 16  ;;  %v4376_v16 = vadd.f32 %v13653_v59, %v3950_v2  ;;  %v4671_v45 = vshll.u32 %v4475_v14, 16  ;;  %v4666_v59 = vrot.slane %v13673_v49, 4 }
 0x2e4   : > { %v5164_v15 = vsel %vm13062_vm14, %v10677_v29, %v5163_v13  ;;  %v6180_v49 = vsel %vm12141_vm5, %v6178_v12, %v6179_v50  ;;  %v5702_v58 = vpack.c.b16 %v5677_v10, %v5676_v3  ;;  %v5445_v62 = vshrl.u32 %v13712_v22, 16  ;;  %v13721_v13 = vpop.f32.mrf.mxu1 }
 0x2e5   : > { %v4670_v61 = vrot.slane %v4668_v57, 7  ;;  %v4412_v34 = vadd.f32 %v13368_v37, %v4376_v16  ;;  %5165 = vst [vmem:[#allocation2 + $0x80] sm:$0x1] %v5164_v15  ;;  %v6284_v27 = vunpack.c.l.b16 %v6180_v49  ;;  %v5443_v29 = vrot.slane %v5441_v7, 5  ;;  %v15361_v16 = vld [vmem:[#allocation14_spill] sm:$0xff] }
 0x2e6   : > { %v3223_v48 = vpop.f32.mrf.mxu2  ;;  %v5447_v57 = vrot.slane %v5445_v62, 4  ;;  %v2955_v53 = vadd.f32 %v13550_v41, %v15361_v16  ;;  %v5432_v50 = vshrl.u32 %v5213_v25, 16  ;;  %v4892_v15 = vld [vmem:[#allocation2 + $0x90] sm:$0xf]  ;;  %v5435_v10 = vshll.u32 %v5213_v25, 16 }
 0x2e7   : > { %v4673_v1 = vor.u32 %v4671_v45, %v4670_v61  ;;  %v4675_v42 = vrot.slane %v4670_v61, 4  ;;  %v4444_v8 = vmax.f32 %v4412_v34, 0.0  ;;  %v3905_v17 = vpop.f32.mrf.mxu3  ;;  %v3269_v56 = vadd.f32 %v3223_v48, %v2954_v30 }
 0x2e8   : > { %v13702_v37 = vpop.f32.mrf.mxu0  ;;  %v5448_v41 = vor.u32 %v5447_v57, %v5443_v29  ;;  %v5451_v9 = vshll.u32 %v13725_v6, 16  ;;  %v5434_v48 = vrot.slane %v5432_v50, 4 }
 0x2e9   : > { %v4937_v55 = vld [vmem:[#allocation2 + $0x84] sm:$0x2]  ;;  %v4674_v28 = vsel %vm12998_vm13, %v4666_v59, %v4673_v1  ;;  %v4890_v0 = vsel %vm12984_vm12, %v4675_v42, %v4889_v36  ;;  %v4476_v11 = vpack.c.bf16 %v4444_v8, %v4444_v8  ;;  %v3951_v51 = vadd.f32 %v3905_v17, %v3269_v56  ;;  %v5037_v52 = vld [vmem:[#allocation2 + $0x84] sm:$0x1]  ;;  %v11555_v1 = vld [vmem:[#allocation2 + $0x3c] sm:$0xff] }
 0x2ea   : > { %v10662_v44 = vrot.slane %v4937_v55, 9  ;;  %4888 = vst [vmem:[#allocation2 + $0x88] sm:$0xf] %v4674_v28  ;;  %5814 = vmatmul.bf16.gmra.mxu1 %v5702_v58  ;;  %v6311_v59 = vpack.c.b16 %v6284_v27, %v6283_v23  ;;  %v5437_v42 = vrot.slane %v5435_v10, 5  ;;  %v5449_v8 = vrot.slane %v5448_v41, 4 }
 0x2eb   : > { %4891 = vst [vmem:[#allocation2 + $0x8c] sm:$0x1] %v4890_v0  ;;  %v4677_v14 = vshrl.u32 %v4476_v11, 16  ;;  %v4680_v2 = vshll.u32 %v4476_v11, 16  ;;  %6037 = vmatmul.bf16.gmra.mxu2 %v11515_v46  ;;  %v4377_v24 = vadd.f32 %v13683_v47, %v3951_v51  ;;  %v13730_v47 = vld [vmem:[%s15304_s2] ss:$0 sm:$0xff] }
 0x2ec   : > { %v5038_v32 = vsel %vm12984_vm12, %v10662_v44, %v5037_v52  ;;  %v5453_v3 = vrot.slane %v5451_v9, 5  ;;  %v6183_v55 = vrot.slane %v13620_v26, 5  ;;  %v5438_v11 = vor.u32 %v5437_v42, %v5434_v48  ;;  %v6103_v52 = vld [vmem:[#allocation2 + $0x3c] sm:$0xe]  ;;  %v4896_v23 = vld [vmem:[#allocation2 + $0x98] sm:$0x1] }
 0x2ed   : > { %5039 = vst [vmem:[#allocation2 + $0x84] sm:$0x1] %v5038_v32  ;;  %v13723_v45 = vrot.slane %v4677_v14, 7  ;;  %v4413_v61 = vadd.f32 %v13730_v47, %v4377_v24  ;;  %v6186_v14 = vrot.slane %v13631_v21, 5  ;;  %v15362_v26 = vld [vmem:[#allocation15_spill] sm:$0xff] }
 0x2ee   : > { %v3226_v34 = vpop.f32.mrf.mxu2  ;;  %v5454_v58 = vsel %vm11839_vm2, %v5449_v8, %v5453_v3  ;;  %v5439_v62 = vrot.slane %v5438_v11, 4  ;;  %v6185_v16 = vrot.slane %v6183_v55, 4  ;;  %v11516_v48 = vld [vmem:[#allocation2 + $0x3c] sm:$0xff] }
 0x2ef   : > { %v4682_v30 = vor.u32 %v4680_v2, %v13723_v45  ;;  %v3270_v36 = vadd.f32 %v3226_v34, %v2955_v53  ;;  %v3908_v4 = vpop.f32.mrf.mxu3  ;;  %v4445_v12 = vmax.f32 %v4413_v61, 0.0  ;;  %v2956_v2 = vadd.f32 %v13575_v54, %v15362_v26  ;;  %v13749_v53 = vpop.f32.mrf.mxu1  ;;  %v4899_v26 = vld [vmem:[#allocation2 + $0x9c] sm:$0xf] }
 0x2f0   : > { %v4336_v17 = vpop.f32.mrf.mxu0  ;;  %v5679_v32 = vunpack.c.l.b16 %v5454_v58  ;;  %v10833_v34 = vrot.slane %v6103_v52, 9  ;;  %v4683_v54 = vrot.slane %v13723_v45, 4  ;;  %v13773_v52 = vld [vmem:[#allocation2 + $0x68] sm:$0x1] }
 0x2f1   : > { %v5065_v56 = vld [vmem:[#allocation2 + $0x88] sm:$0x8]  ;;  %v4893_v20 = vsel %vm12957_vm8, %v4682_v30, %v4892_v15  ;;  %6415 = vmatmul.bf16.gmra.mxu3 %v6311_v59  ;;  %v3952_v49 = vadd.f32 %v3908_v4, %v3270_v36  ;;  %v4477_v0 = vpack.c.bf16 %v4445_v12, %v4445_v12  ;;  %v6187_v30 = vsel %vm12141_vm5, %v6185_v16, %v6186_v14 }
 0x2f2   : > { %v10678_v28 = vrot.slane %v5065_v56, 11  ;;  %4894 = vst [vmem:[#allocation2 + $0x90] sm:$0xf] %v4893_v20  ;;  %6729 = vmatmul.bf16.gmra.mxu0 %v11555_v1  ;;  %v5166_v46 = vld [vmem:[#allocation2 + $0x8c] sm:$0x1]  ;;  %v6184_v12 = vsel %vm12141_vm5, %v10833_v34, %v6183_v55 }
 0x2f3   : > { %v4378_v44 = vadd.f32 %v13702_v37, %v3952_v49  ;;  %v4685_v7 = vshrl.u32 %v4477_v0, 16  ;;  %v4688_v25 = vshll.u32 %v4477_v0, 16  ;;  %v5444_v37 = vsel %vm11839_vm2, %v5439_v62, %v5443_v29  ;;  %v13758_v1 = vld [vmem:[#allocation2 + $0x64] sm:$0xf] }
 0x2f4   : > { %v5167_v51 = vsel %vm13062_vm14, %v10678_v28, %v5166_v46  ;;  %v5678_v15 = vunpack.c.l.b16 %v5444_v37  ;;  %v5465_v3 = vshll.u32 %v13758_v1, 16  ;;  %v6286_v28 = vunpack.c.l.b16 %v6187_v30  ;;  %v15363_v0 = vld [vmem:[#allocation16_spill] sm:$0xff] }
 0x2f5   : > { %5168 = vst [vmem:[#allocation2 + $0x8c] sm:$0x1] %v5167_v51  ;;  %v4414_v27 = vadd.f32 %v13730_v47, %v4378_v44  ;;  %v4687_v24 = vrot.slane %v4685_v7, 7  ;;  %v5469_v55 = vshrl.u32 %v13758_v1, 16  ;;  %v2957_v11 = vadd.f32 %v13604_v33, %v15363_v0  ;;  %v5215_v44 = vld [vmem:[#allocation2 + $0x60] sm:$0xf] }
 0x2f6   : > { %v3228_v57 = vpop.f32.mrf.mxu2  ;;  %v5703_v36 = vpack.c.b16 %v5679_v32, %v5678_v15  ;;  %v5467_v51 = vrot.slane %v5465_v3, 5  ;;  %v5456_v14 = vshrl.u32 %v5215_v44, 16  ;;  %v5475_v32 = vshll.u32 %v13773_v52, 16  ;;  %v11556_v15 = vld [vmem:[#allocation2 + $0x48] sm:$0xff] }
 0x2f7   : > { %v4446_v50 = vmax.f32 %v4414_v27, 0.0  ;;  %v3271_v21 = vadd.f32 %v3228_v57, %v2956_v2  ;;  %v3910_v61 = vpop.f32.mrf.mxu3  ;;  %v4690_v10 = vor.u32 %v4688_v25, %v4687_v24  ;;  %v4692_v41 = vrot.slane %v4687_v24, 4  ;;  %v11578_v24 = vld [vmem:[%s15305_s3 + $0x118] sm:$0xff] }
 0x2f8   : > { %v13752_v9 = vpop.f32.mrf.mxu0  ;;  %v5459_v27 = vshll.u32 %v5215_v44, 16  ;;  %v5471_v33 = vrot.slane %v5469_v55, 4  ;;  %7387 = vmatpush.bf16.msrb.mxu1 %v11578_v24  ;;  %v6193_v55 = vrot.slane %v13676_v43, 5 }
 0x2f9   : > { %v4938_v29 = vld [vmem:[#allocation2 + $0x90] sm:$0x2]  ;;  %v4478_v59 = vpack.c.bf16 %v4446_v50, %v4446_v50  ;;  %v3953_v4 = vadd.f32 %v3910_v61, %v3271_v21  ;;  %v4691_v45 = vsel %vm12998_vm13, %v4683_v54, %v4690_v10  ;;  %v4897_v8 = vsel %vm12984_vm12, %v4692_v41, %v4896_v23  ;;  %v5040_v56 = vld [vmem:[#allocation2 + $0x90] sm:$0x1]  ;;  %v6104_v10 = vld [vmem:[#allocation2 + $0x48] sm:$0xe] }
 0x2fa   : > { %v10663_v42 = vrot.slane %v4938_v29, 9  ;;  %4895 = vst [vmem:[#allocation2 + $0x94] sm:$0xf] %v4691_v45  ;;  %5819 = vmatmul.bf16.gmra.mxu1 %v5703_v36  ;;  %v5458_v21 = vrot.slane %v5456_v14, 4  ;;  %v5461_v61 = vrot.slane %v5459_v27, 5  ;;  %v5472_v34 = vor.u32 %v5471_v33, %v5467_v51 }
 0x2fb   : > { %v4694_v20 = vshrl.u32 %v4478_v59, 16  ;;  %v4379_v49 = vadd.f32 %v4336_v17, %v3953_v4  ;;  %6042 = vmatmul.bf16.gmra.mxu2 %v11516_v48  ;;  %4898 = vst [vmem:[#allocation2 + $0x98] sm:$0x1] %v4897_v8  ;;  %v4697_v46 = vshll.u32 %v4478_v59, 16  ;;  %v6285_v17 = vunpack.c.l.b16 %v6184_v12 }
 0x2fc   : > { %v5041_v58 = vsel %vm12984_vm12, %v10663_v42, %v5040_v56  ;;  %v5477_v54 = vrot.slane %v5475_v32, 5  ;;  %v5462_v4 = vor.u32 %v5461_v61, %v5458_v21  ;;  %v5473_v48 = vrot.slane %v5472_v34, 4  ;;  %v13807_v21 = vld [vmem:[#allocation2 + $0x70] sm:$0xf] }
 0x2fd   : > { %5042 = vst [vmem:[#allocation2 + $0x90] sm:$0x1] %v5041_v58  ;;  %v13770_v7 = vrot.slane %v4694_v20, 7  ;;  %v4415_v62 = vadd.f32 %v13730_v47, %v4379_v49  ;;  %v6312_v16 = vpack.c.b16 %v6286_v28, %v6285_v17  ;;  %v6190_v12 = vrot.slane %v13661_v5, 5 }
 0x2fe   : > { %v3231_v2 = vpop.f32.mrf.mxu2  ;;  %v13780_v57 = vpop.f32.mrf.mxu1  ;;  %v10834_v3 = vrot.slane %v6104_v10, 9  ;;  %v5463_v49 = vrot.slane %v5462_v4, 4  ;;  %v5478_v28 = vsel %vm11839_vm2, %v5473_v48, %v5477_v54  ;;  %v5489_v54 = vshll.u32 %v13807_v21, 16 }
 0x2ff   : > { %v4699_v25 = vor.u32 %v4697_v46, %v13770_v7  ;;  %v4447_v37 = vmax.f32 %v4415_v62, 0.0  ;;  %v3272_v23 = vadd.f32 %v3231_v2, %v2957_v11  ;;  %v3913_v50 = vpop.f32.mrf.mxu3  ;;  %v5681_v5 = vunpack.c.l.b16 %v5478_v28  ;;  %v15364_v46 = vld [vmem:[#allocation17_spill] sm:$0xff]  ;;  %v4903_v62 = vld [vmem:[#allocation2 + $0xa4] sm:$0x1]  ;;  %v13817_v28 = vld [vmem:[#allocation2 + $0x74] sm:$0x1] }
 0x300   : > { %v4341_v59 = vpop.f32.mrf.mxu0  ;;  %v2958_v44 = vadd.f32 %v13635_v35, %v15364_v46  ;;  %v5468_v17 = vsel %vm11839_vm2, %v5463_v49, %v5467_v51  ;;  %v6191_v35 = vsel %vm12141_vm5, %v10834_v3, %v6190_v12  ;;  %v5493_v10 = vshrl.u32 %v13807_v21, 16  ;;  %v15365_v3 = vld [vmem:[#allocation18_spill] sm:$0xff] }
 0x301   : > { %v4900_v41 = vsel %vm12957_vm8, %v4699_v25, %v4899_v26  ;;  %v4479_v30 = vpack.c.bf16 %v4447_v37, %v4447_v37  ;;  %6420 = vmatmul.bf16.gmra.mxu3 %v6312_v16  ;;  %v3954_v29 = vadd.f32 %v3913_v50, %v3272_v23  ;;  %v5066_v36 = vld [vmem:[#allocation2 + $0x94] sm:$0x8]  ;;  %v6192_v26 = vrot.slane %v6190_v12, 4 }
 0x302   : > { %4901 = vst [vmem:[#allocation2 + $0x9c] sm:$0xf] %v4900_v41  ;;  %6734 = vmatmul.bf16.gmra.mxu0 %v11556_v15  ;;  %v10679_v42 = vrot.slane %v5066_v36, 11  ;;  %v5169_v56 = vld [vmem:[#allocation2 + $0x98] sm:$0x1]  ;;  %v5680_v33 = vunpack.c.l.b16 %v5468_v17  ;;  %v11517_v15 = vld [vmem:[#allocation2 + $0x48] sm:$0xff]  ;;  %v6287_v49 = vunpack.c.l.b16 %v6191_v35 }
 0x303   : > { %v4702_v45 = vshrl.u32 %v4479_v30, 16  ;;  %v4380_v8 = vadd.f32 %v13752_v9, %v3954_v29  ;;  %v4705_v20 = vshll.u32 %v4479_v30, 16  ;;  %v4700_v9 = vrot.slane %v13770_v7, 4 }
 0x304   : > { %v5170_v0 = vsel %vm13062_vm14, %v10679_v42, %v5169_v56  ;;  %v6194_v7 = vsel %vm12141_vm5, %v6192_v26, %v6193_v55  ;;  %v5704_v50 = vpack.c.b16 %v5681_v5, %v5680_v33  ;;  %v5217_v42 = vld [vmem:[#allocation2 + $0x6c] sm:$0xf]  ;;  %v2959_v56 = vadd.f32 %v13657_v60, %v15365_v3 }
 0x305   : > { %v4704_v11 = vrot.slane %v4702_v45, 7  ;;  %v4416_v58 = vadd.f32 %v13730_v47, %v4380_v8  ;;  %5171 = vst [vmem:[#allocation2 + $0x98] sm:$0x1] %v5170_v0  ;;  %v6288_v4 = vunpack.c.l.b16 %v6194_v7  ;;  %v5491_v45 = vrot.slane %v5489_v54, 5  ;;  %v4906_v0 = vld [vmem:[#allocation2 + $0xa8] sm:$0xf] }
 0x306   : > { %v3233_v14 = vpop.f32.mrf.mxu2  ;;  %v13797_v32 = vpop.f32.mrf.mxu1  ;;  %v5495_v8 = vrot.slane %v5493_v10, 4  ;;  %v5480_v55 = vshrl.u32 %v5217_v42, 16  ;;  %v5483_v5 = vshll.u32 %v5217_v42, 16  ;;  %v6197_v7 = vrot.slane %v13712_v22, 5  ;;  %v6105_v10 = vld [vmem:[#allocation2 + $0x54] sm:$0xe] }
 0x307   : > { %v4707_v43 = vor.u32 %v4705_v20, %v4704_v11  ;;  %v4709_v2 = vrot.slane %v4704_v11, 4  ;;  %v4448_v27 = vmax.f32 %v4416_v58, 0.0  ;;  %v3915_v24 = vpop.f32.mrf.mxu3  ;;  %v3273_v25 = vadd.f32 %v3233_v14, %v2958_v44 }
 0x308   : > { %v4344_v36 = vpop.f32.mrf.mxu0  ;;  %v5496_v46 = vor.u32 %v5495_v8, %v5491_v45  ;;  %v6313_v60 = vpack.c.b16 %v6288_v4, %v6287_v49  ;;  %v5482_v14 = vrot.slane %v5480_v55, 4  ;;  %v6199_v3 = vrot.slane %v6197_v7, 4 }
 0x309   : > { %v4939_v37 = vld [vmem:[#allocation2 + $0x9c] sm:$0x2]  ;;  %v4708_v51 = vsel %vm12998_vm13, %v4700_v9, %v4707_v43  ;;  %v4904_v16 = vsel %vm12984_vm12, %v4709_v2, %v4903_v62  ;;  %v4480_v23 = vpack.c.bf16 %v4448_v27, %v4448_v27  ;;  %v3955_v34 = vadd.f32 %v3915_v24, %v3273_v25  ;;  %v5043_v41 = vld [vmem:[#allocation2 + $0x9c] sm:$0x1]  ;;  %v11557_v43 = vld [vmem:[#allocation2 + $0x54] sm:$0xff] }
 0x30a   : > { %v10664_v61 = vrot.slane %v4939_v37, 9  ;;  %4902 = vst [vmem:[#allocation2 + $0xa0] sm:$0xf] %v4708_v51  ;;  %5824 = vmatmul.bf16.gmra.mxu1 %v5704_v50  ;;  %v5485_v2 = vrot.slane %v5483_v5, 5  ;;  %v5497_v27 = vrot.slane %v5496_v46, 4 }
 0x30b   : > { %4905 = vst [vmem:[#allocation2 + $0xa4] sm:$0x1] %v4904_v16  ;;  %v4711_v30 = vshrl.u32 %v4480_v23, 16  ;;  %v4714_v29 = vshll.u32 %v4480_v23, 16  ;;  %6047 = vmatmul.bf16.gmra.mxu2 %v11517_v15  ;;  %v4381_v12 = vadd.f32 %v4341_v59, %v3955_v34  ;;  %v5499_v59 = vshll.u32 %v13817_v28, 16 }
 0x30c   : > { %v5044_v48 = vsel %vm12984_vm12, %v10664_v61, %v5043_v41  ;;  %v5486_v16 = vor.u32 %v5485_v2, %v5482_v14  ;;  %v6200_v41 = vrot.slane %v13725_v6, 5 }
 0x30d   : > { %5045 = vst [vmem:[#allocation2 + $0x9c] sm:$0x1] %v5044_v48  ;;  %v13815_v20 = vrot.slane %v4711_v30, 7  ;;  %v4417_v11 = vadd.f32 %v13730_v47, %v4381_v12  ;;  %v5501_v33 = vrot.slane %v5499_v59, 5  ;;  %v15366_v30 = vld [vmem:[#allocation19_spill] sm:$0xff] }
 0x30e   : > { %v3236_v58 = vpop.f32.mrf.mxu2  ;;  %v13822_v9 = vpop.f32.mrf.mxu1  ;;  %v5487_v54 = vrot.slane %v5486_v16, 4  ;;  %v2960_v22 = vadd.f32 %v13688_v31, %v15366_v30  ;;  %v6201_v59 = vsel %vm12141_vm5, %v6199_v3, %v6200_v41 }
 0x30f   : > { %v4716_v44 = vor.u32 %v4714_v29, %v13815_v20  ;;  %v3274_v62 = vadd.f32 %v3236_v58, %v2959_v56  ;;  %v3918_v17 = vpop.f32.mrf.mxu3  ;;  %v4449_v26 = vmax.f32 %v4417_v11, 0.0  ;;  %v5502_v23 = vsel %vm11839_vm2, %v5497_v27, %v5501_v33  ;;  %v4910_v56 = vld [vmem:[#allocation2 + $0xb0] sm:$0x1] }
 0x310   : > { %v5683_v4 = vunpack.c.l.b16 %v5502_v23  ;;  %v4346_v48 = vpop.f32.mrf.mxu0  ;;  %v10835_v11 = vrot.slane %v6105_v10, 9  ;;  %v4717_v31 = vrot.slane %v13815_v20, 4  ;;  %v5219_v23 = vld [vmem:[#allocation2 + $0x78] sm:$0xf]  ;;  %v4913_v10 = vld [vmem:[#allocation2 + $0xb4] sm:$0xf] }
 0x311   : > { %v5067_v24 = vld [vmem:[#allocation2 + $0xa0] sm:$0x8]  ;;  %v4907_v25 = vsel %vm12957_vm8, %v4716_v44, %v4906_v0  ;;  %6425 = vmatmul.bf16.gmra.mxu3 %v6313_v60  ;;  %v3956_v35 = vadd.f32 %v3918_v17, %v3274_v62  ;;  %v4481_v51 = vpack.c.bf16 %v4449_v26, %v4449_v26  ;;  %v11518_v17 = vld [vmem:[#allocation2 + $0x54] sm:$0xff]  ;;  %v13844_v26 = vld [vmem:[#allocation2 + $0x7c] sm:$0xf] }
 0x312   : > { %v10680_v37 = vrot.slane %v5067_v24, 11  ;;  %4908 = vst [vmem:[#allocation2 + $0xa8] sm:$0xf] %v4907_v25  ;;  %6739 = vmatmul.bf16.gmra.mxu0 %v11557_v43  ;;  %v5172_v50 = vld [vmem:[#allocation2 + $0xa4] sm:$0x1]  ;;  %v6198_v14 = vsel %vm12141_vm5, %v10835_v11, %v6197_v7  ;;  %v5513_v27 = vshll.u32 %v13844_v26, 16 }
 0x313   : > { %v4382_v15 = vadd.f32 %v4344_v36, %v3956_v35  ;;  %v4719_v34 = vshrl.u32 %v4481_v51, 16  ;;  %v4722_v42 = vshll.u32 %v4481_v51, 16  ;;  %v5492_v36 = vsel %vm11839_vm2, %v5487_v54, %v5491_v45 }
 0x314   : > { %v5173_v61 = vsel %vm13062_vm14, %v10680_v37, %v5172_v50  ;;  %v5682_v55 = vunpack.c.l.b16 %v5492_v36  ;;  %v6290_v35 = vunpack.c.l.b16 %v6201_v59  ;;  %v5517_v7 = vshrl.u32 %v13844_v26, 16 }
 0x315   : > { %5174 = vst [vmem:[#allocation2 + $0xa4] sm:$0x1] %v5173_v61  ;;  %v4418_v29 = vadd.f32 %v13730_v47, %v4382_v15  ;;  %v4721_v12 = vrot.slane %v4719_v34, 7  ;;  %v6289_v16 = vunpack.c.l.b16 %v6198_v14  ;;  %v5515_v50 = vrot.slane %v5513_v27, 5 }
 0x316   : > { %v3238_v8 = vpop.f32.mrf.mxu2  ;;  %v13837_v0 = vpop.f32.mrf.mxu1  ;;  %v5705_v45 = vpack.c.b16 %v5683_v4, %v5682_v55  ;;  %v5504_v34 = vshrl.u32 %v5219_v23, 16  ;;  %v5507_v54 = vshll.u32 %v5219_v23, 16  ;;  %v5519_v30 = vrot.slane %v5517_v7, 4  ;;  %v4917_v7 = vld [vmem:[#allocation2 + $0xbc] sm:$0x1] }
 0x317   : > { %v4450_v49 = vmax.f32 %v4418_v29, 0.0  ;;  %v3275_v6 = vadd.f32 %v3238_v8, %v2960_v22  ;;  %v4724_v58 = vor.u32 %v4722_v42, %v4721_v12  ;;  %v4726_v5 = vrot.slane %v4721_v12, 4  ;;  %v3920_v46 = vpop.f32.mrf.mxu3  ;;  %v15367_v22 = vld [vmem:[#allocation20_spill] sm:$0xff] }
 0x318   : > { %v2961_v29 = vadd.f32 %v13721_v13, %v15367_v22  ;;  %v6314_v42 = vpack.c.b16 %v6290_v35, %v6289_v16  ;;  %v11558_v8 = vld [vmem:[#allocation2 + $0x60] sm:$0xff]  ;;  %v5506_v3 = vrot.slane %v5504_v34, 4  ;;  %v11577_v13 = vld [vmem:[%s15305_s3 + $0x110] sm:$0xff]  ;;  %v6204_v59 = vrot.slane %v13758_v1, 5 }
 0x319   : > { %v4940_v44 = vld [vmem:[#allocation2 + $0xa8] sm:$0x2]  ;;  %v4482_v60 = vpack.c.bf16 %v4450_v49, %v4450_v49  ;;  %v3957_v62 = vadd.f32 %v3920_v46, %v3275_v6  ;;  %v4725_v20 = vsel %vm12998_vm13, %v4717_v31, %v4724_v58  ;;  %v4911_v2 = vsel %vm12984_vm12, %v4726_v5, %v4910_v56  ;;  %v5046_v33 = vld [vmem:[#allocation2 + $0xa8] sm:$0x1]  ;;  %v13864_v31 = vld [vmem:[#allocation2 + $0x80] sm:$0x1]  ;;  %7388 = vmatpush.bf16.msrb.mxu1 %v11577_v13 }
 0x31a   : > { %v10665_v43 = vrot.slane %v4940_v44, 9  ;;  %4909 = vst [vmem:[#allocation2 + $0xac] sm:$0xf] %v4725_v20  ;;  %5829 = vmatmul.bf16.gmra.mxu1 %v5705_v45  ;;  %v5509_v56 = vrot.slane %v5507_v54, 5  ;;  %v5520_v49 = vor.u32 %v5519_v30, %v5515_v50  ;;  %v5523_v46 = vshll.u32 %v13864_v31, 16  ;;  %v15368_v44 = vld [vmem:[#allocation3_spill] sm:$0xff] }
 0x31b   : > { %v4728_v24 = vshrl.u32 %v4482_v60, 16  ;;  %v4383_v25 = vadd.f32 %v4346_v48, %v3957_v62  ;;  %6052 = vmatmul.bf16.gmra.mxu2 %v11518_v17  ;;  %4912 = vst [vmem:[#allocation2 + $0xb0] sm:$0x1] %v4911_v2  ;;  %v4731_v51 = vshll.u32 %v4482_v60, 16  ;;  %v2962_v60 = vadd.f32 %v13749_v53, %v15368_v44  ;;  %v6106_v17 = vld [vmem:[#allocation2 + $0x60] sm:$0xe] }
 0x31c   : > { %v5047_v37 = vsel %vm12984_vm12, %v10665_v43, %v5046_v33  ;;  %v5510_v5 = vor.u32 %v5509_v56, %v5506_v3  ;;  %v5521_v2 = vrot.slane %v5520_v49, 4  ;;  %v5525_v27 = vrot.slane %v5523_v46, 5  ;;  %v11519_v22 = vld [vmem:[#allocation2 + $0x60] sm:$0xff]  ;;  %v13894_v46 = vld [vmem:[#allocation2 + $0x8c] sm:$0x1] }
 0x31d   : > { %5048 = vst [vmem:[#allocation2 + $0xa8] sm:$0x1] %v5047_v37  ;;  %v13854_v15 = vrot.slane %v4728_v24, 7  ;;  %v4419_v61 = vadd.f32 %v13730_v47, %v4383_v25  ;;  %v6207_v33 = vrot.slane %v13773_v52, 5  ;;  %v10836_v16 = vrot.slane %v6106_v17, 9 }
 0x31e   : > { %v3241_v41 = vpop.f32.mrf.mxu2  ;;  %v13860_v36 = vpop.f32.mrf.mxu1  ;;  %v5511_v20 = vrot.slane %v5510_v5, 4  ;;  %v5526_v37 = vsel %vm11839_vm2, %v5521_v2, %v5525_v27  ;;  %v6206_v23 = vrot.slane %v6204_v59, 4  ;;  %v5221_v3 = vld [vmem:[#allocation2 + $0x84] sm:$0xf]  ;;  %v5547_v27 = vshll.u32 %v13894_v46, 16 }
 0x31f   : > { %v4733_v4 = vor.u32 %v4731_v51, %v13854_v15  ;;  %v4451_v48 = vmax.f32 %v4419_v61, 0.0  ;;  %v4349_v12 = vpop.f32.mrf.mxu0  ;;  %v3276_v11 = vadd.f32 %v3241_v41, %v2961_v29  ;;  %v4734_v61 = vrot.slane %v13854_v15, 4 }
 0x320   : > { %v5516_v53 = vsel %vm11839_vm2, %v5511_v20, %v5515_v50  ;;  %v5685_v30 = vunpack.c.l.b16 %v5526_v37  ;;  %v6205_v29 = vsel %vm12141_vm5, %v10836_v16, %v6204_v59  ;;  %v6208_v50 = vsel %vm12141_vm5, %v6206_v23, %v6207_v33  ;;  %v11559_v16 = vld [vmem:[#allocation2 + $0x6c] sm:$0xff] }
 0x321   : > { %v4914_v55 = vsel %vm12957_vm8, %v4733_v4, %v4913_v10  ;;  %v4483_v6 = vpack.c.bf16 %v4451_v48, %v4451_v48  ;;  %6430 = vmatmul.bf16.gmra.mxu3 %v6314_v42  ;;  %v5068_v58 = vld [vmem:[#allocation2 + $0xac] sm:$0x8]  ;;  %v5684_v41 = vunpack.c.l.b16 %v5516_v53  ;;  %v6292_v5 = vunpack.c.l.b16 %v6208_v50 }
 0x322   : > { %4915 = vst [vmem:[#allocation2 + $0xb4] sm:$0xf] %v4914_v55  ;;  %6744 = vmatmul.bf16.gmra.mxu0 %v11558_v8  ;;  %v10681_v45 = vrot.slane %v5068_v58, 11  ;;  %v5175_v14 = vld [vmem:[#allocation2 + $0xb0] sm:$0x1]  ;;  %v6291_v58 = vunpack.c.l.b16 %v6205_v29  ;;  %v5531_v59 = vshll.u32 %v5221_v3, 16 }
 0x323   : > { %v4736_v62 = vshrl.u32 %v4483_v6, 16  ;;  %v4739_v35 = vshll.u32 %v4483_v6, 16  ;;  %v5706_v49 = vpack.c.b16 %v5685_v30, %v5684_v41  ;;  %v13892_v6 = vld [vmem:[#allocation2 + $0x88] sm:$0xf] }
 0x324   : > { %v3923_v43 = vpop.f32.mrf.mxu3  ;;  %v5176_v24 = vsel %vm13062_vm14, %v10681_v45, %v5175_v14  ;;  %v5541_v17 = vshrl.u32 %v13892_v6, 16  ;;  %v11576_v14 = vld [vmem:[%s15305_s3 + $0x108] sm:$0xff]  ;;  %v5533_v2 = vrot.slane %v5531_v59, 5  ;;  %v6315_v37 = vpack.c.b16 %v6292_v5, %v6291_v58 }
 0x325   : > { %v4738_v25 = vrot.slane %v4736_v62, 7  ;;  %v3958_v1 = vadd.f32 %v3923_v43, %v3276_v11  ;;  %5177 = vst [vmem:[#allocation2 + $0xb0] sm:$0x1] %v5176_v24  ;;  %v5528_v11 = vshrl.u32 %v5221_v3, 16  ;;  %v5537_v62 = vshll.u32 %v13892_v6, 16  ;;  %7389 = vmatpush.bf16.msrb.mxu1 %v11576_v14 }
 0x326   : > { %v3243_v51 = vpop.f32.mrf.mxu2  ;;  %v13890_v55 = vpop.f32.mrf.mxu1  ;;  %v5543_v24 = vrot.slane %v5541_v17, 4 }
 0x327   : > { %v4741_v52 = vor.u32 %v4739_v35, %v4738_v25  ;;  %v4743_v34 = vrot.slane %v4738_v25, 4  ;;  %v4384_v54 = vadd.f32 %v4349_v12, %v3958_v1  ;;  %v4351_v10 = vpop.f32.mrf.mxu0  ;;  %v3277_v8 = vadd.f32 %v3243_v51, %v2962_v60 }
 0x328   : > { %v5530_v45 = vrot.slane %v5528_v11, 4  ;;  %v5539_v33 = vrot.slane %v5537_v62, 5  ;;  %v6211_v35 = vrot.slane %v13807_v21, 5 }
 0x329   : > { %v4941_v4 = vld [vmem:[#allocation2 + $0xb4] sm:$0x2]  ;;  %v5049_v48 = vld [vmem:[#allocation2 + $0xb4] sm:$0x1]  ;;  %v4742_v42 = vsel %vm12998_vm13, %v4734_v61, %v4741_v52  ;;  %v4918_v15 = vsel %vm12984_vm12, %v4743_v34, %v4917_v7  ;;  %v4420_v12 = vadd.f32 %v13730_v47, %v4384_v54  ;;  %v5549_v61 = vrot.slane %v5547_v27, 5 }
 0x32a   : > { %v10666_v56 = vrot.slane %v4941_v4, 9  ;;  %4916 = vst [vmem:[#allocation2 + $0xb8] sm:$0xf] %v4742_v42  ;;  %5834 = vmatmul.bf16.gmra.mxu1 %v5706_v49  ;;  %v5534_v51 = vor.u32 %v5533_v2, %v5530_v45  ;;  %v5544_v23 = vor.u32 %v5543_v24, %v5539_v33  ;;  %v5223_v34 = vld [vmem:[#allocation2 + $0x90] sm:$0xf]  ;;  %v6213_v42 = vrot.slane %v6211_v35, 4 }
 0x32b   : > { %4919 = vst [vmem:[#allocation2 + $0xbc] sm:$0x1] %v4918_v15  ;;  %v4452_v13 = vmax.f32 %v4420_v12, 0.0  ;;  %6057 = vmatmul.bf16.gmra.mxu2 %v11519_v22  ;;  %v13908_v54 = vld [vmem:[#allocation2 + $0x94] sm:$0xf]  ;;  %v6214_v15 = vrot.slane %v13817_v28, 5 }
 0x32c   : > { %v5050_v44 = vsel %vm12984_vm12, %v10666_v56, %v5049_v48  ;;  %v3925_v60 = vpop.f32.mrf.mxu3  ;;  %v5535_v29 = vrot.slane %v5534_v51, 4  ;;  %v4920_v4 = vld [vmem:[#allocation2 + $0xc0] sm:$0xf]  ;;  %v5545_v48 = vrot.slane %v5544_v23, 4  ;;  %v5552_v3 = vshrl.u32 %v5223_v34, 16 }
 0x32d   : > { %5051 = vst [vmem:[#allocation2 + $0xb4] sm:$0x1] %v5050_v44  ;;  %v4484_v43 = vpack.c.bf16 %v4452_v13, %v4452_v13  ;;  %v3959_v20 = vadd.f32 %v3925_v60, %v3277_v8  ;;  %v5555_v56 = vshll.u32 %v5223_v34, 16  ;;  %v5561_v58 = vshll.u32 %v13908_v54, 16  ;;  %v13933_v24 = vld [vmem:[#allocation2 + $0x98] sm:$0x1] }
 0x32e   : > { %v6018_v25 = vpop.f32.mrf.mxu2  ;;  %v13914_v11 = vpop.f32.mrf.mxu1  ;;  %v5565_v5 = vshrl.u32 %v13908_v54, 16  ;;  %v5540_v44 = vsel %vm11839_vm2, %v5535_v29, %v5539_v33  ;;  %v6215_v2 = vsel %vm12141_vm5, %v6213_v42, %v6214_v15  ;;  %v5554_v33 = vrot.slane %v5552_v3, 4  ;;  %v4924_v23 = vld [vmem:[#allocation2 + $0xc8] sm:$0x1] }
 0x32f   : > { %v4745_v1 = vshrl.u32 %v4484_v43, 16  ;;  %v4385_v7 = vadd.f32 %v4351_v10, %v3959_v20  ;;  %v13905_v53 = vpop.f32.mrf.mxu0  ;;  %v6019_v52 = vadd.f32 %v6018_v25, %v13780_v57  ;;  %v4748_v22 = vshll.u32 %v4484_v43, 16  ;;  %v6107_v10 = vld [vmem:[#allocation2 + $0x6c] sm:$0xe] }
 0x330   : > { %v10837_v17 = vrot.slane %v6107_v10, 9  ;;  %v5686_v18 = vunpack.c.l.b16 %v5540_v44  ;;  %v5557_v25 = vrot.slane %v5555_v56, 5  ;;  %v5563_v51 = vrot.slane %v5561_v58, 5 }
 0x331   : > { %v5069_v41 = vld [vmem:[#allocation2 + $0xb8] sm:$0x8]  ;;  %v4747_v30 = vrot.slane %v4745_v1, 7  ;;  %v4421_v21 = vadd.f32 %v13730_v47, %v4385_v7  ;;  %6435 = vmatmul.bf16.gmra.mxu3 %v6315_v37  ;;  %v5550_v47 = vsel %vm11839_vm2, %v5545_v48, %v5549_v61  ;;  %v11520_v37 = vld [vmem:[#allocation2 + $0x6c] sm:$0xff] }
 0x332   : > { %v10682_v50 = vrot.slane %v5069_v41, 11  ;;  %6749 = vmatmul.bf16.gmra.mxu0 %v11559_v16  ;;  %v5178_v12 = vld [vmem:[#allocation2 + $0xbc] sm:$0x1]  ;;  %v5687_v45 = vunpack.c.l.b16 %v5550_v47  ;;  %v6212_v27 = vsel %vm12141_vm5, %v10837_v17, %v6211_v35  ;;  %v5567_v16 = vrot.slane %v5565_v5, 4 }
 0x333   : > { %v4750_v57 = vor.u32 %v4748_v22, %v4747_v30  ;;  %v4453_v8 = vmax.f32 %v4421_v21, 0.0  ;;  %v5571_v22 = vshll.u32 %v13933_v24, 16  ;;  %v6293_v21 = vunpack.c.l.b16 %v6212_v27  ;;  %v11560_v47 = vld [vmem:[#allocation2 + $0x78] sm:$0xff] }
 0x334   : > { %v5179_v49 = vsel %vm13062_vm14, %v10682_v50, %v5178_v12  ;;  %v6396_v13 = vpop.f32.mrf.mxu3  ;;  %v5707_v61 = vpack.c.b16 %v5687_v45, %v5686_v18  ;;  %v5558_v29 = vor.u32 %v5557_v25, %v5554_v33  ;;  %v5568_v42 = vor.u32 %v5567_v16, %v5563_v51  ;;  %v5225_v5 = vld [vmem:[#allocation2 + $0x9c] sm:$0xf] }
 0x335   : > { %5180 = vst [vmem:[#allocation2 + $0xbc] sm:$0x1] %v5179_v49  ;;  %v4921_v28 = vsel %vm12957_vm8, %v4750_v57, %v4920_v4  ;;  %v4485_v59 = vpack.c.bf16 %v4453_v8, %v4453_v8  ;;  %v13924_v60 = vadd.f32 %v6396_v13, %v6019_v52  ;;  %v6294_v52 = vunpack.c.l.b16 %v6215_v2 }
 0x336   : > { %4922 = vst [vmem:[#allocation2 + $0xc0] sm:$0xf] %v4921_v28  ;;  %v6020_v62 = vpop.f32.mrf.mxu2  ;;  %v13942_v15 = vpop.f32.mrf.mxu1  ;;  %v5573_v56 = vrot.slane %v5571_v22, 5  ;;  %v5559_v13 = vrot.slane %v5558_v29, 4  ;;  %v5569_v58 = vrot.slane %v5568_v42, 4  ;;  %v6218_v28 = vrot.slane %v13844_v26, 5 }
 0x337   : > { %v4753_v14 = vshrl.u32 %v4485_v59, 16  ;;  %v13926_v43 = vpop.f32.mrf.mxu0  ;;  %v6021_v20 = vadd.f32 %v6020_v62, %v13797_v32  ;;  %v4756_v7 = vshll.u32 %v4485_v59, 16  ;;  %v4751_v32 = vrot.slane %v4747_v30, 4  ;;  %v13950_v59 = vld [vmem:[#allocation2 + $0xa0] sm:$0xf] }
 0x338   : > { %v6316_v3 = vpack.c.b16 %v6294_v52, %v6293_v21  ;;  %v5574_v44 = vsel %vm11839_vm2, %v5569_v58, %v5573_v56  ;;  %v6221_v62 = vrot.slane %v13864_v31, 5  ;;  %v5576_v17 = vshrl.u32 %v5225_v5, 16  ;;  %v11561_v58 = vld [vmem:[#allocation2 + $0x84] sm:$0xff] }
 0x339   : > { %v4755_v1 = vrot.slane %v4753_v14, 7  ;;  %v5579_v2 = vshll.u32 %v5225_v5, 16  ;;  %v5585_v18 = vshll.u32 %v13950_v59, 16  ;;  %v5589_v26 = vshrl.u32 %v13950_v59, 16 }
 0x33a   : > { %5839 = vmatmul.bf16.gmra.mxu1 %v5707_v61  ;;  %v5689_v33 = vunpack.c.l.b16 %v5574_v44  ;;  %v11521_v61 = vld [vmem:[#allocation2 + $0x78] sm:$0xff]  ;;  %v10838_v52 = vrot.slane %v6108_v38, 9  ;;  %v5227_v44 = vld [vmem:[#allocation2 + $0xa8] sm:$0xf] }
 0x33b   : > { %v4758_v34 = vor.u32 %v4756_v7, %v4755_v1  ;;  %v4760_v41 = vrot.slane %v4755_v1, 4  ;;  %6062 = vmatmul.bf16.gmra.mxu2 %v11520_v37  ;;  %v6220_v1 = vrot.slane %v6218_v28, 4  ;;  %v5581_v22 = vrot.slane %v5579_v2, 5 }
 0x33c   : > { %v6398_v35 = vpop.f32.mrf.mxu3  ;;  %v5591_v21 = vrot.slane %v5589_v26, 4  ;;  %v6219_v19 = vsel %vm12141_vm5, %v10838_v52, %v6218_v28  ;;  %v5603_v2 = vshll.u32 %v5227_v44, 16  ;;  %v14004_v52 = vld [vmem:[#allocation2 + $0xb0] sm:$0x1] }
 0x33d   : > { %v4942_v10 = vld [vmem:[#allocation2 + $0xc0] sm:$0x2]  ;;  %v4759_v50 = vsel %vm12998_vm13, %v4751_v32, %v4758_v34  ;;  %v4925_v4 = vsel %vm12984_vm12, %v4760_v41, %v4924_v23  ;;  %v13940_v48 = vadd.f32 %v6398_v35, %v6021_v20  ;;  %v5052_v57 = vld [vmem:[#allocation2 + $0xc0] sm:$0x1]  ;;  %v6222_v32 = vsel %vm12141_vm5, %v6220_v1, %v6221_v62  ;;  %v13970_v34 = vld [vmem:[#allocation2 + $0xa4] sm:$0x1] }
 0x33e   : > { %v10667_v30 = vrot.slane %v4942_v10, 9  ;;  %4923 = vst [vmem:[#allocation2 + $0xc4] sm:$0xf] %v4759_v50  ;;  %v6023_v12 = vpop.f32.mrf.mxu2  ;;  %v5578_v41 = vrot.slane %v5576_v17, 4  ;;  %v5587_v35 = vrot.slane %v5585_v18, 5  ;;  %v5595_v10 = vshll.u32 %v13970_v34, 16 }
 0x33f   : > { %4926 = vst [vmem:[#allocation2 + $0xc8] sm:$0x1] %v4925_v4  ;;  %v13944_v8 = vpop.f32.mrf.mxu0  ;;  %v6024_v63 = vadd.f32 %v6023_v12, %v13822_v9  ;;  %v5564_v9 = vsel %vm11839_vm2, %v5559_v13, %v5563_v51  ;;  %v11575_v4 = vld [vmem:[%s15305_s3 + $0x100] sm:$0xff] }
 0x340   : > { %v5053_v49 = vsel %vm12984_vm12, %v10667_v30, %v5052_v57  ;;  %v5688_v23 = vunpack.c.l.b16 %v5564_v9  ;;  %v6295_v30 = vunpack.c.l.b16 %v6219_v19  ;;  %v5582_v12 = vor.u32 %v5581_v22, %v5578_v41  ;;  %7390 = vmatpush.bf16.msrb.mxu1 %v11575_v4  ;;  %v6109_v17 = vld [vmem:[#allocation2 + $0x84] sm:$0xe]  ;;  %v11590_v4 = vld [vmem:[%s15305_s3 + $0x178] sm:$0xff] }
 0x341   : > { %5054 = vst [vmem:[#allocation2 + $0xc0] sm:$0x1] %v5053_v49  ;;  %6440 = vmatmul.bf16.gmra.mxu3 %v6316_v3  ;;  %v5592_v57 = vor.u32 %v5591_v21, %v5587_v35  ;;  %v5597_v49 = vrot.slane %v5595_v10, 5  ;;  %v6225_v9 = vrot.slane %v13892_v6, 5  ;;  %v5605_v41 = vrot.slane %v5603_v2, 5  ;;  %v11522_v22 = vld [vmem:[#allocation2 + $0x84] sm:$0xff]  ;;  %7809 = vmatpush.bf16.msra.mxu2 %v11590_v4 }
 0x342   : > { %6754 = vmatmul.bf16.gmra.mxu0 %v11560_v47  ;;  %v5708_v29 = vpack.c.b16 %v5689_v33, %v5688_v23  ;;  %v5583_v5 = vrot.slane %v5582_v12, 4 }
 0x343   : > { %v5593_v28 = vrot.slane %v5592_v57, 4  ;;  %v6227_v1 = vrot.slane %v6225_v9, 4 }
 0x344   : > { %v6401_v45 = vpop.f32.mrf.mxu3  ;;  %v5588_v18 = vsel %vm11839_vm2, %v5583_v5, %v5587_v35 }
 0x345   : > { %v5070_v14 = vld [vmem:[#allocation2 + $0xc4] sm:$0x8]  ;;  %v13957_v20 = vadd.f32 %v6401_v45, %v6024_v63  ;;  %v13986_v45 = vld [vmem:[#allocation2 + $0xac] sm:$0xf]  ;;  %v5598_v38 = vsel %vm11839_vm2, %v5593_v28, %v5597_v49  ;;  %v5690_v23 = vunpack.c.l.b16 %v5588_v18  ;;  %v11562_v28 = vld [vmem:[#allocation2 + $0x90] sm:$0xff]  ;;  %v6235_v18 = vrot.slane %v13933_v24, 5 }
 0x346   : > { %v10683_v27 = vrot.slane %v5070_v14, 11  ;;  %v6025_v25 = vpop.f32.mrf.mxu2  ;;  %v5181_v7 = vld [vmem:[#allocation2 + $0xc8] sm:$0x1]  ;;  %v6228_v14 = vrot.slane %v13894_v46, 5  ;;  %v5613_v6 = vshrl.u32 %v13986_v45, 16  ;;  %v5691_v33 = vunpack.c.l.b16 %v5598_v38 }
 0x347   : > { %v13961_v37 = vpop.f32.mrf.mxu0  ;;  %v6026_v51 = vadd.f32 %v6025_v25, %v13837_v0  ;;  %v13966_v16 = vpop.f32.mrf.mxu1  ;;  %v6296_v0 = vunpack.c.l.b16 %v6222_v32 }
 0x348   : > { %v5182_v31 = vsel %vm13062_vm14, %v10683_v27, %v5181_v7  ;;  %v5609_v27 = vshll.u32 %v13986_v45, 16  ;;  %v5615_v21 = vrot.slane %v5613_v6, 4 }
 0x349   : > { %5183 = vst [vmem:[#allocation2 + $0xc8] sm:$0x1] %v5182_v31  ;;  %v6317_v63 = vpack.c.b16 %v6296_v0, %v6295_v30  ;;  %v10839_v31 = vrot.slane %v6109_v17, 9  ;;  %v5619_v0 = vshll.u32 %v14004_v52, 16  ;;  %v6232_v17 = vrot.slane %v13908_v54, 5 }
 0x34a   : > { %5844 = vmatmul.bf16.gmra.mxu1 %v5708_v29  ;;  %v5611_v35 = vrot.slane %v5609_v27, 5  ;;  %v5709_v29 = vpack.c.b16 %v5691_v33, %v5690_v23  ;;  %v6110_v33 = vld [vmem:[#allocation2 + $0x90] sm:$0xe] }
 0x34b   : > { %6067 = vmatmul.bf16.gmra.mxu2 %v11521_v61  ;;  %v6229_v61 = vsel %vm12141_vm5, %v6227_v1, %v6228_v14  ;;  %v6226_v19 = vsel %vm12141_vm5, %v10839_v31, %v6225_v9  ;;  %v11614_v9 = vld [vmem:[%s15305_s3 + $0x1b8] sm:$0xff]  ;;  %v6234_v23 = vrot.slane %v6232_v17, 4  ;;  %v10840_v24 = vrot.slane %v6110_v33, 9 }
 0x34c   : > { %v6403_v50 = vpop.f32.mrf.mxu3  ;;  %v6297_v12 = vunpack.c.l.b16 %v6226_v19  ;;  %v5616_v57 = vor.u32 %v5615_v21, %v5611_v35  ;;  %v14023_v14 = vld [vmem:[#allocation2 + $0xb8] sm:$0xf]  ;;  %8123 = vmatpush.bf16.msra.mxu3 %v11614_v9  ;;  %v14041_v21 = vld [vmem:[#allocation2 + $0xbc] sm:$0x1]  ;;  %v11523_v19 = vld [vmem:[#allocation2 + $0x90] sm:$0xff] }
 0x34d   : > { %v13978_v42 = vadd.f32 %v6403_v50, %v6026_v51  ;;  %v5633_v1 = vshll.u32 %v14023_v14, 16  ;;  %v5637_v54 = vshrl.u32 %v14023_v14, 16 }
 0x34e   : > { %v6028_v3 = vpop.f32.mrf.mxu2  ;;  %v5617_v38 = vrot.slane %v5616_v57, 4  ;;  %v5643_v57 = vshll.u32 %v14041_v21, 16 }
 0x34f   : > { %v13980_v56 = vpop.f32.mrf.mxu0  ;;  %v6029_v47 = vadd.f32 %v6028_v3, %v13860_v36  ;;  %v13983_v13 = vpop.f32.mrf.mxu1  ;;  %v5600_v36 = vshrl.u32 %v5227_v44, 16 }
 0x351   : > { %6445 = vmatmul.bf16.gmra.mxu3 %v6317_v63  ;;  %v5602_v32 = vrot.slane %v5600_v36, 4 }
 0x352   : > { %6759 = vmatmul.bf16.gmra.mxu0 %v11561_v58 }
 0x353   : > { %v5606_v50 = vor.u32 %v5605_v41, %v5602_v32 }
 0x354   : > { %v6406_v62 = vpop.f32.mrf.mxu3 }
 0x355   : > { %v13993_v26 = vadd.f32 %v6406_v62, %v6029_v47  ;;  %v5621_v47 = vrot.slane %v5619_v0, 5  ;;  %v5607_v44 = vrot.slane %v5606_v50, 4  ;;  %v5229_v62 = vld [vmem:[#allocation2 + $0xb4] sm:$0xf]  ;;  %v5639_v50 = vrot.slane %v5637_v54, 4 }
 0x356   : > { %v6030_v25 = vpop.f32.mrf.mxu2  ;;  %v5624_v27 = vshrl.u32 %v5229_v62, 16 }
 0x357   : > { %v13997_v7 = vpop.f32.mrf.mxu0  ;;  %v6031_v51 = vadd.f32 %v6030_v25, %v13890_v55  ;;  %v14000_v46 = vpop.f32.mrf.mxu1  ;;  %v6298_v55 = vunpack.c.l.b16 %v6229_v61  ;;  %v5612_v36 = vsel %vm11839_vm2, %v5607_v44, %v5611_v35  ;;  %v5627_v25 = vshll.u32 %v5229_v62, 16 }
 0x358   : > { %v6236_v35 = vsel %vm12141_vm5, %v6234_v23, %v6235_v18  ;;  %v6822_v18 = vld [vmem:[#allocation2 + $0xc] sm:$0xf]  ;;  %v6242_v23 = vrot.slane %v13970_v34, 5 }
 0x359   : > { %v6318_v49 = vpack.c.b16 %v6298_v55, %v6297_v12  ;;  %v5626_v55 = vrot.slane %v5624_v27, 4  ;;  %v5629_v0 = vrot.slane %v5627_v25, 5  ;;  %v6300_v12 = vunpack.c.l.b16 %v6236_v35 }
 0x35a   : > { %5849 = vmatmul.bf16.gmra.mxu1 %v5709_v29  ;;  %v11622_v29 = vld [vmem:[%s15305_s3 + $0x1f8] sm:$0xff]  ;;  %v6239_v25 = vrot.slane %v13950_v59, 5 }
 0x35b   : > { %6072 = vmatmul.bf16.gmra.mxu2 %v11522_v22  ;;  %v5692_v22 = vunpack.c.l.b16 %v5612_v36  ;;  %8805 = vmatpush.bf16.msra.mxu0 %v11622_v29 }
 0x35c   : > { %v6408_v10 = vpop.f32.mrf.mxu3 }
 0x35d   : > { %v14012_v30 = vadd.f32 %v6408_v10, %v6031_v51  ;;  %v5635_v10 = vrot.slane %v5633_v1, 5  ;;  %v14060_v1 = vld [vmem:[#allocation2 + $0x10] sm:$0xf] }
 0x35e   : > { %v6033_v3 = vpop.f32.mrf.mxu2  ;;  %v6880_v35 = vshll.u32 %v14060_v1, 16  ;;  %v6884_v59 = vshrl.u32 %v14060_v1, 16 }
 0x35f   : > { %v14014_v63 = vpop.f32.mrf.mxu0  ;;  %v6034_v58 = vadd.f32 %v6033_v3, %v13914_v11  ;;  %v14017_v5 = vpop.f32.mrf.mxu1  ;;  %v5622_v11 = vsel %vm11839_vm2, %v5617_v38, %v5621_v47  ;;  %v5640_v44 = vor.u32 %v5639_v50, %v5635_v10 }
 0x360   : > { %v5693_v51 = vunpack.c.l.b16 %v5622_v11 }
 0x361   : > { %6450 = vmatmul.bf16.gmra.mxu3 %v6318_v49  ;;  %v11630_v49 = vld [vmem:[%s15305_s3 + $0x238] sm:$0xff]  ;;  %v5641_v33 = vrot.slane %v5640_v44, 4 }
 0x362   : > { %6764 = vmatmul.bf16.gmra.mxu0 %v11562_v28  ;;  %v5710_v4 = vpack.c.b16 %v5693_v51, %v5692_v22  ;;  %v5630_v28 = vor.u32 %v5629_v0, %v5626_v55  ;;  %9231 = vmatpush.bf16.msra.mxu1 %v11630_v49  ;;  %v6871_v51 = vshrl.u32 %v6822_v18, 16  ;;  %v6241_v55 = vrot.slane %v6239_v25, 4  ;;  %v11524_v49 = vld [vmem:[#allocation2 + $0x9c] sm:$0xff] }
 0x364   : > { %v6411_v2 = vpop.f32.mrf.mxu3  ;;  %v5631_v27 = vrot.slane %v5630_v28, 4  ;;  %v6886_v28 = vrot.slane %v6884_v59, 4 }
 0x365   : > { %v14030_v6 = vadd.f32 %v6411_v2, %v6034_v58  ;;  %v11563_v2 = vld [vmem:[#allocation2 + $0x9c] sm:$0xff] }
 0x366   : > { %v6035_v31 = vpop.f32.mrf.mxu2 }
 0x367   : > { %v14034_v61 = vpop.f32.mrf.mxu0  ;;  %v6036_v32 = vadd.f32 %v6035_v31, %v13942_v15  ;;  %v14037_v41 = vpop.f32.mrf.mxu1  ;;  %v6233_v15 = vsel %vm12141_vm5, %v10840_v24, %v6232_v17  ;;  %v5645_v17 = vrot.slane %v5643_v57, 5  ;;  %v6111_v24 = vld [vmem:[#allocation2 + $0x9c] sm:$0xe]  ;;  %v14078_v57 = vld [vmem:[#allocation2 + $0x14] sm:$0x1] }
 0x368   : > { %v6299_v58 = vunpack.c.l.b16 %v6233_v15 }
 0x369   : > { %v5646_v54 = vsel %vm11839_vm2, %v5641_v33, %v5645_v17 }
 0x36a   : > { %5854 = vmatmul.bf16.gmra.mxu1 %v5710_v4  ;;  %v6319_v62 = vpack.c.b16 %v6300_v12, %v6299_v58  ;;  %v5695_v29 = vunpack.c.l.b16 %v5646_v54  ;;  %v6873_v4 = vrot.slane %v6871_v51, 4  ;;  %v10841_v12 = vrot.slane %v6111_v24, 9  ;;  %v6825_v24 = vld [vmem:[#allocation2 + $0x18] sm:$0xf] }
 0x36b   : > { %6077 = vmatmul.bf16.gmra.mxu2 %v11523_v19  ;;  %v6882_v58 = vrot.slane %v6880_v35, 5 }
 0x36c   : > { %v6413_v3 = vpop.f32.mrf.mxu3 }
 0x36d   : > { %v14052_v47 = vadd.f32 %v6413_v3, %v6036_v32  ;;  %v5636_v32 = vsel %vm11839_vm2, %v5631_v27, %v5635_v10  ;;  %v6243_v10 = vsel %vm12141_vm5, %v6241_v55, %v6242_v23  ;;  %v11621_v27 = vld [vmem:[%s15305_s3 + $0x1f0] sm:$0xff]  ;;  %v6887_v54 = vor.u32 %v6886_v28, %v6882_v58  ;;  %v11564_v23 = vld [vmem:[#allocation2 + $0xa8] sm:$0xff]  ;;  %v11611_v28 = vld [vmem:[%s15305_s3 + $0x1a0] sm:$0xff] }
 0x36e   : > { %v6038_v9 = vpop.f32.mrf.mxu2  ;;  %v5694_v15 = vunpack.c.l.b16 %v5636_v32  ;;  %8806 = vmatpush.bf16.msra.mxu0 %v11621_v27  ;;  %v11612_v55 = vld [vmem:[%s15305_s3 + $0x1a8] sm:$0xff] }
 0x36f   : > { %v14054_v38 = vpop.f32.mrf.mxu0  ;;  %v6039_v11 = vadd.f32 %v6038_v9, %v13966_v16  ;;  %v14057_v36 = vpop.f32.mrf.mxu1  ;;  %v6874_v16 = vshll.u32 %v6822_v18, 16  ;;  %v6240_v9 = vsel %vm12141_vm5, %v10841_v12, %v6239_v25  ;;  %v11613_v18 = vld [vmem:[%s15305_s3 + $0x1b0] sm:$0xff]  ;;  %v11587_v12 = vld [vmem:[%s15305_s3 + $0x160] sm:$0xff] }
 0x370   : > { %v5711_v44 = vpack.c.b16 %v5695_v29, %v5694_v15  ;;  %v6301_v25 = vunpack.c.l.b16 %v6240_v9  ;;  %8124 = vmatpush.bf16.msra.mxu3 %v11613_v18  ;;  %v6246_v15 = vrot.slane %v13986_v45, 5  ;;  %v11619_v45 = vld [vmem:[%s15305_s3 + $0x1e0] sm:$0xff] }
 0x371   : > { %6455 = vmatmul.bf16.gmra.mxu3 %v6319_v62  ;;  %v6876_v3 = vrot.slane %v6874_v16, 5  ;;  %v6890_v62 = vshll.u32 %v14078_v57, 16 }
 0x372   : > { %6769 = vmatmul.bf16.gmra.mxu0 %v11563_v2  ;;  %v11589_v2 = vld [vmem:[%s15305_s3 + $0x170] sm:$0xff] }
 0x373   : > { %7810 = vmatpush.bf16.msra.mxu2 %v11589_v2  ;;  %v6892_v32 = vrot.slane %v6890_v62, 5  ;;  %v6112_v2 = vld [vmem:[#allocation2 + $0xa8] sm:$0xe] }
 0x374   : > { %v6416_v31 = vpop.f32.mrf.mxu3  ;;  %8125 = vmatpush.bf16.msra.mxu3 %v11612_v55 }
 0x375   : > { %v14067_v22 = vadd.f32 %v6416_v31, %v6039_v11  ;;  %v6877_v11 = vor.u32 %v6876_v3, %v6873_v4  ;;  %v14108_v4 = vld [vmem:[#allocation2 + $0x1c] sm:$0xf]  ;;  %v6895_v3 = vshrl.u32 %v6825_v24, 16 }
 0x376   : > { %v6040_v19 = vpop.f32.mrf.mxu2  ;;  %v6904_v62 = vshll.u32 %v14108_v4, 16 }
 0x377   : > { %v14071_v0 = vpop.f32.mrf.mxu0  ;;  %v6041_v50 = vadd.f32 %v6040_v19, %v13983_v13  ;;  %v14074_v34 = vpop.f32.mrf.mxu1  ;;  %v6302_v13 = vunpack.c.l.b16 %v6243_v10  ;;  %v6878_v29 = vrot.slane %v6877_v11, 4  ;;  %v11588_v19 = vld [vmem:[%s15305_s3 + $0x168] sm:$0xff] }
 0x378   : > { %7811 = vmatpush.bf16.msra.mxu2 %v11588_v19  ;;  %8126 = vmatpush.bf16.msra.mxu3 %v11611_v28  ;;  %v11525_v19 = vld [vmem:[#allocation2 + $0xa8] sm:$0xff] }
 0x379   : > { %v6320_v31 = vpack.c.b16 %v6302_v13, %v6301_v25  ;;  %v6883_v9 = vsel %vm11839_vm2, %v6878_v29, %v6882_v58  ;;  %v6249_v13 = vrot.slane %v14004_v52, 5  ;;  %v6248_v25 = vrot.slane %v6246_v15, 4 }
 0x37a   : > { %5859 = vmatmul.bf16.gmra.mxu1 %v5711_v44 }
 0x37b   : > { %6082 = vmatmul.bf16.gmra.mxu2 %v11524_v49  ;;  %v6898_v49 = vshll.u32 %v6825_v24, 16  ;;  %v14136_v24 = vrot.slane %v6904_v62, 5 }
 0x37c   : > { %v6418_v17 = vpop.f32.mrf.mxu3  ;;  %7812 = vmatpush.bf16.msra.mxu2 %v11587_v12  ;;  %v11586_v12 = vld [vmem:[%s15305_s3 + $0x158] sm:$0xff] }
 0x37d   : > { %v14092_v33 = vadd.f32 %v6418_v17, %v6041_v50  ;;  %v6888_v50 = vrot.slane %v6887_v54, 4  ;;  %v6908_v17 = vshrl.u32 %v14108_v4, 16  ;;  %v7271_v54 = vunpack.c.l.b16 %v6883_v9  ;;  %v11585_v9 = vld [vmem:[%s15305_s3 + $0x150] sm:$0xff] }
 0x37e   : > { %v6043_v51 = vpop.f32.mrf.mxu2  ;;  %v6900_v58 = vrot.slane %v6898_v49, 5 }
 0x37f   : > { %v6044_v16 = vadd.f32 %v6043_v51, %v14000_v46  ;;  %v14095_v35 = vpop.f32.mrf.mxu1  ;;  %v14097_v59 = vpop.f32.mrf.mxu0  ;;  %v11620_v46 = vld [vmem:[%s15305_s3 + $0x1e8] sm:$0xff]  ;;  %v6893_v10 = vsel %vm11839_vm2, %v6888_v50, %v6892_v32  ;;  %v10842_v32 = vrot.slane %v6112_v2, 9  ;;  %v6910_v29 = vrot.slane %v6908_v17, 4  ;;  %v11617_v17 = vld [vmem:[%s15305_s3 + $0x1d0] sm:$0xff] }
 0x380   : > { %8807 = vmatpush.bf16.msra.mxu0 %v11620_v46  ;;  %v7272_v18 = vunpack.c.l.b16 %v6893_v10  ;;  %v11610_v10 = vld [vmem:[%s15305_s3 + $0x198] sm:$0xff]  ;;  %7813 = vmatpush.bf16.msra.mxu2 %v11586_v12 }
 0x381   : > { %6460 = vmatmul.bf16.gmra.mxu3 %v6320_v31  ;;  %v14130_v31 = vld [vmem:[#allocation2 + $0x20] sm:$0x1] }
 0x382   : > { %6774 = vmatmul.bf16.gmra.mxu0 %v11564_v23  ;;  %v6897_v23 = vrot.slane %v6895_v3, 4  ;;  %v7303_v55 = vpack.c.b16 %v7272_v18, %v7271_v54  ;;  %v6914_v50 = vshll.u32 %v14130_v31, 16  ;;  %v11618_v3 = vld [vmem:[%s15305_s3 + $0x1d8] sm:$0xff]  ;;  %8127 = vmatpush.bf16.msra.mxu3 %v11610_v10 }
 0x384   : > { %v6421_v44 = vpop.f32.mrf.mxu3  ;;  %8808 = vmatpush.bf16.msra.mxu0 %v11619_v45  ;;  %v6901_v45 = vor.u32 %v6900_v58, %v6897_v23  ;;  %v6916_v18 = vrot.slane %v6914_v50, 5  ;;  %7814 = vmatpush.bf16.msra.mxu2 %v11585_v9  ;;  %v11608_v50 = vld [vmem:[%s15305_s3 + $0x188] sm:$0xff]  ;;  %v6113_v9 = vld [vmem:[#allocation2 + $0xb4] sm:$0xe] }
 0x385   : > { %v14127_v11 = vadd.f32 %v6421_v44, %v6044_v16  ;;  %v6250_v16 = vsel %vm12141_vm5, %v6248_v25, %v6249_v13  ;;  %v11629_v44 = vld [vmem:[%s15305_s3 + $0x230] sm:$0xff] }
 0x386   : > { %v6045_v27 = vpop.f32.mrf.mxu2  ;;  %v6304_v49 = vunpack.c.l.b16 %v6250_v16  ;;  %9232 = vmatpush.bf16.msra.mxu1 %v11629_v44  ;;  %v6902_v58 = vrot.slane %v6901_v45, 4  ;;  %v6828_v16 = vld [vmem:[#allocation2 + $0x24] sm:$0xf] }
 0x387   : > { %v6046_v51 = vadd.f32 %v6045_v27, %v14017_v5  ;;  %v14132_v52 = vpop.f32.mrf.mxu1  ;;  %v14138_v46 = vpop.f32.mrf.mxu0  ;;  %v6247_v5 = vsel %vm12141_vm5, %v10842_v32, %v6246_v15  ;;  %v6911_v15 = vor.u32 %v6910_v29, %v14136_v24  ;;  %v11609_v27 = vld [vmem:[%s15305_s3 + $0x190] sm:$0xff]  ;;  %v11584_v29 = vld [vmem:[%s15305_s3 + $0x148] sm:$0xff]  ;;  %v6922_v45 = vshll.u32 %v6828_v16, 16 }
 0x388   : > { %15369 = vst [vmem:[#allocation6_spill] sm:$0xff] %v14138_v46  ;;  %v6303_v62 = vunpack.c.l.b16 %v6247_v5  ;;  %8809 = vmatpush.bf16.msra.mxu0 %v11618_v3  ;;  %v14179_v5 = vld [vmem:[#allocation2 + $0x28] sm:$0xf]  ;;  %8128 = vmatpush.bf16.msra.mxu3 %v11609_v27  ;;  %v6907_v3 = vsel %vm11839_vm2, %v6902_v58, %v14136_v24  ;;  %v11607_v27 = vld [vmem:[%s15305_s3 + $0x180] sm:$0xff]  ;;  %v14229_v46 = vld [vmem:[#allocation2 + $0x34] sm:$0xf] }
 0x389   : > { %v6912_v32 = vrot.slane %v6911_v15, 4  ;;  %7815 = vmatpush.bf16.msra.mxu2 %v11584_v29 }
 0x38a   : > { %7391 = vmatmul.bf16.vlgmr.msrb.gmra.mxu1 %v7303_v55  ;;  %v6321_v25 = vpack.c.b16 %v6304_v49, %v6303_v62  ;;  %v6253_v55 = vrot.slane %v14023_v14, 5  ;;  %v6256_v49 = vrot.slane %v14041_v21, 5  ;;  %v11583_v14 = vld [vmem:[%s15305_s3 + $0x140] sm:$0xff]  ;;  %v6928_v62 = vshll.u32 %v14179_v5, 16 }
 0x38b   : > { %6087 = vmatmul.bf16.gmra.mxu2 %v11525_v19  ;;  %v11616_v19 = vld [vmem:[%s15305_s3 + $0x1c8] sm:$0xff]  ;;  %v11615_v21 = vld [vmem:[%s15305_s3 + $0x1c0] sm:$0xff] }
 0x38c   : > { %v6423_v28 = vpop.f32.mrf.mxu3  ;;  %8810 = vmatpush.bf16.msra.mxu0 %v11617_v17  ;;  %v6932_v17 = vshrl.u32 %v14179_v5, 16  ;;  %8129 = vmatpush.bf16.msra.mxu3 %v11608_v50  ;;  %v11526_v50 = vld [vmem:[#allocation2 + $0xb4] sm:$0xff] }
 0x38d   : > { %v14159_v13 = vadd.f32 %v6423_v28, %v6046_v51  ;;  %v11565_v51 = vld [vmem:[#allocation2 + $0xb4] sm:$0xff]  ;;  %v6919_v28 = vshrl.u32 %v6828_v16, 16  ;;  %7816 = vmatpush.bf16.msra.mxu2 %v11583_v14 }
 0x38e   : > { %v6048_v2 = vpop.f32.mrf.mxu2 }
 0x38f   : > { %15370 = vst [vmem:[#allocation7_spill] sm:$0xff] %v14159_v13  ;;  %v6049_v54 = vadd.f32 %v6048_v2, %v14037_v41  ;;  %v14168_v23 = vpop.f32.mrf.mxu1  ;;  %v6917_v41 = vsel %vm11839_vm2, %v6912_v32, %v6916_v18  ;;  %v14184_v12 = vpop.f32.mrf.mxu0  ;;  %v6255_v2 = vrot.slane %v6253_v55, 4  ;;  %v14200_v18 = vld [vmem:[#allocation2 + $0x2c] sm:$0x1]  ;;  %v10843_v32 = vrot.slane %v6113_v9, 9 }
 0x390   : > { %15371 = vst [vmem:[#allocation4_spill] sm:$0xff] %v14184_v12  ;;  %v7274_v44 = vunpack.c.l.b16 %v6917_v41  ;;  %8811 = vmatpush.bf16.msra.mxu0 %v11616_v19  ;;  %v6921_v29 = vrot.slane %v6919_v28, 4  ;;  %v6924_v19 = vrot.slane %v6922_v45, 5  ;;  %v8244_v41 = vld [vmem:[#allocation2 + $0x18] sm:$0xf]  ;;  %v14210_v12 = vrot.slane %v6928_v62, 5  ;;  %8130 = vmatpush.bf16.msra.mxu3 %v11607_v27 }
 0x391   : > { %6465 = vmatmul.bf16.gmra.mxu3 %v6321_v25  ;;  %v7273_v25 = vunpack.c.l.b16 %v6907_v3  ;;  %v6257_v16 = vsel %vm12141_vm5, %v6255_v2, %v6256_v49  ;;  %v6938_v3 = vshll.u32 %v14200_v18, 16  ;;  %v7570_v9 = vrot.slane %v14060_v1, 5 }
 0x392   : > { %6779 = vmatmul.bf16.gmra.mxu0 %v11565_v51  ;;  %v8245_v51 = vld [vmem:[#allocation2 + $0x1c] sm:$0xf]  ;;  %v6306_v28 = vunpack.c.l.b16 %v6257_v16  ;;  %v8293_v45 = vshrl.u32 %v8244_v41, 16  ;;  %v8296_v14 = vshll.u32 %v8244_v41, 16  ;;  %v6925_v62 = vor.u32 %v6924_v19, %v6921_v29 }
 0x393   : > { %v8306_v49 = vshrl.u32 %v8245_v51, 16 }
 0x394   : > { %v6426_v10 = vpop.f32.mrf.mxu3  ;;  %8812 = vmatpush.bf16.msra.mxu0 %v11615_v21  ;;  %v8298_v19 = vrot.slane %v8296_v14, 5 }
 0x395   : > { %v14193_v15 = vadd.f32 %v6426_v10, %v6049_v54  ;;  %v7304_v10 = vpack.c.b16 %v7274_v44, %v7273_v25  ;;  %v7573_v25 = vrot.slane %v14078_v57, 5  ;;  %v8308_v41 = vrot.slane %v8306_v49, 4  ;;  %v6831_v49 = vld [vmem:[#allocation2 + $0x30] sm:$0xf] }
 0x396   : > { %v6050_v24 = vpop.f32.mrf.mxu2 }
 0x397   : > { %15372 = vst [vmem:[#allocation8_spill] sm:$0xff] %v14193_v15  ;;  %v6051_v54 = vadd.f32 %v6050_v24, %v14057_v36  ;;  %v14206_v58 = vpop.f32.mrf.mxu1  ;;  %v6934_v15 = vrot.slane %v6932_v17, 4  ;;  %v6254_v36 = vsel %vm12141_vm5, %v10843_v32, %v6253_v55  ;;  %v8302_v24 = vshll.u32 %v8245_v51, 16  ;;  %v8246_v55 = vld [vmem:[#allocation2 + $0x20] sm:$0x1]  ;;  %v14220_v27 = vpop.f32.mrf.mxu0 }
 0x398   : > { %v6305_v17 = vunpack.c.l.b16 %v6254_v36  ;;  %15374 = vst [vmem:[#allocation9_spill] sm:$0xff] %v14220_v27  ;;  %v6940_v32 = vrot.slane %v6938_v3, 5  ;;  %v7504_v51 = vld [vmem:[#allocation2 + $0xc] sm:$0xe]  ;;  %v8312_v57 = vshll.u32 %v8246_v55, 16 }
 0x399   : > { %v6935_v21 = vor.u32 %v6934_v15, %v14210_v12  ;;  %v14222_v16 = vrot.slane %v8302_v24, 5  ;;  %v11566_v15 = vld [vmem:[#allocation2 + $0xc0] sm:$0xff]  ;;  %v11052_v27 = vrot.slane %v7504_v51, 9  ;;  %v6946_v51 = vshll.u32 %v6831_v49, 16 }
 0x39a   : > { %7396 = vmatmul.bf16.gmra.mxu1 %v7304_v10  ;;  %v6322_v10 = vpack.c.b16 %v6306_v28, %v6305_v17 }
 0x39b   : > { %6092 = vmatmul.bf16.gmra.mxu2 %v11526_v50  ;;  %v7572_v50 = vrot.slane %v7570_v9, 4  ;;  %v8309_v24 = vor.u32 %v8308_v41, %v14222_v16  ;;  %v7571_v28 = vsel %vm12141_vm5, %v11052_v27, %v7570_v9 }
 0x39c   : > { %v6428_v44 = vpop.f32.mrf.mxu3  ;;  %v7697_v41 = vunpack.c.l.b16 %v7571_v28 }
 0x39d   : > { %v14216_v2 = vadd.f32 %v6428_v44, %v6051_v54  ;;  %v8295_v54 = vrot.slane %v8293_v45, 4  ;;  %v6926_v44 = vrot.slane %v6925_v62, 4  ;;  %v7574_v3 = vsel %vm12141_vm5, %v7572_v50, %v7573_v25 }
 0x39e   : > { %v6053_v1 = vpop.f32.mrf.mxu2  ;;  %v7698_v17 = vunpack.c.l.b16 %v7574_v3  ;;  %v6952_v25 = vshll.u32 %v14229_v46, 16  ;;  %v6956_v50 = vshrl.u32 %v14229_v46, 16  ;;  %v8310_v9 = vrot.slane %v8309_v24, 4 }
 0x39f   : > { %15373 = vst [vmem:[#allocation5_spill] sm:$0xff] %v14216_v2  ;;  %v6054_v29 = vadd.f32 %v6053_v1, %v14074_v34  ;;  %v14225_v36 = vpop.f32.mrf.mxu1  ;;  %v6936_v2 = vrot.slane %v6935_v21, 4  ;;  %v8299_v45 = vor.u32 %v8298_v19, %v8295_v54  ;;  %v6931_v62 = vsel %vm11839_vm2, %v6926_v44, %v14210_v12  ;;  %v8247_v54 = vld [vmem:[#allocation2 + $0x24] sm:$0xf]  ;;  %v14244_v19 = vpop.f32.mrf.mxu0  ;;  %v14248_v44 = vld [vmem:[#allocation2 + $0x38] sm:$0x1] }
 0x3a0   : > { %v8314_v21 = vrot.slane %v8312_v57, 5  ;;  %v6943_v1 = vshrl.u32 %v6831_v49, 16  ;;  %15376 = vst [vmem:[#allocation11_spill] sm:$0xff] %v14244_v19  ;;  %v7275_v12 = vunpack.c.l.b16 %v6931_v62  ;;  %v8248_v57 = vld [vmem:[#allocation2 + $0x28] sm:$0xf]  ;;  %v14252_v28 = vrot.slane %v6952_v25, 5 }
 0x3a1   : > { %6470 = vmatmul.bf16.gmra.mxu3 %v6322_v10  ;;  %v6941_v34 = vsel %vm11839_vm2, %v6936_v2, %v6940_v32  ;;  %v8300_v10 = vrot.slane %v8299_v45, 4  ;;  %v6958_v24 = vrot.slane %v6956_v50, 4  ;;  %v7577_v45 = vrot.slane %v14108_v4, 5  ;;  %v11628_v25 = vld [vmem:[%s15305_s3 + $0x228] sm:$0xff] }
 0x3a2   : > { %6784 = vmatmul.bf16.gmra.mxu0 %v11566_v15  ;;  %v7276_v2 = vunpack.c.l.b16 %v6941_v34  ;;  %v7729_v15 = vpack.c.b16 %v7698_v17, %v7697_v41  ;;  %v6945_v49 = vrot.slane %v6943_v1, 4  ;;  %v6948_v34 = vrot.slane %v6946_v51, 5  ;;  %9233 = vmatpush.bf16.msra.mxu1 %v11628_v25  ;;  %v14273_v25 = vld [vmem:[#allocation2 + $0x40] sm:$0xf] }
 0x3a3   : > { %v8305_v62 = vsel %vm11839_vm2, %v8300_v10, %v14222_v16  ;;  %v6962_v17 = vshll.u32 %v14248_v44, 16  ;;  %v8330_v41 = vshrl.u32 %v8248_v57, 16 }
 0x3a4   : > { %v6431_v14 = vpop.f32.mrf.mxu3  ;;  %v6949_v4 = vor.u32 %v6948_v34, %v6945_v49  ;;  %v8693_v16 = vunpack.c.l.b16 %v8305_v62 }
 0x3a5   : > { %v14240_v55 = vadd.f32 %v6431_v14, %v6054_v29  ;;  %v8315_v29 = vsel %vm11839_vm2, %v8310_v9, %v8314_v21  ;;  %v8317_v14 = vshrl.u32 %v8247_v54, 16  ;;  %v8326_v21 = vshll.u32 %v8248_v57, 16 }
 0x3a6   : > { %v6055_v32 = vpop.f32.mrf.mxu2  ;;  %v8694_v51 = vunpack.c.l.b16 %v8315_v29  ;;  %v7580_v9 = vrot.slane %v14130_v31, 5  ;;  %v11591_v29 = vld [vmem:[#allocation2 + $0x18] sm:$0xff]  ;;  %v6950_v31 = vrot.slane %v6949_v4, 4 }
 0x3a7   : > { %15375 = vst [vmem:[#allocation10_spill] sm:$0xff] %v14240_v55  ;;  %v6056_v27 = vadd.f32 %v6055_v32, %v14095_v35  ;;  %v14250_v3 = vpop.f32.mrf.mxu1  ;;  %v7305_v35 = vpack.c.b16 %v7276_v2, %v7275_v12  ;;  %v8320_v32 = vshll.u32 %v8247_v54, 16  ;;  %v6959_v2 = vor.u32 %v6958_v24, %v14252_v28  ;;  %v8249_v54 = vld [vmem:[#allocation2 + $0x2c] sm:$0x1]  ;;  %v7505_v12 = vld [vmem:[#allocation2 + $0x18] sm:$0xe] }
 0x3a8   : > { %v8319_v57 = vrot.slane %v8317_v14, 4  ;;  %v6964_v55 = vrot.slane %v6962_v17, 5  ;;  %v8328_v13 = vrot.slane %v8326_v21, 5  ;;  %v8336_v49 = vshll.u32 %v8249_v54, 16  ;;  %v6834_v14 = vld [vmem:[#allocation2 + $0x3c] sm:$0xf] }
 0x3a9   : > { %v6960_v24 = vrot.slane %v6959_v2, 4  ;;  %v11053_v62 = vrot.slane %v7505_v12, 9  ;;  %v6967_v54 = vshrl.u32 %v6834_v14, 16  ;;  %v6976_v12 = vshll.u32 %v14273_v25, 16 }
 0x3aa   : > { %7401 = vmatmul.bf16.gmra.mxu1 %v7305_v35  ;;  %v8322_v35 = vrot.slane %v8320_v32, 5  ;;  %v14271_v32 = vpop.f32.mrf.mxu0  ;;  %v8338_v2 = vrot.slane %v8336_v49, 5  ;;  %v14287_v49 = vld [vmem:[#allocation2 + $0x44] sm:$0x1] }
 0x3ab   : > { %7817 = vmatmul.bf16.vlgmr.msra.gmra.mxu2 %v7729_v15  ;;  %v7579_v15 = vrot.slane %v7577_v45, 4  ;;  %15378 = vst [vmem:[#allocation13_spill] sm:$0xff] %v14271_v32  ;;  %v7578_v17 = vsel %vm12141_vm5, %v11053_v62, %v7577_v45  ;;  %v8250_v62 = vld [vmem:[#allocation2 + $0x30] sm:$0xf] }
 0x3ac   : > { %v6433_v1 = vpop.f32.mrf.mxu3  ;;  %v8323_v21 = vor.u32 %v8322_v35, %v8319_v57  ;;  %v7699_v57 = vunpack.c.l.b16 %v7578_v17  ;;  %v7584_v17 = vrot.slane %v14179_v5, 5 }
 0x3ad   : > { %v14262_v50 = vadd.f32 %v6433_v1, %v6056_v27  ;;  %v8332_v27 = vrot.slane %v8330_v41, 4  ;;  %v8725_v1 = vpack.c.b16 %v8694_v51, %v8693_v16  ;;  %v6970_v16 = vshll.u32 %v6834_v14, 16 }
 0x3ae   : > { %v6058_v10 = vpop.f32.mrf.mxu2  ;;  %v8324_v35 = vrot.slane %v8323_v21, 4 }
 0x3af   : > { %15377 = vst [vmem:[#allocation12_spill] sm:$0xff] %v14262_v50  ;;  %v6059_v19 = vadd.f32 %v6058_v10, %v14132_v52  ;;  %v14267_v34 = vpop.f32.mrf.mxu1  ;;  %v7581_v50 = vsel %vm12141_vm5, %v7579_v15, %v7580_v9  ;;  %v6965_v52 = vsel %vm11839_vm2, %v6960_v24, %v6964_v55  ;;  %v8333_v41 = vor.u32 %v8332_v27, %v8328_v13  ;;  %v8251_v27 = vld [vmem:[#allocation2 + $0x34] sm:$0xf] }
 0x3b0   : > { %v7700_v4 = vunpack.c.l.b16 %v7581_v50  ;;  %v6955_v10 = vsel %vm11839_vm2, %v6950_v31, %v14252_v28  ;;  %v6980_v55 = vshrl.u32 %v14273_v25, 16  ;;  %v7278_v15 = vunpack.c.l.b16 %v6965_v52 }
 0x3b1   : > { %8131 = vmatmul.bf16.vlgmr.msra.gmra.mxu3 %v11591_v29  ;;  %v8334_v50 = vrot.slane %v8333_v41, 4  ;;  %v6972_v24 = vrot.slane %v6970_v16, 5  ;;  %v14293_v52 = vrot.slane %v6976_v12, 5  ;;  %v8350_v21 = vshll.u32 %v8251_v27, 16 }
 0x3b2   : > { %8813 = vmatmul.bf16.vlgmr.msra.gmra.mxu0 %v8725_v1  ;;  %v7277_v1 = vunpack.c.l.b16 %v6955_v10  ;;  %v7730_v28 = vpack.c.b16 %v7700_v4, %v7699_v57  ;;  %v8354_v41 = vshrl.u32 %v8251_v27, 16  ;;  %v6986_v16 = vshll.u32 %v14287_v49, 16  ;;  %v14299_v4 = vpop.f32.mrf.mxu0 }
 0x3b3   : > { %v8339_v31 = vsel %vm11839_vm2, %v8334_v50, %v8338_v2  ;;  %v8341_v10 = vshrl.u32 %v8250_v62, 16  ;;  %15380 = vst [vmem:[#allocation15_spill] sm:$0xff] %v14299_v4  ;;  %v8252_v50 = vld [vmem:[#allocation2 + $0x38] sm:$0x1] }
 0x3b4   : > { %v6436_v51 = vpop.f32.mrf.mxu3  ;;  %v8696_v12 = vunpack.c.l.b16 %v8339_v31  ;;  %v6988_v4 = vrot.slane %v6986_v16, 5 }
 0x3b5   : > { %v14279_v9 = vadd.f32 %v6436_v51, %v6059_v19  ;;  %v6969_v19 = vrot.slane %v6967_v54, 4  ;;  %v6982_v51 = vrot.slane %v6980_v55, 4  ;;  %v8329_v54 = vsel %vm11839_vm2, %v8324_v35, %v8328_v13  ;;  %v7506_v13 = vld [vmem:[#allocation2 + $0x24] sm:$0xe] }
 0x3b6   : > { %v6060_v29 = vpop.f32.mrf.mxu2  ;;  %v8695_v27 = vunpack.c.l.b16 %v8329_v54  ;;  %v7586_v35 = vrot.slane %v7584_v17, 4  ;;  %v8343_v31 = vrot.slane %v8341_v10, 4  ;;  %v11054_v54 = vrot.slane %v7506_v13, 9 }
 0x3b7   : > { %15379 = vst [vmem:[#allocation14_spill] sm:$0xff] %v14279_v9  ;;  %v6061_v45 = vadd.f32 %v6060_v29, %v14168_v23  ;;  %v14289_v14 = vpop.f32.mrf.mxu1  ;;  %v7306_v23 = vpack.c.b16 %v7278_v15, %v7277_v1  ;;  %v8344_v29 = vshll.u32 %v8250_v62, 16  ;;  %v6973_v57 = vor.u32 %v6972_v24, %v6969_v19  ;;  %v11592_v9 = vld [vmem:[#allocation2 + $0x24] sm:$0xff] }
 0x3b8   : > { %v6983_v5 = vor.u32 %v6982_v51, %v14293_v52  ;;  %v7587_v15 = vrot.slane %v14200_v18, 5  ;;  %v8356_v62 = vrot.slane %v8354_v41, 4  ;;  %v7585_v10 = vsel %vm12141_vm5, %v11054_v54, %v7584_v17 }
 0x3b9   : > { %v8346_v19 = vrot.slane %v8344_v29, 5  ;;  %v6974_v24 = vrot.slane %v6973_v57, 4 }
 0x3ba   : > { %7406 = vmatmul.bf16.gmra.mxu1 %v7306_v23  ;;  %v6984_v18 = vrot.slane %v6983_v5, 4 }
 0x3bb   : > { %7822 = vmatmul.bf16.gmra.mxu2 %v7730_v28  ;;  %v14305_v28 = vrot.slane %v8350_v21, 5  ;;  %v14312_v21 = vld [vmem:[#allocation2 + $0x4c] sm:$0xf]  ;;  %v8347_v29 = vor.u32 %v8346_v19, %v8343_v31 }
 0x3bc   : > { %v6438_v2 = vpop.f32.mrf.mxu3  ;;  %v6989_v16 = vsel %vm11839_vm2, %v6984_v18, %v6988_v4  ;;  %v7004_v13 = vshrl.u32 %v14312_v21, 16  ;;  %v14326_v4 = vpop.f32.mrf.mxu0  ;;  %v8254_v18 = vld [vmem:[#allocation2 + $0x40] sm:$0xf] }
 0x3bd   : > { %v14301_v55 = vadd.f32 %v6438_v2, %v6061_v45  ;;  %v8726_v45 = vpack.c.b16 %v8696_v12, %v8695_v27  ;;  %v8360_v2 = vshll.u32 %v8252_v50, 16  ;;  %v8357_v41 = vor.u32 %v8356_v62, %v14305_v28  ;;  %15383 = vst [vmem:[#allocation18_spill] sm:$0xff] %v14326_v4 }
 0x3be   : > { %v6063_v1 = vpop.f32.mrf.mxu2  ;;  %v7701_v62 = vunpack.c.l.b16 %v7585_v10  ;;  %v7006_v10 = vrot.slane %v7004_v13, 4 }
 0x3bf   : > { %15381 = vst [vmem:[#allocation16_spill] sm:$0xff] %v14301_v55  ;;  %v6064_v23 = vadd.f32 %v6063_v1, %v14206_v58  ;;  %v14308_v51 = vpop.f32.mrf.mxu1  ;;  %v7588_v55 = vsel %vm12141_vm5, %v7586_v35, %v7587_v15  ;;  %v6837_v58 = vld [vmem:[#allocation2 + $0x48] sm:$0xf]  ;;  %v8362_v5 = vrot.slane %v8360_v2, 5  ;;  %v7000_v15 = vshll.u32 %v14312_v21, 16 }
 0x3c0   : > { %v7702_v57 = vunpack.c.l.b16 %v7588_v55  ;;  %v6991_v27 = vshrl.u32 %v6837_v58, 16  ;;  %v6994_v1 = vshll.u32 %v6837_v58, 16  ;;  %v7280_v35 = vunpack.c.l.b16 %v6989_v16  ;;  %v14331_v2 = vld [vmem:[#allocation2 + $0x50] sm:$0x1] }
 0x3c1   : > { %8136 = vmatmul.bf16.gmra.mxu3 %v11592_v9  ;;  %v6979_v9 = vsel %vm11839_vm2, %v6974_v24, %v14293_v52  ;;  %v8358_v31 = vrot.slane %v8357_v41, 4  ;;  %v8253_v52 = vld [vmem:[#allocation2 + $0x3c] sm:$0xf]  ;;  %v14335_v16 = vrot.slane %v7000_v15, 5  ;;  %v11627_v15 = vld [vmem:[%s15305_s3 + $0x220] sm:$0xff] }
 0x3c2   : > { %8818 = vmatmul.bf16.gmra.mxu0 %v8726_v45  ;;  %v8348_v45 = vrot.slane %v8347_v29, 4  ;;  %v7279_v55 = vunpack.c.l.b16 %v6979_v9  ;;  %v7731_v24 = vpack.c.b16 %v7702_v57, %v7701_v62  ;;  %v6993_v58 = vrot.slane %v6991_v27, 4  ;;  %9234 = vmatpush.bf16.msra.mxu1 %v11627_v15  ;;  %v14356_v15 = vld [vmem:[#allocation2 + $0x58] sm:$0xf] }
 0x3c3   : > { %v8365_v29 = vshrl.u32 %v8253_v52, 16  ;;  %v7010_v57 = vshll.u32 %v14331_v2, 16  ;;  %v8378_v62 = vshrl.u32 %v8254_v18, 16 }
 0x3c4   : > { %v6441_v12 = vpop.f32.mrf.mxu3  ;;  %v7307_v41 = vpack.c.b16 %v7280_v35, %v7279_v55  ;;  %v8353_v9 = vsel %vm11839_vm2, %v8348_v45, %v14305_v28  ;;  %v7007_v35 = vor.u32 %v7006_v10, %v14335_v16  ;;  %v7507_v55 = vld [vmem:[#allocation2 + $0x30] sm:$0xe] }
 0x3c5   : > { %v14323_v50 = vadd.f32 %v6441_v12, %v6064_v23  ;;  %v8363_v23 = vsel %vm11839_vm2, %v8358_v31, %v8362_v5  ;;  %v6996_v12 = vrot.slane %v6994_v1, 5  ;;  %v8374_v5 = vshll.u32 %v8254_v18, 16 }
 0x3c6   : > { %v6065_v17 = vpop.f32.mrf.mxu2  ;;  %v8698_v1 = vunpack.c.l.b16 %v8363_v23  ;;  %v7594_v31 = vrot.slane %v14248_v44, 5  ;;  %v8697_v28 = vunpack.c.l.b16 %v8353_v9  ;;  %v8367_v18 = vrot.slane %v8365_v29, 4  ;;  %v11593_v23 = vld [vmem:[#allocation2 + $0x30] sm:$0xff] }
 0x3c7   : > { %15382 = vst [vmem:[#allocation17_spill] sm:$0xff] %v14323_v50  ;;  %v6066_v19 = vadd.f32 %v6065_v17, %v14225_v36  ;;  %v14333_v54 = vpop.f32.mrf.mxu1  ;;  %v7591_v36 = vrot.slane %v14229_v46, 5  ;;  %v8368_v17 = vshll.u32 %v8253_v52, 16  ;;  %v6997_v46 = vor.u32 %v6996_v12, %v6993_v58  ;;  %v8255_v52 = vld [vmem:[#allocation2 + $0x44] sm:$0x1] }
 0x3c8   : > { %v7012_v4 = vrot.slane %v7010_v57, 5  ;;  %v8376_v32 = vrot.slane %v8374_v5, 5  ;;  %v8727_v58 = vpack.c.b16 %v8698_v1, %v8697_v28  ;;  %v8384_v12 = vshll.u32 %v8255_v52, 16 }
 0x3c9   : > { %v6998_v44 = vrot.slane %v6997_v46, 4  ;;  %v7008_v9 = vrot.slane %v7007_v35, 4 }
 0x3ca   : > { %7411 = vmatmul.bf16.gmra.mxu1 %v7307_v41  ;;  %v8370_v41 = vrot.slane %v8368_v17, 5  ;;  %v6840_v17 = vld [vmem:[#allocation2 + $0x54] sm:$0xf]  ;;  %v8386_v46 = vrot.slane %v8384_v12, 5  ;;  %v14370_v12 = vld [vmem:[#allocation2 + $0x5c] sm:$0x1] }
 0x3cb   : > { %7827 = vmatmul.bf16.gmra.mxu2 %v7731_v24  ;;  %v7593_v24 = vrot.slane %v7591_v36, 4  ;;  %v7015_v35 = vshrl.u32 %v6840_v17, 16  ;;  %v7018_v28 = vshll.u32 %v6840_v17, 16 }
 0x3cc   : > { %v6443_v27 = vpop.f32.mrf.mxu3  ;;  %v8371_v5 = vor.u32 %v8370_v41, %v8367_v18 }
 0x3cd   : > { %v14345_v13 = vadd.f32 %v6443_v27, %v6066_v19  ;;  %v8380_v19 = vrot.slane %v8378_v62, 4  ;;  %v14350_v27 = vpop.f32.mrf.mxu0  ;;  %v7595_v29 = vsel %vm12141_vm5, %v7593_v24, %v7594_v31  ;;  %v7003_v31 = vsel %vm11839_vm2, %v6998_v44, %v14335_v16 }
 0x3ce   : > { %v6068_v45 = vpop.f32.mrf.mxu2  ;;  %15385 = vst [vmem:[#allocation20_spill] sm:$0xff] %v14350_v27  ;;  %v7704_v52 = vunpack.c.l.b16 %v7595_v29  ;;  %v8372_v18 = vrot.slane %v8371_v5, 4  ;;  %v8256_v29 = vld [vmem:[#allocation2 + $0x48] sm:$0xf]  ;;  %v7598_v5 = vrot.slane %v14273_v25, 5  ;;  %v7601_v25 = vrot.slane %v14287_v49, 5 }
 0x3cf   : > { %15384 = vst [vmem:[#allocation19_spill] sm:$0xff] %v14345_v13  ;;  %v6069_v50 = vadd.f32 %v6068_v45, %v14250_v3  ;;  %v14352_v10 = vpop.f32.mrf.mxu1  ;;  %v11055_v13 = vrot.slane %v7507_v55, 9  ;;  %v7013_v3 = vsel %vm11839_vm2, %v7008_v9, %v7012_v4  ;;  %v8381_v62 = vor.u32 %v8380_v19, %v8376_v32  ;;  %v8257_v19 = vld [vmem:[#allocation2 + $0x4c] sm:$0xf]  ;;  %v11596_v27 = vld [vmem:[#allocation2 + $0x54] sm:$0xff] }
 0x3d0   : > { %v7024_v55 = vshll.u32 %v14356_v15, 16  ;;  %v7028_v4 = vshrl.u32 %v14356_v15, 16  ;;  %v7282_v24 = vunpack.c.l.b16 %v7013_v3  ;;  %v7020_v9 = vrot.slane %v7018_v28, 5 }
 0x3d1   : > { %8141 = vmatmul.bf16.gmra.mxu3 %v11593_v23  ;;  %v7592_v57 = vsel %vm12141_vm5, %v11055_v13, %v7591_v36  ;;  %v8382_v41 = vrot.slane %v8381_v62, 4  ;;  %v8398_v62 = vshll.u32 %v8257_v19, 16  ;;  %v7034_v28 = vshll.u32 %v14370_v12, 16 }
 0x3d2   : > { %8823 = vmatmul.bf16.gmra.mxu0 %v8727_v58  ;;  %v7703_v13 = vunpack.c.l.b16 %v7592_v57  ;;  %v7281_v58 = vunpack.c.l.b16 %v7003_v31  ;;  %v14376_v3 = vrot.slane %v7024_v55, 5  ;;  %v8402_v31 = vshrl.u32 %v8257_v19, 16 }
 0x3d3   : > { %v8387_v44 = vsel %vm11839_vm2, %v8382_v41, %v8386_v46  ;;  %v8258_v41 = vld [vmem:[#allocation2 + $0x50] sm:$0x1] }
 0x3d4   : > { %v6446_v1 = vpop.f32.mrf.mxu3  ;;  %v7732_v16 = vpack.c.b16 %v7704_v52, %v7703_v13  ;;  %v7308_v57 = vpack.c.b16 %v7282_v24, %v7281_v58  ;;  %v8389_v52 = vshrl.u32 %v8256_v29, 16  ;;  %v8700_v55 = vunpack.c.l.b16 %v8387_v44 }
 0x3d5   : > { %v14362_v45 = vadd.f32 %v6446_v1, %v6069_v50  ;;  %v7017_v50 = vrot.slane %v7015_v35, 4  ;;  %v7030_v1 = vrot.slane %v7028_v4, 4  ;;  %v8377_v35 = vsel %vm11839_vm2, %v8372_v18, %v8376_v32 }
 0x3d6   : > { %v6070_v23 = vpop.f32.mrf.mxu2  ;;  %v8699_v19 = vunpack.c.l.b16 %v8377_v35  ;;  %v14388_v32 = vrot.slane %v8398_v62, 5  ;;  %v8404_v18 = vrot.slane %v8402_v31, 4  ;;  %v8391_v44 = vrot.slane %v8389_v52, 4  ;;  %v14395_v62 = vld [vmem:[#allocation2 + $0x64] sm:$0xf] }
 0x3d7   : > { %15386 = vst [vmem:[#allocation3_spill] sm:$0xff] %v14362_v45  ;;  %v6071_v36 = vadd.f32 %v6070_v23, %v14267_v34  ;;  %v14372_v17 = vpop.f32.mrf.mxu1  ;;  %v14378_v34 = vpop.f32.mrf.mxu0  ;;  %v8392_v23 = vshll.u32 %v8256_v29, 16  ;;  %v7021_v13 = vor.u32 %v7020_v9, %v7017_v50  ;;  %v7031_v24 = vor.u32 %v7030_v1, %v14376_v3 }
 0x3d8   : > { %15387 = vst [vmem:[#allocation21_spill] sm:$0xff] %v14378_v34  ;;  %v7600_v45 = vrot.slane %v7598_v5, 4  ;;  %v11594_v34 = vld [vmem:[#allocation2 + $0x3c] sm:$0xff]  ;;  %v8405_v31 = vor.u32 %v8404_v18, %v14388_v32 }
 0x3d9   : > { %v8394_v50 = vrot.slane %v8392_v23, 5  ;;  %v7022_v9 = vrot.slane %v7021_v13, 4  ;;  %v7032_v49 = vrot.slane %v7031_v24, 4 }
 0x3da   : > { %7416 = vmatmul.bf16.gmra.mxu1 %v7308_v57  ;;  %v7036_v57 = vrot.slane %v7034_v28, 5 }
 0x3db   : > { %7832 = vmatmul.bf16.gmra.mxu2 %v7732_v16  ;;  %v7508_v16 = vld [vmem:[#allocation2 + $0x3c] sm:$0xe]  ;;  %v8395_v23 = vor.u32 %v8394_v50, %v8391_v44  ;;  %v8406_v44 = vrot.slane %v8405_v31, 4 }
 0x3dc   : > { %v6448_v46 = vpop.f32.mrf.mxu3  ;;  %v11056_v35 = vrot.slane %v7508_v16, 9  ;;  %v7037_v28 = vsel %vm11839_vm2, %v7032_v49, %v7036_v57  ;;  %v7052_v16 = vshrl.u32 %v14395_v62, 16  ;;  %v8259_v49 = vld [vmem:[#allocation2 + $0x54] sm:$0xf] }
 0x3dd   : > { %v14384_v4 = vadd.f32 %v6448_v46, %v6071_v36  ;;  %v8728_v36 = vpack.c.b16 %v8700_v55, %v8699_v19  ;;  %v8408_v46 = vshll.u32 %v8258_v41, 16  ;;  %v7284_v18 = vunpack.c.l.b16 %v7037_v28 }
 0x3de   : > { %v6073_v58 = vpop.f32.mrf.mxu2  ;;  %v7599_v52 = vsel %vm12141_vm5, %v11056_v35, %v7598_v5 }
 0x3df   : > { %15388 = vst [vmem:[#allocation22_spill] sm:$0xff] %v14384_v4  ;;  %v6074_v29 = vadd.f32 %v6073_v58, %v14289_v14  ;;  %v14391_v1 = vpop.f32.mrf.mxu1  ;;  %v7602_v4 = vsel %vm12141_vm5, %v7600_v45, %v7601_v25  ;;  %v6843_v14 = vld [vmem:[#allocation2 + $0x60] sm:$0xf]  ;;  %v14402_v55 = vpop.f32.mrf.mxu0  ;;  %v7027_v45 = vsel %vm11839_vm2, %v7022_v9, %v14376_v3  ;;  %v8410_v24 = vrot.slane %v8408_v46, 5  ;;  %v14414_v9 = vld [vmem:[#allocation2 + $0x68] sm:$0x1] }
 0x3e0   : > { %15389 = vst [vmem:[#allocation23_spill] sm:$0xff] %v14402_v55  ;;  %v7706_v13 = vunpack.c.l.b16 %v7602_v4  ;;  %v7048_v25 = vshll.u32 %v14395_v62, 16  ;;  %v7039_v19 = vshrl.u32 %v6843_v14, 16  ;;  %v7042_v58 = vshll.u32 %v6843_v14, 16 }
 0x3e1   : > { %8146 = vmatmul.bf16.gmra.mxu3 %v11594_v34  ;;  %v7705_v57 = vunpack.c.l.b16 %v7599_v52  ;;  %v7283_v35 = vunpack.c.l.b16 %v7027_v45  ;;  %v8411_v4 = vsel %vm11839_vm2, %v8406_v44, %v8410_v24  ;;  %v7054_v52 = vrot.slane %v7052_v16, 4 }
 0x3e2   : > { %8828 = vmatmul.bf16.gmra.mxu0 %v8728_v36  ;;  %v8396_v36 = vrot.slane %v8395_v23, 4  ;;  %v7041_v14 = vrot.slane %v7039_v19, 4  ;;  %v14418_v28 = vrot.slane %v7048_v25, 5  ;;  %v8413_v23 = vshrl.u32 %v8259_v49, 16  ;;  %v11626_v25 = vld [vmem:[%s15305_s3 + $0x218] sm:$0xff] }
 0x3e3   : > { %v7733_v3 = vpack.c.b16 %v7706_v13, %v7705_v57  ;;  %v7309_v31 = vpack.c.b16 %v7284_v18, %v7283_v35  ;;  %v7058_v13 = vshll.u32 %v14414_v9, 16  ;;  %v7608_v44 = vrot.slane %v14331_v2, 5  ;;  %9235 = vmatpush.bf16.msra.mxu1 %v11626_v25  ;;  %v14441_v25 = vld [vmem:[#allocation2 + $0x70] sm:$0xf] }
 0x3e4   : > { %v6451_v34 = vpop.f32.mrf.mxu3  ;;  %v8401_v45 = vsel %vm11839_vm2, %v8396_v36, %v14388_v32  ;;  %v7055_v18 = vor.u32 %v7054_v52, %v14418_v28 }
 0x3e5   : > { %v14408_v41 = vadd.f32 %v6451_v34, %v6074_v29  ;;  %v8260_v29 = vld [vmem:[#allocation2 + $0x58] sm:$0xf]  ;;  %v7044_v34 = vrot.slane %v7042_v58, 5  ;;  %v8702_v58 = vunpack.c.l.b16 %v8411_v4  ;;  %v8701_v36 = vunpack.c.l.b16 %v8401_v45 }
 0x3e6   : > { %v6075_v5 = vpop.f32.mrf.mxu2  ;;  %v8422_v24 = vshll.u32 %v8260_v29, 16  ;;  %v8426_v57 = vshrl.u32 %v8260_v29, 16  ;;  %v7056_v45 = vrot.slane %v7055_v18, 4 }
 0x3e7   : > { %15390 = vst [vmem:[#allocation24_spill] sm:$0xff] %v14408_v41  ;;  %v6076_v50 = vadd.f32 %v6075_v5, %v14308_v51  ;;  %v14416_v46 = vpop.f32.mrf.mxu1  ;;  %v7605_v51 = vrot.slane %v14312_v21, 5  ;;  %v8416_v5 = vshll.u32 %v8259_v49, 16  ;;  %v7045_v21 = vor.u32 %v7044_v34, %v7041_v14  ;;  %v8261_v49 = vld [vmem:[#allocation2 + $0x5c] sm:$0x1]  ;;  %v14432_v32 = vpop.f32.mrf.mxu0  ;;  %v11595_v41 = vld [vmem:[#allocation2 + $0x48] sm:$0xff] }
 0x3e8   : > { %15392 = vst [vmem:[#allocation26_spill] sm:$0xff] %v14432_v32  ;;  %v8428_v14 = vrot.slane %v8426_v57, 4  ;;  %v8729_v34 = vpack.c.b16 %v8702_v58, %v8701_v36  ;;  %v8432_v52 = vshll.u32 %v8261_v49, 16 }
 0x3e9   : > { %v7607_v29 = vrot.slane %v7605_v51, 4  ;;  %v8418_v4 = vrot.slane %v8416_v5, 5  ;;  %v6846_v5 = vld [vmem:[#allocation2 + $0x6c] sm:$0xf] }
 0x3ea   : > { %7421 = vmatmul.bf16.gmra.mxu1 %v7309_v31  ;;  %v8415_v31 = vrot.slane %v8413_v23, 4  ;;  %v7063_v18 = vshrl.u32 %v6846_v5, 16  ;;  %v7066_v49 = vshll.u32 %v6846_v5, 16 }
 0x3eb   : > { %7837 = vmatmul.bf16.gmra.mxu2 %v7733_v3  ;;  %v7509_v3 = vld [vmem:[#allocation2 + $0x48] sm:$0xe]  ;;  %v7609_v23 = vsel %vm12141_vm5, %v7607_v29, %v7608_v44 }
 0x3ec   : > { %v6453_v19 = vpop.f32.mrf.mxu3  ;;  %v11057_v32 = vrot.slane %v7509_v3, 9  ;;  %v7708_v58 = vunpack.c.l.b16 %v7609_v23  ;;  %v7076_v3 = vshrl.u32 %v14441_v25, 16  ;;  %v7068_v23 = vrot.slane %v7066_v49, 5 }
 0x3ed   : > { %v14428_v16 = vadd.f32 %v6453_v19, %v6076_v50  ;;  %v7060_v50 = vrot.slane %v7058_v13, 5  ;;  %v14435_v19 = vrot.slane %v8422_v24, 5  ;;  %v8419_v24 = vor.u32 %v8418_v4, %v8415_v31 }
 0x3ee   : > { %v6078_v35 = vpop.f32.mrf.mxu2  ;;  %v7606_v13 = vsel %vm12141_vm5, %v11057_v32, %v7605_v51 }
 0x3ef   : > { %15391 = vst [vmem:[#allocation25_spill] sm:$0xff] %v14428_v16  ;;  %v6079_v55 = vadd.f32 %v6078_v35, %v14333_v54  ;;  %v14437_v2 = vpop.f32.mrf.mxu1  ;;  %v7046_v16 = vrot.slane %v7045_v21, 4  ;;  %v7061_v54 = vsel %vm11839_vm2, %v7056_v45, %v7060_v50  ;;  %v8429_v57 = vor.u32 %v8428_v14, %v14435_v19  ;;  %v8263_v14 = vld [vmem:[#allocation2 + $0x64] sm:$0xf] }
 0x3f0   : > { %v8434_v21 = vrot.slane %v8432_v52, 5  ;;  %v7072_v35 = vshll.u32 %v14441_v25, 16  ;;  %v7286_v29 = vunpack.c.l.b16 %v7061_v54  ;;  %v7707_v31 = vunpack.c.l.b16 %v7606_v13  ;;  %v14458_v52 = vld [vmem:[#allocation2 + $0x74] sm:$0x1] }
 0x3f1   : > { %8151 = vmatmul.bf16.gmra.mxu3 %v11595_v41  ;;  %v7051_v44 = vsel %vm11839_vm2, %v7046_v16, %v14418_v28  ;;  %v8420_v4 = vrot.slane %v8419_v24, 4  ;;  %v8430_v50 = vrot.slane %v8429_v57, 4  ;;  %v7065_v45 = vrot.slane %v7063_v18, 4  ;;  %v8262_v28 = vld [vmem:[#allocation2 + $0x60] sm:$0xf] }
 0x3f2   : > { %8833 = vmatmul.bf16.gmra.mxu0 %v8729_v34  ;;  %v14456_v34 = vpop.f32.mrf.mxu0  ;;  %v7734_v5 = vpack.c.b16 %v7708_v58, %v7707_v31  ;;  %v7510_v24 = vld [vmem:[#allocation2 + $0x54] sm:$0xe]  ;;  %v7612_v57 = vrot.slane %v14356_v15, 5  ;;  %v7082_v49 = vshll.u32 %v14458_v52, 16  ;;  %v8437_v58 = vshrl.u32 %v8262_v28, 16 }
 0x3f3   : > { %15394 = vst [vmem:[#allocation28_spill] sm:$0xff] %v14456_v34  ;;  %v8435_v54 = vsel %vm11839_vm2, %v8430_v50, %v8434_v21  ;;  %v8425_v18 = vsel %vm11839_vm2, %v8420_v4, %v14435_v19  ;;  %v8440_v31 = vshll.u32 %v8262_v28, 16  ;;  %v7069_v50 = vor.u32 %v7068_v23, %v7065_v45 }
 0x3f4   : > { %v6456_v41 = vpop.f32.mrf.mxu3  ;;  %v7614_v34 = vrot.slane %v7612_v57, 4 }
 0x3f5   : > { %v14448_v36 = vadd.f32 %v6456_v41, %v6079_v55  ;;  %v7285_v55 = vunpack.c.l.b16 %v7051_v44  ;;  %v14464_v41 = vrot.slane %v7072_v35, 5  ;;  %v8450_v44 = vshrl.u32 %v8263_v14, 16 }
 0x3f6   : > { %v6080_v51 = vpop.f32.mrf.mxu2  ;;  %v8704_v35 = vunpack.c.l.b16 %v8435_v54  ;;  %v8439_v54 = vrot.slane %v8437_v58, 4  ;;  %v8442_v45 = vrot.slane %v8440_v31, 5 }
 0x3f7   : > { %15393 = vst [vmem:[#allocation27_spill] sm:$0xff] %v14448_v36  ;;  %v6081_v32 = vadd.f32 %v6080_v51, %v14352_v10  ;;  %v14460_v16 = vpop.f32.mrf.mxu1  ;;  %v7078_v10 = vrot.slane %v7076_v3, 4  ;;  %v7310_v13 = vpack.c.b16 %v7286_v29, %v7285_v55  ;;  %v8446_v51 = vshll.u32 %v8263_v14, 16  ;;  %v8264_v55 = vld [vmem:[#allocation2 + $0x68] sm:$0x1] }
 0x3f8   : > { %v7615_v3 = vrot.slane %v14370_v12, 5  ;;  %v11058_v14 = vrot.slane %v7510_v24, 9  ;;  %v8452_v4 = vrot.slane %v8450_v44, 4  ;;  %v7070_v12 = vrot.slane %v7069_v50, 4  ;;  %v14484_v44 = vld [vmem:[#allocation2 + $0x7c] sm:$0xf] }
 0x3f9   : > { %v7079_v15 = vor.u32 %v7078_v10, %v14464_v41  ;;  %v14475_v19 = vrot.slane %v8446_v51, 5  ;;  %v8456_v10 = vshll.u32 %v8264_v55, 16  ;;  %v8443_v58 = vor.u32 %v8442_v45, %v8439_v54 }
 0x3fa   : > { %7426 = vmatmul.bf16.gmra.mxu1 %v7310_v13  ;;  %v7084_v13 = vrot.slane %v7082_v49, 5  ;;  %v7613_v51 = vsel %vm12141_vm5, %v11058_v14, %v7612_v57  ;;  %v7096_v50 = vshll.u32 %v14484_v44, 16  ;;  %v7100_v55 = vshrl.u32 %v14484_v44, 16 }
 0x3fb   : > { %7842 = vmatmul.bf16.gmra.mxu2 %v7734_v5  ;;  %v8703_v5 = vunpack.c.l.b16 %v8425_v18  ;;  %v7080_v18 = vrot.slane %v7079_v15, 4  ;;  %v8458_v57 = vrot.slane %v8456_v10, 5 }
 0x3fc   : > { %v6458_v21 = vpop.f32.mrf.mxu3 }
 0x3fd   : > { %v14472_v29 = vadd.f32 %v6458_v21, %v6081_v32  ;;  %v8730_v23 = vpack.c.b16 %v8704_v35, %v8703_v5  ;;  %v7616_v32 = vsel %vm12141_vm5, %v7614_v34, %v7615_v3  ;;  %v14486_v21 = vpop.f32.mrf.mxu0  ;;  %v7085_v49 = vsel %vm11839_vm2, %v7080_v18, %v7084_v13  ;;  %v14504_v18 = vld [vmem:[#allocation2 + $0x80] sm:$0x1] }
 0x3fe   : > { %v6083_v36 = vpop.f32.mrf.mxu2  ;;  %v7710_v34 = vunpack.c.l.b16 %v7616_v32  ;;  %v7709_v35 = vunpack.c.l.b16 %v7613_v51  ;;  %v7288_v5 = vunpack.c.l.b16 %v7085_v49  ;;  %v7619_v32 = vrot.slane %v14395_v62, 5 }
 0x3ff   : > { %15395 = vst [vmem:[#allocation29_spill] sm:$0xff] %v14472_v29  ;;  %v6084_v28 = vadd.f32 %v6083_v36, %v14372_v17  ;;  %v14480_v24 = vpop.f32.mrf.mxu1  ;;  %v8453_v17 = vor.u32 %v8452_v4, %v14475_v19  ;;  %v6849_v36 = vld [vmem:[#allocation2 + $0x78] sm:$0xf]  ;;  %v7622_v51 = vrot.slane %v14414_v9, 5  ;;  %v7106_v9 = vshll.u32 %v14504_v18, 16 }
 0x400   : > { %v7087_v15 = vshrl.u32 %v6849_v36, 16  ;;  %v7090_v14 = vshll.u32 %v6849_v36, 16  ;;  %v7735_v45 = vpack.c.b16 %v7710_v34, %v7709_v35  ;;  %v8265_v36 = vld [vmem:[#allocation2 + $0x6c] sm:$0xf]  ;;  %v14507_v34 = vrot.slane %v7096_v50, 5 }
 0x401   : > { %8156 = vmatmul.bf16.gmra.mxu3 %v11596_v27  ;;  %v7075_v27 = vsel %vm11839_vm2, %v7070_v12, %v14464_v41  ;;  %v8454_v13 = vrot.slane %v8453_v17, 4  ;;  %v8266_v41 = vld [vmem:[#allocation2 + $0x70] sm:$0xf]  ;;  %v6790_v12 = vadd.f32 %v13905_v53, %v13924_v60  ;;  %v7511_v35 = vld [vmem:[#allocation2 + $0x60] sm:$0xe]  ;;  %v7108_v29 = vrot.slane %v7106_v9, 5 }
 0x402   : > { %8838 = vmatmul.bf16.gmra.mxu0 %v8730_v23  ;;  %v8444_v23 = vrot.slane %v8443_v58, 4  ;;  %v7287_v10 = vunpack.c.l.b16 %v7075_v27  ;;  %v7089_v49 = vrot.slane %v7087_v15, 4  ;;  %v7102_v58 = vrot.slane %v7100_v55, 4  ;;  %v14534_v9 = vld [vmem:[#allocation2 + $0x88] sm:$0xf] }
 0x403   : > { %v8470_v53 = vshll.u32 %v8266_v41, 16  ;;  %v8474_v60 = vshrl.u32 %v8266_v41, 16  ;;  %v7621_v55 = vrot.slane %v7619_v32, 4 }
 0x404   : > { %v6461_v31 = vpop.f32.mrf.mxu3  ;;  %v8449_v27 = vsel %vm11839_vm2, %v8444_v23, %v14475_v19  ;;  %v7103_v41 = vor.u32 %v7102_v58, %v14507_v34  ;;  %v11059_v19 = vrot.slane %v7511_v35, 9  ;;  %v8267_v23 = vld [vmem:[#allocation2 + $0x74] sm:$0x1] }
 0x405   : > { %v14495_v3 = vadd.f32 %v6461_v31, %v6084_v28  ;;  %v8459_v28 = vsel %vm11839_vm2, %v8454_v13, %v8458_v57  ;;  %v7311_v31 = vpack.c.b16 %v7288_v5, %v7287_v10  ;;  %v8461_v57 = vshrl.u32 %v8265_v36, 16  ;;  %v14515_v15 = vpop.f32.mrf.mxu0  ;;  %v11625_v5 = vld [vmem:[%s15305_s3 + $0x210] sm:$0xff] }
 0x406   : > { %v6085_v4 = vpop.f32.mrf.mxu2  ;;  %9236 = vmatpush.bf16.msra.mxu1 %v11625_v5  ;;  %v8480_v58 = vshll.u32 %v8267_v23, 16  ;;  %v7124_v23 = vshrl.u32 %v14534_v9, 16 }
 0x407   : > { %15396 = vst [vmem:[#allocation30_spill] sm:$0xff] %v14495_v3  ;;  %v6086_v54 = vadd.f32 %v6085_v4, %v14391_v1  ;;  %v7392_v17 = vpop.f32.mrf.mxu1  ;;  %v7092_v1 = vrot.slane %v7090_v14, 5  ;;  %v8464_v4 = vshll.u32 %v8265_v36, 16  ;;  %v8706_v14 = vunpack.c.l.b16 %v8459_v28 }
 0x408   : > { %v14509_v62 = vadd.f32 %v7392_v17, %v6790_v12  ;;  %v8705_v12 = vunpack.c.l.b16 %v8449_v27  ;;  %v7623_v36 = vsel %vm12141_vm5, %v7621_v55, %v7622_v51  ;;  %v14525_v17 = vrot.slane %v8470_v53, 5  ;;  %v6852_v53 = vld [vmem:[#allocation2 + $0x84] sm:$0xf] }
 0x409   : > { %v8476_v28 = vrot.slane %v8474_v60, 4  ;;  %v7620_v51 = vsel %vm12141_vm5, %v11059_v19, %v7619_v32  ;;  %v8482_v55 = vrot.slane %v8480_v58, 5  ;;  %v7111_v5 = vshrl.u32 %v6852_v53, 16 }
 0x40a   : > { %7431 = vmatmul.bf16.gmra.mxu1 %v7311_v31  ;;  %v11597_v31 = vld [vmem:[#allocation2 + $0x60] sm:$0xff]  ;;  %v7120_v19 = vshll.u32 %v14534_v9, 16 }
 0x40b   : > { %7847 = vmatmul.bf16.gmra.mxu2 %v7735_v45  ;;  %v7093_v45 = vor.u32 %v7092_v1, %v7089_v49  ;;  %v6791_v49 = vadd.f32 %v13926_v43, %v13940_v48  ;;  %v8731_v1 = vpack.c.b16 %v8706_v14, %v8705_v12  ;;  %v8477_v48 = vor.u32 %v8476_v28, %v14525_v17 }
 0x40c   : > { %v6463_v50 = vpop.f32.mrf.mxu3  ;;  %v7711_v14 = vunpack.c.l.b16 %v7620_v51 }
 0x40d   : > { %v14520_v13 = vadd.f32 %v6463_v50, %v6086_v54  ;;  %v8463_v54 = vrot.slane %v8461_v57, 4  ;;  %v8466_v50 = vrot.slane %v8464_v4, 5  ;;  %v7094_v27 = vrot.slane %v7093_v45, 4  ;;  %v14546_v12 = vpop.f32.mrf.mxu0 }
 0x40e   : > { %v6088_v10 = vpop.f32.mrf.mxu2  ;;  %v7114_v45 = vshll.u32 %v6852_v53, 16  ;;  %v14556_v53 = vrot.slane %v7120_v19, 5 }
 0x40f   : > { %15397 = vst [vmem:[#allocation31_spill] sm:$0xff] %v14520_v13  ;;  %v6089_v3 = vadd.f32 %v6088_v10, %v14416_v46  ;;  %v7394_v35 = vpop.f32.mrf.mxu1  ;;  %v7104_v13 = vrot.slane %v7103_v41, 4  ;;  %v7712_v46 = vunpack.c.l.b16 %v7623_v36  ;;  %v8467_v43 = vor.u32 %v8466_v50, %v8463_v54  ;;  %v8269_v54 = vld [vmem:[#allocation2 + $0x7c] sm:$0xf] }
 0x410   : > { %v14532_v60 = vadd.f32 %v7394_v35, %v6791_v49  ;;  %v7099_v32 = vsel %vm11839_vm2, %v7094_v27, %v14507_v34  ;;  %v6792_v50 = vadd.f32 %v13944_v8, %v13957_v20  ;;  %v14552_v49 = vld [vmem:[#allocation2 + $0x8c] sm:$0x1]  ;;  %v7116_v58 = vrot.slane %v7114_v45, 5  ;;  %v8268_v35 = vld [vmem:[#allocation2 + $0x78] sm:$0xf] }
 0x411   : > { %8161 = vmatmul.bf16.gmra.mxu3 %v11597_v31  ;;  %v7109_v57 = vsel %vm11839_vm2, %v7104_v13, %v7108_v29  ;;  %v7736_v10 = vpack.c.b16 %v7712_v46, %v7711_v14  ;;  %v8468_v28 = vrot.slane %v8467_v43, 4  ;;  %v8478_v31 = vrot.slane %v8477_v48, 4  ;;  %v7512_v43 = vld [vmem:[#allocation2 + $0x6c] sm:$0xe] }
 0x412   : > { %8843 = vmatmul.bf16.gmra.mxu0 %v8731_v1  ;;  %v7290_v29 = vunpack.c.l.b16 %v7109_v57  ;;  %v7289_v34 = vunpack.c.l.b16 %v7099_v32  ;;  %v7113_v1 = vrot.slane %v7111_v5, 4  ;;  %v7629_v46 = vrot.slane %v14458_v52, 5 }
 0x413   : > { %v8483_v51 = vsel %vm11839_vm2, %v8478_v31, %v8482_v55  ;;  %v8494_v8 = vshll.u32 %v8269_v54, 16  ;;  %v8498_v20 = vshrl.u32 %v8269_v54, 16  ;;  %v8473_v48 = vsel %vm11839_vm2, %v8468_v28, %v14525_v17 }
 0x414   : > { %v6466_v4 = vpop.f32.mrf.mxu3  ;;  %v7312_v57 = vpack.c.b16 %v7290_v29, %v7289_v34  ;;  %v8485_v14 = vshrl.u32 %v8268_v35, 16  ;;  %v8488_v55 = vshll.u32 %v8268_v35, 16  ;;  %v8708_v45 = vunpack.c.l.b16 %v8483_v51 }
 0x415   : > { %v14539_v41 = vadd.f32 %v6466_v4, %v6089_v3  ;;  %v7626_v3 = vrot.slane %v14441_v25, 5  ;;  %v7130_v4 = vshll.u32 %v14552_v49, 16  ;;  %v7117_v32 = vor.u32 %v7116_v58, %v7113_v1 }
 0x416   : > { %v6090_v13 = vpop.f32.mrf.mxu2  ;;  %v11060_v29 = vrot.slane %v7512_v43, 9  ;;  %v14570_v28 = vrot.slane %v8494_v8, 5  ;;  %v8500_v54 = vrot.slane %v8498_v20, 4  ;;  %v8487_v1 = vrot.slane %v8485_v14, 4  ;;  %v14579_v20 = vld [vmem:[#allocation2 + $0x94] sm:$0xf] }
 0x417   : > { %v6091_v36 = vadd.f32 %v6090_v13, %v14437_v2  ;;  %v7397_v27 = vpop.f32.mrf.mxu1  ;;  %v7126_v2 = vrot.slane %v7124_v23, 4  ;;  %v7628_v52 = vrot.slane %v7626_v3, 4  ;;  %v8270_v13 = vld [vmem:[#allocation2 + $0x80] sm:$0x1]  ;;  %v7132_v35 = vrot.slane %v7130_v4, 5 }
 0x418   : > { %v14559_v25 = vadd.f32 %v7397_v27, %v6792_v50  ;;  %v11598_v50 = vld [vmem:[#allocation2 + $0x6c] sm:$0xff]  ;;  %v8490_v58 = vrot.slane %v8488_v55, 5  ;;  %v6793_v27 = vadd.f32 %v13961_v37, %v13978_v42  ;;  %v7627_v8 = vsel %vm12141_vm5, %v11060_v29, %v7626_v3 }
 0x419   : > { %v7127_v23 = vor.u32 %v7126_v2, %v14556_v53  ;;  %v7630_v17 = vsel %vm12141_vm5, %v7628_v52, %v7629_v46  ;;  %v7118_v2 = vrot.slane %v7117_v32, 4  ;;  %v6855_v4 = vld [vmem:[#allocation2 + $0x90] sm:$0xf]  ;;  %v7144_v32 = vshll.u32 %v14579_v20, 16 }
 0x41a   : > { %7436 = vmatmul.bf16.gmra.mxu1 %v7312_v57  ;;  %v8504_v57 = vshll.u32 %v8270_v13, 16  ;;  %v7714_v42 = vunpack.c.l.b16 %v7630_v17  ;;  %v8491_v14 = vor.u32 %v8490_v58, %v8487_v1  ;;  %v7138_v29 = vshll.u32 %v6855_v4, 16  ;;  %v8272_v1 = vld [vmem:[#allocation2 + $0x88] sm:$0xf] }
 0x41b   : > { %7852 = vmatmul.bf16.gmra.mxu2 %v7736_v10  ;;  %v8707_v10 = vunpack.c.l.b16 %v8473_v48  ;;  %v7128_v46 = vrot.slane %v7127_v23, 4  ;;  %v8501_v48 = vor.u32 %v8500_v54, %v14570_v28  ;;  %v7135_v23 = vshrl.u32 %v6855_v4, 16 }
 0x41c   : > { %v6468_v5 = vpop.f32.mrf.mxu3  ;;  %v8506_v3 = vrot.slane %v8504_v57, 5  ;;  %v7148_v13 = vshrl.u32 %v14579_v20, 16 }
 0x41d   : > { %v14565_v19 = vadd.f32 %v6468_v5, %v6091_v36  ;;  %v14573_v36 = vpop.f32.mrf.mxu0  ;;  %v8732_v51 = vpack.c.b16 %v8708_v45, %v8707_v10  ;;  %v7133_v37 = vsel %vm11839_vm2, %v7128_v46, %v7132_v35  ;;  %v7123_v5 = vsel %vm11839_vm2, %v7118_v2, %v14556_v53  ;;  %v8271_v2 = vld [vmem:[#allocation2 + $0x84] sm:$0xf] }
 0x41e   : > { %v6093_v31 = vpop.f32.mrf.mxu2  ;;  %v7713_v45 = vunpack.c.l.b16 %v7627_v8  ;;  %v7292_v10 = vunpack.c.l.b16 %v7133_v37  ;;  %v8502_v54 = vrot.slane %v8501_v48, 4  ;;  %v8492_v35 = vrot.slane %v8491_v14, 4 }
 0x41f   : > { %v6094_v34 = vadd.f32 %v6093_v31, %v14460_v16  ;;  %v7399_v43 = vpop.f32.mrf.mxu1  ;;  %v6794_v53 = vadd.f32 %v13980_v56, %v13993_v26  ;;  %v7291_v58 = vunpack.c.l.b16 %v7123_v5  ;;  %v7140_v46 = vrot.slane %v7138_v29, 5 }
 0x420   : > { %v14581_v16 = vadd.f32 %v7399_v43, %v6793_v27  ;;  %v14598_v27 = vld [vmem:[#allocation2 + $0x98] sm:$0x1]  ;;  %v7137_v43 = vrot.slane %v7135_v23, 4  ;;  %v14601_v8 = vrot.slane %v7144_v32, 5  ;;  %v8518_v26 = vshll.u32 %v8272_v1, 16 }
 0x421   : > { %8166 = vmatmul.bf16.gmra.mxu3 %v11598_v50  ;;  %v7737_v50 = vpack.c.b16 %v7714_v42, %v7713_v45  ;;  %v7313_v56 = vpack.c.b16 %v7292_v10, %v7291_v58  ;;  %v8522_v37 = vshrl.u32 %v8272_v1, 16  ;;  %v8497_v42 = vsel %vm11839_vm2, %v8492_v35, %v14570_v28  ;;  %v8273_v10 = vld [vmem:[#allocation2 + $0x8c] sm:$0x1] }
 0x422   : > { %8848 = vmatmul.bf16.gmra.mxu0 %v8732_v51  ;;  %v7633_v51 = vrot.slane %v14484_v44, 5  ;;  %v7154_v44 = vshll.u32 %v14598_v27, 16  ;;  %v8509_v14 = vshrl.u32 %v8271_v2, 16  ;;  %v7141_v23 = vor.u32 %v7140_v46, %v7137_v43 }
 0x423   : > { %v8709_v28 = vunpack.c.l.b16 %v8497_v42  ;;  %v14618_v35 = vrot.slane %v8518_v26, 5  ;;  %v8524_v1 = vrot.slane %v8522_v37, 4  ;;  %v6858_v37 = vld [vmem:[#allocation2 + $0x9c] sm:$0xf] }
 0x424   : > { %v6471_v55 = vpop.f32.mrf.mxu3  ;;  %v7156_v58 = vrot.slane %v7154_v44, 5  ;;  %v14628_v44 = vld [vmem:[#allocation2 + $0xa0] sm:$0xf] }
 0x425   : > { %v14590_v52 = vadd.f32 %v6471_v55, %v6094_v34  ;;  %v8507_v34 = vsel %vm11839_vm2, %v8502_v54, %v8506_v3  ;;  %v14603_v48 = vpop.f32.mrf.mxu0  ;;  %v8512_v55 = vshll.u32 %v8271_v2, 16  ;;  %v11624_v3 = vld [vmem:[%s15305_s3 + $0x208] sm:$0xff]  ;;  %v7513_v54 = vld [vmem:[#allocation2 + $0x78] sm:$0xe] }
 0x426   : > { %v6095_v31 = vpop.f32.mrf.mxu2  ;;  %v8710_v45 = vunpack.c.l.b16 %v8507_v34  ;;  %9237 = vmatpush.bf16.msra.mxu1 %v11624_v3  ;;  %v11061_v42 = vrot.slane %v7513_v54, 9  ;;  %v7168_v54 = vshll.u32 %v14628_v44, 16 }
 0x427   : > { %v6096_v17 = vadd.f32 %v6095_v31, %v14480_v24  ;;  %v7402_v57 = vpop.f32.mrf.mxu1  ;;  %v7150_v24 = vrot.slane %v7148_v13, 4  ;;  %v7636_v13 = vrot.slane %v14504_v18, 5  ;;  %v8514_v2 = vrot.slane %v8512_v55, 5 }
 0x428   : > { %v14605_v4 = vadd.f32 %v7402_v57, %v6794_v53  ;;  %v11599_v53 = vld [vmem:[#allocation2 + $0x78] sm:$0xff]  ;;  %v6795_v57 = vadd.f32 %v13997_v7, %v14012_v30  ;;  %v8733_v43 = vpack.c.b16 %v8710_v45, %v8709_v28  ;;  %v8528_v18 = vshll.u32 %v8273_v10, 16  ;;  %v8275_v10 = vld [vmem:[#allocation2 + $0x94] sm:$0xf] }
 0x429   : > { %v7151_v29 = vor.u32 %v7150_v24, %v14601_v8  ;;  %v7142_v24 = vrot.slane %v7141_v23, 4  ;;  %v7634_v30 = vsel %vm12141_vm5, %v11061_v42, %v7633_v51 }
 0x42a   : > { %7441 = vmatmul.bf16.gmra.mxu1 %v7313_v56  ;;  %v8530_v23 = vrot.slane %v8528_v18, 5  ;;  %v8542_v18 = vshll.u32 %v8275_v10, 16 }
 0x42b   : > { %7857 = vmatmul.bf16.gmra.mxu2 %v7737_v50  ;;  %v7635_v50 = vrot.slane %v7633_v51, 4  ;;  %v7152_v56 = vrot.slane %v7151_v29, 4  ;;  %v7159_v29 = vshrl.u32 %v6858_v37, 16  ;;  %v7147_v28 = vsel %vm11839_vm2, %v7142_v24, %v14601_v8  ;;  %v14647_v24 = vld [vmem:[#allocation2 + $0xa4] sm:$0x1] }
 0x42c   : > { %v6473_v5 = vpop.f32.mrf.mxu3  ;;  %v6796_v8 = vadd.f32 %v14014_v63, %v14030_v6  ;;  %v7178_v6 = vshll.u32 %v14647_v24, 16 }
 0x42d   : > { %v14614_v32 = vadd.f32 %v6473_v5, %v6096_v17  ;;  %v8511_v17 = vrot.slane %v8509_v14, 4  ;;  %v7637_v26 = vsel %vm12141_vm5, %v7635_v50, %v7636_v13  ;;  %v7157_v7 = vsel %vm11839_vm2, %v7152_v56, %v7156_v58  ;;  %v14634_v55 = vpop.f32.mrf.mxu0 }
 0x42e   : > { %v7818_v31 = vpop.f32.mrf.mxu2  ;;  %v7716_v3 = vunpack.c.l.b16 %v7637_v26  ;;  %v7162_v13 = vshll.u32 %v6858_v37, 16  ;;  %v7172_v50 = vshrl.u32 %v14628_v44, 16  ;;  %v7294_v51 = vunpack.c.l.b16 %v7157_v7 }
 0x42f   : > { %v7898_v34 = vadd.f32 %v7818_v31, %v14509_v62  ;;  %v7404_v46 = vpop.f32.mrf.mxu1  ;;  %v8525_v62 = vor.u32 %v8524_v1, %v14618_v35  ;;  %v8515_v14 = vor.u32 %v8514_v2, %v8511_v17  ;;  %v7640_v17 = vrot.slane %v14534_v9, 5 }
 0x430   : > { %v14625_v5 = vadd.f32 %v7404_v46, %v6795_v57  ;;  %v8546_v46 = vshrl.u32 %v8275_v10, 16  ;;  %v7161_v56 = vrot.slane %v7159_v29, 4  ;;  %v7164_v42 = vrot.slane %v7162_v13, 5 }
 0x431   : > { %8171 = vmatmul.bf16.gmra.mxu3 %v11599_v53  ;;  %v7715_v53 = vunpack.c.l.b16 %v7634_v30  ;;  %v8526_v58 = vrot.slane %v8525_v62, 4  ;;  %v8516_v57 = vrot.slane %v8515_v14, 4  ;;  %v14651_v9 = vrot.slane %v7168_v54, 5  ;;  %v8276_v54 = vld [vmem:[#allocation2 + $0x98] sm:$0x1] }
 0x432   : > { %8853 = vmatmul.bf16.gmra.mxu0 %v8733_v43  ;;  %v8274_v43 = vld [vmem:[#allocation2 + $0x90] sm:$0xf]  ;;  %v7643_v14 = vrot.slane %v14552_v49, 5  ;;  %v7642_v29 = vrot.slane %v7640_v17, 4 }
 0x433   : > { %v7738_v37 = vpack.c.b16 %v7716_v3, %v7715_v53  ;;  %v8531_v62 = vsel %vm11839_vm2, %v8526_v58, %v8530_v23  ;;  %v8521_v63 = vsel %vm11839_vm2, %v8516_v57, %v14618_v35  ;;  %v7514_v3 = vld [vmem:[#allocation2 + $0x84] sm:$0xe]  ;;  %v8536_v13 = vshll.u32 %v8274_v43, 16 }
 0x434   : > { %v8132_v45 = vpop.f32.mrf.mxu3  ;;  %v8712_v10 = vunpack.c.l.b16 %v8531_v62  ;;  %v8711_v35 = vunpack.c.l.b16 %v8521_v63  ;;  %v11062_v57 = vrot.slane %v7514_v3, 9 }
 0x435   : > { %v14639_v31 = vadd.f32 %v8132_v45, %v7898_v34  ;;  %v7293_v34 = vunpack.c.l.b16 %v7147_v28  ;;  %v8533_v45 = vshrl.u32 %v8274_v43, 16  ;;  %v7165_v28 = vor.u32 %v7164_v42, %v7161_v56  ;;  %v14665_v53 = vpop.f32.mrf.mxu0 }
 0x436   : > { %v7820_v1 = vpop.f32.mrf.mxu2  ;;  %v7644_v43 = vsel %vm12141_vm5, %v7642_v29, %v7643_v14  ;;  %v8552_v42 = vshll.u32 %v8276_v54, 16  ;;  %v7641_v14 = vsel %vm12141_vm5, %v11062_v57, %v7640_v17 }
 0x437   : > { %v7899_v2 = vadd.f32 %v7820_v1, %v14532_v60  ;;  %v7407_v26 = vpop.f32.mrf.mxu1  ;;  %v7174_v60 = vrot.slane %v7172_v50, 4  ;;  %v7314_v30 = vpack.c.b16 %v7294_v51, %v7293_v34  ;;  %v14660_v50 = vrot.slane %v8542_v18, 5  ;;  %v11600_v34 = vld [vmem:[#allocation2 + $0x84] sm:$0xff] }
 0x438   : > { %v14653_v7 = vadd.f32 %v7407_v26, %v6796_v8  ;;  %v8548_v51 = vrot.slane %v8546_v46, 4  ;;  %v8535_v8 = vrot.slane %v8533_v45, 4  ;;  %v7180_v26 = vrot.slane %v7178_v6, 5  ;;  %v14675_v45 = vld [vmem:[#allocation2 + $0xac] sm:$0xf] }
 0x439   : > { %v7175_v1 = vor.u32 %v7174_v60, %v14651_v9  ;;  %v8538_v18 = vrot.slane %v8536_v13, 5  ;;  %v8734_v46 = vpack.c.b16 %v8712_v10, %v8711_v35  ;;  %v6861_v6 = vld [vmem:[#allocation2 + $0xa8] sm:$0xf]  ;;  %v8554_v3 = vrot.slane %v8552_v42, 5  ;;  %v8278_v35 = vld [vmem:[#allocation2 + $0xa0] sm:$0xf] }
 0x43a   : > { %7446 = vmatmul.bf16.gmra.mxu1 %v7314_v30  ;;  %v8549_v62 = vor.u32 %v8548_v51, %v14660_v50  ;;  %v7192_v17 = vshll.u32 %v14675_v45, 16  ;;  %v7183_v54 = vshrl.u32 %v6861_v6, 16  ;;  %v7186_v51 = vshll.u32 %v6861_v6, 16 }
 0x43b   : > { %7862 = vmatmul.bf16.gmra.mxu2 %v7738_v37  ;;  %v7166_v37 = vrot.slane %v7165_v28, 4  ;;  %v7176_v30 = vrot.slane %v7175_v1, 4  ;;  %v7196_v1 = vshrl.u32 %v14675_v45, 16 }
 0x43c   : > { %v8134_v23 = vpop.f32.mrf.mxu3  ;;  %v8550_v10 = vrot.slane %v8549_v62, 4  ;;  %v8570_v62 = vshrl.u32 %v8278_v35, 16 }
 0x43d   : > { %v14662_v49 = vadd.f32 %v8134_v23, %v7899_v2  ;;  %v6797_v2 = vadd.f32 %v14034_v61, %v14052_v47  ;;  %v7181_v61 = vsel %vm11839_vm2, %v7176_v30, %v7180_v26  ;;  %v8539_v47 = vor.u32 %v8538_v18, %v8535_v8  ;;  %v8277_v18 = vld [vmem:[#allocation2 + $0x9c] sm:$0xf]  ;;  %v14692_v42 = vpop.f32.mrf.mxu0 }
 0x43e   : > { %v7823_v58 = vpop.f32.mrf.mxu2  ;;  %v7171_v29 = vsel %vm11839_vm2, %v7166_v37, %v14651_v9  ;;  %v7717_v23 = vunpack.c.l.b16 %v7641_v14  ;;  %v8555_v9 = vsel %vm11839_vm2, %v8550_v10, %v8554_v3  ;;  %v7647_v26 = vrot.slane %v14579_v20, 5  ;;  %v7515_v3 = vld [vmem:[#allocation2 + $0x90] sm:$0xe] }
 0x43f   : > { %v7900_v56 = vadd.f32 %v7823_v58, %v14559_v25  ;;  %v7409_v60 = vpop.f32.mrf.mxu1  ;;  %v7718_v25 = vunpack.c.l.b16 %v7644_v43  ;;  %v7296_v58 = vunpack.c.l.b16 %v7181_v61  ;;  %v8566_v37 = vshll.u32 %v8278_v35, 16 }
 0x440   : > { %v14677_v63 = vadd.f32 %v7409_v60, %v6797_v2  ;;  %v7295_v2 = vunpack.c.l.b16 %v7171_v29  ;;  %v7185_v30 = vrot.slane %v7183_v54, 4  ;;  %v14698_v14 = vrot.slane %v7192_v17, 5  ;;  %v8279_v17 = vld [vmem:[#allocation2 + $0xa4] sm:$0x1] }
 0x441   : > { %8176 = vmatmul.bf16.gmra.mxu3 %v11600_v34  ;;  %v7739_v43 = vpack.c.b16 %v7718_v25, %v7717_v23  ;;  %v8540_v34 = vrot.slane %v8539_v47, 4  ;;  %v7198_v25 = vrot.slane %v7196_v1, 4  ;;  %v7650_v61 = vrot.slane %v14598_v27, 5  ;;  %v11623_v27 = vld [vmem:[%s15305_s3 + $0x200] sm:$0xff] }
 0x442   : > { %8858 = vmatmul.bf16.gmra.mxu0 %v8734_v46  ;;  %v14696_v46 = vld [vmem:[#allocation2 + $0xb0] sm:$0x1]  ;;  %v7315_v20 = vpack.c.b16 %v7296_v58, %v7295_v2  ;;  %v8557_v47 = vshrl.u32 %v8277_v18, 16  ;;  %v8560_v29 = vshll.u32 %v8277_v18, 16  ;;  %v8714_v23 = vunpack.c.l.b16 %v8555_v9  ;;  %9238 = vmatpush.bf16.msra.mxu1 %v11623_v27 }
 0x443   : > { %v7649_v10 = vrot.slane %v7647_v26, 4  ;;  %v14707_v54 = vrot.slane %v8566_v37, 5  ;;  %v11601_v18 = vld [vmem:[#allocation2 + $0x90] sm:$0xff] }
 0x444   : > { %v8137_v13 = vpop.f32.mrf.mxu3  ;;  %v8559_v9 = vrot.slane %v8557_v47, 4  ;;  %v8562_v37 = vrot.slane %v8560_v29, 5  ;;  %v6864_v47 = vld [vmem:[#allocation2 + $0xb4] sm:$0xf] }
 0x445   : > { %v14685_v28 = vadd.f32 %v8137_v13, %v7900_v56  ;;  %v6798_v56 = vadd.f32 %v14054_v38, %v14067_v22  ;;  %v8545_v38 = vsel %vm11839_vm2, %v8540_v34, %v14660_v50  ;;  %v7202_v22 = vshll.u32 %v14696_v46, 16 }
 0x446   : > { %v7825_v57 = vpop.f32.mrf.mxu2  ;;  %v7199_v50 = vor.u32 %v7198_v25, %v14698_v14  ;;  %v8713_v58 = vunpack.c.l.b16 %v8545_v38  ;;  %v7651_v34 = vsel %vm12141_vm5, %v7649_v10, %v7650_v61  ;;  %v14723_v38 = vpop.f32.mrf.mxu0 }
 0x447   : > { %v7901_v8 = vadd.f32 %v7825_v57, %v14581_v16  ;;  %v7412_v60 = vpop.f32.mrf.mxu1  ;;  %v7188_v16 = vrot.slane %v7186_v51, 5  ;;  %v8572_v51 = vrot.slane %v8570_v62, 4  ;;  %v8576_v62 = vshll.u32 %v8279_v17, 16 }
 0x448   : > { %v14700_v6 = vadd.f32 %v7412_v60, %v6798_v56  ;;  %v7204_v56 = vrot.slane %v7202_v22, 5  ;;  %v8735_v60 = vpack.c.b16 %v8714_v23, %v8713_v58  ;;  %v7207_v17 = vshrl.u32 %v6864_v47, 16 }
 0x449   : > { %v7189_v35 = vor.u32 %v7188_v16, %v7185_v30  ;;  %v8573_v30 = vor.u32 %v8572_v51, %v14707_v54  ;;  %v8578_v29 = vrot.slane %v8576_v62, 5  ;;  %v7210_v51 = vshll.u32 %v6864_v47, 16  ;;  %v8280_v62 = vld [vmem:[#allocation2 + $0xa8] sm:$0xf] }
 0x44a   : > { %7451 = vmatmul.bf16.gmra.mxu1 %v7315_v20  ;;  %v7200_v20 = vrot.slane %v7199_v50, 4 }
 0x44b   : > { %7867 = vmatmul.bf16.gmra.mxu2 %v7739_v43  ;;  %v11063_v43 = vrot.slane %v7515_v3, 9  ;;  %v7190_v25 = vrot.slane %v7189_v35, 4  ;;  %v14727_v3 = vld [vmem:[#allocation2 + $0xb8] sm:$0xf]  ;;  %v8574_v10 = vrot.slane %v8573_v30, 4  ;;  %v7212_v30 = vrot.slane %v7210_v51, 5 }
 0x44c   : > { %v8139_v13 = vpop.f32.mrf.mxu3  ;;  %v7216_v35 = vshll.u32 %v14727_v3, 16  ;;  %v7220_v50 = vshrl.u32 %v14727_v3, 16 }
 0x44d   : > { %v14712_v1 = vadd.f32 %v8139_v13, %v7901_v8  ;;  %v6799_v8 = vadd.f32 %v14071_v0, %v14092_v33  ;;  %v7648_v61 = vsel %vm12141_vm5, %v11063_v43, %v7647_v26  ;;  %v7205_v0 = vsel %vm11839_vm2, %v7200_v20, %v7204_v56 }
 0x44e   : > { %v7828_v57 = vpop.f32.mrf.mxu2  ;;  %v8563_v33 = vor.u32 %v8562_v37, %v8559_v9  ;;  %v7719_v23 = vunpack.c.l.b16 %v7648_v61  ;;  %v7195_v26 = vsel %vm11839_vm2, %v7190_v25, %v14698_v14  ;;  %v7298_v58 = vunpack.c.l.b16 %v7205_v0 }
 0x44f   : > { %v7902_v2 = vadd.f32 %v7828_v57, %v14605_v4  ;;  %v7414_v16 = vpop.f32.mrf.mxu1  ;;  %v7720_v4 = vunpack.c.l.b16 %v7651_v34  ;;  %v8281_v34 = vld [vmem:[#allocation2 + $0xac] sm:$0xf]  ;;  %v8579_v56 = vsel %vm11839_vm2, %v8574_v10, %v8578_v29  ;;  %v7654_v37 = vrot.slane %v14628_v44, 5 }
 0x450   : > { %v14725_v22 = vadd.f32 %v7414_v16, %v6799_v8  ;;  %v6800_v14 = vadd.f32 %v14097_v59, %v14127_v11  ;;  %v14744_v8 = vld [vmem:[#allocation2 + $0xbc] sm:$0x1]  ;;  %v14746_v25 = vrot.slane %v7216_v35, 5  ;;  %v7222_v20 = vrot.slane %v7220_v50, 4 }
 0x451   : > { %8181 = vmatmul.bf16.gmra.mxu3 %v11601_v18  ;;  %v7740_v43 = vpack.c.b16 %v7720_v4, %v7719_v23  ;;  %v8564_v18 = vrot.slane %v8563_v33, 4  ;;  %v8594_v61 = vshrl.u32 %v8281_v34, 16  ;;  %v8581_v0 = vshrl.u32 %v8280_v62, 16  ;;  %v7516_v33 = vld [vmem:[#allocation2 + $0x9c] sm:$0xe] }
 0x452   : > { %15398 = vst [vmem:[#allocation32_spill] sm:$0xff] %v14725_v22  ;;  %8863 = vmatmul.bf16.gmra.mxu0 %v8735_v60  ;;  %v7209_v60 = vrot.slane %v7207_v17, 4  ;;  %v8584_v44 = vshll.u32 %v8280_v62, 16  ;;  %v7226_v11 = vshll.u32 %v14744_v8, 16  ;;  %v7657_v29 = vrot.slane %v14647_v24, 5  ;;  %v5192_v62 = vld [vmem:[#allocation2 + $0xb4] sm:$0xff]  }
 0x453   : > { %v8569_v59 = vsel %vm11839_vm2, %v8564_v18, %v14707_v54  ;;  %v8716_v10 = vunpack.c.l.b16 %v8579_v56  ;;  %v7656_v51 = vrot.slane %v7654_v37, 4  ;;  %v7223_v35 = vor.u32 %v7222_v20, %v14746_v25  ;;  %5196 = vst [vmem:[#allocation2 + $0xcc] sm:$0xff] %v5192_v62  }
 0x454   : > { %v8142_v13 = vpop.f32.mrf.mxu3  ;;  %v7213_v17 = vor.u32 %v7212_v30, %v7209_v60  ;;  %v8715_v54 = vunpack.c.l.b16 %v8569_v59  ;;  %v8583_v24 = vrot.slane %v8581_v0, 4  ;;  %v8586_v18 = vrot.slane %v8584_v44, 5  ;;  %v15400_v60 = vld [vmem:[#allocation7_spill] sm:$0xff]  ;;  %v15401_v30 = vld [vmem:[#allocation6_spill] sm:$0xff] }
 0x455   : > { %v14734_v27 = vadd.f32 %v8142_v13, %v7902_v2  ;;  %v7297_v2 = vunpack.c.l.b16 %v7195_v26  ;;  %v14755_v13 = vpop.f32.mrf.mxu0  ;;  %v7224_v44 = vrot.slane %v7223_v35, 4 }
 0x456   : > { %v7830_v57 = vpop.f32.mrf.mxu2  ;;  %v8736_v20 = vpack.c.b16 %v8716_v10, %v8715_v54 }
 0x457   : > { %v7903_v9 = vadd.f32 %v7830_v57, %v14625_v5  ;;  %v7417_v16 = vpop.f32.mrf.mxu1  ;;  %v8590_v5 = vshll.u32 %v8281_v34, 16  ;;  %v7316_v4 = vpack.c.b16 %v7298_v58, %v7297_v2  ;;  %v8596_v58 = vrot.slane %v8594_v61, 4  ;;  %v14762_v34 = vld [vmem:[#allocation2 + $0xb0] sm:$0x1] }
 0x458   : > { %v14748_v47 = vadd.f32 %v7417_v16, %v6800_v14  ;;  %v11602_v14 = vld [vmem:[#allocation2 + $0x9c] sm:$0xff]  ;;  %v7228_v2 = vrot.slane %v7226_v11, 5  ;;  %v6801_v16 = vadd.f32 %v15401_v30, %v15400_v60 }
 0x459   : > { %v14760_v50 = vrot.slane %v8590_v5, 5  ;;  %v7214_v5 = vrot.slane %v7213_v17, 4  ;;  %v6867_v11 = vld [vmem:[#allocation2 + $0xc0] sm:$0xf] }
 0x45a   : > { %15399 = vst [vmem:[#allocation33_spill] sm:$0xff] %v14748_v47  ;;  %7456 = vmatmul.bf16.gmra.mxu1 %v7316_v4  ;;  %v14771_v4 = vld [vmem:[#allocation2 + $0xc4] sm:$0xf]  ;;  %v7229_v10 = vsel %vm11839_vm2, %v7224_v44, %v7228_v2  ;;  %v7231_v54 = vshrl.u32 %v6867_v11, 16 }
 0x45b   : > { %7872 = vmatmul.bf16.gmra.mxu2 %v7740_v43  ;;  %v11064_v43 = vrot.slane %v7516_v33, 9  ;;  %v8597_v59 = vor.u32 %v8596_v58, %v14760_v50  ;;  %v7219_v35 = vsel %vm11839_vm2, %v7214_v5, %v14746_v25  ;;  %v7300_v2 = vunpack.c.l.b16 %v7229_v10 }
 0x45c   : > { %v8144_v23 = vpop.f32.mrf.mxu3  ;;  %v7299_v25 = vunpack.c.l.b16 %v7219_v35  ;;  %v7233_v10 = vrot.slane %v7231_v54, 4  ;;  %v7661_v35 = vrot.slane %v14675_v45, 5 }
 0x45d   : > { %v14757_v26 = vadd.f32 %v8144_v23, %v7903_v9  ;;  %v7658_v9 = vsel %vm12141_vm5, %v7656_v51, %v7657_v29  ;;  %v7655_v61 = vsel %vm12141_vm5, %v11064_v43, %v7654_v37  ;;  %v8587_v23 = vor.u32 %v8586_v18, %v8583_v24  ;;  %v8283_v51 = vld [vmem:[#allocation2 + $0xb4] sm:$0xf]  ;;  %v14786_v18 = vpop.f32.mrf.mxu0 }
 0x45e   : > { %v7833_v57 = vpop.f32.mrf.mxu2  ;;  %v7722_v29 = vunpack.c.l.b16 %v7658_v9  ;;  %v7721_v17 = vunpack.c.l.b16 %v7655_v61  ;;  %v7240_v37 = vshll.u32 %v14771_v4, 16  ;;  %v7244_v43 = vshrl.u32 %v14771_v4, 16  ;;  %v5194_v61 = vld [vmem:[#allocation2 + $0xbc] sm:$0x1] }
 0x45f   : > { %v7904_v56 = vadd.f32 %v7833_v57, %v14653_v7  ;;  %v7419_v0 = vpop.f32.mrf.mxu1  ;;  %v8600_v7 = vshll.u32 %v14762_v34, 16  ;;  %v7234_v57 = vshll.u32 %v6867_v11, 16  ;;  %v8588_v30 = vrot.slane %v8587_v23, 4  ;;  %5198 = vst [vmem:[#allocation2 + $0xd4] sm:$0x1] %v5194_v61 }
 0x460   : > { %v14775_v33 = vadd.f32 %v7419_v0, %v6801_v16  ;;  %v7741_v60 = vpack.c.b16 %v7722_v29, %v7721_v17  ;;  %v14788_v16 = vld [vmem:[#allocation2 + $0xb8] sm:$0xf]  ;;  %v14791_v0 = vld [vmem:[#allocation2 + $0xc8] sm:$0x1]  ;;  %v14793_v44 = vrot.slane %v7240_v37, 5  ;;  %v7246_v29 = vrot.slane %v7244_v43, 4 }
 0x461   : > { %8186 = vmatmul.bf16.gmra.mxu3 %v11602_v14  ;;  %v8598_v14 = vrot.slane %v8597_v59, 4  ;;  %v8602_v24 = vrot.slane %v8600_v7, 5  ;;  %15403 = vst [vmem:[#allocation6_spill] sm:$0xff] %v14788_v16  ;;  %v15404_v59 = vld [vmem:[#allocation8_spill] sm:$0xff]  ;;  %v7250_v61 = vshll.u32 %v14791_v0, 16  ;;  %v8593_v54 = vsel %vm11839_vm2, %v8588_v30, %v14760_v50 }
 0x462   : > { %15402 = vst [vmem:[#allocation7_spill] sm:$0xff] %v14775_v33  ;;  %8868 = vmatmul.bf16.gmra.mxu0 %v8736_v20  ;;  %v8605_v20 = vshrl.u32 %v8283_v51, 16  ;;  %v15405_v7 = vld [vmem:[#allocation4_spill] sm:$0xff]  ;;  %v8717_v50 = vunpack.c.l.b16 %v8593_v54 }
 0x463   : > { %v6802_v11 = vadd.f32 %v15405_v7, %v15404_v59  ;;  %v8603_v17 = vsel %vm11839_vm2, %v8598_v14, %v8602_v24  ;;  %v7247_v7 = vor.u32 %v7246_v29, %v14793_v44  ;;  %v7252_v30 = vrot.slane %v7250_v61, 5  ;;  %v15408_v29 = vld [vmem:[#allocation5_spill] sm:$0xff]  ;;  %v14826_v54 = vld [vmem:[#allocation2 + $0xc4] sm:$0xf] }
 0x464   : > { %v8147_v58 = vpop.f32.mrf.mxu3  ;;  %v8607_v43 = vrot.slane %v8605_v20, 4  ;;  %v8718_v24 = vunpack.c.l.b16 %v8603_v17 }
 0x465   : > { %v14784_v62 = vadd.f32 %v8147_v58, %v7904_v56  ;;  %v8608_v56 = vshll.u32 %v8283_v51, 16  ;;  %v7236_v58 = vrot.slane %v7234_v57, 5  ;;  %v7317_v51 = vpack.c.b16 %v7300_v2, %v7299_v25 }
 0x466   : > { %v7835_v9 = vpop.f32.mrf.mxu2  ;;  %v7664_v57 = vrot.slane %v14696_v46, 5  ;;  %v11603_v46 = vld [vmem:[#allocation2 + $0xa8] sm:$0xff] }
 0x467   : > { %v7905_v5 = vadd.f32 %v7835_v9, %v14677_v63  ;;  %v7422_v23 = vpop.f32.mrf.mxu1  ;;  %v8614_v63 = vshll.u32 %v14788_v16, 16  ;;  %v8618_v9 = vshrl.u32 %v14788_v16, 16  ;;  %v8610_v14 = vrot.slane %v8608_v56, 5 }
 0x468   : > { %v14802_v37 = vadd.f32 %v7422_v23, %v6802_v11  ;;  %v7237_v59 = vor.u32 %v7236_v58, %v7233_v10  ;;  %v7517_v11 = vld [vmem:[#allocation2 + $0xa8] sm:$0xe]  ;;  %v14810_v23 = vld [vmem:[#allocation2 + $0xbc] sm:$0x1]  ;;  %v14819_v58 = vpop.f32.mrf.mxu0 }
 0x469   : > { %15407 = vst [vmem:[#allocation4_spill] sm:$0xff] %v14810_v23  ;;  %v14814_v25 = vrot.slane %v8614_v63, 5  ;;  %v11065_v20 = vrot.slane %v7517_v11, 9  ;;  %v8611_v17 = vor.u32 %v8610_v14, %v8607_v43  ;;  %v8624_v10 = vshll.u32 %v14810_v23, 16  ;;  %v14832_v11 = vld [vmem:[#allocation2 + $0xd0] sm:$0xf] }
 0x46a   : > { %15406 = vst [vmem:[#allocation8_spill] sm:$0xff] %v14802_v37  ;;  %7461 = vmatmul.bf16.gmra.mxu1 %v7317_v51  ;;  %v8620_v37 = vrot.slane %v8618_v9, 4  ;;  %v15409_v51 = vld [vmem:[#allocation9_spill] sm:$0xff]  ;;  %v7238_v33 = vrot.slane %v7237_v59, 4  ;;  %v7248_v63 = vrot.slane %v7247_v7, 4 }
 0x46b   : > { %7877 = vmatmul.bf16.gmra.mxu2 %v7741_v60  ;;  %v7663_v60 = vrot.slane %v7661_v35, 4  ;;  %v7662_v9 = vsel %vm12141_vm5, %v11065_v20, %v7661_v35  ;;  %v8612_v59 = vrot.slane %v8611_v17, 4  ;;  %v8626_v7 = vrot.slane %v8624_v10, 5 }
 0x46c   : > { %v8149_v45 = vpop.f32.mrf.mxu3  ;;  %v8621_v61 = vor.u32 %v8620_v37, %v14814_v25  ;;  %v7253_v43 = vsel %vm11839_vm2, %v7248_v63, %v7252_v30  ;;  %v7243_v35 = vsel %vm11839_vm2, %v7238_v33, %v14793_v44  ;;  %v7723_v37 = vunpack.c.l.b16 %v7662_v9  ;;  %v8286_v44 = vld [vmem:[#allocation2 + $0xc0] sm:$0xf]  ;;  %v15411_v63 = vld [vmem:[#allocation10_spill] sm:$0xff]  ;;  %v15412_v9 = vld [vmem:[#allocation11_spill] sm:$0xff] }
 0x46d   : > { %v14812_v2 = vadd.f32 %v8149_v45, %v7905_v5  ;;  %v7665_v56 = vsel %vm12141_vm5, %v7663_v60, %v7664_v57  ;;  %v6803_v5 = vadd.f32 %v15409_v51, %v15408_v29  ;;  %v8737_v45 = vpack.c.b16 %v8718_v24, %v8717_v50  ;;  %v8941_v24 = vld [vmem:[#allocation2 + $0xcc] sm:$0xe]  ;;  %v8940_v60 = vld [vmem:[#allocation2 + $0xc0] sm:$0xe]  ;;  %v14837_v50 = vld [vmem:[#allocation2 + $0xd4] sm:$0x1] }
 0x46e   : > { %v7724_v14 = vunpack.c.l.b16 %v7665_v56  ;;  %v8622_v20 = vrot.slane %v8621_v61, 4  ;;  %v14840_v29 = vld [vmem:[#allocation2 + $0xc8] sm:$0x1]  ;;  %v11291_v30 = vrot.slane %v8941_v24, 9  ;;  %v9097_v56 = vrot.slane %v14832_v11, 5 }
 0x46f   : > { %v7424_v47 = vpop.f32.mrf.mxu1  ;;  %v11290_v17 = vrot.slane %v8940_v60, 9  ;;  %v7301_v10 = vunpack.c.l.b16 %v7243_v35  ;;  %v6804_v61 = vadd.f32 %v15412_v9, %v15411_v63  ;;  %v8642_v63 = vshrl.u32 %v14826_v54, 16 }
 0x470   : > { %v14828_v57 = vadd.f32 %v7424_v47, %v6803_v5  ;;  %v9090_v47 = vrot.slane %v14826_v54, 5  ;;  %v7742_v51 = vpack.c.b16 %v7724_v14, %v7723_v37  ;;  %v8617_v5 = vsel %vm11839_vm2, %v8612_v59, %v14814_v25 }
 0x471   : > { %8191 = vmatmul.bf16.gmra.mxu3 %v11603_v46  ;;  %v7302_v46 = vunpack.c.l.b16 %v7253_v43  ;;  %v8627_v33 = vsel %vm11839_vm2, %v8622_v20, %v8626_v7  ;;  %v9093_v14 = vrot.slane %v14840_v29, 5  ;;  %v8638_v37 = vshll.u32 %v14826_v54, 16  ;;  %v14857_v7 = vpop.f32.mrf.mxu0  ;;  %v11604_v54 = vld [vmem:[#allocation2 + $0xb4] sm:$0xff] }
 0x472   : > { %15410 = vst [vmem:[#allocation5_spill] sm:$0xff] %v14828_v57  ;;  %8873 = vmatmul.bf16.gmra.mxu0 %v8737_v45  ;;  %v9100_v45 = vrot.slane %v14837_v50, 5  ;;  %v9091_v43 = vsel %vm12141_vm5, %v11290_v17, %v9090_v47  ;;  %v9092_v24 = vrot.slane %v9090_v47, 4  ;;  %v9098_v25 = vsel %vm12141_vm5, %v11291_v30, %v9097_v56 }
 0x473   : > { %v7318_v35 = vpack.c.b16 %v7302_v46, %v7301_v10  ;;  %v9099_v59 = vrot.slane %v9097_v56, 4  ;;  %v8629_v57 = vshrl.u32 %v8286_v44, 16  ;;  %v8632_v17 = vshll.u32 %v8286_v44, 16 }
 0x474   : > { %v9094_v47 = vsel %vm12141_vm5, %v9092_v24, %v9093_v14  ;;  %v9147_v9 = vunpack.c.l.b16 %v9091_v43  ;;  %v8720_v30 = vunpack.c.l.b16 %v8627_v33  ;;  %v7668_v56 = vrot.slane %v14727_v3, 5  ;;  %v11723_v24 = vld [vmem:[#allocation2 + $0x20] sm:$0x1]  ;;  %v7518_v14 = vld [vmem:[#allocation2 + $0xb4] sm:$0xe] }
 0x475   : > { %v9148_v46 = vunpack.c.l.b16 %v9094_v47  ;;  %v9101_v10 = vsel %vm12141_vm5, %v9099_v59, %v9100_v45  ;;  %v9149_v23 = vunpack.c.l.b16 %v9098_v25  ;;  %v8719_v22 = vunpack.c.l.b16 %v8617_v5  ;;  %v15415_v3 = vld [vmem:[#allocation12_spill] sm:$0xff]  ;;  %v15416_v25 = vld [vmem:[#allocation13_spill] sm:$0xff] }
 0x476   : > { %v7671_v44 = vrot.slane %v14744_v8, 5  ;;  %v8631_v45 = vrot.slane %v8629_v57, 4  ;;  %v8640_v33 = vrot.slane %v8638_v37, 5  ;;  %v8644_v59 = vrot.slane %v8642_v63, 4 }
 0x477   : > { %v7427_v60 = vpop.f32.mrf.mxu1  ;;  %v14867_v16 = vpack.c.b16 %v9148_v46, %v9147_v9  ;;  %v6805_v47 = vadd.f32 %v15416_v25, %v15415_v3  ;;  %v7670_v9 = vrot.slane %v7668_v56, 4  ;;  %v11066_v8 = vrot.slane %v7518_v14, 9 }
 0x478   : > { %v14859_v20 = vadd.f32 %v7427_v60, %v6804_v61  ;;  %v9150_v61 = vunpack.c.l.b16 %v9101_v10  ;;  %v11722_v60 = vld [vmem:[#allocation2 + $0x1c] sm:$0xf]  ;;  %v8738_v10 = vpack.c.b16 %v8720_v30, %v8719_v22  ;;  %v8645_v22 = vor.u32 %v8644_v59, %v8640_v33 }
 0x479   : > { %15414 = vst [vmem:[#allocation10_spill] sm:$0xff] %v14867_v16  ;;  %v7669_v30 = vsel %vm12141_vm5, %v11066_v8, %v7668_v56  ;;  %v8662_v8 = vshll.u32 %v14832_v11, 16 }
 0x47a   : > { %15413 = vst [vmem:[#allocation9_spill] sm:$0xff] %v14859_v20  ;;  %7466 = vmatmul.bf16.gmra.mxu1 %v7318_v35  ;;  %v8992_v20 = vrot.slane %v11722_v60, 5  ;;  %v14870_v43 = vpack.c.b16 %v9150_v61, %v9149_v23  ;;  %v8634_v35 = vrot.slane %v8632_v17, 5  ;;  %v8926_v60 = vld [vmem:[#allocation2 + $0x18] sm:$0xe]  ;;  %v7672_v23 = vsel %vm12141_vm5, %v7670_v9, %v7671_v44  ;;  %v14881_v17 = vpop.f32.mrf.mxu0 }
 0x47b   : > { %7882 = vmatmul.bf16.gmra.mxu2 %v7742_v51  ;;  %v8995_v51 = vrot.slane %v11723_v24, 5  ;;  %v8648_v24 = vshll.u32 %v14840_v29, 16  ;;  %v11276_v57 = vrot.slane %v8926_v60, 9  ;;  %v7726_v61 = vunpack.c.l.b16 %v7672_v23  ;;  %v15418_v60 = vld [vmem:[#allocation15_spill] sm:$0xff] }
 0x47c   : > { %v8994_v5 = vrot.slane %v8992_v20, 4  ;;  %v8635_v63 = vor.u32 %v8634_v35, %v8631_v45  ;;  %v7725_v3 = vunpack.c.l.b16 %v7669_v30  ;;  %v8646_v44 = vrot.slane %v8645_v22, 4 }
 0x47d   : > { %v8993_v29 = vsel %vm12141_vm5, %v11276_v57, %v8992_v20  ;;  %v8666_v23 = vshrl.u32 %v14832_v11, 16  ;;  %v15419_v11 = vld [vmem:[#allocation16_spill] sm:$0xff] }
 0x47e   : > { %v8996_v37 = vsel %vm12141_vm5, %v8994_v5, %v8995_v51  ;;  %v8636_v25 = vrot.slane %v8635_v63, 4  ;;  %v9119_v45 = vunpack.c.l.b16 %v8993_v29  ;;  %v7743_v59 = vpack.c.b16 %v7726_v61, %v7725_v3  ;;  %v11724_v63 = vld [vmem:[#allocation2 + $0x28] sm:$0xf]  ;;  %v11725_v61 = vld [vmem:[#allocation2 + $0x2c] sm:$0x1] }
 0x47f   : > { %v7429_v46 = vpop.f32.mrf.mxu1  ;;  %v9120_v14 = vunpack.c.l.b16 %v8996_v37  ;;  %v7675_v37 = vrot.slane %v14771_v4, 5  ;;  %v8999_v22 = vrot.slane %v11724_v63, 5  ;;  %v7678_v3 = vrot.slane %v14791_v0, 5  ;;  %v8927_v4 = vld [vmem:[#allocation2 + $0x24] sm:$0xe] }
 0x480   : > { %v14875_v16 = vadd.f32 %v7429_v46, %v6805_v47  ;;  %v8289_v47 = vld [vmem:[#allocation2 + $0xcc] sm:$0xf]  ;;  %v8641_v5 = vsel %vm11839_vm2, %v8636_v25, %v8640_v33  ;;  %v11605_v33 = vld [vmem:[#allocation2 + $0xc0] sm:$0xff] }
 0x481   : > { %8196 = vmatmul.bf16.gmra.mxu3 %v11604_v54  ;;  %v8650_v54 = vrot.slane %v8648_v24, 5  ;;  %v9151_v46 = vpack.c.b16 %v9120_v14, %v9119_v45  ;;  %v8653_v20 = vshrl.u32 %v8289_v47, 16  ;;  %v8656_v24 = vshll.u32 %v8289_v47, 16  ;;  %v7519_v14 = vld [vmem:[#allocation2 + $0xc0] sm:$0xe] }
 0x482   : > { %8878 = vmatmul.bf16.gmra.mxu0 %v8738_v10  ;;  %v15417_v10 = vld [vmem:[#allocation14_spill] sm:$0xff]  ;;  %v14898_v30 = vpop.f32.mrf.mxu0  ;;  %v8721_v29 = vunpack.c.l.b16 %v8641_v5  ;;  %v8664_v47 = vrot.slane %v8662_v8, 5  ;;  %v11067_v0 = vrot.slane %v7519_v14, 9 }
 0x483   : > { %v6806_v51 = vadd.f32 %v15418_v60, %v15417_v10  ;;  %v8651_v9 = vsel %vm11839_vm2, %v8646_v44, %v8650_v54  ;;  %v9002_v54 = vrot.slane %v11725_v61, 5  ;;  %v8655_v25 = vrot.slane %v8653_v20, 4  ;;  %v15420_v60 = vld [vmem:[#allocation18_spill] sm:$0xff] }
 0x484   : > { %v8722_v57 = vunpack.c.l.b16 %v8651_v9  ;;  %v8658_v44 = vrot.slane %v8656_v24, 5  ;;  %v8668_v10 = vrot.slane %v8666_v23, 4  ;;  %v9001_v9 = vrot.slane %v8999_v22, 4 }
 0x485   : > { %v11277_v24 = vrot.slane %v8927_v4, 9  ;;  %v7676_v63 = vsel %vm12141_vm5, %v11067_v0, %v7675_v37 }
 0x486   : > { %v8739_v45 = vpack.c.b16 %v8722_v57, %v8721_v29  ;;  %v9003_v8 = vsel %vm12141_vm5, %v9001_v9, %v9002_v54  ;;  %v8659_v23 = vor.u32 %v8658_v44, %v8655_v25  ;;  %v8669_v57 = vor.u32 %v8668_v10, %v8664_v47  ;;  %v11726_v9 = vld [vmem:[#allocation2 + $0x34] sm:$0xf] }
 0x487   : > { %v7432_v35 = vpop.f32.mrf.mxu1  ;;  %v9000_v29 = vsel %vm12141_vm5, %v11277_v24, %v8999_v22  ;;  %v11727_v24 = vld [vmem:[#allocation2 + $0x38] sm:$0x1] }
 0x488   : > { %v14891_v56 = vadd.f32 %v7432_v35, %v6806_v51  ;;  %v6807_v51 = vadd.f32 %v15420_v60, %v15419_v11  ;;  %v7677_v35 = vrot.slane %v7675_v37, 4  ;;  %v7727_v11 = vunpack.c.l.b16 %v7676_v63 }
 0x489   : > { %v8660_v14 = vrot.slane %v8659_v23, 4  ;;  %v8670_v60 = vrot.slane %v8669_v57, 4  ;;  %v9121_v54 = vunpack.c.l.b16 %v9000_v29  ;;  %v15423_v23 = vld [vmem:[#allocation19_spill] sm:$0xff]  ;;  %v15424_v57 = vld [vmem:[#allocation21_spill] sm:$0xff] }
 0x48a   : > { %9239 = vmatmul.bf16.vlgmr.msra.gmra.mxu1 %v9151_v46  ;;  %v8672_v46 = vshll.u32 %v14837_v50, 16  ;;  %v7679_v20 = vsel %vm12141_vm5, %v7677_v35, %v7678_v3  ;;  %v15421_v3 = vld [vmem:[#allocation17_spill] sm:$0xff]  ;;  %v6809_v63 = vadd.f32 %v15424_v57, %v15423_v23  ;;  %v8929_v23 = vld [vmem:[#allocation2 + $0x3c] sm:$0xe] }
 0x48b   : > { %7887 = vmatmul.bf16.gmra.mxu2 %v7743_v59  ;;  %v7728_v50 = vunpack.c.l.b16 %v7679_v20  ;;  %v8665_v35 = vsel %vm11839_vm2, %v8660_v14, %v8664_v47  ;;  %v11606_v20 = vld [vmem:[#allocation2 + $0xcc] sm:$0xff] }
 0x48c   : > { %v8674_v61 = vrot.slane %v8672_v46, 5  ;;  %v9006_v46 = vrot.slane %v11726_v9, 5  ;;  %v8723_v0 = vunpack.c.l.b16 %v8665_v35  ;;  %v11728_v35 = vld [vmem:[#allocation2 + $0x40] sm:$0xf]  ;;  %v11729_v9 = vld [vmem:[#allocation2 + $0x44] sm:$0x1] }
 0x48d   : > { %v7744_v44 = vpack.c.b16 %v7728_v50, %v7727_v11  ;;  %v8928_v50 = vld [vmem:[#allocation2 + $0x30] sm:$0xe] }
 0x48e   : > { %v8675_v37 = vsel %vm11839_vm2, %v8670_v60, %v8674_v61  ;;  %v11278_v47 = vrot.slane %v8928_v50, 9 }
 0x48f   : > { %v7434_v59 = vpop.f32.mrf.mxu1 }
 0x490   : > { %v14904_v5 = vadd.f32 %v7434_v59, %v6807_v51  ;;  %v14914_v51 = vpop.f32.mrf.mxu0  ;;  %v8724_v59 = vunpack.c.l.b16 %v8675_v37  ;;  %v9007_v60 = vsel %vm12141_vm5, %v11278_v47, %v9006_v46  ;;  %v15429_v47 = vld [vmem:[#allocation24_spill] sm:$0xff] }
 0x491   : > { %8201 = vmatmul.bf16.gmra.mxu3 %v11605_v33  ;;  %v9122_v33 = vunpack.c.l.b16 %v9003_v8  ;;  %v9009_v8 = vrot.slane %v11727_v24, 5  ;;  %v15428_v24 = vld [vmem:[#allocation26_spill] sm:$0xff] }
 0x492   : > { %8883 = vmatmul.bf16.gmra.mxu0 %v8739_v45  ;;  %v15422_v45 = vld [vmem:[#allocation20_spill] sm:$0xff]  ;;  %v8740_v29 = vpack.c.b16 %v8724_v59, %v8723_v0  ;;  %v9013_v59 = vrot.slane %v11728_v35, 5  ;;  %v9016_v0 = vrot.slane %v11729_v9, 5  ;;  %v15431_v9 = vld [vmem:[#allocation25_spill] sm:$0xff] }
 0x493   : > { %v6808_v4 = vadd.f32 %v15422_v45, %v15421_v3  ;;  %v9152_v22 = vpack.c.b16 %v9122_v33, %v9121_v54  ;;  %v9008_v33 = vrot.slane %v9006_v46, 4  ;;  %v15425_v45 = vld [vmem:[#allocation3_spill] sm:$0xff] }
 0x494   : > { %v9015_v46 = vrot.slane %v9013_v59, 4 }
 0x495   : > { %v9010_v14 = vsel %vm12141_vm5, %v9008_v33, %v9009_v8 }
 0x496   : > { %v9124_v3 = vunpack.c.l.b16 %v9010_v14  ;;  %v9017_v50 = vsel %vm12141_vm5, %v9015_v46, %v9016_v0  ;;  %v15430_v14 = vld [vmem:[#allocation28_spill] sm:$0xff]  ;;  %v6813_v0 = vadd.f32 %v14486_v21, %v15431_v9 }
 0x497   : > { %v7437_v25 = vpop.f32.mrf.mxu1  ;;  %v9126_v33 = vunpack.c.l.b16 %v9017_v50  ;;  %v15432_v50 = vld [vmem:[#allocation27_spill] sm:$0xff] }
 0x498   : > { %v14920_v10 = vadd.f32 %v7437_v25, %v6808_v4  ;;  %v14926_v11 = vpop.f32.mrf.mxu0  ;;  %v15426_v4 = vld [vmem:[#allocation23_spill] sm:$0xff]  ;;  %v9123_v25 = vunpack.c.l.b16 %v9007_v60  ;;  %v6812_v60 = vadd.f32 %v15430_v14, %v15429_v47 }
 0x499   : > { %v6810_v54 = vadd.f32 %v15426_v4, %v15425_v45 }
 0x49a   : > { %9244 = vmatmul.bf16.gmra.mxu1 %v9152_v22  ;;  %v9153_v22 = vpack.c.b16 %v9124_v3, %v9123_v25  ;;  %v11730_v25 = vld [vmem:[#allocation2 + $0x4c] sm:$0xf] }
 0x49b   : > { %7892 = vmatmul.bf16.gmra.mxu2 %v7744_v44 }
 0x49f   : > { %v7439_v61 = vpop.f32.mrf.mxu1 }
 0x4a0   : > { %v14928_v40 = vadd.f32 %v7439_v61, %v6809_v63 }
 0x4a1   : > { %8206 = vmatmul.bf16.gmra.mxu3 %v11606_v20  ;;  %v15427_v20 = vld [vmem:[#allocation22_spill] sm:$0xff] }
 0x4a2   : > { %8888 = vmatmul.bf16.gmra.mxu0 %v8740_v29  ;;  %v6811_v8 = vadd.f32 %v15428_v24, %v15427_v20  ;;  %v11279_v29 = vrot.slane %v8929_v23, 9  ;;  %v8930_v20 = vld [vmem:[#allocation2 + $0x48] sm:$0xe] }
 0x4a3   : > { %v11280_v23 = vrot.slane %v8930_v20, 9 }
 0x4a4   : > { %v9014_v61 = vsel %vm12141_vm5, %v11279_v29, %v9013_v59 }
 0x4a5   : > { %v9125_v3 = vunpack.c.l.b16 %v9014_v61  ;;  %v6814_v61 = vadd.f32 %v14515_v15, %v15432_v50 }
 0x4a7   : > { %v7442_v44 = vpop.f32.mrf.mxu1 }
 0x4a8   : > { %v14936_v37 = vadd.f32 %v7442_v44, %v6810_v54  ;;  %v9154_v54 = vpack.c.b16 %v9126_v33, %v9125_v3  ;;  %v9020_v44 = vrot.slane %v11730_v25, 5  ;;  %v15433_v25 = vld [vmem:[#allocation29_spill] sm:$0xff] }
 0x4aa   : > { %9249 = vmatmul.bf16.gmra.mxu1 %v9153_v22  ;;  %v11731_v22 = vld [vmem:[#allocation2 + $0x50] sm:$0x1]  ;;  %v9022_v59 = vrot.slane %v9020_v44, 4  ;;  %v9021_v46 = vsel %vm12141_vm5, %v11280_v23, %v9020_v44 }
 0x4ab   : > { %v9023_v35 = vrot.slane %v11731_v22, 5  ;;  %v9127_v33 = vunpack.c.l.b16 %v9021_v46  ;;  %v6815_v22 = vadd.f32 %v14546_v12, %v15433_v25  ;;  %v15434_v23 = vld [vmem:[#allocation30_spill] sm:$0xff] }
 0x4af   : > { %v7444_v57 = vpop.f32.mrf.mxu1 }
 0x4b0   : > { %v14940_v63 = vadd.f32 %v7444_v57, %v6811_v8  ;;  %v9024_v57 = vsel %vm12141_vm5, %v9022_v59, %v9023_v35  ;;  %v8931_v35 = vld [vmem:[#allocation2 + $0x54] sm:$0xe] }
 0x4b1   : > { %v9128_v29 = vunpack.c.l.b16 %v9024_v57  ;;  %v11281_v20 = vrot.slane %v8931_v35, 9  ;;  %v6816_v57 = vadd.f32 %v14573_v36, %v15434_v23  ;;  %v11736_v23 = vld [vmem:[#allocation2 + $0x70] sm:$0xf] }
 0x4b3   : > { %v9155_v21 = vpack.c.b16 %v9128_v29, %v9127_v33 }
 0x4b7   : > { %v7447_v45 = vpop.f32.mrf.mxu1 }
 0x4b8   : > { %v14948_v4 = vadd.f32 %v7447_v45, %v6812_v60  ;;  %v11732_v60 = vld [vmem:[#allocation2 + $0x58] sm:$0xf]  ;;  %v11733_v45 = vld [vmem:[#allocation2 + $0x5c] sm:$0x1] }
 0x4b9   : > { %v9027_v3 = vrot.slane %v11732_v60, 5  ;;  %v15435_v60 = vld [vmem:[#allocation31_spill] sm:$0xff] }
 0x4ba   : > { %9254 = vmatmul.bf16.gmra.mxu1 %v9154_v54  ;;  %v9030_v54 = vrot.slane %v11733_v45, 5  ;;  %v6817_v45 = vadd.f32 %v14603_v48, %v15435_v60 }
 0x4bb   : > { %v9029_v44 = vrot.slane %v9027_v3, 4 }
 0x4bd   : > { %v9031_v15 = vsel %vm12141_vm5, %v9029_v44, %v9030_v54  ;;  %v8932_v54 = vld [vmem:[#allocation2 + $0x60] sm:$0xe] }
 0x4be   : > { %v9130_v59 = vunpack.c.l.b16 %v9031_v15  ;;  %v11282_v35 = vrot.slane %v8932_v54, 9  ;;  %v6820_v54 = vadd.f32 %v14692_v42, %v14590_v52 }
 0x4bf   : > { %v7449_v24 = vpop.f32.mrf.mxu1 }
 0x4c0   : > { %v14952_v8 = vadd.f32 %v7449_v24, %v6813_v0  ;;  %v9028_v24 = vsel %vm12141_vm5, %v11281_v20, %v9027_v3  ;;  %v6818_v20 = vadd.f32 %v14634_v55, %v14539_v41 }
 0x4c1   : > { %v9129_v46 = vunpack.c.l.b16 %v9028_v24 }
 0x4c3   : > { %v9156_v12 = vpack.c.b16 %v9130_v59, %v9129_v46  ;;  %v11737_v46 = vld [vmem:[#allocation2 + $0x74] sm:$0x1] }
 0x4c7   : > { %v7452_v47 = vpop.f32.mrf.mxu1 }
 0x4c8   : > { %v14960_v14 = vadd.f32 %v7452_v47, %v6814_v61  ;;  %v11734_v61 = vld [vmem:[#allocation2 + $0x64] sm:$0xf]  ;;  %v11735_v47 = vld [vmem:[#allocation2 + $0x68] sm:$0x1] }
 0x4c9   : > { %v9034_v33 = vrot.slane %v11734_v61, 5  ;;  %v8933_v61 = vld [vmem:[#allocation2 + $0x6c] sm:$0xe] }
 0x4ca   : > { %9259 = vmatmul.bf16.gmra.mxu1 %v9155_v21  ;;  %v9037_v21 = vrot.slane %v11735_v47, 5  ;;  %v11283_v41 = vrot.slane %v8933_v61, 9 }
 0x4cb   : > { %v9036_v3 = vrot.slane %v9034_v33, 4 }
 0x4cd   : > { %v9038_v36 = vsel %vm12141_vm5, %v9036_v3, %v9037_v21 }
 0x4ce   : > { %v9132_v44 = vunpack.c.l.b16 %v9038_v36 }
 0x4cf   : > { %v7454_v9 = vpop.f32.mrf.mxu1 }
 0x4d0   : > { %v14964_v0 = vadd.f32 %v7454_v9, %v6815_v22  ;;  %v9035_v9 = vsel %vm12141_vm5, %v11282_v35, %v9034_v33  ;;  %v11738_v35 = vld [vmem:[#allocation2 + $0x7c] sm:$0xf] }
 0x4d1   : > { %v9131_v15 = vunpack.c.l.b16 %v9035_v9  ;;  %v9048_v36 = vrot.slane %v11738_v35, 5  ;;  %v11739_v9 = vld [vmem:[#allocation2 + $0x80] sm:$0x1] }
 0x4d3   : > { %v9157_v48 = vpack.c.b16 %v9132_v44, %v9131_v15  ;;  %v9051_v44 = vrot.slane %v11739_v9, 5  ;;  %v11340_v15 = vld [vmem:[%s11815_s8 + $0xc] sm:$0xff]  }
 0x4d4   : > { %v9400_v52 = vunpack.c.l.bf16 %v11340_v15  ;;  %v9401_v42 = vunpack.c.h.bf16 %v11340_v15 }
 0x4d7   : > { %v7457_v29 = vpop.f32.mrf.mxu1 }
 0x4d8   : > { %v14972_v50 = vadd.f32 %v7457_v29, %v6816_v57  ;;  %v9041_v57 = vrot.slane %v11736_v23, 5  ;;  %v9044_v29 = vrot.slane %v11737_v46, 5  ;;  %v9050_v23 = vrot.slane %v9048_v36, 4 }
 0x4da   : > { %9264 = vmatmul.bf16.gmra.mxu1 %v9156_v12  ;;  %v6819_v12 = vadd.f32 %v14665_v53, %v14565_v19  ;;  %v9043_v33 = vrot.slane %v9041_v57, 4  ;;  %v9042_v60 = vsel %vm12141_vm5, %v11283_v41, %v9041_v57 }
 0x4dc   : > { %v9045_v55 = vsel %vm12141_vm5, %v9043_v33, %v9044_v29  ;;  %v9052_v29 = vsel %vm12141_vm5, %v9050_v23, %v9051_v44  ;;  %v15012_v33 = vld [vmem:[%s15306_s4] ss:$0 sm:$0xff]  ;;  %v8935_v44 = vld [vmem:[#allocation2 + $0x84] sm:$0xe]  ;;  %v11663_v23 = vld [vmem:[%s11815_s8 + $0x18] sm:$0xff]  }
 0x4dd   : > { %v9136_v61 = vunpack.c.l.b16 %v9052_v29  ;;  %v11285_v29 = vrot.slane %v8935_v44, 9 }
 0x4df   : > { %v7459_v25 = vpop.f32.mrf.mxu1 }
 0x4e0   : > { %v14976_v22 = vadd.f32 %v7459_v25, %v6817_v45  ;;  %v9134_v45 = vunpack.c.l.b16 %v9045_v55  ;;  %v9133_v25 = vunpack.c.l.b16 %v9042_v60  ;;  %v11342_v55 = vld [vmem:[%s11815_s8 + $0x14] sm:$0x1] }
 0x4e2   : > { %v9158_v53 = vpack.c.b16 %v9134_v45, %v9133_v25 }
 0x4e7   : > { %v7462_v24 = vpop.f32.mrf.mxu1 }
 0x4e8   : > { %v14984_v59 = vadd.f32 %v7462_v24, %v6818_v20  ;;  %v6821_v20 = vadd.f32 %v14723_v38, %v14614_v32  ;;  %v8934_v24 = vld [vmem:[#allocation2 + $0x78] sm:$0xe]  ;;  %v9498_v32 = vrot.slane %v9401_v42, 1  ;;  %v8894_v38 = vadd.f32 %v14755_v13, %v14639_v31  ;;  %v11740_v31 = vld [vmem:[#allocation2 + $0x88] sm:$0xf] }
 0x4e9   : > { %v11284_v46 = vrot.slane %v8934_v24, 9  ;;  %v9055_v13 = vrot.slane %v11740_v31, 5  ;;  %v11345_v31 = vld [vmem:[%s11815_s8 + $0x20] sm:$0x1] }
 0x4ea   : > { %9269 = vmatmul.bf16.gmra.mxu1 %v9157_v48 }
 0x4eb   : > { %v9057_v42 = vrot.slane %v9055_v13, 4 }
 0x4ef   : > { %v7464_v47 = vpop.f32.mrf.mxu1 }
 0x4f0   : > { %v14988_v21 = vadd.f32 %v7464_v47, %v6819_v12  ;;  %v9049_v12 = vsel %vm12141_vm5, %v11284_v46, %v9048_v36  ;;  %v9497_v47 = vrot.slane %v9400_v52, 1  ;;  %v15018_v36 = vpop.f32.mrf.mxu2 }
 0x4f1   : > { %v9135_v41 = vunpack.c.l.b16 %v9049_v12 }
 0x4f2   : > { %v9499_v25 = vsel %vm9496_vm15, %v9497_v47, %v9498_v32  ;;  %v11634_v47 = vunpack.c.h.bf16 %v11663_v23 }
 0x4f7   : > { %v7467_v3 = vpop.f32.mrf.mxu1 }
 0x4f8   : > { %v14996_v19 = vadd.f32 %v7467_v3, %v6820_v54  ;;  %v9159_v54 = vpack.c.b16 %v9136_v61, %v9135_v41  ;;  %v9402_v3 = vunpack.c.l.bf16 %v11342_v55  ;;  %v11633_v61 = vunpack.c.l.bf16 %v11663_v23  ;;  %v15033_v55 = vpop.f32.mrf.mxu3 }
 0x4fa   : > { %9274 = vmatmul.bf16.gmra.mxu1 %v9158_v53  ;;  %v9500_v9 = vrot.slane %v9402_v3, 1  ;;  %v8896_v3 = vadd.f32 %v14819_v58, %v14685_v28 }
 0x4fc   : > { %v9501_v12 = vsel %vm9496_vm15, %v9498_v32, %v9500_v9 }
 0x4ff   : > { %v7469_v48 = vpop.f32.mrf.mxu1 }
 0x500   : > { %v15001_v57 = vadd.f32 %v7469_v48, %v6821_v20  ;;  %v11741_v20 = vld [vmem:[#allocation2 + $0x8c] sm:$0x1]  ;;  %v8895_v48 = vadd.f32 %v14786_v18, %v14662_v49  ;;  %v9056_v49 = vsel %vm12141_vm5, %v11285_v29, %v9055_v13  ;;  %v15047_v28 = vpop.f32.mrf.mxu3 }
 0x501   : > { %v9058_v15 = vrot.slane %v11741_v20, 5 }
 0x507   : > { %v9240_v60 = vpop.f32.mrf.mxu1 }
 0x508   : > { %v9320_v45 = vadd.f32 %v9240_v60, %v8894_v38  ;;  %v9059_v38 = vsel %vm12141_vm5, %v9057_v42, %v9058_v15  ;;  %v9405_v15 = vunpack.c.l.bf16 %v11345_v31  ;;  %v8936_v42 = vld [vmem:[#allocation2 + $0x90] sm:$0xe] }
 0x509   : > { %v9138_v60 = vunpack.c.l.b16 %v9059_v38 }
 0x50a   : > { %v9613_v53 = vadd.f32 %v15012_v33, %v9320_v45  ;;  %9279 = vmatmul.bf16.gmra.mxu1 %v9159_v54  ;;  %v9502_v45 = vrot.slane %v11633_v61, 1  ;;  %v9503_v54 = vrot.slane %v11634_v47, 1  ;;  %v9505_v58 = vrot.slane %v9405_v15, 1  ;;  %v11346_v47 = vld [vmem:[%s11815_s8 + $0x24] sm:$0xff]  }
 0x50b   : > { %v8897_v61 = vadd.f32 %v14857_v7, %v14712_v1 }
 0x50c   : > { %v9645_v35 = vadd.f32 %v9613_v53, %v9499_v25  ;;  %v15037_v25 = vpop.f32.mrf.mxu0  ;;  %v9137_v53 = vunpack.c.l.b16 %v9056_v49  ;;  %v9504_v13 = vsel %vm9496_vm15, %v9502_v45, %v9503_v54 }
 0x50e   : > { %v9677_v24 = vmax.f32 %v9645_v35, 0.0  ;;  %v15042_v35 = vpop.f32.mrf.mxu2  ;;  %v9160_v20 = vpack.c.b16 %v9138_v60, %v9137_v53  ;;  %v11286_v60 = vrot.slane %v8936_v42, 9  ;;  %v9407_v53 = vunpack.c.h.bf16 %v11346_v47 }
 0x50f   : > { %v9242_v52 = vpop.f32.mrf.mxu1 }
 0x510   : > { %9709 = vst [vmem:[%s15023_s12] sm:$0xff] %v9677_v24  ;;  %v9321_v46 = vadd.f32 %v9242_v52, %v8895_v48  ;;  %v11742_v48 = vld [vmem:[#allocation2 + $0x94] sm:$0xf] }
 0x511   : > { %v9062_v23 = vrot.slane %v11742_v48, 5  ;;  %v11348_v48 = vld [vmem:[%s11815_s8 + $0x2c] sm:$0x1] }
 0x512   : > { %v9614_v41 = vadd.f32 %v15012_v33, %v9321_v46  ;;  %v11743_v46 = vld [vmem:[#allocation2 + $0x98] sm:$0x1] }
 0x513   : > { %v9065_v29 = vrot.slane %v11743_v46, 5  ;;  %v9063_v7 = vsel %vm12141_vm5, %v11286_v60, %v9062_v23  ;;  %v11745_v60 = vld [vmem:[#allocation2 + $0xa4] sm:$0x1] }
 0x514   : > { %v9646_v18 = vadd.f32 %v9614_v41, %v9501_v12  ;;  %v9064_v41 = vrot.slane %v9062_v23, 4  ;;  %v15052_v49 = vpop.f32.mrf.mxu0  ;;  %v9408_v23 = vunpack.c.l.bf16 %v11348_v48 }
 0x516   : > { %v9678_v32 = vmax.f32 %v9646_v18, 0.0  ;;  %v15055_v45 = vpop.f32.mrf.mxu2  ;;  %v9066_v31 = vsel %vm12141_vm5, %v9064_v41, %v9065_v29  ;;  %v9510_v41 = vrot.slane %v9408_v23, 1 }
 0x517   : > { %v9245_v9 = vpop.f32.mrf.mxu1 }
 0x518   : > { %9710 = vst [vmem:[%s15023_s12 + $0x8] sm:$0xff] %v9678_v32  ;;  %v9322_v44 = vadd.f32 %v9245_v9, %v8896_v3  ;;  %v9506_v32 = vsel %vm9496_vm15, %v9503_v54, %v9505_v58  ;;  %v9406_v3 = vunpack.c.l.bf16 %v11346_v47  ;;  %v9139_v54 = vunpack.c.l.b16 %v9063_v7 }
 0x51a   : > { %v9615_v24 = vadd.f32 %v15012_v33, %v9322_v44  ;;  %9284 = vmatmul.bf16.gmra.mxu1 %v9160_v20  ;;  %v9140_v44 = vunpack.c.l.b16 %v9066_v31  ;;  %v9507_v20 = vrot.slane %v9406_v3, 1  ;;  %v11664_v31 = vld [vmem:[%s11815_s8 + $0x30] sm:$0xff]  }
 0x51c   : > { %v9647_v52 = vadd.f32 %v9615_v24, %v9504_v13  ;;  %v9508_v13 = vrot.slane %v9407_v53, 1  ;;  %v8898_v24 = vadd.f32 %v14881_v17, %v14734_v27  ;;  %v9161_v46 = vpack.c.b16 %v9140_v44, %v9139_v54  ;;  %v11744_v27 = vld [vmem:[#allocation2 + $0xa0] sm:$0xf] }
 0x51d   : > { %v9069_v17 = vrot.slane %v11744_v27, 5  ;;  %v8899_v53 = vadd.f32 %v14898_v30, %v14757_v26  ;;  %v11638_v54 = vunpack.c.h.bf16 %v11664_v31  ;;  %v8900_v27 = vadd.f32 %v14914_v51, %v14784_v62  ;;  %v8938_v51 = vld [vmem:[#allocation2 + $0xa8] sm:$0xe] }
 0x51e   : > { %v9679_v12 = vmax.f32 %v9647_v52, 0.0  ;;  %v15066_v52 = vpop.f32.mrf.mxu3  ;;  %v9509_v29 = vsel %vm9496_vm15, %v9507_v20, %v9508_v13  ;;  %v15073_v47 = vpop.f32.mrf.mxu2 }
 0x51f   : > { %v9247_v38 = vpop.f32.mrf.mxu1  ;;  %v9071_v7 = vrot.slane %v9069_v17, 4 }
 0x520   : > { %9711 = vst [vmem:[%s15023_s12 + $0x10] sm:$0xff] %v9679_v12  ;;  %v9323_v18 = vadd.f32 %v9247_v38, %v8897_v61  ;;  %v15070_v12 = vpop.f32.mrf.mxu0 }
 0x522   : > { %v9616_v1 = vadd.f32 %v15012_v33, %v9323_v18  ;;  %v8937_v18 = vld [vmem:[#allocation2 + $0x9c] sm:$0xe] }
 0x523   : > { %v11287_v44 = vrot.slane %v8937_v18, 9 }
 0x524   : > { %v9648_v9 = vadd.f32 %v9616_v1, %v9506_v32  ;;  %v9072_v32 = vrot.slane %v11745_v60, 5 }
 0x525   : > { %v9070_v26 = vsel %vm12141_vm5, %v11287_v44, %v9069_v17  ;;  %v9079_v44 = vrot.slane %v14762_v34, 5 }
 0x526   : > { %v9680_v15 = vmax.f32 %v9648_v9, 0.0  ;;  %v15079_v20 = vpop.f32.mrf.mxu3  ;;  %v9073_v48 = vsel %vm12141_vm5, %v9071_v7, %v9072_v32 }
 0x527   : > { %v9250_v58 = vpop.f32.mrf.mxu1 }
 0x528   : > { %9712 = vst [vmem:[%s15023_s12 + $0x18] sm:$0xff] %v9680_v15  ;;  %v9324_v42 = vadd.f32 %v9250_v58, %v8898_v24  ;;  %v9511_v15 = vsel %vm9496_vm15, %v9508_v13, %v9510_v41  ;;  %v11637_v24 = vunpack.c.l.bf16 %v11664_v31  ;;  %v15087_v30 = vpop.f32.mrf.mxu0  ;;  %v11351_v41 = vld [vmem:[%s11815_s8 + $0x38] sm:$0x1] }
 0x52a   : > { %v9617_v61 = vadd.f32 %v15012_v33, %v9324_v42  ;;  %9289 = vmatmul.bf16.gmra.mxu1 %v9161_v46  ;;  %v9142_v46 = vunpack.c.l.b16 %v9073_v48  ;;  %v9512_v23 = vrot.slane %v11637_v24, 1  ;;  %v8901_v48 = vadd.f32 %v14926_v11, %v14812_v2 }
 0x52c   : > { %v9649_v38 = vadd.f32 %v9617_v61, %v9509_v29  ;;  %v15089_v29 = vpop.f32.mrf.mxu2  ;;  %v9513_v61 = vrot.slane %v11638_v54, 1 }
 0x52e   : > { %v9681_v3 = vmax.f32 %v9649_v38, 0.0  ;;  %v9141_v38 = vunpack.c.l.b16 %v9070_v26  ;;  %v9514_v17 = vsel %vm9496_vm15, %v9512_v23, %v9513_v61  ;;  %v15097_v31 = vpop.f32.mrf.mxu3 }
 0x52f   : > { %v9252_v1 = vpop.f32.mrf.mxu1 }
 0x530   : > { %9713 = vst [vmem:[%s15023_s12 + $0x20] sm:$0xff] %v9681_v3  ;;  %v9325_v9 = vadd.f32 %v9252_v1, %v8899_v53  ;;  %v9162_v32 = vpack.c.b16 %v9142_v46, %v9141_v38  ;;  %v9411_v3 = vunpack.c.l.bf16 %v11351_v41  ;;  %v11746_v1 = vld [vmem:[#allocation2 + $0xac] sm:$0xf]  ;;  %v15102_v24 = vpop.f32.mrf.mxu0 }
 0x531   : > { %v9076_v7 = vrot.slane %v11746_v1, 5 }
 0x532   : > { %v9618_v58 = vadd.f32 %v15012_v33, %v9325_v9  ;;  %v9515_v62 = vrot.slane %v9411_v3, 1 }
 0x533   : > { %v9078_v46 = vrot.slane %v9076_v7, 4 }
 0x534   : > { %v9650_v42 = vadd.f32 %v9618_v58, %v9511_v15  ;;  %v7906_v15 = vadd.f32 %v15018_v36, %v14700_v6  ;;  %v11352_v58 = vld [vmem:[%s11815_s8 + $0x3c] sm:$0xff]   ;;  %v15107_v26 = vpop.f32.mrf.mxu2 }
 0x535   : > { %v9412_v34 = vunpack.c.l.bf16 %v11352_v58  ;;  %v9413_v38 = vunpack.c.h.bf16 %v11352_v58  ;;  %v9080_v6 = vsel %vm12141_vm5, %v9078_v46, %v9079_v44 }
 0x536   : > { %v9682_v13 = vmax.f32 %v9650_v42, 0.0  ;;  %v8220_v36 = vadd.f32 %v15033_v55, %v7906_v15 }
 0x537   : > { %v9255_v18 = vpop.f32.mrf.mxu1 }
 0x538   : > { %9714 = vst [vmem:[%s15023_s12 + $0x28] sm:$0xff] %v9682_v13  ;;  %v9326_v60 = vadd.f32 %v9255_v18, %v8900_v27  ;;  %v11288_v13 = vrot.slane %v8938_v51, 9  ;;  %v9516_v27 = vsel %vm9496_vm15, %v9513_v61, %v9515_v62  ;;  %v9144_v18 = vunpack.c.l.b16 %v9080_v6  ;;  %v11354_v62 = vld [vmem:[%s11815_s8 + $0x44] sm:$0x1]  ;;  %v15123_v51 = vpop.f32.mrf.mxu0 }
 0x539   : > { %v9518_v61 = vrot.slane %v9413_v38, 1  ;;  %v8902_v1 = vadd.f32 %v15037_v25, %v8220_v36  ;;  %v15437_v25 = vld [vmem:[#allocation6_spill] sm:$0xff]  ;;  %v15439_v38 = vld [vmem:[#allocation33_spill] sm:$0xff] }
 0x53a   : > { %v9619_v53 = vadd.f32 %v15012_v33, %v9326_v60  ;;  %9294 = vmatmul.bf16.gmra.mxu1 %v9162_v32  ;;  %v9077_v11 = vsel %vm12141_vm5, %v11288_v13, %v9076_v7  ;;  %v15117_v60 = vpop.f32.mrf.mxu3  ;;  %v9517_v32 = vrot.slane %v9412_v34, 1  ;;  %v8939_v13 = vld [vmem:[#allocation2 + $0xb4] sm:$0xe]  ;;  %v7908_v6 = vadd.f32 %v15055_v45, %v15439_v38 }
 0x53c   : > { %v9651_v9 = vadd.f32 %v9619_v53, %v9514_v17  ;;  %v15436_v17 = vld [vmem:[#allocation32_spill] sm:$0xff]  ;;  %v15126_v15 = vpop.f32.mrf.mxu2  ;;  %v8222_v45 = vadd.f32 %v15066_v52, %v7908_v6 }
 0x53d   : > { %v7907_v3 = vadd.f32 %v15042_v35, %v15436_v17  ;;  %v11289_v17 = vrot.slane %v8939_v13, 9 }
 0x53e   : > { %v9683_v54 = vmax.f32 %v9651_v9, 0.0  ;;  %v9143_v9 = vunpack.c.l.b16 %v9077_v11  ;;  %v11665_v11 = vld [vmem:[%s11815_s8 + $0x48] sm:$0xff]  }
 0x53f   : > { %v9257_v42 = vpop.f32.mrf.mxu1  ;;  %v8221_v35 = vadd.f32 %v15047_v28, %v7907_v3 }
 0x540   : > { %9715 = vst [vmem:[%s15023_s12 + $0x30] sm:$0xff] %v9683_v54  ;;  %v9327_v23 = vadd.f32 %v9257_v42, %v8901_v48  ;;  %v9163_v7 = vpack.c.b16 %v9144_v18, %v9143_v9  ;;  %v9519_v54 = vsel %vm9496_vm15, %v9517_v32, %v9518_v61  ;;  %v9414_v48 = vunpack.c.l.bf16 %v11354_v62 }
 0x541   : > { %v9083_v42 = vrot.slane %v15437_v25, 5 }
 0x542   : > { %v9620_v2 = vadd.f32 %v15012_v33, %v9327_v23  ;;  %v9520_v23 = vrot.slane %v9414_v48, 1 }
 0x543   : > { %v9085_v18 = vrot.slane %v9083_v42, 4 }
 0x544   : > { %v9652_v41 = vadd.f32 %v9620_v2, %v9516_v27  ;;  %v15438_v27 = vld [vmem:[#allocation4_spill] sm:$0xff]  ;;  %v8903_v2 = vadd.f32 %v15052_v49, %v8221_v35  ;;  %v9521_v3 = vsel %vm9496_vm15, %v9518_v61, %v9520_v23  ;;  %v15144_v49 = vpop.f32.mrf.mxu0  ;;  %v15440_v35 = vld [vmem:[#allocation7_spill] sm:$0xff]  ;;  %v11357_v23 = vld [vmem:[%s11815_s8 + $0x50] sm:$0x1] }
 0x545   : > { %v9086_v34 = vrot.slane %v15438_v27, 5  ;;  %v9417_v38 = vunpack.c.l.bf16 %v11357_v23 }
 0x546   : > { %v9684_v53 = vmax.f32 %v9652_v41, 0.0  ;;  %v15137_v41 = vpop.f32.mrf.mxu3 }
 0x547   : > { %v9260_v55 = vpop.f32.mrf.mxu1  ;;  %v9087_v9 = vsel %vm12141_vm5, %v9085_v18, %v9086_v34 }
 0x548   : > { %9716 = vst [vmem:[%s15023_s12 + $0x38] sm:$0xff] %v9684_v53  ;;  %v9328_v44 = vadd.f32 %v9260_v55, %v8902_v1  ;;  %v11641_v53 = vunpack.c.l.bf16 %v11665_v11  ;;  %v11642_v1 = vunpack.c.h.bf16 %v11665_v11  ;;  %v15147_v55 = vpop.f32.mrf.mxu2  ;;  %v9146_v61 = vunpack.c.l.b16 %v9087_v9 }
 0x549   : > { %v9525_v11 = vrot.slane %v9417_v38, 1 }
 0x54a   : > { %v9621_v58 = vadd.f32 %v15012_v33, %v9328_v44  ;;  %9299 = vmatmul.bf16.gmra.mxu1 %v9163_v7  ;;  %v9084_v44 = vsel %vm12141_vm5, %v11289_v17, %v9083_v42  ;;  %v9523_v48 = vrot.slane %v11642_v1, 1 }
 0x54b   : > { %v9145_v52 = vunpack.c.l.b16 %v9084_v44 }
 0x54c   : > { %v9653_v46 = vadd.f32 %v9621_v58, %v9519_v54  ;;  %v9522_v54 = vrot.slane %v11641_v53, 1  ;;  %v7909_v58 = vadd.f32 %v15073_v47, %v15440_v35  ;;  %v9526_v1 = vsel %vm9496_vm15, %v9523_v48, %v9525_v11 }
 0x54d   : > { %v9164_v34 = vpack.c.b16 %v9146_v61, %v9145_v52 }
 0x54e   : > { %v9685_v36 = vmax.f32 %v9653_v46, 0.0  ;;  %v8904_v46 = vadd.f32 %v15070_v12, %v8222_v45  ;;  %v15156_v39 = vpop.f32.mrf.mxu3  ;;  %v9524_v42 = vsel %vm9496_vm15, %v9522_v54, %v9523_v48  ;;  %v8223_v6 = vadd.f32 %v15079_v20, %v7909_v58 }
 0x54f   : > { %v9262_v28 = vpop.f32.mrf.mxu1 }
 0x550   : > { %9717 = vst [vmem:[%s15023_s12 + $0x40] sm:$0xff] %v9685_v36  ;;  %v9329_v32 = vadd.f32 %v9262_v28, %v8903_v2  ;;  %v15161_v36 = vpop.f32.mrf.mxu0  ;;  %v15163_v2 = vpop.f32.mrf.mxu2  ;;  %v15441_v28 = vld [vmem:[#allocation8_spill] sm:$0xff]  ;;  %v8905_v17 = vadd.f32 %v15087_v30, %v8223_v6  ;;  %v15442_v30 = vld [vmem:[#allocation5_spill] sm:$0xff] }
 0x551   : > { %v7910_v18 = vadd.f32 %v15089_v29, %v15441_v28  ;;  %v7911_v35 = vadd.f32 %v15107_v26, %v15442_v30  ;;  %v11363_v30 = vld [vmem:[%s11815_s8 + $0x68] sm:$0x1] }
 0x552   : > { %v9622_v62 = vadd.f32 %v15012_v33, %v9329_v32 }
 0x554   : > { %v9654_v7 = vadd.f32 %v9622_v62, %v9521_v3  ;;  %v11358_v3 = vld [vmem:[%s11815_s8 + $0x54] sm:$0xff]   ;;  %v8224_v62 = vadd.f32 %v15097_v31, %v7910_v18  ;;  %v11666_v18 = vld [vmem:[%s11815_s8 + $0x60] sm:$0xff]  }
 0x555   : > { %v9418_v9 = vunpack.c.l.bf16 %v11358_v3  ;;  %v9419_v45 = vunpack.c.h.bf16 %v11358_v3 }
 0x556   : > { %v9686_v25 = vmax.f32 %v9654_v7, 0.0  ;;  %v15173_v7 = vpop.f32.mrf.mxu3  ;;  %v8906_v48 = vadd.f32 %v15102_v24, %v8224_v62 }
 0x557   : > { %v9265_v13 = vpop.f32.mrf.mxu1  ;;  %v9527_v61 = vrot.slane %v9418_v9, 1  ;;  %v9528_v54 = vrot.slane %v9419_v45, 1 }
 0x558   : > { %9718 = vst [vmem:[%s15023_s12 + $0x48] sm:$0xff] %v9686_v25  ;;  %v9330_v27 = vadd.f32 %v9265_v13, %v8904_v46  ;;  %v15177_v58 = vpop.f32.mrf.mxu0  ;;  %v11360_v46 = vld [vmem:[%s11815_s8 + $0x5c] sm:$0x1]  ;;  %v15181_v52 = vpop.f32.mrf.mxu2 }
 0x559   : > { %v9529_v13 = vsel %vm9496_vm15, %v9527_v61, %v9528_v54 }
 0x55a   : > { %v9623_v47 = vadd.f32 %v15012_v33, %v9330_v27  ;;  %9304 = vmatmul.bf16.gmra.mxu1 %v9164_v34  ;;  %v9420_v27 = vunpack.c.l.bf16 %v11360_v46  ;;  %v8225_v34 = vadd.f32 %v15117_v60, %v7911_v35 }
 0x55c   : > { %v9655_v12 = vadd.f32 %v9623_v47, %v9524_v42  ;;  %v15443_v42 = vld [vmem:[#allocation10_spill] sm:$0xff]  ;;  %v9530_v24 = vrot.slane %v9420_v27, 1  ;;  %v15444_v47 = vld [vmem:[#allocation9_spill] sm:$0xff]  ;;  %v8907_v28 = vadd.f32 %v15123_v51, %v8225_v34 }
 0x55e   : > { %v9687_v32 = vmax.f32 %v9655_v12, 0.0  ;;  %v15188_v6 = vpop.f32.mrf.mxu3  ;;  %v7912_v12 = vadd.f32 %v15126_v15, %v15444_v47 }
 0x55f   : > { %v9267_v53 = vpop.f32.mrf.mxu1 }
 0x560   : > { %9719 = vst [vmem:[%s15023_s12 + $0x50] sm:$0xff] %v9687_v32  ;;  %v9331_v20 = vadd.f32 %v9267_v53, %v8905_v17  ;;  %v15194_v17 = vpop.f32.mrf.mxu0  ;;  %v7863_v3 = vpop.f32.mrf.mxu2  ;;  %v9531_v53 = vsel %vm9496_vm15, %v9528_v54, %v9530_v24  ;;  %v8226_v9 = vadd.f32 %v15137_v41, %v7912_v12 }
 0x562   : > { %v9624_v44 = vadd.f32 %v15012_v33, %v9331_v20  ;;  %v11645_v20 = vunpack.c.l.bf16 %v11666_v18  ;;  %v8908_v61 = vadd.f32 %v15144_v49, %v8226_v9 }
 0x564   : > { %v9656_v29 = vadd.f32 %v9624_v44, %v9526_v1  ;;  %v11646_v1 = vunpack.c.h.bf16 %v11666_v18  ;;  %v9532_v62 = vrot.slane %v11645_v20, 1  ;;  %v7913_v44 = vadd.f32 %v15147_v55, %v14875_v16  ;;  %v11366_v20 = vld [vmem:[%s11815_s8 + $0x74] sm:$0x1] }
 0x566   : > { %v9688_v25 = vmax.f32 %v9656_v29, 0.0  ;;  %v9533_v51 = vrot.slane %v11646_v1, 1  ;;  %v8177_v35 = vpop.f32.mrf.mxu3  ;;  %v8227_v46 = vadd.f32 %v15156_v39, %v7913_v44 }
 0x567   : > { %v9270_v31 = vpop.f32.mrf.mxu1 }
 0x568   : > { %9720 = vst [vmem:[%s15023_s12 + $0x58] sm:$0xff] %v9688_v25  ;;  %v9332_v23 = vadd.f32 %v9270_v31, %v8906_v48  ;;  %v9534_v41 = vsel %vm9496_vm15, %v9532_v62, %v9533_v51  ;;  %v9423_v48 = vunpack.c.l.bf16 %v11363_v30  ;;  %v8859_v31 = vpop.f32.mrf.mxu0  ;;  %v7865_v16 = vpop.f32.mrf.mxu2  ;;  %v8909_v34 = vadd.f32 %v15161_v36, %v8227_v46  ;;  %v11667_v30 = vld [vmem:[%s11815_s8 + $0x78] sm:$0xff]  }
 0x569   : > { %v11650_v46 = vunpack.c.h.bf16 %v11667_v30 }
 0x56a   : > { %v9625_v26 = vadd.f32 %v15012_v33, %v9332_v23  ;;  %9309 = vmatmul.bf16.gmra.mxu1 %v15443_v42  ;;  %v9535_v49 = vrot.slane %v9423_v48, 1  ;;  %v11649_v48 = vunpack.c.l.bf16 %v11667_v30 }
 0x56c   : > { %v9657_v38 = vadd.f32 %v9625_v26, %v9529_v13  ;;  %v7914_v13 = vadd.f32 %v15163_v2, %v14891_v56  ;;  %v11364_v26 = vld [vmem:[%s11815_s8 + $0x6c] sm:$0xff]   ;;  %v9536_v24 = vsel %vm9496_vm15, %v9533_v51, %v9535_v49 }
 0x56d   : > { %v9424_v47 = vunpack.c.l.bf16 %v11364_v26 }
 0x56e   : > { %v9689_v11 = vmax.f32 %v9657_v38, 0.0  ;;  %v8179_v39 = vpop.f32.mrf.mxu3  ;;  %v8228_v12 = vadd.f32 %v15173_v7, %v7914_v13  ;;  %v9543_v13 = vrot.slane %v11650_v46, 1 }
 0x56f   : > { %v9272_v32 = vpop.f32.mrf.mxu1  ;;  %v9537_v18 = vrot.slane %v9424_v47, 1 }
 0x570   : > { %9721 = vst [vmem:[%s15023_s12 + $0x60] sm:$0xff] %v9689_v11  ;;  %v9333_v60 = vadd.f32 %v9272_v32, %v8907_v28  ;;  %v8861_v28 = vpop.f32.mrf.mxu0  ;;  %v7868_v2 = vpop.f32.mrf.mxu2  ;;  %v7915_v32 = vadd.f32 %v15181_v52, %v14904_v5  ;;  %v7916_v5 = vadd.f32 %v7863_v3, %v14920_v10  ;;  %v9542_v3 = vrot.slane %v11649_v48, 1 }
 0x572   : > { %v9626_v15 = vadd.f32 %v15012_v33, %v9333_v60 }
 0x574   : > { %v9658_v45 = vadd.f32 %v9626_v15, %v9531_v53  ;;  %v8910_v53 = vadd.f32 %v15177_v58, %v8228_v12  ;;  %v9426_v15 = vunpack.c.l.bf16 %v11366_v20 }
 0x576   : > { %v9690_v29 = vmax.f32 %v9658_v45, 0.0  ;;  %v8229_v45 = vadd.f32 %v15188_v6, %v7915_v32  ;;  %v8182_v51 = vpop.f32.mrf.mxu3 }
 0x577   : > { %v9275_v25 = vpop.f32.mrf.mxu1 }
 0x578   : > { %9722 = vst [vmem:[%s15023_s12 + $0x68] sm:$0xff] %v9690_v29  ;;  %v9334_v54 = vadd.f32 %v9275_v25, %v8908_v61  ;;  %v9540_v29 = vrot.slane %v9426_v15, 1  ;;  %v8864_v52 = vpop.f32.mrf.mxu0  ;;  %v8911_v61 = vadd.f32 %v15194_v17, %v8229_v45  ;;  %v7870_v25 = vpop.f32.mrf.mxu2  ;;  %v7917_v17 = vadd.f32 %v7865_v16, %v14928_v40 }
 0x579   : > { %v7918_v40 = vadd.f32 %v7868_v2, %v14936_v37 }
 0x57a   : > { %v9627_v23 = vadd.f32 %v15012_v33, %v9334_v54  ;;  %9314 = vmatmul.bf16.gmra.mxu1 %v14870_v43  ;;  %v9425_v43 = vunpack.c.h.bf16 %v11364_v26  ;;  %v11369_v26 = vld [vmem:[%s11815_s8 + $0x80] sm:$0x1]  ;;  %v8231_v12 = vadd.f32 %v8179_v39, %v7917_v17 }
 0x57b   : > { %v8232_v39 = vadd.f32 %v8182_v51, %v7918_v40 }
 0x57c   : > { %v9659_v55 = vadd.f32 %v9627_v23, %v9534_v41  ;;  %v9538_v36 = vrot.slane %v9425_v43, 1  ;;  %v8230_v23 = vadd.f32 %v8177_v35, %v7916_v5  ;;  %v9544_v35 = vsel %vm9496_vm15, %v9542_v3, %v9543_v13  ;;  %v11372_v5 = vld [vmem:[%s11815_s8 + $0x8c] sm:$0x1] }
 0x57d   : > { %v9429_v43 = vunpack.c.l.bf16 %v11369_v26 }
 0x57e   : > { %v9691_v27 = vmax.f32 %v9659_v55, 0.0  ;;  %v9539_v7 = vsel %vm9496_vm15, %v9537_v18, %v9538_v36  ;;  %v9541_v6 = vsel %vm9496_vm15, %v9538_v36, %v9540_v29  ;;  %v8184_v10 = vpop.f32.mrf.mxu3  ;;  %v11370_v36 = vld [vmem:[%s11815_s8 + $0x84] sm:$0xff]   ;;  %v8914_v29 = vadd.f32 %v8864_v52, %v8232_v39  ;;  %v11376_v39 = vld [vmem:[%s11815_s8 + $0x9c] sm:$0xff]  }
 0x57f   : > { %v9277_v42 = vpop.f32.mrf.mxu1  ;;  %v9545_v18 = vrot.slane %v9429_v43, 1 }
 0x580   : > { %9723 = vst [vmem:[%s15023_s12 + $0x70] sm:$0xff] %v9691_v27  ;;  %v9335_v38 = vadd.f32 %v9277_v42, %v8909_v34  ;;  %v8912_v34 = vadd.f32 %v8859_v31, %v8230_v23  ;;  %v7873_v47 = vpop.f32.mrf.mxu2  ;;  %v8913_v31 = vadd.f32 %v8861_v28, %v8231_v12  ;;  %v7919_v28 = vadd.f32 %v7870_v25, %v14940_v63 }
 0x581   : > { %v9546_v20 = vsel %vm9496_vm15, %v9543_v13, %v9545_v18  ;;  %v7920_v63 = vadd.f32 %v7873_v47, %v14948_v4 }
 0x582   : > { %v9628_v11 = vadd.f32 %v15012_v33, %v9335_v38  ;;  %v8866_v38 = vpop.f32.mrf.mxu0 }
 0x584   : > { %v9660_v56 = vadd.f32 %v9628_v11, %v9536_v24 }
 0x586   : > { %v9692_v60 = vmax.f32 %v9660_v56, 0.0  ;;  %v8187_v32 = vpop.f32.mrf.mxu3 }
 0x587   : > { %v9280_v1 = vpop.f32.mrf.mxu1 }
 0x588   : > { %9724 = vst [vmem:[%s15023_s12 + $0x78] sm:$0xff] %v9692_v60  ;;  %v9336_v9 = vadd.f32 %v9280_v1, %v8910_v53  ;;  %v9430_v1 = vunpack.c.l.bf16 %v11370_v36  ;;  %v7875_v45 = vpop.f32.mrf.mxu2 }
 0x589   : > { %v7921_v4 = vadd.f32 %v7875_v45, %v14952_v8 }
 0x58a   : > { %v9629_v62 = vadd.f32 %v15012_v33, %v9336_v9  ;;  %v9431_v9 = vunpack.c.h.bf16 %v11370_v36  ;;  %v9547_v37 = vrot.slane %v9430_v1, 1 }
 0x58c   : > { %v9661_v44 = vadd.f32 %v9629_v62, %v9539_v7  ;;  %v8869_v7 = vpop.f32.mrf.mxu0  ;;  %v9548_v2 = vrot.slane %v9431_v9, 1 }
 0x58e   : > { %v9693_v58 = vmax.f32 %v9661_v44, 0.0  ;;  %v8189_v30 = vpop.f32.mrf.mxu3  ;;  %v9549_v51 = vsel %vm9496_vm15, %v9547_v37, %v9548_v2 }
 0x58f   : > { %v9282_v54 = vpop.f32.mrf.mxu1  ;;  %v8235_v36 = vadd.f32 %v8189_v30, %v7921_v4 }
 0x590   : > { %9725 = vst [vmem:[%s15023_s12 + $0x80] sm:$0xff] %v9693_v58  ;;  %v9337_v41 = vadd.f32 %v9282_v54, %v8911_v61  ;;  %v9432_v54 = vunpack.c.l.bf16 %v11372_v5  ;;  %v7878_v23 = vpop.f32.mrf.mxu2 }
 0x591   : > { %v7922_v8 = vadd.f32 %v7878_v23, %v14960_v14 }
 0x592   : > { %v9630_v55 = vadd.f32 %v15012_v33, %v9337_v41  ;;  %v8233_v41 = vadd.f32 %v8184_v10, %v7919_v28  ;;  %v9437_v28 = vunpack.c.h.bf16 %v11376_v39 }
 0x594   : > { %v9662_v49 = vadd.f32 %v9630_v55, %v9541_v6  ;;  %v8871_v48 = vpop.f32.mrf.mxu0  ;;  %v9550_v55 = vrot.slane %v9432_v54, 1  ;;  %v8915_v25 = vadd.f32 %v8866_v38, %v8233_v41  ;;  %v9558_v14 = vrot.slane %v9437_v28, 1  ;;  %v11378_v54 = vld [vmem:[%s11815_s8 + $0xa4] sm:$0x1] }
 0x595   : > { %v8917_v9 = vadd.f32 %v8871_v48, %v8235_v36  ;;  %v9438_v23 = vunpack.c.l.bf16 %v11378_v54 }
 0x596   : > { %v9694_v27 = vmax.f32 %v9662_v49, 0.0  ;;  %v11668_v49 = vld [vmem:[%s11815_s8 + $0x90] sm:$0xff]   ;;  %v9551_v17 = vsel %vm9496_vm15, %v9548_v2, %v9550_v55  ;;  %v9436_v2 = vunpack.c.l.bf16 %v11376_v39 }
 0x597   : > { %v9285_v42 = vpop.f32.mrf.mxu1  ;;  %v11654_v10 = vunpack.c.h.bf16 %v11668_v49 }
 0x598   : > { %9726 = vst [vmem:[%s15023_s12 + $0x88] sm:$0xff] %v9694_v27  ;;  %v9338_v24 = vadd.f32 %v9285_v42, %v8912_v34  ;;  %v11653_v27 = vunpack.c.l.bf16 %v11668_v49  ;;  %v8234_v34 = vadd.f32 %v8187_v32, %v7920_v63  ;;  %v8192_v42 = vpop.f32.mrf.mxu3 }
 0x599   : > { %v9553_v43 = vrot.slane %v11654_v10, 1 }
 0x59a   : > { %v9631_v11 = vadd.f32 %v15012_v33, %v9338_v24  ;;  %v8916_v12 = vadd.f32 %v8869_v7, %v8234_v34 }
 0x59c   : > { %v9663_v56 = vadd.f32 %v9631_v11, %v9544_v35  ;;  %v9552_v35 = vrot.slane %v11653_v27, 1  ;;  %v8874_v38 = vpop.f32.mrf.mxu0  ;;  %v11375_v11 = vld [vmem:[%s11815_s8 + $0x98] sm:$0x1]  ;;  %v11669_v27 = vld [vmem:[%s11815_s8 + $0xa8] sm:$0xff]  }
 0x59e   : > { %v9695_v16 = vmax.f32 %v9663_v56, 0.0  ;;  %v7880_v56 = vpop.f32.mrf.mxu2 }
 0x59f   : > { %v9287_v60 = vpop.f32.mrf.mxu1 }
 0x5a0   : > { %9727 = vst [vmem:[%s15023_s12 + $0x90] sm:$0xff] %v9695_v16  ;;  %v9339_v53 = vadd.f32 %v9287_v60, %v8913_v31  ;;  %v9554_v16 = vsel %vm9496_vm15, %v9552_v35, %v9553_v43  ;;  %v9435_v31 = vunpack.c.l.bf16 %v11375_v11  ;;  %v11658_v35 = vunpack.c.h.bf16 %v11669_v27 }
 0x5a2   : > { %v9632_v15 = vadd.f32 %v15012_v33, %v9339_v53  ;;  %v8194_v53 = vpop.f32.mrf.mxu3  ;;  %v9563_v11 = vrot.slane %v11658_v35, 1 }
 0x5a4   : > { %v9664_v62 = vadd.f32 %v9632_v15, %v9546_v20  ;;  %v9555_v20 = vrot.slane %v9435_v31, 1  ;;  %v8876_v15 = vpop.f32.mrf.mxu0 }
 0x5a6   : > { %v9696_v44 = vmax.f32 %v9664_v62, 0.0  ;;  %v7883_v62 = vpop.f32.mrf.mxu2  ;;  %v9556_v37 = vsel %vm9496_vm15, %v9553_v43, %v9555_v20 }
 0x5a7   : > { %v9290_v58 = vpop.f32.mrf.mxu1 }
 0x5a8   : > { %9728 = vst [vmem:[%s15023_s12 + $0x98] sm:$0xff] %v9696_v44  ;;  %v9340_v61 = vadd.f32 %v9290_v58, %v8914_v29  ;;  %v8236_v44 = vadd.f32 %v8192_v42, %v7922_v8  ;;  %v9557_v58 = vrot.slane %v9436_v2, 1 }
 0x5aa   : > { %v9633_v6 = vadd.f32 %v15012_v33, %v9340_v61  ;;  %v7923_v61 = vadd.f32 %v7880_v56, %v14964_v0  ;;  %v8197_v41 = vpop.f32.mrf.mxu3  ;;  %v7924_v0 = vadd.f32 %v7883_v62, %v14972_v50 }
 0x5ac   : > { %v9665_v46 = vadd.f32 %v9633_v6, %v9549_v51  ;;  %v8918_v51 = vadd.f32 %v8874_v38, %v8236_v44  ;;  %v8237_v55 = vadd.f32 %v8194_v53, %v7923_v61  ;;  %v8879_v63 = vpop.f32.mrf.mxu0  ;;  %v8238_v43 = vadd.f32 %v8197_v41, %v7924_v0 }
 0x5ae   : > { %v9697_v52 = vmax.f32 %v9665_v46, 0.0  ;;  %v9559_v46 = vsel %vm9496_vm15, %v9557_v58, %v9558_v14 }
 0x5af   : > { %v9292_v3 = vpop.f32.mrf.mxu1 }
 0x5b0   : > { %9729 = vst [vmem:[%s15023_s12 + $0xa0] sm:$0xff] %v9697_v52  ;;  %v9341_v13 = vadd.f32 %v9292_v3, %v8915_v25  ;;  %v7885_v25 = vpop.f32.mrf.mxu2  ;;  %v9560_v3 = vrot.slane %v9438_v23, 1 }
 0x5b1   : > { %v7925_v56 = vadd.f32 %v7885_v25, %v14976_v22  ;;  %v11747_v25 = vld [vmem:[%s15306_s4] ss:$0 sm:$0xff] }
 0x5b2   : > { %v9634_v26 = vadd.f32 %v15012_v33, %v9341_v13  ;;  %v9561_v42 = vsel %vm9496_vm15, %v9558_v14, %v9560_v3 }
 0x5b4   : > { %v9666_v24 = vadd.f32 %v9634_v26, %v9551_v17  ;;  %v8919_v17 = vadd.f32 %v8876_v15, %v8237_v55  ;;  %v8199_v26 = vpop.f32.mrf.mxu3  ;;  %v8881_v38 = vpop.f32.mrf.mxu0 }
 0x5b5   : > { %v8239_v53 = vadd.f32 %v8199_v26, %v7925_v56 }
 0x5b6   : > { %v9698_v47 = vmax.f32 %v9666_v24, 0.0  ;;  %v11657_v24 = vunpack.c.l.bf16 %v11669_v27  ;;  %v11670_v27 = vld [vmem:[%s11815_s8 + $0xc0] sm:$0xff]  }
 0x5b7   : > { %v9295_v18 = vpop.f32.mrf.mxu1  ;;  %v8921_v15 = vadd.f32 %v8881_v38, %v8239_v53  ;;  %v11662_v35 = vunpack.c.h.bf16 %v11670_v27 }
 0x5b8   : > { %9730 = vst [vmem:[%s15023_s12 + $0xa8] sm:$0xff] %v9698_v47  ;;  %v9342_v40 = vadd.f32 %v9295_v18, %v8916_v12  ;;  %v7888_v12 = vpop.f32.mrf.mxu2  ;;  %v9562_v50 = vrot.slane %v11657_v24, 1  ;;  %v11661_v24 = vunpack.c.l.bf16 %v11670_v27 }
 0x5b9   : > { %v7926_v22 = vadd.f32 %v7888_v12, %v14984_v59 }
 0x5ba   : > { %v9635_v32 = vadd.f32 %v15012_v33, %v9342_v40  ;;  %v8920_v40 = vadd.f32 %v8879_v63, %v8238_v43 }
 0x5bc   : > { %v9667_v60 = vadd.f32 %v9635_v32, %v9554_v16  ;;  %v11381_v16 = vld [vmem:[%s11815_s8 + $0xb0] sm:$0x1]  ;;  %v9564_v32 = vsel %vm9496_vm15, %v9562_v50, %v9563_v11  ;;  %v8202_v8 = vpop.f32.mrf.mxu3  ;;  %v8884_v39 = vpop.f32.mrf.mxu0  ;;  %v9572_v50 = vrot.slane %v11661_v24, 1 }
 0x5be   : > { %v9699_v1 = vmax.f32 %v9667_v60, 0.0  ;;  %v9441_v60 = vunpack.c.l.bf16 %v11381_v16 }
 0x5bf   : > { %v9297_v7 = vpop.f32.mrf.mxu1 }
 0x5c0   : > { %9731 = vst [vmem:[%s15023_s12 + $0xb0] sm:$0xff] %v9699_v1  ;;  %v9343_v45 = vadd.f32 %v9297_v7, %v8917_v9  ;;  %v9565_v9 = vrot.slane %v9441_v60, 1  ;;  %v7890_v62 = vpop.f32.mrf.mxu2 }
 0x5c2   : > { %v9636_v29 = vadd.f32 %v15012_v33, %v9343_v45  ;;  %v11382_v45 = vld [vmem:[%s11815_s8 + $0xb4] sm:$0xff]   ;;  %v9566_v28 = vsel %vm9496_vm15, %v9563_v11, %v9565_v9 }
 0x5c3   : > { %v9442_v44 = vunpack.c.l.bf16 %v11382_v45 }
 0x5c4   : > { %v9668_v5 = vadd.f32 %v9636_v29, %v9556_v37  ;;  %v9443_v29 = vunpack.c.h.bf16 %v11382_v45  ;;  %v8204_v61 = vpop.f32.mrf.mxu3  ;;  %v8886_v23 = vpop.f32.mrf.mxu0 }
 0x5c6   : > { %v9700_v30 = vmax.f32 %v9668_v5, 0.0  ;;  %v8240_v5 = vadd.f32 %v8202_v8, %v7926_v22  ;;  %v9568_v59 = vrot.slane %v9443_v29, 1 }
 0x5c7   : > { %v9300_v6 = vpop.f32.mrf.mxu1 }
 0x5c8   : > { %9732 = vst [vmem:[%s15023_s12 + $0xb8] sm:$0xff] %v9700_v30  ;;  %v9344_v48 = vadd.f32 %v9300_v6, %v8918_v51  ;;  %v9567_v30 = vrot.slane %v9442_v44, 1  ;;  %v7927_v51 = vadd.f32 %v7890_v62, %v14988_v21  ;;  %v8922_v41 = vadd.f32 %v8884_v39, %v8240_v5  ;;  %v11384_v6 = vld [vmem:[%s11815_s8 + $0xbc] sm:$0x1]  ;;  %v7893_v55 = vpop.f32.mrf.mxu2 }
 0x5c9   : > { %v7928_v0 = vadd.f32 %v7893_v55, %v14996_v19  ;;  %v9573_v19 = vrot.slane %v11662_v35, 1 }
 0x5ca   : > { %v9637_v52 = vadd.f32 %v15012_v33, %v9344_v48  ;;  %v9569_v63 = vsel %vm9496_vm15, %v9567_v30, %v9568_v59 }
 0x5cc   : > { %v9669_v49 = vadd.f32 %v9637_v52, %v9559_v46  ;;  %v9444_v52 = vunpack.c.l.bf16 %v11384_v6  ;;  %v8889_v38 = vpop.f32.mrf.mxu0 }
 0x5ce   : > { %v9701_v13 = vmax.f32 %v9669_v49, 0.0  ;;  %v9570_v3 = vrot.slane %v9444_v52, 1 }
 0x5cf   : > { %v9302_v10 = vpop.f32.mrf.mxu1 }
 0x5d0   : > { %9733 = vst [vmem:[%s15023_s12 + $0xc0] sm:$0xff] %v9701_v13  ;;  %v9345_v34 = vadd.f32 %v9302_v10, %v8919_v17  ;;  %v8207_v10 = vpop.f32.mrf.mxu3 }
 0x5d1   : > { %v8242_v43 = vadd.f32 %v8207_v10, %v7928_v0 }
 0x5d2   : > { %v9638_v4 = vadd.f32 %v15012_v33, %v9345_v34 }
 0x5d4   : > { %v9670_v47 = vadd.f32 %v9638_v4, %v9561_v42  ;;  %v9571_v42 = vsel %vm9496_vm15, %v9568_v59, %v9570_v3 }
 0x5d6   : > { %v9702_v18 = vmax.f32 %v9670_v47, 0.0  ;;  %v7895_v47 = vpop.f32.mrf.mxu2 }
 0x5d7   : > { %v9305_v31 = vpop.f32.mrf.mxu1  ;;  %v7929_v11 = vadd.f32 %v7895_v47, %v15001_v57 }
 0x5d8   : > { %9734 = vst [vmem:[%s15023_s12 + $0xc8] sm:$0xff] %v9702_v18  ;;  %v9346_v36 = vadd.f32 %v9305_v31, %v8920_v40  ;;  %v8924_v18 = vadd.f32 %v8889_v38, %v8242_v43  ;;  %v11387_v40 = vld [vmem:[%s11815_s8 + $0xc8] sm:$0x1] }
 0x5d9   : > { %v9447_v60 = vunpack.c.l.bf16 %v11387_v40 }
 0x5da   : > { %v9639_v20 = vadd.f32 %v15012_v33, %v9346_v36  ;;  %v8209_v36 = vpop.f32.mrf.mxu3 }
 0x5db   : > { %v8243_v53 = vadd.f32 %v8209_v36, %v7929_v11  ;;  %v9575_v9 = vrot.slane %v9447_v60, 1 }
 0x5dc   : > { %v9671_v1 = vadd.f32 %v9639_v20, %v9564_v32  ;;  %v9574_v32 = vsel %vm9496_vm15, %v9572_v50, %v9573_v19 }
 0x5de   : > { %v9703_v7 = vmax.f32 %v9671_v1, 0.0  ;;  %v8891_v1 = vpop.f32.mrf.mxu0 }
 0x5df   : > { %v9307_v37 = vpop.f32.mrf.mxu1  ;;  %v8925_v22 = vadd.f32 %v8891_v1, %v8243_v53 }
 0x5e0   : > { %9735 = vst [vmem:[%s15023_s12 + $0xd0] sm:$0xff] %v9703_v7  ;;  %v9347_v2 = vadd.f32 %v9307_v37, %v8921_v15  ;;  %v9576_v15 = vsel %vm9496_vm15, %v9573_v19, %v9575_v9 }
 0x5e2   : > { %v9640_v58 = vadd.f32 %v15012_v33, %v9347_v2  ;;  %v8241_v33 = vadd.f32 %v8204_v61, %v7927_v51 }
 0x5e4   : > { %v9672_v14 = vadd.f32 %v9640_v58, %v9566_v28  ;;  %v8923_v17 = vadd.f32 %v8886_v23, %v8241_v33 }
 0x5e6   : > { %v9704_v54 = vmax.f32 %v9672_v14, 0.0 }
 0x5e7   : > { %v9310_v48 = vpop.f32.mrf.mxu1 }
 0x5e8   : > { %9736 = vst [vmem:[%s15023_s12 + $0xd8] sm:$0xff] %v9704_v54  ;;  %v9348_v46 = vadd.f32 %v9310_v48, %v8922_v41 }
 0x5ea   : > { %v9641_v49 = vadd.f32 %v11747_v25, %v9348_v46 }
 0x5ec   : > { %v9673_v21 = vadd.f32 %v9641_v49, %v9569_v63 }
 0x5ee   : > { %v9705_v13 = vmax.f32 %v9673_v21, 0.0 }
 0x5ef   : > { %v9312_v34 = vpop.f32.mrf.mxu1 }
 0x5f0   : > { %9737 = vst [vmem:[%s15023_s12 + $0xe0] sm:$0xff] %v9705_v13  ;;  %v9349_v26 = vadd.f32 %v9312_v34, %v8923_v17 }
 0x5f2   : > { %v9642_v4 = vadd.f32 %v11747_v25, %v9349_v26 }
 0x5f4   : > { %v9674_v12 = vadd.f32 %v9642_v4, %v9571_v42 }
 0x5f6   : > { %v9706_v56 = vmax.f32 %v9674_v12, 0.0 }
 0x5f7   : > { %v9315_v16 = vpop.f32.mrf.mxu1 }
 0x5f8   : > { %9738 = vst [vmem:[%s15023_s12 + $0xe8] sm:$0xff] %v9706_v56  ;;  %v9350_v31 = vadd.f32 %v9315_v16, %v8924_v18 }
 0x5fa   : > { %v9643_v20 = vadd.f32 %v11747_v25, %v9350_v31 }
 0x5fc   : > { %v9675_v8 = vadd.f32 %v9643_v20, %v9574_v32 }
 0x5fe   : > { %v9707_v39 = vmax.f32 %v9675_v8, 0.0 }
 0x5ff   : > { %v9317_v57 = vpop.f32.mrf.mxu1 }
 0x600   : > { %9739 = vst [vmem:[%s15023_s12 + $0xf0] sm:$0xff] %v9707_v39  ;;  %v9351_v7 = vadd.f32 %v9317_v57, %v8925_v22 }
 0x602   : > { %v9644_v45 = vadd.f32 %v11747_v25, %v9351_v7 }
 0x604   : > { %v9676_v62 = vadd.f32 %v9644_v45, %v9576_v15 }
 0x606   : > { %v9708_v37 = vmax.f32 %v9676_v62, 0.0 }
 0x608   : > { %9740 = vst [vmem:[%s15023_s12 + $0xf8] sm:$0xff] %v9708_v37 }
 0x609 PF: > { %s15_s18 = sadd.s32 1, %s11754_s18  }
 0x60a   : > { %p12_p4 = scmp.ge.s32.totalorder %s15_s18, 4  }
 0x60c   :  { %14 = sbr.rel (!%p12_p4) target bundleno = 1 (0x1), region = 92 }

</bundles_post_ra>
